<compile_context>
chip_gen: v6e
topology: v6e:2x2x1
jax: 0.10.0
libtpu: 0.0.40
codegen_flags: <defaults>
</compile_context>

<pallas_src>
import functools

import jax
import jax.numpy as jnp
from jax.experimental import pallas as pl
from jax.experimental.pallas import tpu as pltpu

BN_EPS = 1e-5
_MIB = 1024 * 1024


def _vmem_budget_bytes():
    """Usable VMEM budget for scoped allocations (generation aware)."""
    try:
        cap = int(pltpu.get_tpu_info().vmem_capacity_bytes)
    except Exception:
        cap = 64 * _MIB            # conservative default (v7x per-core VMEM)
    return max((cap * 3) // 4, 32 * _MIB)


def _clamp(v, lo, hi):
    return int(min(max(int(v), lo), hi))


# ---------------------------------------------------------------------------
# Fused path: whole pixel matrix resident in VMEM, one pallas_call.
# ---------------------------------------------------------------------------
def _make_fused_kernel(n_imgs, pix_per_img, num_layers, num_enc_layers):
    inv_m = 1.0 / float(n_imgs * pix_per_img)

    def kernel(x_ref, *refs):
        out_ref = refs[-1]
        param_refs = refs[:-1]

        # (N, C, L) -> lane-dense (C, N*L): concat images along lanes (cheap,
        # whole-L slabs), so every layer is a clean 2-D W @ h matmul.
        h = jnp.concatenate([x_ref[n] for n in range(n_imgs)], axis=-1)
        h = h.astype(jnp.float32)

        for layer in range(num_layers):
            w = param_refs[4 * layer][...]          # (F_out, F_in)
            b = param_refs[4 * layer + 1][...]      # (F_out, 1)
            g = param_refs[4 * layer + 2][...]      # (F_out, 1)
            beta = param_refs[4 * layer + 3][...]   # (F_out, 1)

            # Linear + ReLU (MXU; K is tiny at the ends, VPU is the binder).
            a = jnp.dot(w, h, preferred_element_type=jnp.float32) + b
            a = jnp.maximum(a, 0.0)

            # BatchNorm1d (training-mode batch stats) in a single sweep:
            # per-feature sum / sum-of-squares, then one folded scale/shift.
            s = jnp.sum(a, axis=1, keepdims=True)
            sq = jnp.sum(a * a, axis=1, keepdims=True)
            mean = s * inv_m
            var = jnp.maximum(sq * inv_m - mean * mean, 0.0)
            scale = g * jax.lax.rsqrt(var + BN_EPS)
            shift = beta - mean * scale
            h = a * scale + shift

            if layer == num_enc_layers - 1:
                h = jax.nn.sigmoid(h)               # latent bottleneck

        for n in range(n_imgs):
            out_ref[n] = h[:, n * pix_per_img:(n + 1) * pix_per_img].astype(
                out_ref.dtype)

    return kernel


def _forward_fused(x3, flat_params, num_enc_layers, budget):
    n_imgs, chan, pix = x3.shape
    m_rows = n_imgs * pix
    num_layers = len(flat_params) // 4
    feat = [chan] + [flat_params[4 * i].shape[0] for i in range(num_layers)]
    fmax = max(feat)
    param_bytes = sum(int(p.size) * p.dtype.itemsize for p in flat_params)

    io_bytes = 2 * m_rows * chan * 4
    need = io_bytes + param_bytes + 4 * m_rows * fmax * 4 + 4 * _MIB
    vmem_limit = _clamp(need, 32 * _MIB, budget)

    flops = sum(2 * m_rows * feat[i] * feat[i + 1] for i in range(num_layers))
    flops += 8 * m_rows * sum(feat[1:])
    cost = pl.CostEstimate(
        flops=int(flops),
        transcendentals=int(m_rows * feat[num_enc_layers]),
        bytes_accessed=int(io_bytes + param_bytes))

    kernel = _make_fused_kernel(n_imgs, pix, num_layers, num_enc_layers)
    n_in = 1 + len(flat_params)
    return pl.pallas_call(
        kernel,
        out_shape=jax.ShapeDtypeStruct((n_imgs, chan, pix), x3.dtype),
        in_specs=[pl.BlockSpec(memory_space=pltpu.MemorySpace.VMEM)] * n_in,
        out_specs=pl.BlockSpec(memory_space=pltpu.MemorySpace.VMEM),
        compiler_params=pltpu.CompilerParams(vmem_limit_bytes=vmem_limit),
        cost_estimate=cost,
    )(x3, *flat_params)


# ---------------------------------------------------------------------------
# Tiled path: per-layer pallas_call gridded over (image, pixel-tile) blocks,
# full-batch BN statistics accumulated across the whole grid.
# ---------------------------------------------------------------------------
def _make_layer_kernel(apply_sigmoid_to_input):
    def kernel(scale_ref, shift_ref, a_prev_ref, w_ref, b_ref,
               a_out_ref, sum_ref, sumsq_ref):
        # Previous layer's folded BatchNorm applied on the fly to this tile.
        h = a_prev_ref[0].astype(jnp.float32)               # (F_in, TL)
        h = h * scale_ref[...] + shift_ref[...]
        if apply_sigmoid_to_input:
            h = jax.nn.sigmoid(h)                           # latent bottleneck

        a = jnp.dot(w_ref[...], h, preferred_element_type=jnp.float32)
        a = jnp.maximum(a + b_ref[...], 0.0)                # (F_out, TL)
        a_out_ref[0] = a.astype(a_out_ref.dtype)

        # Full-batch BN statistics: zero on the first grid step, then
        # accumulate per-feature sum / sum-of-squares across every tile.
        @pl.when(jnp.logical_and(pl.program_id(0) == 0, pl.program_id(1) == 0))
        def _():
            sum_ref[...] = jnp.zeros_like(sum_ref)
            sumsq_ref[...] = jnp.zeros_like(sumsq_ref)

        sum_ref[...] += jnp.sum(a, axis=1, keepdims=True)
        sumsq_ref[...] += jnp.sum(a * a, axis=1, keepdims=True)

    return kernel


def _finalize_kernel(scale_ref, shift_ref, a_ref, out_ref):
    out_ref[0] = (a_ref[0].astype(jnp.float32) * scale_ref[...]
                  + shift_ref[...]).astype(out_ref.dtype)


def _forward_tiled(x3, flat_params, num_enc_layers, tile_l, budget):
    n_imgs, chan, pix = x3.shape
    if pix % tile_l != 0:
        tile_l = pix
    m_rows = n_imgs * pix
    grid = (n_imgs, pix // tile_l)
    num_layers = len(flat_params) // 4

    a = x3.astype(jnp.float32)                    # pre-BN acts of "layer -1"
    f_in = chan
    scale = jnp.ones((chan, 1), jnp.float32)      # identity BN for raw input
    shift = jnp.zeros((chan, 1), jnp.float32)

    for i in range(num_layers):
        w, b, g, beta = flat_params[4 * i: 4 * i + 4]
        f_out = w.shape[0]
        apply_sig = (i == num_enc_layers)         # sigmoid on decoder input

        tile_bytes = 4 * tile_l * (f_in + f_out) * 4   # dbl-buffered in+out
        param_bytes = 4 * (f_out * f_in + 3 * f_out)
        vmem_limit = _clamp(tile_bytes + param_bytes + 4 * _MIB,
                            16 * _MIB, budget)
        cost = pl.CostEstimate(
            flops=int(2 * m_rows * f_in * f_out + 8 * m_rows * f_out),
            transcendentals=int(m_rows * f_in) if apply_sig else 0,
            bytes_accessed=int(4 * m_rows * (f_in + f_out) + param_bytes))

        a, s, sq = pl.pallas_call(
            _make_layer_kernel(apply_sig),
            grid=grid,
            in_specs=[
                pl.BlockSpec((f_in, 1), lambda n, l: (0, 0)),
                pl.BlockSpec((f_in, 1), lambda n, l: (0, 0)),
                pl.BlockSpec((1, f_in, tile_l), lambda n, l: (n, 0, l)),
                pl.BlockSpec((f_out, f_in), lambda n, l: (0, 0)),
                pl.BlockSpec((f_out, 1), lambda n, l: (0, 0)),
            ],
            out_specs=(
                pl.BlockSpec((1, f_out, tile_l), lambda n, l: (n, 0, l)),
                pl.BlockSpec((f_out, 1), lambda n, l: (0, 0)),
                pl.BlockSpec((f_out, 1), lambda n, l: (0, 0)),
            ),
            out_shape=(
                jax.ShapeDtypeStruct((n_imgs, f_out, pix), jnp.float32),
                jax.ShapeDtypeStruct((f_out, 1), jnp.float32),
                jax.ShapeDtypeStruct((f_out, 1), jnp.float32),
            ),
            compiler_params=pltpu.CompilerParams(
                # BN sums accumulate across every grid step -> both axes
                # must be "arbitrary" (sequential accumulator outputs).
                # TODO(synk): per-core partial sums + a tiny reduce kernel
                # would let v7x's second TensorCore share this work.
                dimension_semantics=("arbitrary", "arbitrary"),
                vmem_limit_bytes=vmem_limit),
            cost_estimate=cost,
        )(scale, shift, a, w, b)

        # Fold this layer's batch statistics into one scale/shift (tiny
        # (F,1) math between calls).
        mean = s * (1.0 / m_rows)
        var = jnp.maximum(sq * (1.0 / m_rows) - mean * mean, 0.0)
        scale = g * jax.lax.rsqrt(var + BN_EPS)
        shift = beta - mean * scale
        f_in = f_out

    # Apply the last layer's folded BatchNorm (no trailing sigmoid).
    out = pl.pallas_call(
        _finalize_kernel,
        grid=grid,
        in_specs=[
            pl.BlockSpec((f_in, 1), lambda n, l: (0, 0)),
            pl.BlockSpec((f_in, 1), lambda n, l: (0, 0)),
            pl.BlockSpec((1, f_in, tile_l), lambda n, l: (n, 0, l)),
        ],
        out_specs=pl.BlockSpec((1, f_in, tile_l), lambda n, l: (n, 0, l)),
        out_shape=jax.ShapeDtypeStruct((n_imgs, f_in, pix), x3.dtype),
        compiler_params=pltpu.CompilerParams(
            dimension_semantics=("parallel", "parallel"),
            vmem_limit_bytes=_clamp(4 * tile_l * f_in * 8 + 4 * _MIB,
                                    16 * _MIB, budget)),
        cost_estimate=pl.CostEstimate(
            flops=int(2 * m_rows * f_in), transcendentals=0,
            bytes_accessed=int(8 * m_rows * f_in)),
    )(scale, shift, a)
    return out


# ---------------------------------------------------------------------------
# Public forward + parameter helpers.
# ---------------------------------------------------------------------------
def _pick_tile_l(pix):
    for cand in (2048, 1024, 512, 256, 128):
        if pix % cand == 0:
            return cand
    return pix


@functools.partial(jax.jit,
                   static_argnames=("num_enc_layers", "force_tiled", "tile_l"))
def grey2color_forward(x, flat_params, num_enc_layers,
                       force_tiled=False, tile_l=None):
    """x: (N, C, Y, X) f32. flat_params: [W(out,in), b(F,1), g(F,1), beta(F,1)]*L."""
    n_imgs, chan, height, width = x.shape
    pix = height * width
    x3 = x.reshape(n_imgs, chan, pix)             # free: no HBM transpose

    num_layers = len(flat_params) // 4
    feat = [chan] + [flat_params[4 * i].shape[0] for i in range(num_layers)]
    fmax = max(feat)
    param_bytes = sum(int(p.size) * p.dtype.itemsize for p in flat_params)
    m_rows = n_imgs * pix

    budget = _vmem_budget_bytes()
    fused_need = (2 * m_rows * chan * 4 + param_bytes
                  + 4 * m_rows * fmax * 4 + 4 * _MIB)
    use_tiled = force_tiled or fused_need > (budget * 6) // 10

    if use_tiled:
        tl = tile_l if tile_l is not None else _pick_tile_l(pix)
        out3 = _forward_tiled(x3, flat_params, num_enc_layers, tl, budget)
    else:
        out3 = _forward_fused(x3, flat_params, num_enc_layers, budget)
    return out3.reshape(n_imgs, chan, height, width)


def init_grey2color_params(key, channel_dims, encoder_dims=(256, 128),
                           decoder_dims=(128, 256), latent_dim=3):
    """nn.Linear / nn.BatchNorm1d default-style init."""
    enc_dims = [channel_dims] + list(encoder_dims) + [latent_dim]
    dec_dims = [latent_dim] + list(decoder_dims) + [channel_dims]
    params = []
    for dims in (enc_dims, dec_dims):
        for i in range(len(dims) - 1):
            d_in, d_out = dims[i], dims[i + 1]
            key, kw, kb = jax.random.split(key, 3)
            bound = 1.0 / float(d_in) ** 0.5
            w = jax.random.uniform(kw, (d_out, d_in), jnp.float32, -bound, bound)
            b = jax.random.uniform(kb, (d_out,), jnp.float32, -bound, bound)
            params.append((w, b, jnp.ones((d_out,), jnp.float32),
                           jnp.zeros((d_out,), jnp.float32)))
    return params, len(enc_dims) - 1


def _flatten_params(params):
    flat = []
    for (w, b, gamma, beta) in params:
        flat.append(jnp.asarray(w, jnp.float32))            # (F_out, F_in)
        flat.append(b.reshape(-1, 1).astype(jnp.float32))    # (F_out, 1)
        flat.append(gamma.reshape(-1, 1).astype(jnp.float32))
        flat.append(beta.reshape(-1, 1).astype(jnp.float32))
    return flat


def _reference_forward(x, params, num_enc_layers):
    """Pure-JAX reference matching the PyTorch forward (training-mode BN)."""
    n_imgs, chan, height, width = x.shape
    h = jnp.transpose(x, (0, 2, 3, 1)).reshape(-1, chan)
    for i, (w, b, gamma, beta) in enumerate(params):
        h = h @ w.T + b
        h = jnp.maximum(h, 0.0)
        mean = jnp.mean(h, axis=0, keepdims=True)
        var = jnp.mean((h - mean) ** 2, axis=0, keepdims=True)
        h = (h - mean) * jax.lax.rsqrt(var + BN_EPS) * gamma + beta
        if i == num_enc_layers - 1:
            h = jax.nn.sigmoid(h)
    return jnp.transpose(h.reshape(n_imgs, height, width, chan), (0, 3, 1, 2))


if __name__ == "__main__":
    key = jax.random.PRNGKey(0)
    k_param, k_x = jax.random.split(key)

    N, C, Y, X = 2, 4, 16, 16
    x = jax.random.uniform(k_x, (N, C, Y, X), jnp.float32)

    params, num_enc_layers = init_grey2color_params(k_param, channel_dims=C)
    flat_params = _flatten_params(params)

    out_fused = jax.block_until_ready(
        grey2color_forward(x, flat_params, num_enc_layers=num_enc_layers))
    out_tiled = jax.block_until_ready(
        grey2color_forward(x, flat_params, num_enc_layers=num_enc_layers,
                           force_tiled=True, tile_l=128))

    ref = _reference_forward(x, params, num_enc_layers)
    assert out_fused.shape == (N, C, Y, X), out_fused.shape
    assert jnp.allclose(out_fused, ref, atol=2e-3, rtol=2e-3), (
        float(jnp.max(jnp.abs(out_fused - ref))))
    assert jnp.allclose(out_tiled, ref, atol=2e-3, rtol=2e-3), (
        float(jnp.max(jnp.abs(out_tiled - ref))))

    # TODO(synk): histogram_equalization / latent_image (256-bin scatter,
    # data-dependent masks) are not part of forward() and are not implemented.
    # TODO(synk): optional bf16 matmul casts (v6e/v7x capacity & MXU win) left
    # out to stay safely within the 2e-3 tolerance vs the f32 reference.
    print("KERNEL_OK")
</pallas_src>

<mosaic_0001>
module attributes {stable_mosaic.version = 11 : i64} {
  func.func @kernel(%arg0: memref<2x4x256xf32, #tpu.memory_space<vmem>>, %arg1: memref<256x4xf32, #tpu.memory_space<vmem>>, %arg2: memref<256x1xf32, #tpu.memory_space<vmem>>, %arg3: memref<256x1xf32, #tpu.memory_space<vmem>>, %arg4: memref<256x1xf32, #tpu.memory_space<vmem>>, %arg5: memref<128x256xf32, #tpu.memory_space<vmem>>, %arg6: memref<128x1xf32, #tpu.memory_space<vmem>>, %arg7: memref<128x1xf32, #tpu.memory_space<vmem>>, %arg8: memref<128x1xf32, #tpu.memory_space<vmem>>, %arg9: memref<3x128xf32, #tpu.memory_space<vmem>>, %arg10: memref<3x1xf32, #tpu.memory_space<vmem>>, %arg11: memref<3x1xf32, #tpu.memory_space<vmem>>, %arg12: memref<3x1xf32, #tpu.memory_space<vmem>>, %arg13: memref<128x3xf32, #tpu.memory_space<vmem>>, %arg14: memref<128x1xf32, #tpu.memory_space<vmem>>, %arg15: memref<128x1xf32, #tpu.memory_space<vmem>>, %arg16: memref<128x1xf32, #tpu.memory_space<vmem>>, %arg17: memref<256x128xf32, #tpu.memory_space<vmem>>, %arg18: memref<256x1xf32, #tpu.memory_space<vmem>>, %arg19: memref<256x1xf32, #tpu.memory_space<vmem>>, %arg20: memref<256x1xf32, #tpu.memory_space<vmem>>, %arg21: memref<4x256xf32, #tpu.memory_space<vmem>>, %arg22: memref<4x1xf32, #tpu.memory_space<vmem>>, %arg23: memref<4x1xf32, #tpu.memory_space<vmem>>, %arg24: memref<4x1xf32, #tpu.memory_space<vmem>>, %arg25: memref<2x4x256xf32, #tpu.memory_space<vmem>>) attributes {dimension_semantics = [], scalar_prefetch = 0 : i64, scratch_operands = 0 : i64, tpu.core_type = #tpu.core_type<tc>} {
    %c0 = arith.constant 0 : index
    %c0_0 = arith.constant 0 : index
    %c0_1 = arith.constant 0 : index
    %0 = vector.load %arg0[%c0, %c0_0, %c0_1] : memref<2x4x256xf32, #tpu.memory_space<vmem>>, vector<1x4x256xf32>
    %1 = vector.shape_cast %0 : vector<1x4x256xf32> to vector<4x256xf32>
    %c1 = arith.constant 1 : index
    %c0_2 = arith.constant 0 : index
    %c0_3 = arith.constant 0 : index
    %2 = vector.load %arg0[%c1, %c0_2, %c0_3] : memref<2x4x256xf32, #tpu.memory_space<vmem>>, vector<1x4x256xf32>
    %3 = vector.shape_cast %2 : vector<1x4x256xf32> to vector<4x256xf32>
    %4 = tpu.concatenate %1, %3 in 1 : vector<4x256xf32>, vector<4x256xf32> -> vector<4x512xf32>
    %c0_4 = arith.constant 0 : index
    %c0_5 = arith.constant 0 : index
    %5 = vector.load %arg1[%c0_4, %c0_5] : memref<256x4xf32, #tpu.memory_space<vmem>>, vector<256x4xf32>
    %c0_6 = arith.constant 0 : index
    %c0_7 = arith.constant 0 : index
    %6 = vector.load %arg2[%c0_6, %c0_7] : memref<256x1xf32, #tpu.memory_space<vmem>>, vector<256x1xf32>
    %c0_8 = arith.constant 0 : index
    %c0_9 = arith.constant 0 : index
    %7 = vector.load %arg3[%c0_8, %c0_9] : memref<256x1xf32, #tpu.memory_space<vmem>>, vector<256x1xf32>
    %c0_10 = arith.constant 0 : index
    %c0_11 = arith.constant 0 : index
    %8 = vector.load %arg4[%c0_10, %c0_11] : memref<256x1xf32, #tpu.memory_space<vmem>>, vector<256x1xf32>
    %cst = arith.constant dense<0.000000e+00> : vector<256x512xf32>
    %9 = tpu.matmul %5, %4, %cst {dimension_numbers = #tpu.dot_dimension_numbers<[1], [0], [0], [1], [0, 0, 1, 1], [], []>} : vector<256x4xf32>, vector<4x512xf32>, vector<256x512xf32> -> vector<256x512xf32>
    %10 = vector.broadcast %6 : vector<256x1xf32> to vector<256x512xf32>
    %11 = arith.addf %9, %10 : vector<256x512xf32>
    %cst_12 = arith.constant 0.000000e+00 : f32
    %12 = vector.broadcast %cst_12 : f32 to vector<256x512xf32>
    %13 = arith.maximumf %11, %12 : vector<256x512xf32>
    %cst_13 = arith.constant dense<0.000000e+00> : vector<256xf32>
    %14 = vector.multi_reduction <add>, %13, %cst_13 [1] : vector<256x512xf32> to vector<256xf32>
    %15 = vector.shape_cast %14 : vector<256xf32> to vector<256x1xf32>
    %16 = arith.mulf %13, %13 : vector<256x512xf32>
    %cst_14 = arith.constant dense<0.000000e+00> : vector<256xf32>
    %17 = vector.multi_reduction <add>, %16, %cst_14 [1] : vector<256x512xf32> to vector<256xf32>
    %18 = vector.shape_cast %17 : vector<256xf32> to vector<256x1xf32>
    %cst_15 = arith.constant 0.001953125 : f32
    %19 = vector.broadcast %cst_15 : f32 to vector<256x1xf32>
    %20 = arith.mulf %15, %19 : vector<256x1xf32>
    %cst_16 = arith.constant 0.001953125 : f32
    %21 = vector.broadcast %cst_16 : f32 to vector<256x1xf32>
    %22 = arith.mulf %18, %21 : vector<256x1xf32>
    %23 = arith.mulf %20, %20 : vector<256x1xf32>
    %24 = arith.subf %22, %23 : vector<256x1xf32>
    %cst_17 = arith.constant 0.000000e+00 : f32
    %25 = vector.broadcast %cst_17 : f32 to vector<256x1xf32>
    %26 = arith.maximumf %24, %25 : vector<256x1xf32>
    %cst_18 = arith.constant 9.99999974E-6 : f32
    %27 = vector.broadcast %cst_18 : f32 to vector<256x1xf32>
    %28 = arith.addf %26, %27 : vector<256x1xf32>
    %29 = math.rsqrt %28 : vector<256x1xf32>
    %30 = arith.mulf %7, %29 : vector<256x1xf32>
    %31 = arith.mulf %20, %30 : vector<256x1xf32>
    %32 = arith.subf %8, %31 : vector<256x1xf32>
    %33 = vector.broadcast %30 : vector<256x1xf32> to vector<256x512xf32>
    %34 = arith.mulf %13, %33 : vector<256x512xf32>
    %35 = vector.broadcast %32 : vector<256x1xf32> to vector<256x512xf32>
    %36 = arith.addf %34, %35 : vector<256x512xf32>
    %c0_19 = arith.constant 0 : index
    %c0_20 = arith.constant 0 : index
    %37 = vector.load %arg5[%c0_19, %c0_20] : memref<128x256xf32, #tpu.memory_space<vmem>>, vector<128x256xf32>
    %c0_21 = arith.constant 0 : index
    %c0_22 = arith.constant 0 : index
    %38 = vector.load %arg6[%c0_21, %c0_22] : memref<128x1xf32, #tpu.memory_space<vmem>>, vector<128x1xf32>
    %c0_23 = arith.constant 0 : index
    %c0_24 = arith.constant 0 : index
    %39 = vector.load %arg7[%c0_23, %c0_24] : memref<128x1xf32, #tpu.memory_space<vmem>>, vector<128x1xf32>
    %c0_25 = arith.constant 0 : index
    %c0_26 = arith.constant 0 : index
    %40 = vector.load %arg8[%c0_25, %c0_26] : memref<128x1xf32, #tpu.memory_space<vmem>>, vector<128x1xf32>
    %cst_27 = arith.constant dense<0.000000e+00> : vector<128x512xf32>
    %41 = tpu.matmul %37, %36, %cst_27 {dimension_numbers = #tpu.dot_dimension_numbers<[1], [0], [0], [1], [0, 0, 1, 1], [], []>} : vector<128x256xf32>, vector<256x512xf32>, vector<128x512xf32> -> vector<128x512xf32>
    %42 = vector.broadcast %38 : vector<128x1xf32> to vector<128x512xf32>
    %43 = arith.addf %41, %42 : vector<128x512xf32>
    %cst_28 = arith.constant 0.000000e+00 : f32
    %44 = vector.broadcast %cst_28 : f32 to vector<128x512xf32>
    %45 = arith.maximumf %43, %44 : vector<128x512xf32>
    %cst_29 = arith.constant dense<0.000000e+00> : vector<128xf32>
    %46 = vector.multi_reduction <add>, %45, %cst_29 [1] : vector<128x512xf32> to vector<128xf32>
    %47 = vector.shape_cast %46 : vector<128xf32> to vector<128x1xf32>
    %48 = arith.mulf %45, %45 : vector<128x512xf32>
    %cst_30 = arith.constant dense<0.000000e+00> : vector<128xf32>
    %49 = vector.multi_reduction <add>, %48, %cst_30 [1] : vector<128x512xf32> to vector<128xf32>
    %50 = vector.shape_cast %49 : vector<128xf32> to vector<128x1xf32>
    %cst_31 = arith.constant 0.001953125 : f32
    %51 = vector.broadcast %cst_31 : f32 to vector<128x1xf32>
    %52 = arith.mulf %47, %51 : vector<128x1xf32>
    %cst_32 = arith.constant 0.001953125 : f32
    %53 = vector.broadcast %cst_32 : f32 to vector<128x1xf32>
    %54 = arith.mulf %50, %53 : vector<128x1xf32>
    %55 = arith.mulf %52, %52 : vector<128x1xf32>
    %56 = arith.subf %54, %55 : vector<128x1xf32>
    %cst_33 = arith.constant 0.000000e+00 : f32
    %57 = vector.broadcast %cst_33 : f32 to vector<128x1xf32>
    %58 = arith.maximumf %56, %57 : vector<128x1xf32>
    %cst_34 = arith.constant 9.99999974E-6 : f32
    %59 = vector.broadcast %cst_34 : f32 to vector<128x1xf32>
    %60 = arith.addf %58, %59 : vector<128x1xf32>
    %61 = math.rsqrt %60 : vector<128x1xf32>
    %62 = arith.mulf %39, %61 : vector<128x1xf32>
    %63 = arith.mulf %52, %62 : vector<128x1xf32>
    %64 = arith.subf %40, %63 : vector<128x1xf32>
    %65 = vector.broadcast %62 : vector<128x1xf32> to vector<128x512xf32>
    %66 = arith.mulf %45, %65 : vector<128x512xf32>
    %67 = vector.broadcast %64 : vector<128x1xf32> to vector<128x512xf32>
    %68 = arith.addf %66, %67 : vector<128x512xf32>
    %c0_35 = arith.constant 0 : index
    %c0_36 = arith.constant 0 : index
    %69 = vector.load %arg9[%c0_35, %c0_36] : memref<3x128xf32, #tpu.memory_space<vmem>>, vector<3x128xf32>
    %c0_37 = arith.constant 0 : index
    %c0_38 = arith.constant 0 : index
    %70 = vector.load %arg10[%c0_37, %c0_38] : memref<3x1xf32, #tpu.memory_space<vmem>>, vector<3x1xf32>
    %c0_39 = arith.constant 0 : index
    %c0_40 = arith.constant 0 : index
    %71 = vector.load %arg11[%c0_39, %c0_40] : memref<3x1xf32, #tpu.memory_space<vmem>>, vector<3x1xf32>
    %c0_41 = arith.constant 0 : index
    %c0_42 = arith.constant 0 : index
    %72 = vector.load %arg12[%c0_41, %c0_42] : memref<3x1xf32, #tpu.memory_space<vmem>>, vector<3x1xf32>
    %cst_43 = arith.constant dense<0.000000e+00> : vector<3x512xf32>
    %73 = tpu.matmul %69, %68, %cst_43 {dimension_numbers = #tpu.dot_dimension_numbers<[1], [0], [0], [1], [0, 0, 1, 1], [], []>} : vector<3x128xf32>, vector<128x512xf32>, vector<3x512xf32> -> vector<3x512xf32>
    %74 = vector.broadcast %70 : vector<3x1xf32> to vector<3x512xf32>
    %75 = arith.addf %73, %74 : vector<3x512xf32>
    %cst_44 = arith.constant 0.000000e+00 : f32
    %76 = vector.broadcast %cst_44 : f32 to vector<3x512xf32>
    %77 = arith.maximumf %75, %76 : vector<3x512xf32>
    %cst_45 = arith.constant dense<0.000000e+00> : vector<3xf32>
    %78 = vector.multi_reduction <add>, %77, %cst_45 [1] : vector<3x512xf32> to vector<3xf32>
    %79 = vector.shape_cast %78 : vector<3xf32> to vector<3x1xf32>
    %80 = arith.mulf %77, %77 : vector<3x512xf32>
    %cst_46 = arith.constant dense<0.000000e+00> : vector<3xf32>
    %81 = vector.multi_reduction <add>, %80, %cst_46 [1] : vector<3x512xf32> to vector<3xf32>
    %82 = vector.shape_cast %81 : vector<3xf32> to vector<3x1xf32>
    %cst_47 = arith.constant 0.001953125 : f32
    %83 = vector.broadcast %cst_47 : f32 to vector<3x1xf32>
    %84 = arith.mulf %79, %83 : vector<3x1xf32>
    %cst_48 = arith.constant 0.001953125 : f32
    %85 = vector.broadcast %cst_48 : f32 to vector<3x1xf32>
    %86 = arith.mulf %82, %85 : vector<3x1xf32>
    %87 = arith.mulf %84, %84 : vector<3x1xf32>
    %88 = arith.subf %86, %87 : vector<3x1xf32>
    %cst_49 = arith.constant 0.000000e+00 : f32
    %89 = vector.broadcast %cst_49 : f32 to vector<3x1xf32>
    %90 = arith.maximumf %88, %89 : vector<3x1xf32>
    %cst_50 = arith.constant 9.99999974E-6 : f32
    %91 = vector.broadcast %cst_50 : f32 to vector<3x1xf32>
    %92 = arith.addf %90, %91 : vector<3x1xf32>
    %93 = math.rsqrt %92 : vector<3x1xf32>
    %94 = arith.mulf %71, %93 : vector<3x1xf32>
    %95 = arith.mulf %84, %94 : vector<3x1xf32>
    %96 = arith.subf %72, %95 : vector<3x1xf32>
    %97 = vector.broadcast %94 : vector<3x1xf32> to vector<3x512xf32>
    %98 = arith.mulf %77, %97 : vector<3x512xf32>
    %99 = vector.broadcast %96 : vector<3x1xf32> to vector<3x512xf32>
    %100 = arith.addf %98, %99 : vector<3x512xf32>
    %101 = arith.negf %100 : vector<3x512xf32>
    %102 = math.exp %101 : vector<3x512xf32>
    %cst_51 = arith.constant 1.000000e+00 : f32
    %103 = vector.broadcast %cst_51 : f32 to vector<3x512xf32>
    %104 = arith.addf %103, %102 : vector<3x512xf32>
    %105 = arith.divf %103, %104 : vector<3x512xf32>
    %c0_52 = arith.constant 0 : index
    %c0_53 = arith.constant 0 : index
    %106 = vector.load %arg13[%c0_52, %c0_53] : memref<128x3xf32, #tpu.memory_space<vmem>>, vector<128x3xf32>
    %c0_54 = arith.constant 0 : index
    %c0_55 = arith.constant 0 : index
    %107 = vector.load %arg14[%c0_54, %c0_55] : memref<128x1xf32, #tpu.memory_space<vmem>>, vector<128x1xf32>
    %c0_56 = arith.constant 0 : index
    %c0_57 = arith.constant 0 : index
    %108 = vector.load %arg15[%c0_56, %c0_57] : memref<128x1xf32, #tpu.memory_space<vmem>>, vector<128x1xf32>
    %c0_58 = arith.constant 0 : index
    %c0_59 = arith.constant 0 : index
    %109 = vector.load %arg16[%c0_58, %c0_59] : memref<128x1xf32, #tpu.memory_space<vmem>>, vector<128x1xf32>
    %cst_60 = arith.constant dense<0.000000e+00> : vector<128x512xf32>
    %110 = tpu.matmul %106, %105, %cst_60 {dimension_numbers = #tpu.dot_dimension_numbers<[1], [0], [0], [1], [0, 0, 1, 1], [], []>} : vector<128x3xf32>, vector<3x512xf32>, vector<128x512xf32> -> vector<128x512xf32>
    %111 = vector.broadcast %107 : vector<128x1xf32> to vector<128x512xf32>
    %112 = arith.addf %110, %111 : vector<128x512xf32>
    %cst_61 = arith.constant 0.000000e+00 : f32
    %113 = vector.broadcast %cst_61 : f32 to vector<128x512xf32>
    %114 = arith.maximumf %112, %113 : vector<128x512xf32>
    %cst_62 = arith.constant dense<0.000000e+00> : vector<128xf32>
    %115 = vector.multi_reduction <add>, %114, %cst_62 [1] : vector<128x512xf32> to vector<128xf32>
    %116 = vector.shape_cast %115 : vector<128xf32> to vector<128x1xf32>
    %117 = arith.mulf %114, %114 : vector<128x512xf32>
    %cst_63 = arith.constant dense<0.000000e+00> : vector<128xf32>
    %118 = vector.multi_reduction <add>, %117, %cst_63 [1] : vector<128x512xf32> to vector<128xf32>
    %119 = vector.shape_cast %118 : vector<128xf32> to vector<128x1xf32>
    %cst_64 = arith.constant 0.001953125 : f32
    %120 = vector.broadcast %cst_64 : f32 to vector<128x1xf32>
    %121 = arith.mulf %116, %120 : vector<128x1xf32>
    %cst_65 = arith.constant 0.001953125 : f32
    %122 = vector.broadcast %cst_65 : f32 to vector<128x1xf32>
    %123 = arith.mulf %119, %122 : vector<128x1xf32>
    %124 = arith.mulf %121, %121 : vector<128x1xf32>
    %125 = arith.subf %123, %124 : vector<128x1xf32>
    %cst_66 = arith.constant 0.000000e+00 : f32
    %126 = vector.broadcast %cst_66 : f32 to vector<128x1xf32>
    %127 = arith.maximumf %125, %126 : vector<128x1xf32>
    %cst_67 = arith.constant 9.99999974E-6 : f32
    %128 = vector.broadcast %cst_67 : f32 to vector<128x1xf32>
    %129 = arith.addf %127, %128 : vector<128x1xf32>
    %130 = math.rsqrt %129 : vector<128x1xf32>
    %131 = arith.mulf %108, %130 : vector<128x1xf32>
    %132 = arith.mulf %121, %131 : vector<128x1xf32>
    %133 = arith.subf %109, %132 : vector<128x1xf32>
    %134 = vector.broadcast %131 : vector<128x1xf32> to vector<128x512xf32>
    %135 = arith.mulf %114, %134 : vector<128x512xf32>
    %136 = vector.broadcast %133 : vector<128x1xf32> to vector<128x512xf32>
    %137 = arith.addf %135, %136 : vector<128x512xf32>
    %c0_68 = arith.constant 0 : index
    %c0_69 = arith.constant 0 : index
    %138 = vector.load %arg17[%c0_68, %c0_69] : memref<256x128xf32, #tpu.memory_space<vmem>>, vector<256x128xf32>
    %c0_70 = arith.constant 0 : index
    %c0_71 = arith.constant 0 : index
    %139 = vector.load %arg18[%c0_70, %c0_71] : memref<256x1xf32, #tpu.memory_space<vmem>>, vector<256x1xf32>
    %c0_72 = arith.constant 0 : index
    %c0_73 = arith.constant 0 : index
    %140 = vector.load %arg19[%c0_72, %c0_73] : memref<256x1xf32, #tpu.memory_space<vmem>>, vector<256x1xf32>
    %c0_74 = arith.constant 0 : index
    %c0_75 = arith.constant 0 : index
    %141 = vector.load %arg20[%c0_74, %c0_75] : memref<256x1xf32, #tpu.memory_space<vmem>>, vector<256x1xf32>
    %cst_76 = arith.constant dense<0.000000e+00> : vector<256x512xf32>
    %142 = tpu.matmul %138, %137, %cst_76 {dimension_numbers = #tpu.dot_dimension_numbers<[1], [0], [0], [1], [0, 0, 1, 1], [], []>} : vector<256x128xf32>, vector<128x512xf32>, vector<256x512xf32> -> vector<256x512xf32>
    %143 = vector.broadcast %139 : vector<256x1xf32> to vector<256x512xf32>
    %144 = arith.addf %142, %143 : vector<256x512xf32>
    %cst_77 = arith.constant 0.000000e+00 : f32
    %145 = vector.broadcast %cst_77 : f32 to vector<256x512xf32>
    %146 = arith.maximumf %144, %145 : vector<256x512xf32>
    %cst_78 = arith.constant dense<0.000000e+00> : vector<256xf32>
    %147 = vector.multi_reduction <add>, %146, %cst_78 [1] : vector<256x512xf32> to vector<256xf32>
    %148 = vector.shape_cast %147 : vector<256xf32> to vector<256x1xf32>
    %149 = arith.mulf %146, %146 : vector<256x512xf32>
    %cst_79 = arith.constant dense<0.000000e+00> : vector<256xf32>
    %150 = vector.multi_reduction <add>, %149, %cst_79 [1] : vector<256x512xf32> to vector<256xf32>
    %151 = vector.shape_cast %150 : vector<256xf32> to vector<256x1xf32>
    %cst_80 = arith.constant 0.001953125 : f32
    %152 = vector.broadcast %cst_80 : f32 to vector<256x1xf32>
    %153 = arith.mulf %148, %152 : vector<256x1xf32>
    %cst_81 = arith.constant 0.001953125 : f32
    %154 = vector.broadcast %cst_81 : f32 to vector<256x1xf32>
    %155 = arith.mulf %151, %154 : vector<256x1xf32>
    %156 = arith.mulf %153, %153 : vector<256x1xf32>
    %157 = arith.subf %155, %156 : vector<256x1xf32>
    %cst_82 = arith.constant 0.000000e+00 : f32
    %158 = vector.broadcast %cst_82 : f32 to vector<256x1xf32>
    %159 = arith.maximumf %157, %158 : vector<256x1xf32>
    %cst_83 = arith.constant 9.99999974E-6 : f32
    %160 = vector.broadcast %cst_83 : f32 to vector<256x1xf32>
    %161 = arith.addf %159, %160 : vector<256x1xf32>
    %162 = math.rsqrt %161 : vector<256x1xf32>
    %163 = arith.mulf %140, %162 : vector<256x1xf32>
    %164 = arith.mulf %153, %163 : vector<256x1xf32>
    %165 = arith.subf %141, %164 : vector<256x1xf32>
    %166 = vector.broadcast %163 : vector<256x1xf32> to vector<256x512xf32>
    %167 = arith.mulf %146, %166 : vector<256x512xf32>
    %168 = vector.broadcast %165 : vector<256x1xf32> to vector<256x512xf32>
    %169 = arith.addf %167, %168 : vector<256x512xf32>
    %c0_84 = arith.constant 0 : index
    %c0_85 = arith.constant 0 : index
    %170 = vector.load %arg21[%c0_84, %c0_85] : memref<4x256xf32, #tpu.memory_space<vmem>>, vector<4x256xf32>
    %c0_86 = arith.constant 0 : index
    %c0_87 = arith.constant 0 : index
    %171 = vector.load %arg22[%c0_86, %c0_87] : memref<4x1xf32, #tpu.memory_space<vmem>>, vector<4x1xf32>
    %c0_88 = arith.constant 0 : index
    %c0_89 = arith.constant 0 : index
    %172 = vector.load %arg23[%c0_88, %c0_89] : memref<4x1xf32, #tpu.memory_space<vmem>>, vector<4x1xf32>
    %c0_90 = arith.constant 0 : index
    %c0_91 = arith.constant 0 : index
    %173 = vector.load %arg24[%c0_90, %c0_91] : memref<4x1xf32, #tpu.memory_space<vmem>>, vector<4x1xf32>
    %cst_92 = arith.constant dense<0.000000e+00> : vector<4x512xf32>
    %174 = tpu.matmul %170, %169, %cst_92 {dimension_numbers = #tpu.dot_dimension_numbers<[1], [0], [0], [1], [0, 0, 1, 1], [], []>} : vector<4x256xf32>, vector<256x512xf32>, vector<4x512xf32> -> vector<4x512xf32>
    %175 = vector.broadcast %171 : vector<4x1xf32> to vector<4x512xf32>
    %176 = arith.addf %174, %175 : vector<4x512xf32>
    %cst_93 = arith.constant 0.000000e+00 : f32
    %177 = vector.broadcast %cst_93 : f32 to vector<4x512xf32>
    %178 = arith.maximumf %176, %177 : vector<4x512xf32>
    %cst_94 = arith.constant dense<0.000000e+00> : vector<4xf32>
    %179 = vector.multi_reduction <add>, %178, %cst_94 [1] : vector<4x512xf32> to vector<4xf32>
    %180 = vector.shape_cast %179 : vector<4xf32> to vector<4x1xf32>
    %181 = arith.mulf %178, %178 : vector<4x512xf32>
    %cst_95 = arith.constant dense<0.000000e+00> : vector<4xf32>
    %182 = vector.multi_reduction <add>, %181, %cst_95 [1] : vector<4x512xf32> to vector<4xf32>
    %183 = vector.shape_cast %182 : vector<4xf32> to vector<4x1xf32>
    %cst_96 = arith.constant 0.001953125 : f32
    %184 = vector.broadcast %cst_96 : f32 to vector<4x1xf32>
    %185 = arith.mulf %180, %184 : vector<4x1xf32>
    %cst_97 = arith.constant 0.001953125 : f32
    %186 = vector.broadcast %cst_97 : f32 to vector<4x1xf32>
    %187 = arith.mulf %183, %186 : vector<4x1xf32>
    %188 = arith.mulf %185, %185 : vector<4x1xf32>
    %189 = arith.subf %187, %188 : vector<4x1xf32>
    %cst_98 = arith.constant 0.000000e+00 : f32
    %190 = vector.broadcast %cst_98 : f32 to vector<4x1xf32>
    %191 = arith.maximumf %189, %190 : vector<4x1xf32>
    %cst_99 = arith.constant 9.99999974E-6 : f32
    %192 = vector.broadcast %cst_99 : f32 to vector<4x1xf32>
    %193 = arith.addf %191, %192 : vector<4x1xf32>
    %194 = math.rsqrt %193 : vector<4x1xf32>
    %195 = arith.mulf %172, %194 : vector<4x1xf32>
    %196 = arith.mulf %185, %195 : vector<4x1xf32>
    %197 = arith.subf %173, %196 : vector<4x1xf32>
    %198 = vector.broadcast %195 : vector<4x1xf32> to vector<4x512xf32>
    %199 = arith.mulf %178, %198 : vector<4x512xf32>
    %200 = vector.broadcast %197 : vector<4x1xf32> to vector<4x512xf32>
    %201 = arith.addf %199, %200 : vector<4x512xf32>
    %202 = vector.extract_strided_slice %201 {offsets = [0, 0], sizes = [4, 256], strides = [1, 1]} : vector<4x512xf32> to vector<4x256xf32>
    %c0_100 = arith.constant 0 : index
    %c0_101 = arith.constant 0 : index
    %c0_102 = arith.constant 0 : index
    %203 = vector.load %arg25[%c0_100, %c0_101, %c0_102] : memref<2x4x256xf32, #tpu.memory_space<vmem>>, vector<1x4x256xf32>
    %204 = vector.shape_cast %203 : vector<1x4x256xf32> to vector<4x256xf32>
    %205 = vector.shape_cast %202 : vector<4x256xf32> to vector<1x4x256xf32>
    tpu.vector_store %arg25[%c0_100, %c0_101, %c0_102], %205 {strides = array<i32>} : memref<2x4x256xf32, #tpu.memory_space<vmem>>, vector<1x4x256xf32>,
    %206 = vector.extract_strided_slice %201 {offsets = [0, 256], sizes = [4, 256], strides = [1, 1]} : vector<4x512xf32> to vector<4x256xf32>
    %c1_103 = arith.constant 1 : index
    %c0_104 = arith.constant 0 : index
    %c0_105 = arith.constant 0 : index
    %207 = vector.load %arg25[%c1_103, %c0_104, %c0_105] : memref<2x4x256xf32, #tpu.memory_space<vmem>>, vector<1x4x256xf32>
    %208 = vector.shape_cast %207 : vector<1x4x256xf32> to vector<4x256xf32>
    %209 = vector.shape_cast %206 : vector<4x256xf32> to vector<1x4x256xf32>
    tpu.vector_store %arg25[%c1_103, %c0_104, %c0_105], %209 {strides = array<i32>} : memref<2x4x256xf32, #tpu.memory_space<vmem>>, vector<1x4x256xf32>,
    return
  }
}

</mosaic_0001>

<bundles_post_ra>
// kernel: grey2color_forward.1
= control target key start
LH: loop header
LB: loop body
LE: loop exit
PB: predicated region body
PF: predicated region fallthrough
CT: control target
= control target key end

     0   :  { %v8004_v0 = vmov 0   ;;  %vm472_vm0 = vcmask 1043456   ;;  %v14186_v7 = vmov 0.0   ;;  %vm375_vm1 = vcmask 31744   ;;  %s14151_s2 = inlined_call_operand.vmem [shape: f32[256,1], index: 2, kind: input, shape index: {}]   ;;  %s14152_s0 = inlined_call_operand.vmem [shape: f32[2,4,256], index: 0, kind: input, shape index: {}]   ;;  %s14153_s1 = inlined_call_operand.vmem [shape: f32[256,4], index: 1, kind: input, shape index: {}]   ;;  %s14154_s3 = inlined_call_operand.vmem [shape: f32[256,1], index: 3, kind: input, shape index: {}]   ;;  %s14155_s4 = inlined_call_operand.vmem [shape: f32[256,1], index: 4, kind: input, shape index: {}]   ;;  %s14156_s6 = inlined_call_operand.vmem [shape: f32[128,1], index: 6, kind: input, shape index: {}]   ;;  %s14157_s5 = inlined_call_operand.vmem [shape: f32[128,256], index: 5, kind: input, shape index: {}]   ;;  %s14158_s7 = inlined_call_operand.vmem [shape: f32[128,1], index: 7, kind: input, shape index: {}]   ;;  %s14159_s8 = inlined_call_operand.vmem [shape: f32[128,1], index: 8, kind: input, shape index: {}]   ;;  %s14160_s10 = inlined_call_operand.vmem [shape: f32[3,1], index: 10, kind: input, shape index: {}]   ;;  %s14161_s9 = inlined_call_operand.vmem [shape: f32[3,128], index: 9, kind: input, shape index: {}]   ;;  %s14162_s11 = inlined_call_operand.vmem [shape: f32[3,1], index: 11, kind: input, shape index: {}]   ;;  %s14163_s12 = inlined_call_operand.vmem [shape: f32[3,1], index: 12, kind: input, shape index: {}]   ;;  %s14164_s14 = inlined_call_operand.vmem [shape: f32[128,1], index: 14, kind: input, shape index: {}]   ;;  %s14165_s13 = inlined_call_operand.vmem [shape: f32[128,3], index: 13, kind: input, shape index: {}]   ;;  %s14166_s15 = inlined_call_operand.vmem [shape: f32[128,1], index: 15, kind: input, shape index: {}]   ;;  %s14167_s16 = inlined_call_operand.vmem [shape: f32[128,1], index: 16, kind: input, shape index: {}]   ;;  %s14168_s18 = inlined_call_operand.vmem [shape: f32[256,1], index: 18, kind: input, shape index: {}]   ;;  %s14169_s17 = inlined_call_operand.vmem [shape: f32[256,128], index: 17, kind: input, shape index: {}]   ;;  %s14170_s19 = inlined_call_operand.vmem [shape: f32[256,1], index: 19, kind: input, shape index: {}]   ;;  %s14171_s20 = inlined_call_operand.vmem [shape: f32[256,1], index: 20, kind: input, shape index: {}]   ;;  %s14172_s22 = inlined_call_operand.vmem [shape: f32[4,1], index: 22, kind: input, shape index: {}]   ;;  %s14173_s21 = inlined_call_operand.vmem [shape: f32[4,256], index: 21, kind: input, shape index: {}]   ;;  %s14174_s23 = inlined_call_operand.vmem [shape: f32[4,1], index: 23, kind: input, shape index: {}]   ;;  %s14175_s24 = inlined_call_operand.vmem [shape: f32[4,1], index: 24, kind: input, shape index: {}]   ;;  %s14176_s25 = inlined_call_operand.vmem [shape: f32[2,4,256], index: 25, kind: output, shape index: {}]  }
   0x1   :  { %14520 = sst [smem:[#allocation130_spill]] %s14151_s2  ;;  %7788 = vset.pattern.permute.xlu1 %v8004_v0  ;;  %7787 = vset.pattern.permute.xlu0 %v8004_v0  ;;  %vm3840_vm2 = vcmask 1042432   ;;  %vm4059_vm3 = vcmask 23552  }
   0x2   :  { %14521 = sst [smem:[#allocation131_spill]] %s14152_s0  ;;  %545 = vmatprep.mubr.f32.mxu0 %v14186_v7  ;;  %802 = vmatprep.mubr.f32.mxu1 %v14186_v7 }
   0x3   :  { %14522 = sst [smem:[#allocation132_spill]] %s14153_s1 }
   0x4   :  { %14523 = sst [smem:[#allocation133_spill]] %s14154_s3 }
   0x5   :  { %14524 = sst [smem:[#allocation134_spill]] %s14155_s4 }
   0x6   :  { %14525 = sst [smem:[#allocation135_spill]] %s14156_s6 }
   0x7   :  { %14526 = sst [smem:[#allocation136_spill]] %s14157_s5 }
   0x8   :  { %14527 = sst [smem:[#allocation137_spill]] %s14158_s7 }
   0x9   :  { %14528 = sst [smem:[#allocation138_spill]] %s14159_s8 }
   0xa   :  { %14529 = sst [smem:[#allocation139_spill]] %s14160_s10 }
   0xb   :  { %s14530_s5 = sld [smem:[#allocation130_spill]] }
   0xc   :  { %s14531_s0 = sld [smem:[#allocation131_spill]] }
   0xd   :  { %s14532_s2 = sld [smem:[#allocation132_spill]] }
   0xe   :  { %s14655_s29 = sld [smem:[#allocation133_spill]] }
   0xf   :  { %s14656_s3 = sld [smem:[#allocation134_spill]] }
  0x10   :  { %s14660_s6 = sld [smem:[#allocation135_spill]] }
  0x11   :  { %v134_v1 = vld [vmem:[%s14530_s5 + $0x78] sm:$0xff]  ;;  %v132_v2 = vld [vmem:[%s14530_s5 + $0x68] sm:$0xff]  ;;  %v133_v8 = vld [vmem:[%s14530_s5 + $0x70] sm:$0xff]  ;;  %s14661_s7 = sld [smem:[#allocation136_spill]] }
  0x12   :  { %v80_v3 = vld [vmem:[%s14531_s0] sm:$0xff]  ;;  %292 = vperm.xlu0 %7787, %v134_v1   ;;  %282 = vperm.xlu1 %7788, %v132_v2   ;;  %v7675_v5 = vld [vmem:[%s14531_s0 + $0x8] sm:$0xff]  ;;  %v130_v11 = vld [vmem:[%s14530_s5 + $0x58] sm:$0xff]  ;;  %s14858_s10 = sld [smem:[#allocation137_spill]] }
  0x13   :  { %v84_v4 = vcombine.high %v80_v3, %v80_v3  ;;  %v86_v6 = vcombine.high %v7675_v5, %v7675_v5  ;;  %v131_v9 = vld [vmem:[%s14530_s5 + $0x60] sm:$0xff]  ;;  %v129_v12 = vld [vmem:[%s14530_s5 + $0x50] sm:$0xff]  ;;  %v88_v13 = vld [vmem:[%s14532_s2 + $0x8] sm:$0xff]  ;;  %s14859_s30 = sld [smem:[#allocation138_spill]] }
  0x14   :  { %v87_v10 = vld [vmem:[%s14532_s2] sm:$0xff]  ;;  %v128_v14 = vld [vmem:[%s14530_s5 + $0x48] sm:$0xff]  ;;  %v89_v16 = vld [vmem:[%s14532_s2 + $0x10] sm:$0xff]  ;;  %s14860_s27 = sld [smem:[#allocation139_spill]] }
  0x15   :  { %7676 = vmatprep.subr.msk.mxu0 %vm472_vm0, %v84_v4  ;;  %7710 = vmatprep.subr.msk.mxu1 %vm472_vm0, %v86_v6  ;;  %v127_v15 = vld [vmem:[%s14530_s5 + $0x40] sm:$0xff]  ;;  %v126_v17 = vld [vmem:[%s14530_s5 + $0x38] sm:$0xff]  ;;  %v125_v18 = vld [vmem:[%s14530_s5 + $0x30] sm:$0xff] }
  0x16   :  { %7677 = vmatpush1.msk.msra.mxu0 %vm472_vm0, %v80_v3  ;;  %7711 = vmatpush1.msk.msra.mxu1 %vm472_vm0, %v7675_v5  ;;  %v90_v19 = vld [vmem:[%s14532_s2 + $0x18] sm:$0xff]  ;;  %v124_v20 = vld [vmem:[%s14530_s5 + $0x28] sm:$0xff]  ;;  %v123_v21 = vld [vmem:[%s14530_s5 + $0x20] sm:$0xff] }
  0x17   :  { %287 = vperm.xlu0 %7787, %v133_v8   ;;  %277 = vperm.xlu1 %7788, %v131_v9   ;;  %v91_v22 = vld [vmem:[%s14532_s2 + $0x20] sm:$0xff]  ;;  %v122_v23 = vld [vmem:[%s14530_s5 + $0x18] sm:$0xff]  ;;  %v121_v24 = vld [vmem:[%s14530_s5 + $0x10] sm:$0xff] }
  0x18   :  { %7678 = vmatmul.mubr.msk.f32.vlgmr.msra.gmra.mxu0 %vm375_vm1, %v87_v10  ;;  %7712 = vmatmul.mubr.msk.f32.vlgmr.msra.gmra.mxu1 %vm375_vm1, %v87_v10  ;;  %v92_v25 = vld [vmem:[%s14532_s2 + $0x28] sm:$0xff]  ;;  %v119_v27 = vld [vmem:[%s14530_s5] sm:$0xff]  ;;  %v93_v28 = vld [vmem:[%s14532_s2 + $0x30] sm:$0xff] }
  0x19   :  { %551 = vmatprep.mubr.f32.mxu0 %v14186_v7  ;;  %808 = vmatprep.mubr.f32.mxu1 %v14186_v7  ;;  %v120_v26 = vld [vmem:[%s14530_s5 + $0x8] sm:$0xff]  ;;  %v150_v29 = vld [vmem:[%s14530_s5 + $0xf8] sm:$0xff]  ;;  %v149_v30 = vld [vmem:[%s14530_s5 + $0xf0] sm:$0xff] }
  0x1a   :  { %v94_v31 = vld [vmem:[%s14532_s2 + $0x38] sm:$0xff]  ;;  %v148_v32 = vld [vmem:[%s14530_s5 + $0xe8] sm:$0xff]  ;;  %v147_v33 = vld [vmem:[%s14530_s5 + $0xe0] sm:$0xff] }
  0x1b   :  { %272 = vperm.xlu0 %7787, %v130_v11   ;;  %267 = vperm.xlu1 %7788, %v129_v12   ;;  %v95_v34 = vld [vmem:[%s14532_s2 + $0x40] sm:$0xff]  ;;  %v146_v35 = vld [vmem:[%s14530_s5 + $0xd8] sm:$0xff]  ;;  %v145_v36 = vld [vmem:[%s14530_s5 + $0xd0] sm:$0xff] }
  0x1c   :  { %7679 = vmatmul.mubr.msk.f32.gmra.mxu0 %vm375_vm1, %v88_v13  ;;  %7713 = vmatmul.mubr.msk.f32.gmra.mxu1 %vm375_vm1, %v88_v13  ;;  %v96_v37 = vld [vmem:[%s14532_s2 + $0x48] sm:$0xff]  ;;  %v143_v39 = vld [vmem:[%s14530_s5 + $0xc0] sm:$0xff]  ;;  %v97_v40 = vld [vmem:[%s14532_s2 + $0x50] sm:$0xff] }
  0x1d   :  { %557 = vmatprep.mubr.f32.mxu0 %v14186_v7  ;;  %814 = vmatprep.mubr.f32.mxu1 %v14186_v7  ;;  %v144_v38 = vld [vmem:[%s14530_s5 + $0xc8] sm:$0xff]  ;;  %v142_v41 = vld [vmem:[%s14530_s5 + $0xb8] sm:$0xff]  ;;  %v141_v42 = vld [vmem:[%s14530_s5 + $0xb0] sm:$0xff] }
  0x1e   :  { %v98_v43 = vld [vmem:[%s14532_s2 + $0x58] sm:$0xff]  ;;  %v140_v44 = vld [vmem:[%s14530_s5 + $0xa8] sm:$0xff]  ;;  %v139_v45 = vld [vmem:[%s14530_s5 + $0xa0] sm:$0xff] }
  0x1f   :  { %262 = vperm.xlu0 %7787, %v128_v14   ;;  %257 = vperm.xlu1 %7788, %v127_v15   ;;  %v99_v46 = vld [vmem:[%s14532_s2 + $0x60] sm:$0xff]  ;;  %v138_v47 = vld [vmem:[%s14530_s5 + $0x98] sm:$0xff]  ;;  %v137_v48 = vld [vmem:[%s14530_s5 + $0x90] sm:$0xff] }
  0x20   :  { %7680 = vmatmul.mubr.msk.f32.gmra.mxu0 %vm375_vm1, %v89_v16  ;;  %7714 = vmatmul.mubr.msk.f32.gmra.mxu1 %vm375_vm1, %v89_v16  ;;  %v100_v49 = vld [vmem:[%s14532_s2 + $0x68] sm:$0xff]  ;;  %v135_v51 = vld [vmem:[%s14530_s5 + $0x80] sm:$0xff]  ;;  %v101_v52 = vld [vmem:[%s14532_s2 + $0x70] sm:$0xff] }
  0x21   :  { %563 = vmatprep.mubr.f32.mxu0 %v14186_v7  ;;  %820 = vmatprep.mubr.f32.mxu1 %v14186_v7  ;;  %v136_v50 = vld [vmem:[%s14530_s5 + $0x88] sm:$0xff]  ;;  %v102_v53 = vld [vmem:[%s14532_s2 + $0x78] sm:$0xff]  ;;  %v103_v54 = vld [vmem:[%s14532_s2 + $0x80] sm:$0xff] }
  0x22   :  { %v104_v55 = vld [vmem:[%s14532_s2 + $0x88] sm:$0xff]  ;;  %v105_v56 = vld [vmem:[%s14532_s2 + $0x90] sm:$0xff]  ;;  %v106_v57 = vld [vmem:[%s14532_s2 + $0x98] sm:$0xff] }
  0x23   :  { %252 = vperm.xlu0 %7787, %v126_v17   ;;  %247 = vperm.xlu1 %7788, %v125_v18   ;;  %v107_v58 = vld [vmem:[%s14532_s2 + $0xa0] sm:$0xff]  ;;  %v108_v59 = vld [vmem:[%s14532_s2 + $0xa8] sm:$0xff]  ;;  %v109_v60 = vld [vmem:[%s14532_s2 + $0xb0] sm:$0xff] }
  0x24   :  { %7681 = vmatmul.mubr.msk.f32.gmra.mxu0 %vm375_vm1, %v90_v19  ;;  %7715 = vmatmul.mubr.msk.f32.gmra.mxu1 %vm375_vm1, %v90_v19  ;;  %v110_v61 = vld [vmem:[%s14532_s2 + $0xb8] sm:$0xff]  ;;  %v111_v62 = vld [vmem:[%s14532_s2 + $0xc0] sm:$0xff]  ;;  %v112_v63 = vld [vmem:[%s14532_s2 + $0xc8] sm:$0xff] }
  0x25   :  { %569 = vmatprep.mubr.f32.mxu0 %v14186_v7  ;;  %826 = vmatprep.mubr.f32.mxu1 %v14186_v7  ;;  %v113_v0 = vld [vmem:[%s14532_s2 + $0xd0] sm:$0xff]  ;;  %v114_v1 = vld [vmem:[%s14532_s2 + $0xd8] sm:$0xff]  ;;  %v115_v2 = vld [vmem:[%s14532_s2 + $0xe0] sm:$0xff] }
  0x26   :  { %v116_v3 = vld [vmem:[%s14532_s2 + $0xe8] sm:$0xff]  ;;  %v117_v4 = vld [vmem:[%s14532_s2 + $0xf0] sm:$0xff]  ;;  %v118_v5 = vld [vmem:[%s14532_s2 + $0xf8] sm:$0xff] }
  0x27   :  { %242 = vperm.xlu0 %7787, %v124_v20   ;;  %237 = vperm.xlu1 %7788, %v123_v21  }
  0x28   :  { %7682 = vmatmul.mubr.msk.f32.gmra.mxu0 %vm375_vm1, %v91_v22  ;;  %7716 = vmatmul.mubr.msk.f32.gmra.mxu1 %vm375_vm1, %v91_v22 }
  0x29   :  { %575 = vmatprep.mubr.f32.mxu0 %v14186_v7  ;;  %832 = vmatprep.mubr.f32.mxu1 %v14186_v7 }
  0x2b   :  { %232 = vperm.xlu0 %7787, %v122_v23   ;;  %227 = vperm.xlu1 %7788, %v121_v24  }
  0x2c   :  { %7683 = vmatmul.mubr.msk.f32.gmra.mxu0 %vm375_vm1, %v92_v25  ;;  %7717 = vmatmul.mubr.msk.f32.gmra.mxu1 %vm375_vm1, %v92_v25 }
  0x2d   :  { %581 = vmatprep.mubr.f32.mxu0 %v14186_v7  ;;  %838 = vmatprep.mubr.f32.mxu1 %v14186_v7 }
  0x2f   :  { %222 = vperm.xlu0 %7787, %v120_v26   ;;  %217 = vperm.xlu1 %7788, %v119_v27  }
  0x30   :  { %7684 = vmatmul.mubr.msk.f32.gmra.mxu0 %vm375_vm1, %v93_v28  ;;  %7718 = vmatmul.mubr.msk.f32.gmra.mxu1 %vm375_vm1, %v93_v28 }
  0x31   :  { %587 = vmatprep.mubr.f32.mxu0 %v14186_v7  ;;  %844 = vmatprep.mubr.f32.mxu1 %v14186_v7 }
  0x33   :  { %372 = vperm.xlu0 %7787, %v150_v29   ;;  %367 = vperm.xlu1 %7788, %v149_v30  }
  0x34   :  { %7685 = vmatmul.mubr.msk.f32.gmra.mxu0 %vm375_vm1, %v94_v31  ;;  %7719 = vmatmul.mubr.msk.f32.gmra.mxu1 %vm375_vm1, %v94_v31 }
  0x35   :  { %593 = vmatprep.mubr.f32.mxu0 %v14186_v7  ;;  %850 = vmatprep.mubr.f32.mxu1 %v14186_v7 }
  0x37   :  { %362 = vperm.xlu0 %7787, %v148_v32   ;;  %357 = vperm.xlu1 %7788, %v147_v33  }
  0x38   :  { %7686 = vmatmul.mubr.msk.f32.gmra.mxu0 %vm375_vm1, %v95_v34  ;;  %7720 = vmatmul.mubr.msk.f32.gmra.mxu1 %vm375_vm1, %v95_v34 }
  0x39   :  { %599 = vmatprep.mubr.f32.mxu0 %v14186_v7  ;;  %856 = vmatprep.mubr.f32.mxu1 %v14186_v7 }
  0x3b   :  { %352 = vperm.xlu0 %7787, %v146_v35   ;;  %347 = vperm.xlu1 %7788, %v145_v36  }
  0x3c   :  { %7687 = vmatmul.mubr.msk.f32.gmra.mxu0 %vm375_vm1, %v96_v37  ;;  %7721 = vmatmul.mubr.msk.f32.gmra.mxu1 %vm375_vm1, %v96_v37 }
  0x3d   :  { %605 = vmatprep.mubr.f32.mxu0 %v14186_v7  ;;  %862 = vmatprep.mubr.f32.mxu1 %v14186_v7 }
  0x3f   :  { %342 = vperm.xlu0 %7787, %v144_v38   ;;  %337 = vperm.xlu1 %7788, %v143_v39  }
  0x40   :  { %7688 = vmatmul.mubr.msk.f32.gmra.mxu0 %vm375_vm1, %v97_v40  ;;  %7722 = vmatmul.mubr.msk.f32.gmra.mxu1 %vm375_vm1, %v97_v40 }
  0x41   :  { %611 = vmatprep.mubr.f32.mxu0 %v14186_v7  ;;  %868 = vmatprep.mubr.f32.mxu1 %v14186_v7 }
  0x43   :  { %332 = vperm.xlu0 %7787, %v142_v41   ;;  %327 = vperm.xlu1 %7788, %v141_v42  }
  0x44   :  { %7689 = vmatmul.mubr.msk.f32.gmra.mxu0 %vm375_vm1, %v98_v43  ;;  %7723 = vmatmul.mubr.msk.f32.gmra.mxu1 %vm375_vm1, %v98_v43 }
  0x45   :  { %617 = vmatprep.mubr.f32.mxu0 %v14186_v7  ;;  %874 = vmatprep.mubr.f32.mxu1 %v14186_v7 }
  0x47   :  { %322 = vperm.xlu0 %7787, %v140_v44   ;;  %317 = vperm.xlu1 %7788, %v139_v45  }
  0x48   :  { %7690 = vmatmul.mubr.msk.f32.gmra.mxu0 %vm375_vm1, %v99_v46  ;;  %7724 = vmatmul.mubr.msk.f32.gmra.mxu1 %vm375_vm1, %v99_v46 }
  0x49   :  { %623 = vmatprep.mubr.f32.mxu0 %v14186_v7  ;;  %880 = vmatprep.mubr.f32.mxu1 %v14186_v7 }
  0x4b   :  { %312 = vperm.xlu0 %7787, %v138_v47   ;;  %307 = vperm.xlu1 %7788, %v137_v48  }
  0x4c   :  { %7691 = vmatmul.mubr.msk.f32.gmra.mxu0 %vm375_vm1, %v100_v49  ;;  %7725 = vmatmul.mubr.msk.f32.gmra.mxu1 %vm375_vm1, %v100_v49 }
  0x4d   :  { %629 = vmatprep.mubr.f32.mxu0 %v14186_v7  ;;  %886 = vmatprep.mubr.f32.mxu1 %v14186_v7 }
  0x4f   :  { %302 = vperm.xlu0 %7787, %v136_v50   ;;  %297 = vperm.xlu1 %7788, %v135_v51  }
  0x50   :  { %7692 = vmatmul.mubr.msk.f32.gmra.mxu0 %vm375_vm1, %v101_v52  ;;  %7726 = vmatmul.mubr.msk.f32.gmra.mxu1 %vm375_vm1, %v101_v52 }
  0x51   :  { %635 = vmatprep.mubr.f32.mxu0 %v14186_v7  ;;  %892 = vmatprep.mubr.f32.mxu1 %v14186_v7 }
  0x54   :  { %7693 = vmatmul.mubr.msk.f32.gmra.mxu0 %vm375_vm1, %v102_v53  ;;  %7727 = vmatmul.mubr.msk.f32.gmra.mxu1 %vm375_vm1, %v102_v53 }
  0x55   :  { %641 = vmatprep.mubr.f32.mxu0 %v14186_v7  ;;  %898 = vmatprep.mubr.f32.mxu1 %v14186_v7 }
  0x58   :  { %7694 = vmatmul.mubr.msk.f32.gmra.mxu0 %vm375_vm1, %v103_v54  ;;  %7728 = vmatmul.mubr.msk.f32.gmra.mxu1 %vm375_vm1, %v103_v54 }
  0x59   :  { %647 = vmatprep.mubr.f32.mxu0 %v14186_v7  ;;  %904 = vmatprep.mubr.f32.mxu1 %v14186_v7 }
  0x5c   :  { %7695 = vmatmul.mubr.msk.f32.gmra.mxu0 %vm375_vm1, %v104_v55  ;;  %7729 = vmatmul.mubr.msk.f32.gmra.mxu1 %vm375_vm1, %v104_v55 }
  0x5d   :  { %653 = vmatprep.mubr.f32.mxu0 %v14186_v7  ;;  %910 = vmatprep.mubr.f32.mxu1 %v14186_v7 }
  0x60   :  { %7696 = vmatmul.mubr.msk.f32.gmra.mxu0 %vm375_vm1, %v105_v56  ;;  %7730 = vmatmul.mubr.msk.f32.gmra.mxu1 %vm375_vm1, %v105_v56 }
  0x61   :  { %659 = vmatprep.mubr.f32.mxu0 %v14186_v7  ;;  %916 = vmatprep.mubr.f32.mxu1 %v14186_v7 }
  0x64   :  { %7697 = vmatmul.mubr.msk.f32.gmra.mxu0 %vm375_vm1, %v106_v57  ;;  %7731 = vmatmul.mubr.msk.f32.gmra.mxu1 %vm375_vm1, %v106_v57 }
  0x65   :  { %665 = vmatprep.mubr.f32.mxu0 %v14186_v7  ;;  %922 = vmatprep.mubr.f32.mxu1 %v14186_v7 }
  0x68   :  { %7698 = vmatmul.mubr.msk.f32.gmra.mxu0 %vm375_vm1, %v107_v58  ;;  %7732 = vmatmul.mubr.msk.f32.gmra.mxu1 %vm375_vm1, %v107_v58 }
  0x69   :  { %671 = vmatprep.mubr.f32.mxu0 %v14186_v7  ;;  %928 = vmatprep.mubr.f32.mxu1 %v14186_v7 }
  0x6c   :  { %7699 = vmatmul.mubr.msk.f32.gmra.mxu0 %vm375_vm1, %v108_v59  ;;  %7733 = vmatmul.mubr.msk.f32.gmra.mxu1 %vm375_vm1, %v108_v59 }
  0x6d   :  { %677 = vmatprep.mubr.f32.mxu0 %v14186_v7  ;;  %934 = vmatprep.mubr.f32.mxu1 %v14186_v7 }
  0x70   :  { %7700 = vmatmul.mubr.msk.f32.gmra.mxu0 %vm375_vm1, %v109_v60  ;;  %7734 = vmatmul.mubr.msk.f32.gmra.mxu1 %vm375_vm1, %v109_v60 }
  0x71   :  { %683 = vmatprep.mubr.f32.mxu0 %v14186_v7  ;;  %940 = vmatprep.mubr.f32.mxu1 %v14186_v7 }
  0x74   :  { %7701 = vmatmul.mubr.msk.f32.gmra.mxu0 %vm375_vm1, %v110_v61  ;;  %7735 = vmatmul.mubr.msk.f32.gmra.mxu1 %vm375_vm1, %v110_v61 }
  0x75   :  { %689 = vmatprep.mubr.f32.mxu0 %v14186_v7  ;;  %946 = vmatprep.mubr.f32.mxu1 %v14186_v7 }
  0x78   :  { %7702 = vmatmul.mubr.msk.f32.gmra.mxu0 %vm375_vm1, %v111_v62  ;;  %7736 = vmatmul.mubr.msk.f32.gmra.mxu1 %vm375_vm1, %v111_v62 }
  0x79   :  { %695 = vmatprep.mubr.f32.mxu0 %v14186_v7  ;;  %952 = vmatprep.mubr.f32.mxu1 %v14186_v7 }
  0x7c   :  { %7703 = vmatmul.mubr.msk.f32.gmra.mxu0 %vm375_vm1, %v112_v63  ;;  %7737 = vmatmul.mubr.msk.f32.gmra.mxu1 %vm375_vm1, %v112_v63 }
  0x7d   :  { %701 = vmatprep.mubr.f32.mxu0 %v14186_v7  ;;  %958 = vmatprep.mubr.f32.mxu1 %v14186_v7 }
  0x80   :  { %7704 = vmatmul.mubr.msk.f32.gmra.mxu0 %vm375_vm1, %v113_v0  ;;  %7738 = vmatmul.mubr.msk.f32.gmra.mxu1 %vm375_vm1, %v113_v0 }
  0x81   :  { %707 = vmatprep.mubr.f32.mxu0 %v14186_v7  ;;  %964 = vmatprep.mubr.f32.mxu1 %v14186_v7 }
  0x84   :  { %7705 = vmatmul.mubr.msk.f32.gmra.mxu0 %vm375_vm1, %v114_v1  ;;  %7739 = vmatmul.mubr.msk.f32.gmra.mxu1 %vm375_vm1, %v114_v1 }
  0x85   :  { %713 = vmatprep.mubr.f32.mxu0 %v14186_v7  ;;  %970 = vmatprep.mubr.f32.mxu1 %v14186_v7 }
  0x88   :  { %7706 = vmatmul.mubr.msk.f32.gmra.mxu0 %vm375_vm1, %v115_v2  ;;  %7740 = vmatmul.mubr.msk.f32.gmra.mxu1 %vm375_vm1, %v115_v2 }
  0x89   :  { %719 = vmatprep.mubr.f32.mxu0 %v14186_v7  ;;  %976 = vmatprep.mubr.f32.mxu1 %v14186_v7 }
  0x8c   :  { %7707 = vmatmul.mubr.msk.f32.gmra.mxu0 %vm375_vm1, %v116_v3  ;;  %7741 = vmatmul.mubr.msk.f32.gmra.mxu1 %vm375_vm1, %v116_v3 }
  0x8d   :  { %725 = vmatprep.mubr.f32.mxu0 %v14186_v7  ;;  %982 = vmatprep.mubr.f32.mxu1 %v14186_v7  ;;  %v8466_v6 = vpop.permute.xlu1 %282  ;;  %v8468_v8 = vpop.permute.xlu0 %292 }
  0x90   :  { %7708 = vmatmul.mubr.msk.f32.gmra.mxu0 %vm375_vm1, %v117_v4  ;;  %7742 = vmatmul.mubr.msk.f32.gmra.mxu1 %vm375_vm1, %v117_v4 }
  0x91   :  { %731 = vmatprep.mubr.f32.mxu0 %v14186_v7  ;;  %988 = vmatprep.mubr.f32.mxu1 %v14186_v7 }
  0x92   :  { %v8470_v9 = vpop.permute.xlu1 %277  ;;  %v8472_v10 = vpop.permute.xlu0 %287 }
  0x94   :  { %7709 = vmatmul.mubr.msk.f32.gmra.mxu0 %vm375_vm1, %v118_v5  ;;  %7743 = vmatmul.mubr.msk.f32.gmra.mxu1 %vm375_vm1, %v118_v5 }
  0x96   :  { %v8474_v11 = vpop.permute.xlu1 %267  ;;  %v8476_v12 = vpop.permute.xlu0 %272 }
  0x9a   :  { %v8478_v13 = vpop.permute.xlu1 %257  ;;  %v8480_v14 = vpop.permute.xlu0 %262 }
  0x9e   :  { %v8482_v15 = vpop.permute.xlu1 %247  ;;  %v8484_v16 = vpop.permute.xlu0 %252 }
  0xa2   :  { %v8486_v17 = vpop.permute.xlu1 %237  ;;  %v8488_v18 = vpop.permute.xlu0 %242 }
  0xa6   :  { %v228_v19 = vpop.permute.xlu1 %227  ;;  %v8490_v20 = vpop.permute.xlu0 %232 }
  0xaa   :  { %v218_v21 = vpop.permute.xlu1 %217  ;;  %v223_v29 = vpop.permute.xlu0 %222 }
  0xd8   :  { %v547_v22 = vpop.f32.mrf.mxu0  ;;  %v804_v24 = vpop.f32.mrf.mxu1 }
  0xd9   :  { %v548_v23 = vadd.f32 %v547_v22, %v218_v21  ;;  %v805_v25 = vadd.f32 %v804_v24, %v218_v21 }
  0xda   :  { %v549_v26 = vpop.f32.mrf.mxu0  ;;  %v806_v28 = vpop.f32.mrf.mxu1 }
  0xdb   :  { %v550_v27 = vadd.f32 %v549_v26, %v218_v21  ;;  %v8492_v30 = vmax.f32 %v548_v23, 0.0  ;;  %v807_v31 = vadd.f32 %v806_v28, %v218_v21  ;;  %v8496_v36 = vmax.f32 %v805_v25, 0.0 }
  0xdc   :  { %v553_v32 = vpop.f32.mrf.mxu0  ;;  %v810_v35 = vpop.f32.mrf.mxu1 }
  0xdd   :  { %v8494_v33 = vmax.f32 %v550_v27, 0.0  ;;  %v554_v34 = vadd.f32 %v553_v32, %v223_v29  ;;  %14533 = vst [vmem:[#allocation2_spill] sm:$0xff] %v8496_v36  ;;  %v811_v37 = vadd.f32 %v810_v35, %v223_v29  ;;  %v1283_v43 = vmul.f32 %v8492_v30, %v8492_v30 }
  0xde   :  { %v555_v38 = vpop.f32.mrf.mxu0  ;;  %v812_v41 = vpop.f32.mrf.mxu1  ;;  %v8504_v44 = vmax.f32 %v807_v31, 0.0  ;;  %v1285_v54 = vmul.f32 %v8496_v36, %v8496_v36 }
  0xdf   :  { %v1284_v39 = vmul.f32 %v8494_v33, %v8494_v33  ;;  %v556_v40 = vadd.f32 %v555_v38, %v223_v29  ;;  %v1123_v42 = vadd.f32 %v8494_v33, %v8492_v30  ;;  %v813_v45 = vadd.f32 %v812_v41, %v223_v29 }
  0xe0   :  { %14534 = vst [vmem:[#allocation3_spill] sm:$0xff] %v8504_v44  ;;  %v559_v46 = vpop.f32.mrf.mxu0  ;;  %v8506_v47 = vmax.f32 %v554_v34, 0.0  ;;  %v8508_v48 = vmax.f32 %v811_v37, 0.0  ;;  %v816_v50 = vpop.f32.mrf.mxu1  ;;  %v1286_v63 = vmul.f32 %v8504_v44, %v8504_v44 }
  0xe1   :  { %v8510_v49 = vmax.f32 %v556_v40, 0.0  ;;  %v1124_v51 = vadd.f32 %v1123_v42, %v8496_v36  ;;  %v560_v52 = vadd.f32 %v559_v46, %v228_v19  ;;  %v1411_v55 = vadd.f32 %v1284_v39, %v1283_v43 }
  0xe2   :  { %14535 = vst [vmem:[#allocation4_spill] sm:$0xff] %v8508_v48  ;;  %v561_v53 = vpop.f32.mrf.mxu0  ;;  %v817_v57 = vadd.f32 %v816_v50, %v228_v19  ;;  %v818_v59 = vpop.f32.mrf.mxu1  ;;  %v8518_v61 = vmax.f32 %v813_v45, 0.0  ;;  %v1287_v2 = vmul.f32 %v8506_v47, %v8506_v47  ;;  %v1289_v21 = vmul.f32 %v8508_v48, %v8508_v48 }
  0xe3   :  { %v1288_v56 = vmul.f32 %v8510_v49, %v8510_v49  ;;  %v562_v58 = vadd.f32 %v561_v53, %v228_v19  ;;  %v1125_v60 = vadd.f32 %v1124_v51, %v8504_v44  ;;  %v1412_v0 = vadd.f32 %v1411_v55, %v1285_v54 }
  0xe4   :  { %14536 = vst [vmem:[#allocation5_spill] sm:$0xff] %v8518_v61  ;;  %v565_v62 = vpop.f32.mrf.mxu0  ;;  %v1128_v1 = vadd.f32 %v8510_v49, %v8506_v47  ;;  %v822_v5 = vpop.f32.mrf.mxu1  ;;  %v8531_v22 = vmax.f32 %v560_v52, 0.0  ;;  %v819_v23 = vadd.f32 %v818_v59, %v228_v19  ;;  %v8534_v27 = vmax.f32 %v817_v57, 0.0 }
  0xe5   :  { %v8526_v3 = vmax.f32 %v562_v58, 0.0  ;;  %v566_v4 = vadd.f32 %v565_v62, %v8490_v20  ;;  %1126 = vadd.xlane.f32.xlu0 %v1125_v60  ;;  %v1413_v25 = vadd.f32 %v1412_v0, %v1286_v63  ;;  %v823_v28 = vadd.f32 %v822_v5, %v8490_v20 }
  0xe6   :  { %v567_v24 = vpop.f32.mrf.mxu0  ;;  %v1129_v26 = vadd.f32 %v1128_v1, %v8508_v48  ;;  %14538 = vst [vmem:[#allocation7_spill] sm:$0xff] %v8534_v27  ;;  %v824_v31 = vpop.f32.mrf.mxu1  ;;  %v1416_v32 = vadd.f32 %v1288_v56, %v1287_v2  ;;  %v1290_v19 = vmul.f32 %v8518_v61, %v8518_v61  ;;  %v8549_v45 = vmax.f32 %v819_v23, 0.0 }
  0xe7   :  { %14537 = vst [vmem:[#allocation6_spill] sm:$0xff] %v8526_v3  ;;  %v568_v29 = vadd.f32 %v567_v24, %v8490_v20  ;;  %v8538_v34 = vmax.f32 %v566_v4, 0.0  ;;  %1414 = vadd.xlane.f32.xlu1 %v1413_v25  ;;  %v1133_v38 = vadd.f32 %v8526_v3, %v8531_v22  ;;  %v1292_v39 = vmul.f32 %v8526_v3, %v8526_v3 }
  0xe8   :  { %v571_v35 = vpop.f32.mrf.mxu0  ;;  %v1130_v37 = vadd.f32 %v1129_v26, %v8518_v61  ;;  %v825_v40 = vadd.f32 %v824_v31, %v8490_v20  ;;  %v828_v42 = vpop.f32.mrf.mxu1  ;;  %v1417_v43 = vadd.f32 %v1416_v32, %v1289_v21  ;;  %14539 = vst [vmem:[#allocation8_spill] sm:$0xff] %v8549_v45  ;;  %v1291_v53 = vmul.f32 %v8531_v22, %v8531_v22 }
  0xe9   :  { %v572_v41 = vadd.f32 %v571_v35, %v8486_v17  ;;  %v8551_v46 = vmax.f32 %v568_v29, 0.0  ;;  %v829_v50 = vadd.f32 %v828_v42, %v8486_v17  ;;  %v1134_v52 = vadd.f32 %v1133_v38, %v8534_v27 }
  0xea   :  { %1131 = vadd.xlane.f32.xlu0 %v1130_v37  ;;  %v573_v51 = vpop.f32.mrf.mxu0  ;;  %v8557_v54 = vmax.f32 %v823_v28, 0.0  ;;  %v830_v55 = vpop.f32.mrf.mxu1  ;;  %v1418_v56 = vadd.f32 %v1417_v43, %v1290_v19  ;;  %v1295_v57 = vmul.f32 %v8538_v34, %v8538_v34  ;;  %v8566_v63 = vmax.f32 %v825_v40, 0.0 }
  0xeb   :  { %14540 = vst [vmem:[#allocation9_spill] sm:$0xff] %v8551_v46  ;;  %v574_v20 = vadd.f32 %v573_v51, %v8486_v17  ;;  %v8562_v58 = vmax.f32 %v572_v41, 0.0  ;;  %v831_v59 = vadd.f32 %v830_v55, %v8486_v17  ;;  %v1135_v62 = vadd.f32 %v1134_v52, %v8549_v45 }
  0xec   :  { %14541 = vst [vmem:[#allocation10_spill] sm:$0xff] %v8557_v54  ;;  %v577_v60 = vpop.f32.mrf.mxu0  ;;  %14543 = vst [vmem:[#allocation12_spill] sm:$0xff] %v8566_v63  ;;  %1419 = vadd.xlane.f32.xlu1 %v1418_v56  ;;  %v834_v1 = vpop.f32.mrf.mxu1  ;;  %v1293_v2 = vmul.f32 %v8534_v27, %v8534_v27  ;;  %v1421_v4 = vadd.f32 %v1292_v39, %v1291_v53  ;;  %v1296_v5 = vmul.f32 %v8551_v46, %v8551_v46 }
  0xed   :  { %14542 = vst [vmem:[#allocation11_spill] sm:$0xff] %v8562_v58  ;;  %v578_v0 = vadd.f32 %v577_v60, %v8488_v18  ;;  %v8573_v21 = vmax.f32 %v829_v50, 0.0  ;;  %v1294_v23 = vmul.f32 %v8549_v45, %v8549_v45  ;;  %v1138_v24 = vadd.f32 %v8551_v46, %v8538_v34  ;;  %v8594_v50 = vpop.permute.xlu1 %367 }
  0xee   :  { %1136 = vadd.xlane.f32.xlu0 %v1135_v62  ;;  %v579_v17 = vpop.f32.mrf.mxu0  ;;  %v8579_v25 = vmax.f32 %v574_v20, 0.0  ;;  %v835_v26 = vadd.f32 %v834_v1, %v8488_v18  ;;  %v836_v29 = vpop.f32.mrf.mxu1  ;;  %v1422_v31 = vadd.f32 %v1421_v4, %v1293_v2  ;;  %v1299_v32 = vmul.f32 %v8562_v58, %v8562_v58 }
  0xef   :  { %14544 = vst [vmem:[#allocation13_spill] sm:$0xff] %v8573_v21  ;;  %v580_v28 = vadd.f32 %v579_v17, %v8488_v18  ;;  %v8585_v35 = vmax.f32 %v831_v59, 0.0  ;;  %v8587_v37 = vmax.f32 %v578_v0, 0.0  ;;  %v1139_v38 = vadd.f32 %v1138_v24, %v8557_v54 }
  0xf0   :  { %14545 = vst [vmem:[#allocation14_spill] sm:$0xff] %v8579_v25  ;;  %v583_v19 = vpop.f32.mrf.mxu0  ;;  %v837_v39 = vadd.f32 %v836_v29, %v8488_v18  ;;  %v1423_v40 = vadd.f32 %v1422_v31, %v1294_v23  ;;  %v840_v42 = vpop.f32.mrf.mxu1  ;;  %v1297_v43 = vmul.f32 %v8557_v54, %v8557_v54  ;;  %v1426_v55 = vadd.f32 %v1296_v5, %v1295_v57 }
  0xf1   :  { %14546 = vst [vmem:[#allocation15_spill] sm:$0xff] %v8585_v35  ;;  %14547 = vst [vmem:[#allocation16_spill] sm:$0xff] %v8587_v37  ;;  %v584_v41 = vadd.f32 %v583_v19, %v8482_v15  ;;  %v8596_v51 = vmax.f32 %v580_v28, 0.0  ;;  %v841_v52 = vadd.f32 %v840_v42, %v8482_v15  ;;  %v1140_v53 = vadd.f32 %v1139_v38, %v8566_v63  ;;  %v8618_v28 = vpop.permute.xlu0 %372 }
  0xf2   :  { %v585_v20 = vpop.f32.mrf.mxu0  ;;  %v1300_v18 = vmul.f32 %v8579_v25, %v8579_v25  ;;  %v8602_v56 = vmax.f32 %v835_v26, 0.0  ;;  %1424 = vadd.xlane.f32.xlu1 %v1423_v40  ;;  %v842_v60 = vpop.f32.mrf.mxu1  ;;  %v1143_v62 = vadd.f32 %v8579_v25, %v8562_v58  ;;  %v1303_v0 = vmul.f32 %v8587_v37, %v8587_v37 }
  0xf3   :  { %14548 = vst [vmem:[#allocation17_spill] sm:$0xff] %v8596_v51  ;;  %v586_v59 = vadd.f32 %v585_v20, %v8482_v15  ;;  %v8609_v1 = vmax.f32 %v584_v41, 0.0  ;;  %1141 = vadd.xlane.f32.xlu0 %v1140_v53  ;;  %v1298_v57 = vmul.f32 %v8566_v63, %v8566_v63  ;;  %v1427_v2 = vadd.f32 %v1426_v55, %v1297_v43  ;;  %v8631_v53 = vpop.permute.xlu1 %357 }
  0xf4   :  { %14549 = vst [vmem:[#allocation18_spill] sm:$0xff] %v8602_v56  ;;  %v589_v4 = vpop.f32.mrf.mxu0  ;;  %v8613_v5 = vmax.f32 %v837_v39, 0.0  ;;  %v843_v17 = vadd.f32 %v842_v60, %v8482_v15  ;;  %v846_v24 = vpop.f32.mrf.mxu1  ;;  %v1144_v26 = vadd.f32 %v1143_v62, %v8573_v21  ;;  %v1304_v29 = vmul.f32 %v8596_v51, %v8596_v51 }
  0xf5   :  { %14550 = vst [vmem:[#allocation19_spill] sm:$0xff] %v8609_v1  ;;  %v590_v23 = vadd.f32 %v589_v4, %v8484_v16  ;;  %v8622_v31 = vmax.f32 %v841_v52, 0.0  ;;  %v8624_v19 = vmax.f32 %v586_v59, 0.0  ;;  %v1428_v38 = vadd.f32 %v1427_v2, %v1298_v57 }
  0xf6   :  { %14551 = vst [vmem:[#allocation20_spill] sm:$0xff] %v8613_v5  ;;  %v591_v40 = vpop.f32.mrf.mxu0  ;;  %v847_v39 = vadd.f32 %v846_v24, %v8484_v16  ;;  %v1145_v15 = vadd.f32 %v1144_v26, %v8585_v35  ;;  %v848_v42 = vpop.f32.mrf.mxu1  ;;  %v1301_v43 = vmul.f32 %v8573_v21, %v8573_v21  ;;  %v1307_v52 = vmul.f32 %v8609_v1, %v8609_v1 }
  0xf7   :  { %14552 = vst [vmem:[#allocation21_spill] sm:$0xff] %v8622_v31  ;;  %14553 = vst [vmem:[#allocation22_spill] sm:$0xff] %v8624_v19  ;;  %v592_v41 = vadd.f32 %v591_v40, %v8484_v16  ;;  %1429 = vadd.xlane.f32.xlu1 %v1428_v38  ;;  %v8635_v20 = vmax.f32 %v590_v23, 0.0  ;;  %v1431_v55 = vadd.f32 %v1300_v18, %v1299_v32  ;;  %v8639_v62 = vmax.f32 %v843_v17, 0.0  ;;  %v8667_v44 = vpop.permute.xlu1 %347 }
  0xf8   :  { %v595_v59 = vpop.f32.mrf.mxu0  ;;  %v1148_v60 = vadd.f32 %v8596_v51, %v8587_v37  ;;  %1146 = vadd.xlane.f32.xlu0 %v1145_v15  ;;  %v849_v57 = vadd.f32 %v848_v42, %v8484_v16  ;;  %v1302_v2 = vmul.f32 %v8585_v35, %v8585_v35  ;;  %v852_v24 = vpop.f32.mrf.mxu1  ;;  %v1308_v23 = vmul.f32 %v8624_v19, %v8624_v19 }
  0xf9   :  { %14554 = vst [vmem:[#allocation23_spill] sm:$0xff] %v8635_v20  ;;  %14555 = vst [vmem:[#allocation24_spill] sm:$0xff] %v8639_v62  ;;  %v596_v4 = vadd.f32 %v595_v59, %v8478_v13  ;;  %v8647_v26 = vmax.f32 %v592_v41, 0.0  ;;  %v1432_v32 = vadd.f32 %v1431_v55, %v1301_v43  ;;  %v8650_v17 = vmax.f32 %v847_v39, 0.0  ;;  %v8656_v59 = vpop.permute.xlu0 %362 }
  0xfa   :  { %v1149_v18 = vadd.f32 %v1148_v60, %v8602_v56  ;;  %v597_v38 = vpop.f32.mrf.mxu0  ;;  %v853_v16 = vadd.f32 %v852_v24, %v8478_v13  ;;  %v854_v42 = vpop.f32.mrf.mxu1  ;;  %v1311_v7 = vmul.f32 %v8635_v20, %v8635_v20  ;;  %v1305_v55 = vmul.f32 %v8602_v56, %v8602_v56 }
  0xfb   :  { %14556 = vst [vmem:[#allocation25_spill] sm:$0xff] %v8647_v26  ;;  %14557 = vst [vmem:[#allocation26_spill] sm:$0xff] %v8650_v17  ;;  %v8652_v40 = vmax.f32 %v596_v4, 0.0  ;;  %v598_v15 = vadd.f32 %v597_v38, %v8478_v13  ;;  %v1433_v41 = vadd.f32 %v1432_v32, %v1302_v2  ;;  %v8663_v60 = vmax.f32 %v849_v57, 0.0 }
  0xfc   :  { %v1150_v43 = vadd.f32 %v1149_v18, %v8613_v5  ;;  %v601_v39 = vpop.f32.mrf.mxu0  ;;  %v855_v4 = vadd.f32 %v854_v42, %v8478_v13  ;;  %v1436_v24 = vadd.f32 %v1304_v29, %v1303_v0  ;;  %v858_v36 = vpop.f32.mrf.mxu1  ;;  %v1312_v48 = vmul.f32 %v8647_v26, %v8647_v26 }
  0xfd   :  { %14558 = vst [vmem:[#allocation27_spill] sm:$0xff] %v8652_v40  ;;  %14559 = vst [vmem:[#allocation28_spill] sm:$0xff] %v8663_v60  ;;  %v602_v38 = vadd.f32 %v601_v39, %v8480_v14  ;;  %1434 = vadd.xlane.f32.xlu1 %v1433_v41  ;;  %v8671_v2 = vmax.f32 %v598_v15, 0.0  ;;  %v1306_v32 = vmul.f32 %v8613_v5, %v8613_v5  ;;  %v8681_v29 = vmax.f32 %v853_v16, 0.0 }
  0xfe   :  { %1151 = vadd.xlane.f32.xlu0 %v1150_v43  ;;  %v1153_v57 = vadd.f32 %v8624_v19, %v8609_v1  ;;  %v603_v13 = vpop.f32.mrf.mxu0  ;;  %v8679_v0 = vmul.f32 %v8652_v40, %v8652_v40  ;;  %v1437_v18 = vadd.f32 %v1436_v24, %v1305_v55  ;;  %v860_v41 = vpop.f32.mrf.mxu1  ;;  %v859_v15 = vadd.f32 %v858_v36, %v8480_v14 }
  0xff   :  { %14560 = vst [vmem:[#allocation29_spill] sm:$0xff] %v8671_v2  ;;  %14561 = vst [vmem:[#allocation30_spill] sm:$0xff] %v8681_v29  ;;  %v604_v42 = vadd.f32 %v603_v13, %v8480_v14  ;;  %v8684_v43 = vmax.f32 %v602_v38, 0.0  ;;  %v861_v61 = vadd.f32 %v860_v41, %v8480_v14  ;;  %v8689_v45 = vmax.f32 %v855_v4, 0.0  ;;  %v8693_v24 = vpop.permute.xlu0 %352  ;;  %v8706_v41 = vpop.permute.xlu1 %337 }
 0x100   :  { %v1154_v39 = vadd.f32 %v1153_v57, %v8622_v31  ;;  %v607_v27 = vpop.f32.mrf.mxu0  ;;  %v1438_v54 = vadd.f32 %v1437_v18, %v1306_v32  ;;  %v1309_v16 = vmul.f32 %v8622_v31, %v8622_v31  ;;  %v1441_v63 = vadd.f32 %v1308_v23, %v1307_v52  ;;  %v864_v55 = vpop.f32.mrf.mxu1 }
 0x101   :  { %14562 = vst [vmem:[#allocation31_spill] sm:$0xff] %v8684_v43  ;;  %14563 = vst [vmem:[#allocation32_spill] sm:$0xff] %v8689_v45  ;;  %v1316_v38 = vmul.f32 %v8671_v2, %v8671_v2  ;;  %v1310_v57 = vmul.f32 %v8639_v62, %v8639_v62  ;;  %v608_v14 = vadd.f32 %v607_v27, %v8474_v11  ;;  %v8701_v32 = vmax.f32 %v604_v42, 0.0 }
 0x102   :  { %v1155_v36 = vadd.f32 %v1154_v39, %v8639_v62  ;;  %v609_v4 = vpop.f32.mrf.mxu0  ;;  %1439 = vadd.xlane.f32.xlu1 %v1438_v54  ;;  %v1442_v13 = vadd.f32 %v1441_v63, %v1309_v16  ;;  %v1158_v52 = vadd.f32 %v8647_v26, %v8635_v20  ;;  %v866_v18 = vpop.f32.mrf.mxu1  ;;  %v8710_v39 = vmul.f32 %v8684_v43, %v8684_v43 }
 0x103   :  { %14564 = vst [vmem:[#allocation33_spill] sm:$0xff] %v8701_v32  ;;  %v610_v23 = vadd.f32 %v609_v4, %v8474_v11  ;;  %v8712_v21 = vmax.f32 %v859_v15, 0.0  ;;  %v8714_v27 = vmax.f32 %v861_v61, 0.0  ;;  %v865_v54 = vadd.f32 %v864_v55, %v8474_v11 }
 0x104   :  { %1156 = vadd.xlane.f32.xlu0 %v1155_v36  ;;  %v613_v63 = vpop.f32.mrf.mxu0  ;;  %v1443_v42 = vadd.f32 %v1442_v13, %v1310_v57  ;;  %v8717_v16 = vmax.f32 %v608_v14, 0.0  ;;  %v1159_v4 = vadd.f32 %v1158_v52, %v8650_v17  ;;  %v867_v35 = vadd.f32 %v866_v18, %v8474_v11  ;;  %v870_v56 = vpop.f32.mrf.mxu1 }
 0x105   :  { %14565 = vst [vmem:[#allocation34_spill] sm:$0xff] %v8712_v21  ;;  %14566 = vst [vmem:[#allocation35_spill] sm:$0xff] %v8714_v27  ;;  %v8721_v5 = vmax.f32 %v610_v23, 0.0  ;;  %v1313_v15 = vmul.f32 %v8650_v17, %v8650_v17  ;;  %v1446_v31 = vadd.f32 %v1312_v48, %v1311_v7  ;;  %v614_v61 = vadd.f32 %v613_v63, %v8476_v12  ;;  %v8732_v52 = vpop.permute.xlu0 %342  ;;  %v8747_v17 = vpop.permute.xlu1 %327 }
 0x106   :  { %14567 = vst [vmem:[#allocation36_spill] sm:$0xff] %v8717_v16  ;;  %v615_v36 = vpop.f32.mrf.mxu0  ;;  %v1320_v55 = vmul.f32 %v8701_v32, %v8701_v32  ;;  %1444 = vadd.xlane.f32.xlu1 %v1443_v42  ;;  %v1160_v57 = vadd.f32 %v1159_v4, %v8663_v60  ;;  %v871_v14 = vadd.f32 %v870_v56, %v8476_v12  ;;  %v872_v13 = vpop.f32.mrf.mxu1  ;;  %v8734_v23 = vmax.f32 %v865_v54, 0.0 }
 0x107   :  { %14568 = vst [vmem:[#allocation37_spill] sm:$0xff] %v8721_v5  ;;  %v1163_v11 = vadd.f32 %v8671_v2, %v8652_v40  ;;  %v1314_v7 = vmul.f32 %v8663_v60, %v8663_v60  ;;  %v1447_v48 = vadd.f32 %v1446_v31, %v1313_v15  ;;  %v616_v18 = vadd.f32 %v615_v36, %v8476_v12 }
 0x108   :  { %14569 = vst [vmem:[#allocation38_spill] sm:$0xff] %v8734_v23  ;;  %v619_v63 = vpop.f32.mrf.mxu0  ;;  %v8741_v42 = vmul.f32 %v8717_v16, %v8717_v16  ;;  %1161 = vadd.xlane.f32.xlu0 %v1160_v57  ;;  %v8743_v56 = vmax.f32 %v614_v61, 0.0  ;;  %v873_v62 = vadd.f32 %v872_v13, %v8476_v12  ;;  %v876_v54 = vpop.f32.mrf.mxu1  ;;  %v1324_v31 = vmul.f32 %v8721_v5, %v8721_v5 }
 0x109   :  { %v1164_v4 = vadd.f32 %v1163_v11, %v8681_v29  ;;  %v8751_v15 = vmax.f32 %v867_v35, 0.0  ;;  %v1448_v36 = vadd.f32 %v1447_v48, %v1314_v7  ;;  %v8753_v60 = vmax.f32 %v871_v14, 0.0 }
 0x10a   :  { %14570 = vst [vmem:[#allocation39_spill] sm:$0xff] %v8743_v56  ;;  %v621_v2 = vpop.f32.mrf.mxu0  ;;  %v1317_v61 = vmul.f32 %v8681_v29, %v8681_v29  ;;  %v1451_v11 = vadd.f32 %v1316_v38, %v8679_v0  ;;  %v620_v12 = vadd.f32 %v619_v63, %v8470_v9  ;;  %v878_v13 = vpop.f32.mrf.mxu1  ;;  %v8760_v40 = vmax.f32 %v616_v18, 0.0 }
 0x10b   :  { %14571 = vst [vmem:[#allocation40_spill] sm:$0xff] %v8751_v15  ;;  %14572 = vst [vmem:[#allocation41_spill] sm:$0xff] %v8753_v60  ;;  %v1165_v57 = vadd.f32 %v1164_v4, %v8689_v45  ;;  %1449 = vadd.xlane.f32.xlu1 %v1448_v36  ;;  %v1318_v35 = vmul.f32 %v8689_v45, %v8689_v45  ;;  %v1168_v14 = vadd.f32 %v8701_v32, %v8684_v43  ;;  %v8774_v36 = vpop.permute.xlu0 %332 }
 0x10c   :  { %14573 = vst [vmem:[#allocation42_spill] sm:$0xff] %v8760_v40  ;;  %v622_v7 = vadd.f32 %v621_v2, %v8470_v9  ;;  %v625_v48 = vpop.f32.mrf.mxu0  ;;  %v8769_v4 = vmul.f32 %v8743_v56, %v8743_v56  ;;  %v8771_v0 = vmax.f32 %v873_v62, 0.0  ;;  %v1452_v38 = vadd.f32 %v1451_v11, %v1317_v61  ;;  %v882_v63 = vpop.f32.mrf.mxu1 }
 0x10d   :  { %1166 = vadd.xlane.f32.xlu0 %v1165_v57  ;;  %v877_v18 = vadd.f32 %v876_v54, %v8470_v9  ;;  %v8776_v29 = vmax.f32 %v620_v12, 0.0  ;;  %v1169_v45 = vadd.f32 %v1168_v14, %v8712_v21  ;;  %v879_v2 = vadd.f32 %v878_v13, %v8470_v9  ;;  %v8786_v11 = vpop.permute.xlu1 %317 }
 0x10e   :  { %14574 = vst [vmem:[#allocation43_spill] sm:$0xff] %v8771_v0  ;;  %v1321_v32 = vmul.f32 %v8712_v21, %v8712_v21  ;;  %v627_v43 = vpop.f32.mrf.mxu0  ;;  %v1453_v19 = vadd.f32 %v1452_v38, %v1318_v35  ;;  %v8782_v57 = vmax.f32 %v622_v7, 0.0  ;;  %v1456_v62 = vadd.f32 %v1320_v55, %v8710_v39  ;;  %v884_v61 = vpop.f32.mrf.mxu1 }
 0x10f   :  { %14575 = vst [vmem:[#allocation44_spill] sm:$0xff] %v8776_v29  ;;  %v626_v54 = vadd.f32 %v625_v48, %v8466_v6  ;;  %v1328_v12 = vmul.f32 %v8760_v40, %v8760_v40  ;;  %v1170_v14 = vadd.f32 %v1169_v45, %v8714_v27  ;;  %v883_v9 = vadd.f32 %v882_v63, %v8466_v6 }
 0x110   :  { %14576 = vst [vmem:[#allocation45_spill] sm:$0xff] %v8782_v57  ;;  %v1173_v13 = vadd.f32 %v8721_v5, %v8717_v16  ;;  %v631_v35 = vpop.f32.mrf.mxu0  ;;  %1454 = vadd.xlane.f32.xlu1 %v1453_v19  ;;  %v8794_v7 = vmax.f32 %v877_v18, 0.0  ;;  %v1322_v39 = vmul.f32 %v8714_v27, %v8714_v27  ;;  %v1457_v55 = vadd.f32 %v1456_v62, %v1321_v32  ;;  %v888_v38 = vpop.f32.mrf.mxu1 }
 0x111   :  { %v628_v48 = vadd.f32 %v627_v43, %v8466_v6  ;;  %1171 = vadd.xlane.f32.xlu0 %v1170_v14  ;;  %v8799_v21 = vmax.f32 %v879_v2, 0.0  ;;  %v8801_v45 = vmax.f32 %v626_v54, 0.0  ;;  %v885_v5 = vadd.f32 %v884_v61, %v8466_v6  ;;  %v8811_v14 = vpop.permute.xlu0 %322  ;;  %v8825_v26 = vpop.permute.xlu1 %307 }
 0x112   :  { %14577 = vst [vmem:[#allocation46_spill] sm:$0xff] %v8794_v7  ;;  %v1174_v63 = vadd.f32 %v1173_v13, %v8734_v23  ;;  %v633_v16 = vpop.f32.mrf.mxu0  ;;  %v1331_v19 = vmul.f32 %v8776_v29, %v8776_v29  ;;  %v1332_v18 = vmul.f32 %v8782_v57, %v8782_v57  ;;  %v1458_v32 = vadd.f32 %v1457_v55, %v1322_v39  ;;  %v890_v43 = vpop.f32.mrf.mxu1 }
 0x113   :  { %14578 = vst [vmem:[#allocation47_spill] sm:$0xff] %v8799_v21  ;;  %14579 = vst [vmem:[#allocation48_spill] sm:$0xff] %v8801_v45  ;;  %v8809_v62 = vmax.f32 %v883_v9, 0.0  ;;  %v1325_v54 = vmul.f32 %v8734_v23, %v8734_v23  ;;  %v1461_v6 = vadd.f32 %v1324_v31, %v8741_v42  ;;  %v632_v61 = vadd.f32 %v631_v35, %v8472_v10 }
 0x114   :  { %v1175_v2 = vadd.f32 %v1174_v63, %v8751_v15  ;;  %v637_v13 = vpop.f32.mrf.mxu0  ;;  %1459 = vadd.xlane.f32.xlu1 %v1458_v32  ;;  %v8818_v27 = vmax.f32 %v628_v48, 0.0  ;;  %v1326_v9 = vmul.f32 %v8751_v15, %v8751_v15  ;;  %v1178_v39 = vadd.f32 %v8760_v40, %v8743_v56  ;;  %v894_v63 = vpop.f32.mrf.mxu1 }
 0x115   :  { %14580 = vst [vmem:[#allocation49_spill] sm:$0xff] %v8809_v62  ;;  %v634_v55 = vadd.f32 %v633_v16, %v8472_v10  ;;  %v8829_v42 = vmul.f32 %v8801_v45, %v8801_v45  ;;  %v8831_v31 = vmax.f32 %v885_v5, 0.0  ;;  %v1462_v35 = vadd.f32 %v1461_v6, %v1325_v54 }
 0x116   :  { %14581 = vst [vmem:[#allocation50_spill] sm:$0xff] %v8818_v27  ;;  %1176 = vadd.xlane.f32.xlu0 %v1175_v2  ;;  %v889_v48 = vadd.f32 %v888_v38, %v8472_v10  ;;  %v639_v32 = vpop.f32.mrf.mxu0  ;;  %v8834_v23 = vmax.f32 %v632_v61, 0.0  ;;  %v1179_v15 = vadd.f32 %v1178_v39, %v8753_v60  ;;  %v891_v16 = vadd.f32 %v890_v43, %v8472_v10  ;;  %v896_v40 = vpop.f32.mrf.mxu1 }
 0x117   :  { %14582 = vst [vmem:[#allocation51_spill] sm:$0xff] %v8831_v31  ;;  %v1329_v56 = vmul.f32 %v8753_v60, %v8753_v60  ;;  %v1463_v20 = vadd.f32 %v1462_v35, %v1326_v9  ;;  %v8840_v1 = vmax.f32 %v634_v55, 0.0  ;;  %v1466_v5 = vadd.f32 %v1328_v12, %v8769_v4  ;;  %v8850_v39 = vpop.permute.xlu0 %312 }
 0x118   :  { %14583 = vst [vmem:[#allocation52_spill] sm:$0xff] %v8834_v23  ;;  %v638_v2 = vadd.f32 %v637_v13, %v8468_v8  ;;  %v643_v54 = vpop.f32.mrf.mxu0  ;;  %v1336_v38 = vmul.f32 %v8818_v27, %v8818_v27  ;;  %v1180_v6 = vadd.f32 %v1179_v15, %v8771_v0  ;;  %v895_v61 = vadd.f32 %v894_v63, %v8468_v8  ;;  %v900_v43 = vpop.f32.mrf.mxu1 }
 0x119   :  { %14584 = vst [vmem:[#allocation53_spill] sm:$0xff] %v8840_v1  ;;  %v1183_v10 = vadd.f32 %v8782_v57, %v8776_v29  ;;  %1464 = vadd.xlane.f32.xlu1 %v1463_v20  ;;  %v8852_v9 = vmax.f32 %v889_v48, 0.0  ;;  %v1330_v4 = vmul.f32 %v8771_v0, %v8771_v0  ;;  %v1467_v12 = vadd.f32 %v1466_v5, %v1329_v56  ;;  %v298_v20 = vpop.permute.xlu1 %297 }
 0x11a   :  { %v8856_v13 = vmax.f32 %v638_v2, 0.0  ;;  %v645_v55 = vpop.f32.mrf.mxu0  ;;  %1181 = vadd.xlane.f32.xlu0 %v1180_v6  ;;  %v8858_v15 = vmax.f32 %v891_v16, 0.0  ;;  %v640_v35 = vadd.f32 %v639_v32, %v8468_v8  ;;  %v897_v60 = vadd.f32 %v896_v40, %v8468_v8  ;;  %v902_v57 = vpop.f32.mrf.mxu1 }
 0x11b   :  { %14585 = vst [vmem:[#allocation54_spill] sm:$0xff] %v8852_v9  ;;  %v1184_v63 = vadd.f32 %v1183_v10, %v8794_v7  ;;  %v8865_v48 = vmul.f32 %v8834_v23, %v8834_v23  ;;  %v8869_v56 = vmul.f32 %v8840_v1, %v8840_v1  ;;  %v1468_v5 = vadd.f32 %v1467_v12, %v1330_v4 }
 0x11c   :  { %14586 = vst [vmem:[#allocation55_spill] sm:$0xff] %v8856_v13  ;;  %14587 = vst [vmem:[#allocation56_spill] sm:$0xff] %v8858_v15  ;;  %v8871_v2 = vmax.f32 %v895_v61, 0.0  ;;  %v649_v16 = vpop.f32.mrf.mxu0  ;;  %v1333_v32 = vmul.f32 %v8794_v7, %v8794_v7  ;;  %v1471_v8 = vadd.f32 %v1332_v18, %v1331_v19  ;;  %v644_v40 = vadd.f32 %v643_v54, %v298_v20  ;;  %v906_v10 = vpop.f32.mrf.mxu1 }
 0x11d   :  { %v1185_v6 = vadd.f32 %v1184_v63, %v8799_v21  ;;  %1469 = vadd.xlane.f32.xlu1 %v1468_v5  ;;  %v8878_v0 = vmul.f32 %v8856_v13, %v8856_v13  ;;  %v1334_v29 = vmul.f32 %v8799_v21, %v8799_v21  ;;  %v1188_v61 = vadd.f32 %v8818_v27, %v8801_v45  ;;  %v303_v5 = vpop.permute.xlu0 %302 }
 0x11e   :  { %14588 = vst [vmem:[#allocation57_spill] sm:$0xff] %v8871_v2  ;;  %v646_v4 = vadd.f32 %v645_v55, %v298_v20  ;;  %v651_v12 = vpop.f32.mrf.mxu0  ;;  %v8884_v63 = vmax.f32 %v640_v35, 0.0  ;;  %v8886_v7 = vmax.f32 %v897_v60, 0.0  ;;  %v1472_v19 = vadd.f32 %v1471_v8, %v1333_v32  ;;  %v908_v54 = vpop.f32.mrf.mxu1 }
 0x11f   :  { %1186 = vadd.xlane.f32.xlu0 %v1185_v6  ;;  %v901_v18 = vadd.f32 %v900_v43, %v298_v20  ;;  %v8888_v25 = vmax.f32 %v644_v40, 0.0  ;;  %v1189_v51 = vadd.f32 %v1188_v61, %v8809_v62  ;;  %v903_v37 = vadd.f32 %v902_v57, %v298_v20 }
 0x120   :  { %14589 = vst [vmem:[#allocation58_spill] sm:$0xff] %v8884_v63  ;;  %14590 = vst [vmem:[#allocation59_spill] sm:$0xff] %v8886_v7  ;;  %v1337_v21 = vmul.f32 %v8809_v62, %v8809_v62  ;;  %v655_v45 = vpop.f32.mrf.mxu0  ;;  %v1473_v55 = vadd.f32 %v1472_v19, %v1334_v29  ;;  %v8893_v27 = vmax.f32 %v646_v4, 0.0  ;;  %v1476_v35 = vadd.f32 %v1336_v38, %v8829_v42  ;;  %v912_v6 = vpop.f32.mrf.mxu1 }
 0x121   :  { %14591 = vst [vmem:[#allocation60_spill] sm:$0xff] %v8888_v25  ;;  %v650_v60 = vadd.f32 %v649_v16, %v303_v5  ;;  %v1190_v43 = vadd.f32 %v1189_v51, %v8831_v31  ;;  %v1338_v32 = vmul.f32 %v8831_v31, %v8831_v31  ;;  %v907_v8 = vadd.f32 %v906_v10, %v303_v5 }
 0x122   :  { %14592 = vst [vmem:[#allocation61_spill] sm:$0xff] %v8893_v27  ;;  %v652_v40 = vadd.f32 %v651_v12, %v303_v5  ;;  %v657_v61 = vpop.f32.mrf.mxu0  ;;  %1474 = vadd.xlane.f32.xlu1 %v1473_v55  ;;  %v1477_v57 = vadd.f32 %v1476_v35, %v1337_v21  ;;  %v909_v62 = vadd.f32 %v908_v54, %v303_v5  ;;  %v914_v4 = vpop.f32.mrf.mxu1  ;;  %v8905_v38 = vmax.f32 %v901_v18, 0.0 }
 0x123   :  { %v8899_v20 = vmax.f32 %v650_v60, 0.0  ;;  %v1193_v29 = vadd.f32 %v8840_v1, %v8834_v23  ;;  %v1344_v42 = vmul.f32 %v8884_v63, %v8884_v63  ;;  %1191 = vadd.xlane.f32.xlu0 %v1190_v43  ;;  %v656_v16 = vadd.f32 %v655_v45, %v8825_v26 }
 0x124   :  { %14594 = vst [vmem:[#allocation63_spill] sm:$0xff] %v8905_v38  ;;  %v8907_v51 = vmax.f32 %v652_v40, 0.0  ;;  %v661_v10 = vpop.f32.mrf.mxu0  ;;  %v8910_v12 = vmax.f32 %v903_v37, 0.0  ;;  %v1478_v21 = vadd.f32 %v1477_v57, %v1338_v32  ;;  %v913_v54 = vadd.f32 %v912_v6, %v8825_v26  ;;  %v918_v5 = vpop.f32.mrf.mxu1 }
 0x125   :  { %14593 = vst [vmem:[#allocation62_spill] sm:$0xff] %v8899_v20  ;;  %v1194_v19 = vadd.f32 %v1193_v29, %v8852_v9  ;;  %v8916_v55 = vmul.f32 %v8888_v25, %v8888_v25  ;;  %v8920_v18 = vmul.f32 %v8893_v27, %v8893_v27  ;;  %v8922_v35 = vmax.f32 %v907_v8, 0.0 }
 0x126   :  { %14595 = vst [vmem:[#allocation64_spill] sm:$0xff] %v8907_v51  ;;  %14596 = vst [vmem:[#allocation65_spill] sm:$0xff] %v8910_v12  ;;  %v1198_v37 = vadd.f32 %v8884_v63, %v8856_v13  ;;  %v663_v45 = vpop.f32.mrf.mxu0  ;;  %1479 = vadd.xlane.f32.xlu1 %v1478_v21  ;;  %v1351_v60 = vmul.f32 %v8899_v20, %v8899_v20  ;;  %v1352_v6 = vmul.f32 %v8907_v51, %v8907_v51  ;;  %v920_v40 = vpop.f32.mrf.mxu1 }
 0x127   :  { %14597 = vst [vmem:[#allocation66_spill] sm:$0xff] %v8922_v35  ;;  %v8930_v43 = vmax.f32 %v909_v62, 0.0  ;;  %v658_v32 = vadd.f32 %v657_v61, %v8825_v26  ;;  %v8933_v57 = vmax.f32 %v656_v16, 0.0  ;;  %v1341_v29 = vmul.f32 %v8852_v9, %v8852_v9 }
 0x128   :  { %v1199_v8 = vadd.f32 %v1198_v37, %v8871_v2  ;;  %v1481_v21 = vadd.f32 %v8869_v56, %v8865_v48  ;;  %v667_v31 = vpop.f32.mrf.mxu0  ;;  %v1195_v1 = vadd.f32 %v1194_v19, %v8858_v15  ;;  %v8941_v23 = vmax.f32 %v913_v54, 0.0  ;;  %v924_v63 = vpop.f32.mrf.mxu1 }
 0x129   :  { %14598 = vst [vmem:[#allocation67_spill] sm:$0xff] %v8930_v43  ;;  %14599 = vst [vmem:[#allocation68_spill] sm:$0xff] %v8933_v57  ;;  %v915_v62 = vadd.f32 %v914_v4, %v8825_v26  ;;  %v662_v61 = vadd.f32 %v661_v10, %v8850_v39  ;;  %v8946_v13 = vmax.f32 %v658_v32, 0.0  ;;  %v1342_v37 = vmul.f32 %v8858_v15, %v8858_v15 }
 0x12a   :  { %14600 = vst [vmem:[#allocation69_spill] sm:$0xff] %v8941_v23  ;;  %v1200_v16 = vadd.f32 %v1199_v8, %v8886_v7  ;;  %v1482_v9 = vadd.f32 %v1481_v21, %v1341_v29  ;;  %v669_v3 = vpop.f32.mrf.mxu0  ;;  %1196 = vadd.xlane.f32.xlu1 %v1195_v1  ;;  %v919_v48 = vadd.f32 %v918_v5, %v8850_v39  ;;  %v926_v10 = vpop.f32.mrf.mxu1 }
 0x12b   :  { %14601 = vst [vmem:[#allocation70_spill] sm:$0xff] %v8946_v13  ;;  %v1345_v56 = vmul.f32 %v8871_v2, %v8871_v2  ;;  %v1346_v26 = vmul.f32 %v8886_v7, %v8886_v7  ;;  %v1486_v4 = vadd.f32 %v1344_v42, %v8878_v0  ;;  %v8956_v19 = vmax.f32 %v662_v61, 0.0 }
 0x12c   :  { %1201 = vadd.xlane.f32.xlu0 %v1200_v16  ;;  %v664_v54 = vadd.f32 %v663_v45, %v8850_v39  ;;  %v921_v32 = vadd.f32 %v920_v40, %v8850_v39  ;;  %v668_v1 = vadd.f32 %v667_v31, %v8786_v11  ;;  %v673_v8 = vpop.f32.mrf.mxu0  ;;  %v1483_v5 = vadd.f32 %v1482_v9, %v1342_v37  ;;  %v930_v2 = vpop.f32.mrf.mxu1 }
 0x12d   :  { %14602 = vst [vmem:[#allocation71_spill] sm:$0xff] %v8956_v19  ;;  %v1487_v29 = vadd.f32 %v1486_v4, %v1345_v56  ;;  %v925_v21 = vadd.f32 %v924_v63, %v8786_v11  ;;  %v1203_v15 = vadd.f32 %v8893_v27, %v8888_v25  ;;  %v1355_v0 = vmul.f32 %v8933_v57, %v8933_v57 }
 0x12e   :  { %v8966_v42 = vmax.f32 %v915_v62, 0.0  ;;  %v8968_v61 = vmax.f32 %v664_v54, 0.0  ;;  %v670_v39 = vadd.f32 %v669_v3, %v8786_v11  ;;  %v675_v45 = vpop.f32.mrf.mxu0  ;;  %v1356_v31 = vmul.f32 %v8946_v13, %v8946_v13  ;;  %1484 = vadd.xlane.f32.xlu1 %v1483_v5  ;;  %v932_v16 = vpop.f32.mrf.mxu1 }
 0x12f   :  { %v8973_v9 = vmax.f32 %v919_v48, 0.0  ;;  %v1488_v63 = vadd.f32 %v1487_v29, %v1346_v26  ;;  %v1204_v40 = vadd.f32 %v1203_v15, %v8905_v38  ;;  %v1359_v37 = vmul.f32 %v8956_v19, %v8956_v19 }
 0x130   :  { %14603 = vst [vmem:[#allocation72_spill] sm:$0xff] %v8966_v42  ;;  %14604 = vst [vmem:[#allocation73_spill] sm:$0xff] %v8968_v61  ;;  %v8978_v62 = vmax.f32 %v921_v32, 0.0  ;;  %v8980_v56 = vmax.f32 %v668_v1, 0.0  ;;  %v927_v3 = vadd.f32 %v926_v10, %v8786_v11  ;;  %v679_v4 = vpop.f32.mrf.mxu0  ;;  %v1360_v54 = vmul.f32 %v8968_v61, %v8968_v61  ;;  %v936_v5 = vpop.f32.mrf.mxu1 }
 0x131   :  { %14605 = vst [vmem:[#allocation74_spill] sm:$0xff] %v8973_v9  ;;  %1489 = vadd.xlane.f32.xlu0 %v1488_v63  ;;  %v8985_v48 = vmax.f32 %v925_v21, 0.0  ;;  %v1353_v15 = vmul.f32 %v8922_v35, %v8922_v35  ;;  %v1496_v26 = vadd.f32 %v1352_v6, %v1351_v60  ;;  %v1205_v29 = vadd.f32 %v1204_v40, %v8910_v12 }
 0x132   :  { %14606 = vst [vmem:[#allocation75_spill] sm:$0xff] %v8978_v62  ;;  %14607 = vst [vmem:[#allocation76_spill] sm:$0xff] %v8980_v56  ;;  %v8990_v32 = vmax.f32 %v670_v39, 0.0  ;;  %v1354_v1 = vmul.f32 %v8930_v43, %v8930_v43  ;;  %v674_v11 = vadd.f32 %v673_v8, %v8811_v14  ;;  %v681_v10 = vpop.f32.mrf.mxu0  ;;  %v1349_v21 = vmul.f32 %v8905_v38, %v8905_v38  ;;  %v938_v6 = vpop.f32.mrf.mxu1 }
 0x133   :  { %14608 = vst [vmem:[#allocation77_spill] sm:$0xff] %v8985_v48  ;;  %v1497_v63 = vadd.f32 %v1496_v26, %v1353_v15  ;;  %v1491_v25 = vadd.f32 %v8920_v18, %v8916_v55  ;;  %v676_v60 = vadd.f32 %v675_v45, %v8811_v14  ;;  %v1363_v39 = vmul.f32 %v8980_v56, %v8980_v56 }
 0x134   :  { %14609 = vst [vmem:[#allocation78_spill] sm:$0xff] %v8990_v32  ;;  %v9002_v40 = vmax.f32 %v927_v3, 0.0  ;;  %v931_v27 = vadd.f32 %v930_v2, %v8811_v14  ;;  %v1350_v8 = vmul.f32 %v8910_v12, %v8910_v12  ;;  %v685_v15 = vpop.f32.mrf.mxu0  ;;  %v9007_v38 = vmax.f32 %v674_v11, 0.0  ;;  %v942_v18 = vpop.f32.mrf.mxu1 }
 0x135   :  { %1206 = vadd.xlane.f32.xlu0 %v1205_v29  ;;  %v1498_v26 = vadd.f32 %v1497_v63, %v1354_v1  ;;  %v1492_v7 = vadd.f32 %v1491_v25, %v1349_v21  ;;  %v933_v55 = vadd.f32 %v932_v16, %v8811_v14  ;;  %v9010_v45 = vmax.f32 %v676_v60, 0.0 }
 0x136   :  { %14610 = vst [vmem:[#allocation79_spill] sm:$0xff] %v9002_v40  ;;  %14611 = vst [vmem:[#allocation80_spill] sm:$0xff] %v9007_v38  ;;  %v1357_v3 = vmul.f32 %v8941_v23, %v8941_v23  ;;  %v1501_v46 = vadd.f32 %v1356_v31, %v1355_v0  ;;  %v680_v2 = vadd.f32 %v679_v4, %v8747_v17  ;;  %v687_v58 = vpop.f32.mrf.mxu0  ;;  %v944_v14 = vpop.f32.mrf.mxu1  ;;  %v9020_v16 = vmax.f32 %v931_v27, 0.0 }
 0x137   :  { %14612 = vst [vmem:[#allocation81_spill] sm:$0xff] %v9010_v45  ;;  %v1364_v12 = vmul.f32 %v8990_v32, %v8990_v32  ;;  %1499 = vadd.xlane.f32.xlu1 %v1498_v26  ;;  %v1493_v29 = vadd.f32 %v1492_v7, %v1350_v8  ;;  %v937_v1 = vadd.f32 %v936_v5, %v8747_v17  ;;  %v9033_v8 = vmax.f32 %v933_v55, 0.0 }
 0x138   :  { %v1208_v25 = vadd.f32 %v8907_v51, %v8899_v20  ;;  %14613 = vst [vmem:[#allocation82_spill] sm:$0xff] %v9020_v16  ;;  %v1358_v11 = vmul.f32 %v8966_v42, %v8966_v42  ;;  %v1502_v0 = vadd.f32 %v1501_v46, %v1357_v3  ;;  %v682_v31 = vadd.f32 %v681_v10, %v8747_v17  ;;  %v691_v4 = vpop.f32.mrf.mxu0  ;;  %v948_v60 = vpop.f32.mrf.mxu1 }
 0x139   :  { %v1367_v63 = vmul.f32 %v9007_v38, %v9007_v38  ;;  %1494 = vadd.xlane.f32.xlu0 %v1493_v29  ;;  %v9027_v7 = vmax.f32 %v680_v2, 0.0  ;;  %v939_v21 = vadd.f32 %v938_v6, %v8747_v17  ;;  %v1368_v27 = vmul.f32 %v9010_v45, %v9010_v45  ;;  %14615 = vst [vmem:[#allocation84_spill] sm:$0xff] %v9033_v8 }
 0x13a   :  { %v1209_v5 = vadd.f32 %v1208_v25, %v8922_v35  ;;  %v1503_v46 = vadd.f32 %v1502_v0, %v1358_v11  ;;  %v9035_v26 = vmax.f32 %v937_v1, 0.0  ;;  %v693_v10 = vpop.f32.mrf.mxu0  ;;  %v1361_v2 = vmul.f32 %v8973_v9, %v8973_v9  ;;  %v950_v51 = vpop.f32.mrf.mxu1 }
 0x13b   :  { %14614 = vst [vmem:[#allocation83_spill] sm:$0xff] %v9027_v7  ;;  %v1506_v29 = vadd.f32 %v1360_v54, %v1359_v37  ;;  %v686_v25 = vadd.f32 %v685_v15, %v8774_v36  ;;  %v9041_v17 = vmax.f32 %v682_v31, 0.0  ;;  %v1362_v6 = vmul.f32 %v8978_v62, %v8978_v62 }
 0x13c   :  { %14616 = vst [vmem:[#allocation85_spill] sm:$0xff] %v9035_v26  ;;  %v1210_v3 = vadd.f32 %v1209_v5, %v8930_v43  ;;  %1504 = vadd.xlane.f32.xlu1 %v1503_v46  ;;  %v1213_v55 = vadd.f32 %v8946_v13, %v8933_v57  ;;  %v688_v1 = vadd.f32 %v687_v58, %v8774_v36  ;;  %v697_v11 = vpop.f32.mrf.mxu0  ;;  %v9050_v37 = vmax.f32 %v939_v21, 0.0  ;;  %v954_v31 = vpop.f32.mrf.mxu1 }
 0x13d   :  { %14617 = vst [vmem:[#allocation86_spill] sm:$0xff] %v9041_v17  ;;  %v1371_v0 = vmul.f32 %v9027_v7, %v9027_v7  ;;  %v1507_v54 = vadd.f32 %v1506_v29, %v1361_v2  ;;  %v943_v15 = vadd.f32 %v942_v18, %v8774_v36  ;;  %v9053_v5 = vmax.f32 %v686_v25, 0.0 }
 0x13e   :  { %1211 = vadd.xlane.f32.xlu0 %v1210_v3  ;;  %14618 = vst [vmem:[#allocation87_spill] sm:$0xff] %v9050_v37  ;;  %v1214_v46 = vadd.f32 %v1213_v55, %v8941_v23  ;;  %v945_v43 = vadd.f32 %v944_v14, %v8774_v36  ;;  %v1365_v58 = vmul.f32 %v8985_v48, %v8985_v48  ;;  %v699_v35 = vpop.f32.mrf.mxu0  ;;  %v9059_v13 = vmax.f32 %v688_v1, 0.0  ;;  %v956_v2 = vpop.f32.mrf.mxu1 }
 0x13f   :  { %14619 = vst [vmem:[#allocation88_spill] sm:$0xff] %v9053_v5  ;;  %v1508_v20 = vadd.f32 %v1507_v54, %v1362_v6  ;;  %v1511_v3 = vadd.f32 %v1364_v12, %v1363_v39  ;;  %v692_v21 = vadd.f32 %v691_v4, %v8706_v41  ;;  %v1372_v18 = vmul.f32 %v9041_v17, %v9041_v17 }
 0x140   :  { %14620 = vst [vmem:[#allocation89_spill] sm:$0xff] %v9059_v13  ;;  %v1215_v29 = vadd.f32 %v1214_v46, %v8966_v42  ;;  %v949_v25 = vadd.f32 %v948_v60, %v8706_v41  ;;  %v1218_v36 = vadd.f32 %v8968_v61, %v8956_v19  ;;  %v703_v14 = vpop.f32.mrf.mxu0  ;;  %v9068_v55 = vmax.f32 %v943_v15, 0.0  ;;  %v960_v6 = vpop.f32.mrf.mxu1 }
 0x141   :  { %1509 = vadd.xlane.f32.xlu1 %v1508_v20  ;;  %v1366_v12 = vmul.f32 %v9002_v40, %v9002_v40  ;;  %v1512_v39 = vadd.f32 %v1511_v3, %v1365_v58  ;;  %v694_v4 = vadd.f32 %v693_v10, %v8706_v41  ;;  %v9073_v1 = vmax.f32 %v945_v43, 0.0 }
 0x142   :  { %14621 = vst [vmem:[#allocation90_spill] sm:$0xff] %v9068_v55  ;;  %1216 = vadd.xlane.f32.xlu0 %v1215_v29  ;;  %v9075_v54 = vmax.f32 %v692_v21, 0.0  ;;  %v1219_v60 = vadd.f32 %v1218_v36, %v8973_v9  ;;  %v951_v46 = vadd.f32 %v950_v51, %v8706_v41  ;;  %v705_v42 = vpop.f32.mrf.mxu0  ;;  %v1375_v20 = vmul.f32 %v9053_v5, %v9053_v5  ;;  %v962_v10 = vpop.f32.mrf.mxu1 }
 0x143   :  { %14622 = vst [vmem:[#allocation91_spill] sm:$0xff] %v9073_v1  ;;  %v1376_v15 = vmul.f32 %v9059_v13, %v9059_v13  ;;  %v1513_v58 = vadd.f32 %v1512_v39, %v1366_v12  ;;  %v9083_v3 = vmax.f32 %v949_v25, 0.0  ;;  %v1369_v21 = vmul.f32 %v9020_v16, %v9020_v16 }
 0x144   :  { %14623 = vst [vmem:[#allocation92_spill] sm:$0xff] %v9075_v54  ;;  %v1220_v43 = vadd.f32 %v1219_v60, %v8978_v62  ;;  %v1516_v29 = vadd.f32 %v1368_v27, %v1367_v63  ;;  %v698_v36 = vadd.f32 %v697_v11, %v8732_v52  ;;  %v709_v41 = vpop.f32.mrf.mxu0  ;;  %v9089_v51 = vmax.f32 %v694_v4, 0.0  ;;  %v966_v39 = vpop.f32.mrf.mxu1 }
 0x145   :  { %14624 = vst [vmem:[#allocation93_spill] sm:$0xff] %v9083_v3  ;;  %1514 = vadd.xlane.f32.xlu1 %v1513_v58  ;;  %v1370_v23 = vmul.f32 %v9033_v8, %v9033_v8  ;;  %v1223_v25 = vadd.f32 %v8990_v32, %v8980_v56  ;;  %v700_v12 = vadd.f32 %v699_v35, %v8732_v52  ;;  %v9098_v63 = vmax.f32 %v951_v46, 0.0 }
 0x146   :  { %14625 = vst [vmem:[#allocation94_spill] sm:$0xff] %v9089_v51  ;;  %v1379_v60 = vmul.f32 %v9075_v54, %v9075_v54  ;;  %1221 = vadd.xlane.f32.xlu0 %v1220_v43  ;;  %v1517_v27 = vadd.f32 %v1516_v29, %v1369_v21  ;;  %v955_v11 = vadd.f32 %v954_v31, %v8732_v52  ;;  %v711_v4 = vpop.f32.mrf.mxu0  ;;  %v9101_v58 = vmax.f32 %v698_v36, 0.0  ;;  %v968_v57 = vpop.f32.mrf.mxu1 }
 0x147   :  { %14626 = vst [vmem:[#allocation95_spill] sm:$0xff] %v9098_v63  ;;  %v1224_v62 = vadd.f32 %v1223_v25, %v8985_v48  ;;  %v957_v61 = vadd.f32 %v956_v2, %v8732_v52  ;;  %v1373_v35 = vmul.f32 %v9035_v26, %v9035_v26  ;;  %v9107_v19 = vmax.f32 %v700_v12, 0.0 }
 0x148   :  { %14627 = vst [vmem:[#allocation96_spill] sm:$0xff] %v9101_v58  ;;  %v1518_v9 = vadd.f32 %v1517_v27, %v1370_v23  ;;  %v1521_v43 = vadd.f32 %v1372_v18, %v1371_v0  ;;  %v704_v46 = vadd.f32 %v703_v14, %v8667_v44  ;;  %v715_v21 = vpop.f32.mrf.mxu0  ;;  %v1380_v31 = vmul.f32 %v9089_v51, %v9089_v51  ;;  %v972_v2 = vpop.f32.mrf.mxu1 }
 0x149   :  { %14628 = vst [vmem:[#allocation97_spill] sm:$0xff] %v9107_v19  ;;  %v1225_v29 = vadd.f32 %v1224_v62, %v9002_v40  ;;  %v961_v36 = vadd.f32 %v960_v6, %v8667_v44  ;;  %v1228_v52 = vadd.f32 %v9010_v45, %v9007_v38  ;;  %v9116_v25 = vmax.f32 %v955_v11, 0.0 }
 0x14a   :  { %1519 = vadd.xlane.f32.xlu1 %v1518_v9  ;;  %v1374_v23 = vmul.f32 %v9050_v37, %v9050_v37  ;;  %v1522_v0 = vadd.f32 %v1521_v43, %v1373_v35  ;;  %v706_v18 = vadd.f32 %v705_v42, %v8667_v44  ;;  %v717_v14 = vpop.f32.mrf.mxu0  ;;  %v9121_v12 = vmax.f32 %v957_v61, 0.0  ;;  %v974_v40 = vpop.f32.mrf.mxu1 }
 0x14b   :  { %14629 = vst [vmem:[#allocation98_spill] sm:$0xff] %v9116_v25  ;;  %1226 = vadd.xlane.f32.xlu0 %v1225_v29  ;;  %v9123_v62 = vmax.f32 %v704_v46, 0.0  ;;  %v1229_v6 = vadd.f32 %v1228_v52, %v9020_v16  ;;  %v963_v27 = vadd.f32 %v962_v10, %v8667_v44  ;;  %v1383_v9 = vmul.f32 %v9101_v58, %v9101_v58 }
 0x14c   :  { %14630 = vst [vmem:[#allocation99_spill] sm:$0xff] %v9121_v12  ;;  %v1384_v11 = vmul.f32 %v9107_v19, %v9107_v19  ;;  %v1523_v35 = vadd.f32 %v1522_v0, %v1374_v23  ;;  %v9131_v43 = vmax.f32 %v961_v36, 0.0  ;;  %v721_v42 = vpop.f32.mrf.mxu0  ;;  %v1377_v46 = vmul.f32 %v9068_v55, %v9068_v55  ;;  %v978_v0 = vpop.f32.mrf.mxu1 }
 0x14d   :  { %14631 = vst [vmem:[#allocation100_spill] sm:$0xff] %v9123_v62  ;;  %v1230_v61 = vadd.f32 %v1229_v6, %v9033_v8  ;;  %v1526_v29 = vadd.f32 %v1376_v15, %v1375_v20  ;;  %v710_v52 = vadd.f32 %v709_v41, %v8693_v24  ;;  %v9137_v44 = vmax.f32 %v706_v18, 0.0 }
 0x14e   :  { %14632 = vst [vmem:[#allocation101_spill] sm:$0xff] %v9131_v43  ;;  %1524 = vadd.xlane.f32.xlu1 %v1523_v35  ;;  %v1378_v10 = vmul.f32 %v9073_v1, %v9073_v1  ;;  %v1233_v23 = vadd.f32 %v9041_v17, %v9027_v7  ;;  %v712_v36 = vadd.f32 %v711_v4, %v8693_v24  ;;  %v723_v32 = vpop.f32.mrf.mxu0  ;;  %v9146_v20 = vmax.f32 %v963_v27, 0.0 }
 0x14f   :  { %14633 = vst [vmem:[#allocation102_spill] sm:$0xff] %v9137_v44  ;;  %v1387_v6 = vmul.f32 %v9123_v62, %v9123_v62  ;;  %1231 = vadd.xlane.f32.xlu0 %v1230_v61  ;;  %v1527_v15 = vadd.f32 %v1526_v29, %v1377_v46  ;;  %v967_v41 = vadd.f32 %v966_v39, %v8693_v24  ;;  %v9149_v18 = vmax.f32 %v710_v52, 0.0 }
 0x150   :  { %14634 = vst [vmem:[#allocation103_spill] sm:$0xff] %v9146_v20  ;;  %v1234_v35 = vadd.f32 %v1233_v23, %v9035_v26  ;;  %v969_v8 = vadd.f32 %v968_v57, %v8693_v24  ;;  %v1381_v4 = vmul.f32 %v9083_v3, %v9083_v3  ;;  %v9155_v56 = vmax.f32 %v712_v36, 0.0  ;;  %v727_v27 = vpop.f32.mrf.mxu0  ;;  %v980_v57 = vpop.f32.mrf.mxu1 }
 0x151   :  { %14635 = vst [vmem:[#allocation104_spill] sm:$0xff] %v9149_v18  ;;  %v1528_v48 = vadd.f32 %v1527_v15, %v1378_v10  ;;  %v1531_v45 = vadd.f32 %v1380_v31, %v1379_v60  ;;  %v716_v61 = vadd.f32 %v715_v21, %v8631_v53  ;;  %v1388_v46 = vmul.f32 %v9137_v44, %v9137_v44 }
 0x152   :  { %14636 = vst [vmem:[#allocation105_spill] sm:$0xff] %v9155_v56  ;;  %v1235_v39 = vadd.f32 %v1234_v35, %v9050_v37  ;;  %v973_v29 = vadd.f32 %v972_v2, %v8631_v53  ;;  %v1238_v24 = vadd.f32 %v9059_v13, %v9053_v5  ;;  %v9164_v52 = vmax.f32 %v967_v41, 0.0 }
 0x153   :  { %1529 = vadd.xlane.f32.xlu1 %v1528_v48  ;;  %v1382_v60 = vmul.f32 %v9098_v63, %v9098_v63  ;;  %v1532_v31 = vadd.f32 %v1531_v45, %v1381_v4  ;;  %v718_v21 = vadd.f32 %v717_v14, %v8631_v53  ;;  %v9169_v10 = vmax.f32 %v969_v8, 0.0  ;;  %v729_v45 = vpop.f32.mrf.mxu0 }
 0x154   :  { %14637 = vst [vmem:[#allocation106_spill] sm:$0xff] %v9164_v52  ;;  %1236 = vadd.xlane.f32.xlu0 %v1235_v39  ;;  %v9171_v23 = vmax.f32 %v716_v61, 0.0  ;;  %v1239_v2 = vadd.f32 %v1238_v24, %v9068_v55  ;;  %v975_v36 = vadd.f32 %v974_v40, %v8631_v53  ;;  %v1391_v48 = vmul.f32 %v9149_v18, %v9149_v18  ;;  %v984_v39 = vpop.f32.mrf.mxu1  ;;  %v14681_v55 = vld [vmem:[#allocation53_spill] sm:$0xff] }
 0x155   :  { %14638 = vst [vmem:[#allocation107_spill] sm:$0xff] %v9169_v10  ;;  %v1392_v15 = vmul.f32 %v9155_v56, %v9155_v56  ;;  %v1533_v41 = vadd.f32 %v1532_v31, %v1382_v60  ;;  %v9179_v35 = vmax.f32 %v973_v29, 0.0  ;;  %v1385_v8 = vmul.f32 %v9116_v25, %v9116_v25 }
 0x156   :  { %14639 = vst [vmem:[#allocation108_spill] sm:$0xff] %v9171_v23  ;;  %v1240_v14 = vadd.f32 %v1239_v2, %v9073_v1  ;;  %v1536_v4 = vadd.f32 %v1384_v11, %v1383_v9  ;;  %v722_v61 = vadd.f32 %v721_v42, %v8656_v59  ;;  %v9185_v53 = vmax.f32 %v718_v21, 0.0  ;;  %v986_v37 = vpop.f32.mrf.mxu1  ;;  %v14680_v1 = vld [vmem:[#allocation57_spill] sm:$0xff] }
 0x157   :  { %14640 = vst [vmem:[#allocation109_spill] sm:$0xff] %v9179_v35  ;;  %1534 = vadd.xlane.f32.xlu1 %v1533_v41  ;;  %v979_v40 = vadd.f32 %v978_v0, %v8656_v59  ;;  %v1243_v24 = vadd.f32 %v9089_v51, %v9075_v54  ;;  %v724_v29 = vadd.f32 %v723_v32, %v8656_v59  ;;  %v9193_v31 = vmax.f32 %v975_v36, 0.0  ;;  %v733_v32 = vpop.f32.mrf.mxu0 }
 0x158   :  { %14641 = vst [vmem:[#allocation110_spill] sm:$0xff] %v9185_v53  ;;  %v1395_v60 = vmul.f32 %v9171_v23, %v9171_v23  ;;  %1241 = vadd.xlane.f32.xlu0 %v1240_v14  ;;  %v1386_v9 = vmul.f32 %v9121_v12, %v9121_v12  ;;  %v1537_v11 = vadd.f32 %v1536_v4, %v1385_v8  ;;  %v9197_v42 = vmax.f32 %v722_v61, 0.0 }
 0x159   :  { %14642 = vst [vmem:[#allocation111_spill] sm:$0xff] %v9193_v31  ;;  %v1244_v21 = vadd.f32 %v1243_v24, %v9083_v3  ;;  %v981_v0 = vadd.f32 %v980_v57, %v8656_v59  ;;  %v1389_v2 = vmul.f32 %v9131_v43, %v9131_v43  ;;  %v9203_v16 = vmax.f32 %v724_v29, 0.0  ;;  %v14679_v3 = vld [vmem:[#allocation52_spill] sm:$0xff] }
 0x15a   :  { %14643 = vst [vmem:[#allocation112_spill] sm:$0xff] %v9197_v42  ;;  %v1538_v41 = vadd.f32 %v1537_v11, %v1386_v9  ;;  %v1541_v14 = vadd.f32 %v1388_v46, %v1387_v6  ;;  %v728_v36 = vadd.f32 %v727_v27, %v8594_v50  ;;  %v1396_v8 = vmul.f32 %v9185_v53, %v9185_v53  ;;  %v735_v11 = vpop.f32.mrf.mxu0 }
 0x15b   :  { %14644 = vst [vmem:[#allocation113_spill] sm:$0xff] %v9203_v16  ;;  %v9208_v4 = vmax.f32 %v979_v40, 0.0  ;;  %v1245_v61 = vadd.f32 %v1244_v21, %v9098_v63  ;;  %v1248_v59 = vadd.f32 %v9107_v19, %v9101_v58  ;;  %v1390_v57 = vmul.f32 %v9146_v20, %v9146_v20  ;;  %v14678_v63 = vld [vmem:[#allocation59_spill] sm:$0xff] }
 0x15c   :  { %1539 = vadd.xlane.f32.xlu1 %v1538_v41  ;;  %v1542_v24 = vadd.f32 %v1541_v14, %v1389_v2  ;;  %v985_v6 = vadd.f32 %v984_v39, %v8594_v50  ;;  %v730_v27 = vadd.f32 %v729_v45, %v8594_v50  ;;  %v9217_v46 = vmax.f32 %v981_v0, 0.0  ;;  %v990_v45 = vpop.f32.mrf.mxu1 }
 0x15d   :  { %14645 = vst [vmem:[#allocation114_spill] sm:$0xff] %v9208_v4  ;;  %1246 = vadd.xlane.f32.xlu0 %v1245_v61  ;;  %v9219_v29 = vmax.f32 %v728_v36, 0.0  ;;  %v1249_v40 = vadd.f32 %v1248_v59, %v9116_v25  ;;  %v987_v9 = vadd.f32 %v986_v37, %v8594_v50  ;;  %v1399_v21 = vmul.f32 %v9197_v42, %v9197_v42  ;;  %v14677_v25 = vld [vmem:[#allocation58_spill] sm:$0xff] }
 0x15e   :  { %14646 = vst [vmem:[#allocation115_spill] sm:$0xff] %v9217_v46  ;;  %v1400_v2 = vmul.f32 %v9203_v16, %v9203_v16  ;;  %v1543_v41 = vadd.f32 %v1542_v24, %v1390_v57  ;;  %v9227_v39 = vmax.f32 %v730_v27, 0.0  ;;  %v1393_v14 = vmul.f32 %v9164_v52, %v9164_v52 }
 0x15f   :  { %14647 = vst [vmem:[#allocation116_spill] sm:$0xff] %v9219_v29  ;;  %v1250_v0 = vadd.f32 %v1249_v40, %v9121_v12  ;;  %v1546_v36 = vadd.f32 %v1392_v15, %v1391_v48  ;;  %v734_v61 = vadd.f32 %v733_v32, %v8618_v28  ;;  %v9233_v50 = vmax.f32 %v985_v6, 0.0  ;;  %v14676_v12 = vld [vmem:[#allocation55_spill] sm:$0xff] }
 0x160   :  { %14648 = vst [vmem:[#allocation117_spill] sm:$0xff] %v9227_v39  ;;  %1544 = vadd.xlane.f32.xlu1 %v1543_v41  ;;  %v1394_v37 = vmul.f32 %v9169_v10, %v9169_v10  ;;  %v1253_v59 = vadd.f32 %v9137_v44, %v9123_v62  ;;  %v736_v57 = vadd.f32 %v735_v11, %v8618_v28  ;;  %v9242_v27 = vmax.f32 %v987_v9, 0.0  ;;  %v992_v11 = vpop.f32.mrf.mxu1  ;;  %v14675_v62 = vld [vmem:[#allocation27_spill] sm:$0xff] }
 0x161   :  { %14649 = vst [vmem:[#allocation118_spill] sm:$0xff] %v9233_v50  ;;  %v1403_v24 = vmul.f32 %v9219_v29, %v9219_v29  ;;  %1251 = vadd.xlane.f32.xlu0 %v1250_v0  ;;  %v1547_v48 = vadd.f32 %v1546_v36, %v1393_v14  ;;  %v991_v15 = vadd.f32 %v990_v45, %v8618_v28  ;;  %v9247_v6 = vmax.f32 %v734_v61, 0.0 }
 0x162   :  { %14650 = vst [vmem:[#allocation119_spill] sm:$0xff] %v9242_v27  ;;  %v1404_v32 = vmul.f32 %v9227_v39, %v9227_v39  ;;  %v1254_v40 = vadd.f32 %v1253_v59, %v9131_v43  ;;  %v9250_v41 = vmax.f32 %v736_v57, 0.0  ;;  %v1397_v38 = vmul.f32 %v9179_v35, %v9179_v35 }
 0x163   :  { %14651 = vst [vmem:[#allocation120_spill] sm:$0xff] %v9247_v6  ;;  %v1548_v17 = vadd.f32 %v1547_v48, %v1394_v37  ;;  %v1551_v0 = vadd.f32 %v1396_v8, %v1395_v60  ;;  %v1258_v9 = vadd.f32 %v9155_v56, %v9149_v18  ;;  %v1398_v36 = vmul.f32 %v9193_v31, %v9193_v31  ;;  %v14674_v18 = vld [vmem:[#allocation22_spill] sm:$0xff] }
 0x164   :  { %14652 = vst [vmem:[#allocation121_spill] sm:$0xff] %v9250_v41  ;;  %v1255_v45 = vadd.f32 %v1254_v40, %v9146_v20  ;;  %v1408_v14 = vmul.f32 %v9250_v41, %v9250_v41  ;;  %v1401_v61 = vmul.f32 %v9208_v4, %v9208_v4  ;;  %v1556_v57 = vadd.f32 %v1400_v2, %v1399_v21 }
 0x165   :  { %1549 = vadd.xlane.f32.xlu1 %v1548_v17  ;;  %v1552_v37 = vadd.f32 %v1551_v0, %v1397_v38  ;;  %v1259_v59 = vadd.f32 %v1258_v9, %v9164_v52  ;;  %v1263_v60 = vadd.f32 %v9185_v53, %v9171_v23  ;;  %v1407_v8 = vmul.f32 %v9247_v6, %v9247_v6  ;;  %v208_v23 = vld [vmem:[%s14656_s3 + $0xc8] sm:$0xff] }
 0x166   :  { %v9268_v48 = vmax.f32 %v991_v15, 0.0  ;;  %1256 = vadd.xlane.f32.xlu0 %v1255_v45  ;;  %v993_v40 = vadd.f32 %v992_v11, %v8618_v28  ;;  %v1561_v26 = vadd.f32 %v1404_v32, %v1403_v24  ;;  %v1402_v17 = vmul.f32 %v9217_v46, %v9217_v46 }
 0x167   :  { %v1553_v7 = vadd.f32 %v1552_v37, %v1398_v36  ;;  %v1557_v38 = vadd.f32 %v1556_v57, %v1401_v61  ;;  %v1405_v21 = vmul.f32 %v9233_v50, %v9233_v50  ;;  %v1260_v2 = vadd.f32 %v1259_v59, %v9169_v10 }
 0x168   :  { %14653 = vst [vmem:[#allocation122_spill] sm:$0xff] %v9268_v48  ;;  %v1264_v0 = vadd.f32 %v1263_v60, %v9179_v35  ;;  %v1268_v15 = vadd.f32 %v9203_v16, %v9197_v42  ;;  %v1566_v28 = vadd.f32 %v1408_v14, %v1407_v8  ;;  %v9279_v24 = vmax.f32 %v993_v40, 0.0 }
 0x169   :  { %1554 = vadd.xlane.f32.xlu1 %v1553_v7  ;;  %v1558_v9 = vadd.f32 %v1557_v38, %v1402_v17  ;;  %v1562_v45 = vadd.f32 %v1561_v26, %v1405_v21  ;;  %v1406_v32 = vmul.f32 %v9242_v27, %v9242_v27  ;;  %v1409_v11 = vmul.f32 %v9268_v48, %v9268_v48 }
 0x16a   :  { %1261 = vadd.xlane.f32.xlu0 %v1260_v2  ;;  %14654 = vst [vmem:[#allocation123_spill] sm:$0xff] %v9279_v24  ;;  %v1265_v36 = vadd.f32 %v1264_v0, %v9193_v31  ;;  %v1269_v61 = vadd.f32 %v1268_v15, %v9208_v4  ;;  %v1273_v37 = vadd.f32 %v9227_v39, %v9219_v29 }
 0x16b   :  { %v1563_v7 = vadd.f32 %v1562_v45, %v1406_v32  ;;  %v1567_v26 = vadd.f32 %v1566_v28, %v1409_v11  ;;  %v1410_v59 = vmul.f32 %v9279_v24, %v9279_v24  ;;  %v1278_v40 = vadd.f32 %v9250_v41, %v9247_v6  ;;  %v175_v6 = vld [vmem:[%s14655_s29 + $0xc0] sm:$0xff] }
 0x16c   :  { %v1270_v60 = vadd.f32 %v1269_v61, %v9217_v46  ;;  %v1274_v8 = vadd.f32 %v1273_v37, %v9233_v50 }
 0x16d   :  { %1559 = vadd.xlane.f32.xlu1 %v1558_v9  ;;  %v1568_v17 = vadd.f32 %v1567_v26, %v1410_v59  ;;  %v1279_v9 = vadd.f32 %v1278_v40, %v9268_v48 }
 0x16e   :  { %1266 = vadd.xlane.f32.xlu0 %v1265_v36  ;;  %v1127_v14 = vpop.xlane.xlu0 %1126  ;;  %v1275_v15 = vadd.f32 %v1274_v8, %v9242_v27 }
 0x16f   :  { %v1571_v57 = vmul.f32 0.001953125, %v1127_v14 }
 0x170   :  { %v1415_v21 = vpop.xlane.xlu1 %1414 }
 0x171   :  { %1564 = vadd.xlane.f32.xlu1 %v1563_v7  ;;  %v1635_v38 = vmul.f32 %v1571_v57, %v1571_v57  ;;  %v1603_v2 = vmul.f32 0.001953125, %v1415_v21  ;;  %v1280_v7 = vadd.f32 %v1279_v9, %v9279_v24 }
 0x172   :  { %1271 = vadd.xlane.f32.xlu0 %v1270_v60 }
 0x173   :  { %v1132_v0 = vpop.xlane.xlu0 %1131  ;;  %v1667_v45 = vsub.f32 %v1603_v2, %v1635_v38 }
 0x174   :  { %v9297_v28 = vmul.f32 0.001953125, %v1132_v0 }
 0x175   :  { %1569 = vadd.xlane.f32.xlu1 %v1568_v17  ;;  %v1699_v32 = vmax.f32 %v1667_v45, 0.0  ;;  %v1420_v36 = vpop.xlane.xlu1 %1419 }
 0x176   :  { %1276 = vadd.xlane.f32.xlu0 %v1275_v15  ;;  %v1636_v11 = vmul.f32 %v9297_v28, %v9297_v28  ;;  %v1604_v61 = vmul.f32 0.001953125, %v1420_v36 }
 0x177   :  { %v1137_v37 = vpop.xlane.xlu0 %1136  ;;  %v1731_v26 = vadd.f32 1e-05, %v1699_v32 }
 0x178   :  { %v9302_v14 = vmul.f32 0.001953125, %v1137_v37  ;;  %v1668_v59 = vsub.f32 %v1604_v61, %v1636_v11 }
 0x179   :  { %7792 = vrsqrt.f32 %v1731_v26 }
 0x17a   :  { %1281 = vadd.xlane.f32.xlu0 %v1280_v7  ;;  %v1700_v60 = vmax.f32 %v1668_v59, 0.0  ;;  %v1637_v8 = vmul.f32 %v9302_v14, %v9302_v14  ;;  %v151_v7 = vld [vmem:[%s14655_s29] sm:$0xff] }
 0x17b   :  { %v1425_v40 = vpop.xlane.xlu1 %1424 }
 0x17c   :  { %v1732_v17 = vadd.f32 1e-05, %v1700_v60  ;;  %v1605_v38 = vmul.f32 0.001953125, %v1425_v40  ;;  %v1142_v21 = vpop.xlane.xlu0 %1141 }
 0x17d   :  { %v9306_v2 = vmul.f32 0.001953125, %v1142_v21 }
 0x17e   :  { %7794 = vrsqrt.f32 %v1732_v17  ;;  %v1669_v0 = vsub.f32 %v1605_v38, %v1637_v8 }
 0x17f   :  { %v1638_v15 = vmul.f32 %v9306_v2, %v9306_v2 }
 0x180   :  { %v1701_v9 = vmax.f32 %v1669_v0, 0.0  ;;  %v1430_v45 = vpop.xlane.xlu1 %1429 }
 0x181   :  { %v1606_v32 = vmul.f32 0.001953125, %v1430_v45  ;;  %v1147_v11 = vpop.xlane.xlu0 %1146 }
 0x182   :  { %v1733_v36 = vadd.f32 1e-05, %v1701_v9  ;;  %v9310_v61 = vmul.f32 0.001953125, %v1147_v11 }
 0x183   :  { %v1670_v37 = vsub.f32 %v1606_v32, %v1638_v15  ;;  %v183_v15 = vld [vmem:[%s14656_s3] sm:$0xff]  ;;  %v152_v32 = vld [vmem:[%s14655_s29 + $0x8] sm:$0xff] }
 0x184   :  { %7796 = vrsqrt.f32 %v1733_v36  ;;  %v1639_v59 = vmul.f32 %v9310_v61, %v9310_v61 }
 0x185   :  { %v1702_v26 = vmax.f32 %v1670_v37, 0.0 }
 0x186   :  { %v7793_v60 = vpop.eup %7792  ;;  %v1435_v8 = vpop.xlane.xlu1 %1434 }
 0x187   :  { %v1152_v40 = vpop.xlane.xlu0 %1151  ;;  %v1734_v17 = vadd.f32 1e-05, %v1702_v26  ;;  %v1607_v38 = vmul.f32 0.001953125, %v1435_v8  ;;  %v1795_v0 = vmul.f32 %v7793_v60, %v151_v7 }
 0x188   :  { %v9317_v21 = vmul.f32 0.001953125, %v1152_v40 }
 0x189   :  { %7798 = vrsqrt.f32 %v1734_v17  ;;  %v1671_v9 = vsub.f32 %v1607_v38, %v1639_v59  ;;  %1893 = vperm.xlu1 %7788, %v1795_v0   ;;  %v1827_v45 = vmul.f32 %v1795_v0, %v1571_v57  ;;  %v184_v57 = vld [vmem:[%s14656_s3 + $0x8] sm:$0xff] }
 0x18a   :  { %v1640_v11 = vmul.f32 %v9317_v21, %v9317_v21 }
 0x18b   :  { %v7795_v36 = vpop.eup %7794  ;;  %v1703_v37 = vmax.f32 %v1671_v9, 0.0  ;;  %v1440_v26 = vpop.xlane.xlu1 %1439  ;;  %v1859_v8 = vsub.f32 %v183_v15, %v1827_v45  ;;  %v153_v15 = vld [vmem:[%s14655_s29 + $0x10] sm:$0xff] }
 0x18c   :  { %v1608_v7 = vmul.f32 0.001953125, %v1440_v26  ;;  %v1796_v40 = vmul.f32 %v7795_v36, %v152_v32 }
 0x18d   :  { %v1157_v60 = vpop.xlane.xlu0 %1156  ;;  %v1735_v43 = vadd.f32 1e-05, %v1703_v37 }
 0x18e   :  { %v9327_v20 = vmul.f32 0.001953125, %v1157_v60  ;;  %v1672_v59 = vsub.f32 %v1608_v7, %v1640_v11  ;;  %1898 = vperm.xlu1 %7788, %v1796_v40   ;;  %v1828_v17 = vmul.f32 %v1796_v40, %v9297_v28 }
 0x18f   :  { %7800 = vrsqrt.f32 %v1735_v43  ;;  %v1445_v0 = vpop.xlane.xlu1 %1444  ;;  %v185_v43 = vld [vmem:[%s14656_s3 + $0x10] sm:$0xff] }
 0x190   :  { %v1641_v38 = vmul.f32 %v9327_v20, %v9327_v20  ;;  %2181 = vperm.xlu0 %7787, %v1859_v8   ;;  %v1704_v9 = vmax.f32 %v1672_v59, 0.0  ;;  %v1609_v45 = vmul.f32 0.001953125, %v1445_v0  ;;  %v1860_v32 = vsub.f32 %v184_v57, %v1828_v17  ;;  %v154_v59 = vld [vmem:[%s14655_s29 + $0x18] sm:$0xff] }
 0x191   :  { %v7797_v36 = vpop.eup %7796  ;;  %v1162_v37 = vpop.xlane.xlu0 %1161 }
 0x192   :  { %v1736_v26 = vadd.f32 1e-05, %v1704_v9  ;;  %v1673_v11 = vsub.f32 %v1609_v45, %v1641_v38  ;;  %v9338_v7 = vmul.f32 0.001953125, %v1162_v37  ;;  %v1797_v28 = vmul.f32 %v7797_v36, %v153_v15 }
 0x194   :  { %2186 = vperm.xlu0 %7787, %v1860_v32   ;;  %7802 = vrsqrt.f32 %v1736_v26  ;;  %v1705_v8 = vmax.f32 %v1673_v11, 0.0  ;;  %v1642_v60 = vmul.f32 %v9338_v7, %v9338_v7  ;;  %v1450_v40 = vpop.xlane.xlu1 %1449  ;;  %1903 = vperm.xlu1 %7788, %v1797_v28   ;;  %v1829_v57 = vmul.f32 %v1797_v28, %v9302_v14  ;;  %v186_v14 = vld [vmem:[%s14656_s3 + $0x18] sm:$0xff] }
 0x195   :  { %v1610_v17 = vmul.f32 0.001953125, %v1450_v40 }
 0x196   :  { %v1167_v38 = vpop.xlane.xlu0 %1166  ;;  %v7799_v0 = vpop.eup %7798  ;;  %v1737_v15 = vadd.f32 1e-05, %v1705_v8  ;;  %v1861_v45 = vsub.f32 %v185_v43, %v1829_v57  ;;  %v155_v43 = vld [vmem:[%s14655_s29 + $0x20] sm:$0xff] }
 0x197   :  { %v9349_v9 = vmul.f32 0.001953125, %v1167_v38  ;;  %v1674_v32 = vsub.f32 %v1610_v17, %v1642_v60  ;;  %v1798_v36 = vmul.f32 %v7799_v0, %v154_v59 }
 0x198   :  { %7804 = vrsqrt.f32 %v1737_v15  ;;  %2191 = vperm.xlu0 %7787, %v1861_v45  }
 0x199   :  { %v1643_v37 = vmul.f32 %v9349_v9, %v9349_v9  ;;  %v1706_v26 = vmax.f32 %v1674_v32, 0.0  ;;  %v1455_v11 = vpop.xlane.xlu1 %1454  ;;  %1908 = vperm.xlu1 %7788, %v1798_v36   ;;  %v1830_v28 = vmul.f32 %v1798_v36, %v9306_v2 }
 0x19a   :  { %v1611_v8 = vmul.f32 0.001953125, %v1455_v11  ;;  %v1172_v40 = vpop.xlane.xlu0 %1171  ;;  %v187_v11 = vld [vmem:[%s14656_s3 + $0x20] sm:$0xff] }
 0x19b   :  { %v1738_v60 = vadd.f32 1e-05, %v1706_v26  ;;  %v9360_v57 = vmul.f32 0.001953125, %v1172_v40  ;;  %v1862_v59 = vsub.f32 %v186_v14, %v1830_v28 }
 0x19c   :  { %v7801_v17 = vpop.eup %7800  ;;  %v1675_v38 = vsub.f32 %v1611_v8, %v1643_v37  ;;  %v156_v37 = vld [vmem:[%s14655_s29 + $0x28] sm:$0xff] }
 0x19d   :  { %7806 = vrsqrt.f32 %v1738_v60  ;;  %v1644_v0 = vmul.f32 %v9360_v57, %v9360_v57  ;;  %v1460_v15 = vpop.xlane.xlu1 %1459  ;;  %2196 = vperm.xlu0 %7787, %v1862_v59   ;;  %v1799_v45 = vmul.f32 %v7801_v17, %v155_v43 }
 0x19e   :  { %v1707_v2 = vmax.f32 %v1675_v38, 0.0  ;;  %v1612_v32 = vmul.f32 0.001953125, %v1460_v15 }
 0x19f   :  { %v1177_v36 = vpop.xlane.xlu0 %1176  ;;  %1913 = vperm.xlu1 %7788, %v1799_v45   ;;  %v1831_v14 = vmul.f32 %v1799_v45, %v9310_v61  ;;  %v188_v61 = vld [vmem:[%s14656_s3 + $0x28] sm:$0xff] }
 0x1a0   :  { %v9367_v26 = vmul.f32 0.001953125, %v1177_v36  ;;  %v1739_v28 = vadd.f32 1e-05, %v1707_v2  ;;  %v1676_v8 = vsub.f32 %v1612_v32, %v1644_v0  ;;  %v157_v0 = vld [vmem:[%s14655_s29 + $0x30] sm:$0xff] }
 0x1a1   :  { %v7803_v40 = vpop.eup %7802  ;;  %v1863_v60 = vsub.f32 %v187_v11, %v1831_v14 }
 0x1a2   :  { %v1645_v43 = vmul.f32 %v9367_v26, %v9367_v26  ;;  %7808 = vrsqrt.f32 %v1739_v28  ;;  %v1708_v59 = vmax.f32 %v1676_v8, 0.0  ;;  %v1465_v17 = vpop.xlane.xlu1 %1464  ;;  %v1800_v38 = vmul.f32 %v7803_v40, %v156_v37 }
 0x1a3   :  { %v1613_v15 = vmul.f32 0.001953125, %v1465_v17  ;;  %v1182_v36 = vpop.xlane.xlu0 %1181  ;;  %2201 = vperm.xlu0 %7787, %v1863_v60  }
 0x1a4   :  { %v1740_v45 = vadd.f32 1e-05, %v1708_v59  ;;  %v9381_v2 = vmul.f32 0.001953125, %v1182_v36  ;;  %1918 = vperm.xlu1 %7788, %v1800_v38   ;;  %v1832_v32 = vmul.f32 %v1800_v38, %v9317_v21  ;;  %v189_v59 = vld [vmem:[%s14656_s3 + $0x30] sm:$0xff] }
 0x1a5   :  { %v7805_v11 = vpop.eup %7804  ;;  %v1677_v14 = vsub.f32 %v1613_v15, %v1645_v43  ;;  %v158_v43 = vld [vmem:[%s14655_s29 + $0x38] sm:$0xff] }
 0x1a6   :  { %7810 = vrsqrt.f32 %v1740_v45  ;;  %v1646_v37 = vmul.f32 %v9381_v2, %v9381_v2  ;;  %v1470_v28 = vpop.xlane.xlu1 %1469  ;;  %v1864_v8 = vsub.f32 %v188_v61, %v1832_v32  ;;  %v1801_v40 = vmul.f32 %v7805_v11, %v157_v0 }
 0x1a7   :  { %v1709_v60 = vmax.f32 %v1677_v14, 0.0  ;;  %v1614_v17 = vmul.f32 0.001953125, %v1470_v28 }
 0x1a8   :  { %v1187_v52 = vpop.xlane.xlu0 %1186  ;;  %2206 = vperm.xlu0 %7787, %v1864_v8   ;;  %1923 = vperm.xlu1 %7788, %v1801_v40   ;;  %v1833_v21 = vmul.f32 %v1801_v40, %v9327_v20  ;;  %v190_v20 = vld [vmem:[%s14656_s3 + $0x38] sm:$0xff] }
 0x1a9   :  { %v9389_v36 = vmul.f32 0.001953125, %v1187_v52  ;;  %v1741_v38 = vadd.f32 1e-05, %v1709_v60  ;;  %v1678_v15 = vsub.f32 %v1614_v17, %v1646_v37  ;;  %v159_v60 = vld [vmem:[%s14655_s29 + $0x40] sm:$0xff] }
 0x1aa   :  { %v7807_v61 = vpop.eup %7806  ;;  %v1865_v45 = vsub.f32 %v189_v59, %v1833_v21 }
 0x1ab   :  { %v1647_v0 = vmul.f32 %v9389_v36, %v9389_v36  ;;  %7812 = vrsqrt.f32 %v1741_v38  ;;  %v1710_v32 = vmax.f32 %v1678_v15, 0.0  ;;  %v1475_v11 = vpop.xlane.xlu1 %1474  ;;  %v1802_v52 = vmul.f32 %v7807_v61, %v158_v43 }
 0x1ac   :  { %v1615_v14 = vmul.f32 0.001953125, %v1475_v11  ;;  %v1192_v28 = vpop.xlane.xlu0 %1191  ;;  %2211 = vperm.xlu0 %7787, %v1865_v45  }
 0x1ad   :  { %v1742_v8 = vadd.f32 1e-05, %v1710_v32  ;;  %v9400_v40 = vmul.f32 0.001953125, %v1192_v28  ;;  %1928 = vperm.xlu1 %7788, %v1802_v52   ;;  %v1834_v37 = vmul.f32 %v1802_v52, %v9338_v7  ;;  %v191_v7 = vld [vmem:[%s14656_s3 + $0x40] sm:$0xff]  ;;  %v160_v52 = vld [vmem:[%s14655_s29 + $0x48] sm:$0xff] }
 0x1ae   :  { %v1679_v17 = vsub.f32 %v1615_v14, %v1647_v0 }
 0x1af   :  { %v7809_v59 = vpop.eup %7808  ;;  %7814 = vrsqrt.f32 %v1742_v8  ;;  %v1648_v21 = vmul.f32 %v9400_v40, %v9400_v40  ;;  %v1480_v43 = vpop.xlane.xlu1 %1479  ;;  %v1866_v38 = vsub.f32 %v190_v20, %v1834_v37 }
 0x1b0   :  { %v1711_v15 = vmax.f32 %v1679_v17, 0.0  ;;  %v1616_v61 = vmul.f32 0.001953125, %v1480_v43  ;;  %v1803_v45 = vmul.f32 %v7809_v59, %v159_v60 }
 0x1b1   :  { %2216 = vperm.xlu0 %7787, %v1866_v38  }
 0x1b2   :  { %v1743_v32 = vadd.f32 1e-05, %v1711_v15  ;;  %v1680_v11 = vsub.f32 %v1616_v61, %v1648_v21  ;;  %1933 = vperm.xlu1 %7788, %v1803_v45   ;;  %v1835_v0 = vmul.f32 %v1803_v45, %v9349_v9  ;;  %v192_v9 = vld [vmem:[%s14656_s3 + $0x48] sm:$0xff]  ;;  %v161_v21 = vld [vmem:[%s14655_s29 + $0x50] sm:$0xff] }
 0x1b3   :  { %v7811_v14 = vpop.eup %7810  ;;  %v1197_v28 = vpop.xlane.xlu1 %1196 }
 0x1b4   :  { %7816 = vrsqrt.f32 %v1743_v32  ;;  %v1712_v20 = vmax.f32 %v1680_v11, 0.0  ;;  %v9415_v8 = vmul.f32 0.001953125, %v1197_v28  ;;  %v1867_v60 = vsub.f32 %v191_v7, %v1835_v0 }
 0x1b5   :  { %v1202_v37 = vpop.xlane.xlu0 %1201  ;;  %v1804_v17 = vmul.f32 %v7811_v14, %v160_v52 }
 0x1b6   :  { %v1744_v59 = vadd.f32 1e-05, %v1712_v20  ;;  %v9417_v43 = vmul.f32 0.001953125, %v1202_v37  ;;  %2221 = vperm.xlu0 %7787, %v1867_v60   ;;  %v1649_v45 = vmul.f32 %v9415_v8, %v9415_v8  ;;  %v193_v20 = vld [vmem:[%s14656_s3 + $0x50] sm:$0xff] }
 0x1b7   :  { %v1485_v38 = vpop.xlane.xlu1 %1484  ;;  %1938 = vperm.xlu1 %7788, %v1804_v17   ;;  %v1836_v15 = vmul.f32 %v1804_v17, %v9360_v57  ;;  %v162_v57 = vld [vmem:[%s14655_s29 + $0x58] sm:$0xff] }
 0x1b8   :  { %v7813_v61 = vpop.eup %7812  ;;  %7818 = vrsqrt.f32 %v1744_v59  ;;  %v1617_v7 = vmul.f32 0.001953125, %v1485_v38  ;;  %v1650_v52 = vmul.f32 %v9417_v43, %v9417_v43 }
 0x1b9   :  { %v1868_v11 = vsub.f32 %v192_v9, %v1836_v15  ;;  %v1805_v0 = vmul.f32 %v7813_v61, %v161_v21 }
 0x1ba   :  { %v1490_v32 = vpop.xlane.xlu0 %1489  ;;  %v1681_v14 = vsub.f32 %v1617_v7, %v1649_v45  ;;  %v194_v45 = vld [vmem:[%s14656_s3 + $0x58] sm:$0xff] }
 0x1bb   :  { %v1618_v28 = vmul.f32 0.001953125, %v1490_v32  ;;  %2226 = vperm.xlu0 %7787, %v1868_v11   ;;  %1943 = vperm.xlu1 %7788, %v1805_v0   ;;  %v1837_v37 = vmul.f32 %v1805_v0, %v9367_v26  ;;  %v163_v26 = vld [vmem:[%s14655_s29 + $0x60] sm:$0xff] }
 0x1bc   :  { %v7815_v60 = vpop.eup %7814  ;;  %v1713_v17 = vmax.f32 %v1681_v14, 0.0 }
 0x1bd   :  { %v1682_v59 = vsub.f32 %v1618_v28, %v1650_v52  ;;  %v1869_v21 = vsub.f32 %v193_v20, %v1837_v37  ;;  %v1806_v38 = vmul.f32 %v7815_v60, %v162_v57  ;;  %v195_v20 = vld [vmem:[%s14656_s3 + $0x60] sm:$0xff] }
 0x1be   :  { %v9437_v9 = vpop.xlane.xlu0 %1206  ;;  %v1745_v15 = vadd.f32 1e-05, %v1713_v17 }
 0x1bf   :  { %v1714_v61 = vmax.f32 %v1682_v59, 0.0  ;;  %2231 = vperm.xlu0 %7787, %v1869_v21   ;;  %1948 = vperm.xlu1 %7788, %v1806_v38   ;;  %v1838_v32 = vmul.f32 %v1806_v38, %v9381_v2  ;;  %v164_v2 = vld [vmem:[%s14655_s29 + $0x68] sm:$0xff] }
 0x1c0   :  { %v9442_v7 = vpop.xlane.xlu1 %1499  ;;  %7820 = vrsqrt.f32 %v1745_v15 }
 0x1c1   :  { %v1746_v11 = vadd.f32 1e-05, %v1714_v61  ;;  %v7817_v0 = vpop.eup %7816  ;;  %v1870_v14 = vsub.f32 %v194_v45, %v1838_v32  ;;  %v165_v61 = vld [vmem:[%s14655_s29 + $0x70] sm:$0xff] }
 0x1c2   :  { %v9448_v52 = vpop.xlane.xlu0 %1494  ;;  %v1807_v28 = vmul.f32 %v7817_v0, %v163_v26 }
 0x1c3   :  { %7822 = vrsqrt.f32 %v1746_v11  ;;  %2236 = vperm.xlu0 %7787, %v1870_v14  }
 0x1c4   :  { %1953 = vperm.xlu1 %7788, %v1807_v28   ;;  %v1839_v37 = vmul.f32 %v1807_v28, %v9389_v36  ;;  %v166_v36 = vld [vmem:[%s14655_s29 + $0x78] sm:$0xff]  ;;  %v196_v28 = vld [vmem:[%s14656_s3 + $0x68] sm:$0xff] }
 0x1c5   :  { %v9456_v57 = vpop.xlane.xlu1 %1504  ;;  %v7819_v60 = vpop.eup %7818 }
 0x1c6   :  { %v1871_v59 = vsub.f32 %v195_v20, %v1839_v37  ;;  %v1808_v21 = vmul.f32 %v7819_v60, %v164_v2  ;;  %v198_v2 = vld [vmem:[%s14656_s3 + $0x78] sm:$0xff] }
 0x1c7   :  { %v9459_v17 = vpop.xlane.xlu0 %1211 }
 0x1c8   :  { %2241 = vperm.xlu0 %7787, %v1871_v59   ;;  %1958 = vperm.xlu1 %7788, %v1808_v21   ;;  %v1840_v0 = vmul.f32 %v1808_v21, %v9400_v40  ;;  %v197_v21 = vld [vmem:[%s14656_s3 + $0x70] sm:$0xff] }
 0x1ca   :  { %v9461_v38 = vpop.xlane.xlu1 %1509  ;;  %v1872_v60 = vsub.f32 %v196_v28, %v1840_v0 }
 0x1cb   :  { %v9463_v15 = vpop.xlane.xlu0 %1216 }
 0x1cd   :  { %v7821_v45 = vpop.eup %7820 }
 0x1ce   :  { %v9468_v32 = vpop.xlane.xlu1 %1514  ;;  %v1809_v11 = vmul.f32 %v7821_v45, %v165_v61 }
 0x1cf   :  { %v9473_v26 = vpop.xlane.xlu0 %1221 }
 0x1d0   :  { %v7823_v14 = vpop.eup %7822  ;;  %1963 = vperm.xlu0 %7787, %v1809_v11   ;;  %v1841_v61 = vmul.f32 %v1809_v11, %v9415_v8 }
 0x1d1   :  { %v1810_v20 = vmul.f32 %v7823_v14, %v166_v36 }
 0x1d2   :  { %v1873_v14 = vsub.f32 %v197_v21, %v1841_v61 }
 0x1d3   :  { %v9482_v37 = vpop.xlane.xlu1 %1519  ;;  %1968 = vperm.xlu1 %7788, %v1810_v20   ;;  %v1842_v59 = vmul.f32 %v1810_v20, %v9417_v43 }
 0x1d4   :  { %v9486_v40 = vpop.xlane.xlu0 %1226  ;;  %2246 = vperm.xlu0 %7787, %v1872_v60  }
 0x1d5   :  { %v1874_v45 = vsub.f32 %v198_v2, %v1842_v59 }
 0x1d7   :  { %v9491_v36 = vpop.xlane.xlu1 %1524  ;;  %2256 = vperm.xlu1 %7788, %v1874_v45  }
 0x1d8   :  { %v9493_v10 = vpop.xlane.xlu0 %1231  ;;  %2251 = vperm.xlu0 %7787, %v1873_v14  }
 0x1dc   :  { %v1530_v0 = vpop.xlane.xlu1 %1529 }
 0x1dd   :  { %v1237_v28 = vpop.xlane.xlu0 %1236  ;;  %v1626_v11 = vmul.f32 0.001953125, %v1530_v0 }
 0x1e0   :  { %v1535_v43 = vpop.xlane.xlu1 %1534 }
 0x1e1   :  { %v1242_v20 = vpop.xlane.xlu0 %1241  ;;  %v1627_v61 = vmul.f32 0.001953125, %v1535_v43 }
 0x1e2   :  { %v9495_v8 = vmul.f32 0.001953125, %v1242_v20 }
 0x1e4   :  { %v1658_v35 = vmul.f32 %v9495_v8, %v9495_v8 }
 0x1e5   :  { %v1540_v31 = vpop.xlane.xlu1 %1539 }
 0x1e6   :  { %v1690_v60 = vsub.f32 %v1626_v11, %v1658_v35  ;;  %v1247_v2 = vpop.xlane.xlu0 %1246  ;;  %v1628_v0 = vmul.f32 0.001953125, %v1540_v31 }
 0x1e7   :  { %v9499_v59 = vmul.f32 0.001953125, %v1247_v2 }
 0x1e8   :  { %v1722_v45 = vmax.f32 %v1690_v60, 0.0 }
 0x1e9   :  { %v1659_v21 = vmul.f32 %v9499_v59, %v9499_v59  ;;  %v1545_v14 = vpop.xlane.xlu1 %1544 }
 0x1ea   :  { %v1754_v4 = vadd.f32 1e-05, %v1722_v45  ;;  %v1252_v46 = vpop.xlane.xlu0 %1251  ;;  %v1629_v16 = vmul.f32 0.001953125, %v1545_v14 }
 0x1eb   :  { %v1691_v50 = vsub.f32 %v1627_v61, %v1659_v21  ;;  %v9503_v20 = vmul.f32 0.001953125, %v1252_v46 }
 0x1ec   :  { %7824 = vrsqrt.f32 %v1754_v4 }
 0x1ed   :  { %v1723_v29 = vmax.f32 %v1691_v50, 0.0  ;;  %v1660_v35 = vmul.f32 %v9503_v20, %v9503_v20 }
 0x1ee   :  { %v1550_v11 = vpop.xlane.xlu1 %1549 }
 0x1ef   :  { %v1755_v2 = vadd.f32 1e-05, %v1723_v29  ;;  %v1692_v27 = vsub.f32 %v1628_v0, %v1660_v35  ;;  %v1257_v60 = vpop.xlane.xlu0 %1256  ;;  %v1630_v21 = vmul.f32 0.001953125, %v1550_v11 }
 0x1f0   :  { %v9507_v43 = vmul.f32 0.001953125, %v1257_v60 }
 0x1f1   :  { %7826 = vrsqrt.f32 %v1755_v2  ;;  %v1724_v39 = vmax.f32 %v1692_v27, 0.0  ;;  %v174_v27 = vld [vmem:[%s14655_s29 + $0xb8] sm:$0xff] }
 0x1f2   :  { %v1661_v45 = vmul.f32 %v9507_v43, %v9507_v43  ;;  %v1555_v46 = vpop.xlane.xlu1 %1554 }
 0x1f3   :  { %v1756_v61 = vadd.f32 1e-05, %v1724_v39  ;;  %v1262_v4 = vpop.xlane.xlu0 %1261  ;;  %v1631_v11 = vmul.f32 0.001953125, %v1555_v46 }
 0x1f4   :  { %v1693_v31 = vsub.f32 %v1629_v16, %v1661_v45  ;;  %v9511_v50 = vmul.f32 0.001953125, %v1262_v4 }
 0x1f5   :  { %7828 = vrsqrt.f32 %v1756_v61 }
 0x1f6   :  { %v1725_v48 = vmax.f32 %v1693_v31, 0.0  ;;  %v1662_v29 = vmul.f32 %v9511_v50, %v9511_v50  ;;  %v1560_v0 = vpop.xlane.xlu1 %1559 }
 0x1f7   :  { %v1267_v14 = vpop.xlane.xlu0 %1266  ;;  %v1632_v46 = vmul.f32 0.001953125, %v1560_v0 }
 0x1f8   :  { %v1757_v35 = vadd.f32 1e-05, %v1725_v48  ;;  %v1694_v2 = vsub.f32 %v1630_v21, %v1662_v29  ;;  %v9518_v60 = vmul.f32 0.001953125, %v1267_v14  ;;  %v9530_v21 = vmul.f32 0.001953125, %v1237_v28 }
 0x1f9   :  { %v7825_v39 = vpop.eup %7824 }
 0x1fa   :  { %v9520_v16 = vmul.f32 %v7825_v39, %v174_v27  ;;  %7830 = vrsqrt.f32 %v1757_v35  ;;  %v1726_v45 = vmax.f32 %v1694_v2, 0.0  ;;  %v1663_v61 = vmul.f32 %v9518_v60, %v9518_v60  ;;  %v1565_v4 = vpop.xlane.xlu1 %1564 }
 0x1fb   :  { %v1272_v31 = vpop.xlane.xlu0 %1271  ;;  %v1657_v0 = vmul.f32 %v9530_v21, %v9530_v21 }
 0x1fc   :  { %v1758_v42 = vadd.f32 1e-05, %v1726_v45  ;;  %v9527_v48 = vmul.f32 0.001953125, %v1272_v31  ;;  %2008 = vperm.xlu1 %7788, %v9520_v16   ;;  %v1695_v29 = vsub.f32 %v1631_v11, %v1663_v61  ;;  %v207_v45 = vld [vmem:[%s14656_s3 + $0xc0] sm:$0xff]  ;;  %v176_v31 = vld [vmem:[%s14655_s29 + $0xc8] sm:$0xff] }
 0x1fe   :  { %v7827_v27 = vpop.eup %7826  ;;  %7832 = vrsqrt.f32 %v1758_v42  ;;  %v1664_v14 = vmul.f32 %v9527_v48, %v9527_v48  ;;  %v1727_v2 = vmax.f32 %v1695_v29, 0.0  ;;  %v9543_v42 = vmul.f32 0.001953125, %v9493_v10  ;;  %v1570_v61 = vpop.xlane.xlu1 %1569 }
 0x1ff   :  { %v1819_v35 = vmul.f32 %v7827_v27, %v175_v6  ;;  %v1277_v39 = vpop.xlane.xlu0 %1276  ;;  %v1633_v27 = vmul.f32 0.001953125, %v1565_v4  ;;  %v9557_v4 = vmul.f32 0.001953125, %v9486_v40 }
 0x200   :  { %v1696_v28 = vsub.f32 %v1632_v46, %v1664_v14  ;;  %v9540_v53 = vmul.f32 0.001953125, %v1277_v39  ;;  %v1759_v11 = vadd.f32 1e-05, %v1727_v2  ;;  %v1625_v46 = vmul.f32 0.001953125, %v9491_v36 }
 0x201   :  { %v1851_v6 = vmul.f32 %v1819_v35, %v9499_v59  ;;  %2013 = vperm.xlu1 %7788, %v1819_v35   ;;  %v1656_v35 = vmul.f32 %v9543_v42, %v9543_v42 }
 0x202   :  { %v7829_v29 = vpop.eup %7828  ;;  %v1728_v24 = vmax.f32 %v1696_v28, 0.0  ;;  %v1665_v41 = vmul.f32 %v9540_v53, %v9540_v53  ;;  %7834 = vrsqrt.f32 %v1759_v11  ;;  %v1689_v28 = vsub.f32 %v1625_v46, %v1657_v0 }
 0x203   :  { %v1883_v14 = vsub.f32 %v207_v45, %v1851_v6  ;;  %v1820_v39 = vmul.f32 %v7829_v29, %v176_v31  ;;  %v1282_v10 = vpop.xlane.xlu0 %1281  ;;  %v177_v45 = vld [vmem:[%s14655_s29 + $0xd0] sm:$0xff]  ;;  %v1624_v11 = vmul.f32 0.001953125, %v9482_v37  ;;  %v178_v37 = vld [vmem:[%s14655_s29 + $0xd8] sm:$0xff] }
 0x204   :  { %v1760_v59 = vadd.f32 1e-05, %v1728_v24  ;;  %v1697_v2 = vsub.f32 %v1633_v27, %v1665_v41  ;;  %v9554_v44 = vmul.f32 0.001953125, %v1282_v10  ;;  %v9565_v31 = vpop.permute.xlu1 %1893  ;;  %v1634_v41 = vmul.f32 0.001953125, %v1570_v61  ;;  %v209_v61 = vld [vmem:[%s14656_s3 + $0xd0] sm:$0xff] }
 0x205   :  { %v1852_v36 = vmul.f32 %v1820_v39, %v9503_v20  ;;  %2301 = vperm.xlu0 %7787, %v1883_v14   ;;  %2018 = vperm.xlu1 %7788, %v1820_v39   ;;  %14657 = vst [vmem:[#allocation124_spill] sm:$0xff] %v9565_v31  ;;  %v9571_v20 = vmul.f32 0.001953125, %v9473_v26  ;;  %v1655_v14 = vmul.f32 %v9557_v4, %v9557_v4  ;;  %v1721_v10 = vmax.f32 %v1689_v28, 0.0 }
 0x206   :  { %7836 = vrsqrt.f32 %v1760_v59  ;;  %v1729_v24 = vmax.f32 %v1697_v2, 0.0  ;;  %v1666_v40 = vmul.f32 %v9554_v44, %v9554_v44  ;;  %v1688_v39 = vsub.f32 %v1624_v11, %v1656_v35 }
 0x207   :  { %v7831_v6 = vpop.eup %7830  ;;  %v1884_v0 = vsub.f32 %v208_v23, %v1852_v36  ;;  %v9585_v35 = vmul.f32 0.001953125, %v9463_v15  ;;  %v1623_v28 = vmul.f32 0.001953125, %v9468_v32  ;;  %v1753_v11 = vadd.f32 1e-05, %v1721_v10  ;;  %v179_v32 = vld [vmem:[%s14655_s29 + $0xe0] sm:$0xff] }
 0x208   :  { %v1821_v29 = vmul.f32 %v7831_v6, %v177_v45  ;;  %v1761_v27 = vadd.f32 1e-05, %v1729_v24  ;;  %v1698_v46 = vsub.f32 %v1634_v41, %v1666_v40  ;;  %v1654_v45 = vmul.f32 %v9571_v20, %v9571_v20 }
 0x209   :  { %2306 = vperm.xlu0 %7787, %v1884_v0   ;;  %v9582_v59 = vpop.permute.xlu1 %1898  ;;  %v1720_v6 = vmax.f32 %v1688_v39, 0.0  ;;  %v210_v0 = vld [vmem:[%s14656_s3 + $0xd8] sm:$0xff]  ;;  %v1622_v15 = vmul.f32 0.001953125, %v9461_v38  ;;  %v1653_v39 = vmul.f32 %v9585_v35, %v9585_v35 }
 0x20a   :  { %v1853_v23 = vmul.f32 %v1821_v29, %v9507_v43  ;;  %7838 = vrsqrt.f32 %v1761_v27  ;;  %v1730_v26 = vmax.f32 %v1698_v46, 0.0  ;;  %2023 = vperm.xlu1 %7788, %v1821_v29   ;;  %v1687_v43 = vsub.f32 %v1623_v28, %v1655_v14  ;;  %v211_v28 = vld [vmem:[%s14656_s3 + $0xe0] sm:$0xff] }
 0x20b   :  { %v7833_v2 = vpop.eup %7832  ;;  %v9588_v36 = vpop.permute.xlu0 %2181  ;;  %v9603_v14 = vmul.f32 0.001953125, %v9459_v17  ;;  %v1686_v10 = vsub.f32 %v1622_v15, %v1654_v45  ;;  %v1621_v17 = vmul.f32 0.001953125, %v9456_v57  ;;  %v212_v15 = vld [vmem:[%s14656_s3 + $0xe8] sm:$0xff] }
 0x20c   :  { %14658 = vst [vmem:[#allocation125_spill] sm:$0xff] %v9588_v36  ;;  %v1885_v41 = vsub.f32 %v209_v61, %v1853_v23  ;;  %v1822_v24 = vmul.f32 %v7833_v2, %v178_v37  ;;  %v1762_v40 = vadd.f32 1e-05, %v1730_v26  ;;  %v1752_v37 = vadd.f32 1e-05, %v1720_v6  ;;  %v180_v26 = vld [vmem:[%s14655_s29 + $0xe8] sm:$0xff] }
 0x20d   :  { %v9613_v2 = vmul.f32 0.001953125, %v9437_v9 }
 0x20e   :  { %v1854_v29 = vmul.f32 %v1822_v24, %v9511_v50  ;;  %7840 = vrsqrt.f32 %v1762_v40  ;;  %2311 = vperm.xlu0 %7787, %v1885_v41   ;;  %2028 = vperm.xlu1 %7788, %v1822_v24   ;;  %v1719_v50 = vmax.f32 %v1687_v43, 0.0  ;;  %v1619_v24 = vmul.f32 0.001953125, %v9448_v52 }
 0x20f   :  { %v9600_v27 = vpop.permute.xlu0 %2186  ;;  %v7835_v46 = vpop.eup %7834  ;;  %7842 = vrsqrt.f32 %v1753_v11  ;;  %v1652_v40 = vmul.f32 %v9603_v14, %v9603_v14  ;;  %v1685_v43 = vsub.f32 %v1621_v17, %v1653_v39  ;;  %v1718_v11 = vmax.f32 %v1686_v10, 0.0  ;;  %v213_v17 = vld [vmem:[%s14656_s3 + $0xf0] sm:$0xff] }
 0x210   :  { %14659 = vst [vmem:[#allocation126_spill] sm:$0xff] %v9600_v27  ;;  %v1886_v38 = vsub.f32 %v210_v0, %v1854_v29  ;;  %v9607_v61 = vpop.permute.xlu1 %1903  ;;  %v1823_v23 = vmul.f32 %v7835_v46, %v179_v32  ;;  %v1751_v57 = vadd.f32 1e-05, %v1719_v50  ;;  %7844 = vrsqrt.f32 %v1752_v37  ;;  %v14688_v27 = vld [vmem:[#allocation36_spill] sm:$0xff] }
 0x211   :  { %v1651_v29 = vmul.f32 %v9613_v2, %v9613_v2  ;;  %v1620_v39 = vmul.f32 0.001953125, %v9442_v7 }
 0x212   :  { %2316 = vperm.xlu0 %7787, %v1886_v38   ;;  %v1855_v41 = vmul.f32 %v1823_v23, %v9518_v60  ;;  %2033 = vperm.xlu1 %7788, %v1823_v23   ;;  %v181_v60 = vld [vmem:[%s14655_s29 + $0xf0] sm:$0xff]  ;;  %v1717_v23 = vmax.f32 %v1685_v43, 0.0  ;;  %7846 = vrsqrt.f32 %v1751_v57  ;;  %v214_v57 = vld [vmem:[%s14656_s3 + $0xf8] sm:$0xff] }
 0x213   :  { %v7837_v45 = vpop.eup %7836  ;;  %v9623_v9 = vpop.permute.xlu0 %2191  ;;  %v1683_v10 = vsub.f32 %v1619_v24, %v1651_v29  ;;  %v1684_v37 = vsub.f32 %v1620_v39, %v1652_v40 }
 0x214   :  { %v1824_v6 = vmul.f32 %v7837_v45, %v180_v26  ;;  %v1887_v0 = vsub.f32 %v211_v28, %v1855_v41  ;;  %v9631_v52 = vpop.permute.xlu1 %1908  ;;  %v1750_v26 = vadd.f32 1e-05, %v1718_v11  ;;  %v1749_v11 = vadd.f32 1e-05, %v1717_v23 }
 0x215   :  { %v1715_v24 = vmax.f32 %v1683_v10, 0.0 }
 0x216   :  { %v1856_v32 = vmul.f32 %v1824_v6, %v9527_v48  ;;  %2321 = vperm.xlu0 %7787, %v1887_v0   ;;  %2038 = vperm.xlu1 %7788, %v1824_v6   ;;  %v182_v48 = vld [vmem:[%s14655_s29 + $0xf8] sm:$0xff]  ;;  %v1716_v6 = vmax.f32 %v1684_v37, 0.0  ;;  %7848 = vrsqrt.f32 %v1750_v26  ;;  %v172_v37 = vld [vmem:[%s14655_s29 + $0xa8] sm:$0xff] }
 0x217   :  { %v7839_v46 = vpop.eup %7838  ;;  %v1747_v29 = vadd.f32 1e-05, %v1715_v24  ;;  %7850 = vrsqrt.f32 %v1749_v11 }
 0x218   :  { %v1888_v38 = vsub.f32 %v212_v15, %v1856_v32  ;;  %v1825_v50 = vmul.f32 %v7839_v46, %v181_v60  ;;  %v9643_v28 = vpop.permute.xlu0 %2196  ;;  %v1748_v39 = vadd.f32 1e-05, %v1716_v6 }
 0x219   :  { %7852 = vrsqrt.f32 %v1747_v29 }
 0x21a   :  { %v1857_v7 = vmul.f32 %v1825_v50, %v9540_v53  ;;  %2326 = vperm.xlu0 %7787, %v1888_v38   ;;  %2043 = vperm.xlu1 %7788, %v1825_v50   ;;  %v9646_v41 = vpop.permute.xlu1 %1913  ;;  %v173_v53 = vld [vmem:[%s14655_s29 + $0xb0] sm:$0xff]  ;;  %v1850_v38 = vmul.f32 %v9520_v16, %v9495_v8  ;;  %7854 = vrsqrt.f32 %v1748_v39 }
 0x21b   :  { %v7841_v45 = vpop.eup %7840  ;;  %v169_v39 = vld [vmem:[%s14655_s29 + $0x90] sm:$0xff] }
 0x21c   :  { %v1889_v40 = vsub.f32 %v213_v17, %v1857_v7  ;;  %v1826_v43 = vmul.f32 %v7841_v45, %v182_v48  ;;  %v7843_v0 = vpop.eup %7842  ;;  %v171_v7 = vld [vmem:[%s14655_s29 + $0xa0] sm:$0xff]  ;;  %v205_v45 = vld [vmem:[%s14656_s3 + $0xb0] sm:$0xff] }
 0x21d   :  { %v1817_v10 = vmul.f32 %v7843_v0, %v173_v53  ;;  %v7845_v50 = vpop.eup %7844  ;;  %v204_v0 = vld [vmem:[%s14656_s3 + $0xa8] sm:$0xff] }
 0x21e   :  { %v1858_v15 = vmul.f32 %v1826_v43, %v9554_v44  ;;  %2331 = vperm.xlu0 %7787, %v1889_v40   ;;  %2048 = vperm.xlu1 %7788, %v1826_v43   ;;  %v9655_v60 = vpop.permute.xlu0 %2201  ;;  %v206_v44 = vld [vmem:[%s14656_s3 + $0xb8] sm:$0xff]  ;;  %v1816_v17 = vmul.f32 %v7845_v50, %v172_v37 }
 0x21f   :  { %v9657_v46 = vpop.permute.xlu1 %1918  ;;  %v1849_v8 = vmul.f32 %v1817_v10, %v9530_v21  ;;  %v1882_v16 = vsub.f32 %v206_v44, %v1850_v38  ;;  %v7847_v48 = vpop.eup %7846 }
 0x220   :  { %v1890_v32 = vsub.f32 %v214_v57, %v1858_v15  ;;  %v1815_v40 = vmul.f32 %v7847_v48, %v171_v7  ;;  %v1848_v43 = vmul.f32 %v1816_v17, %v9543_v42  ;;  %v170_v57 = vld [vmem:[%s14655_s29 + $0x98] sm:$0xff]  ;;  %v167_v7 = vld [vmem:[%s14655_s29 + $0x80] sm:$0xff] }
 0x221   :  { %v1881_v6 = vsub.f32 %v205_v45, %v1849_v8  ;;  %v168_v8 = vld [vmem:[%s14655_s29 + $0x88] sm:$0xff] }
 0x222   :  { %2003 = vperm.xlu1 %7788, %v1817_v10   ;;  %2336 = vperm.xlu0 %7787, %v1890_v32   ;;  %v1847_v15 = vmul.f32 %v1815_v40, %v9557_v4  ;;  %v1880_v29 = vsub.f32 %v204_v0, %v1848_v43  ;;  %v203_v10 = vld [vmem:[%s14656_s3 + $0xa0] sm:$0xff] }
 0x223   :  { %v9667_v23 = vpop.permute.xlu1 %1923  ;;  %v9669_v26 = vpop.permute.xlu0 %2206 }
 0x224   :  { %v7849_v21 = vpop.eup %7848  ;;  %v1879_v44 = vsub.f32 %v203_v10, %v1847_v15 }
 0x225   :  { %v1814_v53 = vmul.f32 %v7849_v21, %v170_v57  ;;  %v7851_v42 = vpop.eup %7850  ;;  %v201_v21 = vld [vmem:[%s14656_s3 + $0x90] sm:$0xff] }
 0x226   :  { %1998 = vperm.xlu1 %7788, %v1816_v17   ;;  %2296 = vperm.xlu0 %7787, %v1882_v16   ;;  %v7853_v50 = vpop.eup %7852  ;;  %v1813_v37 = vmul.f32 %v7851_v42, %v169_v39  ;;  %v202_v16 = vld [vmem:[%s14656_s3 + $0x98] sm:$0xff]  ;;  %v199_v42 = vld [vmem:[%s14656_s3 + $0x80] sm:$0xff] }
 0x227   :  { %v9678_v24 = vpop.permute.xlu0 %2211  ;;  %v1846_v4 = vmul.f32 %v1814_v53, %v9571_v20  ;;  %v7855_v17 = vpop.eup %7854 }
 0x228   :  { %v9681_v11 = vpop.permute.xlu1 %1928  ;;  %v1812_v20 = vmul.f32 %v7855_v17, %v168_v8  ;;  %v2511_v8 = vld [vmem:[%s14660_s6 + $0x60] sm:$0xff] }
 0x229   :  { %v1878_v43 = vsub.f32 %v202_v16, %v1846_v4  ;;  %v2468_v4 = vld [vmem:[%s14661_s7 + $0x8] sm:$0xff] }
 0x22a   :  { %1993 = vperm.xlu1 %7788, %v1815_v40   ;;  %2291 = vperm.xlu0 %7787, %v1881_v6   ;;  %v1845_v40 = vmul.f32 %v1813_v37, %v9585_v35  ;;  %v1811_v6 = vmul.f32 %v7853_v50, %v167_v7  ;;  %v200_v35 = vld [vmem:[%s14656_s3 + $0x88] sm:$0xff] }
 0x22b   :  { %2691 = vmatprep.mubr.f32.mxu0 %v2468_v4  ;;  %2852 = vmatprep.mubr.f32.mxu1 %v2468_v4  ;;  %v2512_v16 = vld [vmem:[%s14660_s6 + $0x68] sm:$0xff]  ;;  %v14667_v4 = vld [vmem:[#allocation6_spill] sm:$0xff] }
 0x22c   :  { %v9690_v32 = vpop.permute.xlu0 %2216  ;;  %v1877_v15 = vsub.f32 %v201_v21, %v1845_v40  ;;  %v2510_v40 = vld [vmem:[%s14660_s6 + $0x58] sm:$0xff]  ;;  %v2507_v21 = vld [vmem:[%s14660_s6 + $0x40] sm:$0xff] }
 0x22d   :  { %v9698_v38 = vpop.permute.xlu1 %1933 }
 0x22e   :  { %1988 = vperm.xlu1 %7788, %v1814_v53   ;;  %2286 = vperm.xlu0 %7787, %v1880_v29   ;;  %v1844_v53 = vmul.f32 %v1812_v20, %v9603_v14  ;;  %v1843_v29 = vmul.f32 %v1811_v6, %v9613_v2  ;;  %v2513_v14 = vld [vmem:[%s14660_s6 + $0x70] sm:$0xff]  ;;  %v2514_v2 = vld [vmem:[%s14660_s6 + $0x78] sm:$0xff] }
 0x230   :  { %v1876_v10 = vsub.f32 %v200_v35, %v1844_v53  ;;  %v1875_v50 = vsub.f32 %v199_v42, %v1843_v29  ;;  %v2508_v53 = vld [vmem:[%s14660_s6 + $0x48] sm:$0xff]  ;;  %v9775_v29 = vmul.f32 %v9582_v59, %v8506_v47  ;;  %v9779_v35 = vmul.f32 %v9607_v61, %v8531_v22 }
 0x231   :  { %v9707_v48 = vpop.permute.xlu0 %2221  ;;  %v9787_v42 = vmul.f32 %v9565_v31, %v8494_v33 }
 0x232   :  { %1983 = vperm.xlu1 %7788, %v1813_v37   ;;  %2281 = vperm.xlu0 %7787, %v1879_v44   ;;  %v9712_v45 = vpop.permute.xlu1 %1938  ;;  %14663 = vst [vmem:[#allocation128_spill] sm:$0xff] %v9775_v29  ;;  %v14683_v29 = vld [vmem:[#allocation31_spill] sm:$0xff] }
 0x233   :  { %14664 = vst [vmem:[#allocation129_spill] sm:$0xff] %v9787_v42 }
 0x236   :  { %1978 = vperm.xlu1 %7788, %v1812_v20   ;;  %2276 = vperm.xlu0 %7787, %v1878_v43   ;;  %v9718_v57 = vpop.permute.xlu0 %2226  ;;  %v9720_v0 = vpop.permute.xlu1 %1943  ;;  %v2509_v20 = vld [vmem:[%s14660_s6 + $0x50] sm:$0xff] }
 0x23a   :  { %1973 = vperm.xlu1 %7788, %v1811_v6   ;;  %2271 = vperm.xlu0 %7787, %v1877_v15   ;;  %v9730_v39 = vpop.permute.xlu0 %2231  ;;  %v9732_v37 = vpop.permute.xlu1 %1948  ;;  %v9765_v6 = vmul.f32 %v9565_v31, %v8492_v30  ;;  %v9783_v30 = vmul.f32 %v9582_v59, %v8510_v49  ;;  %v9803_v49 = vmul.f32 %v9607_v61, %v14667_v4  ;;  %v14672_v4 = vld [vmem:[#allocation23_spill] sm:$0xff] }
 0x23b   :  { %v9823_v56 = vmul.f32 %v9681_v11, %v14672_v4  ;;  %v9841_v4 = vmul.f32 %v9698_v38, %v14675_v62 }
 0x23c   :  { %14662 = vst [vmem:[#allocation127_spill] sm:$0xff] %v9765_v6  ;;  %v14682_v6 = vld [vmem:[#allocation56_spill] sm:$0xff] }
 0x23e   :  { %2261 = vperm.xlu1 %7788, %v1875_v50   ;;  %2266 = vperm.xlu0 %7787, %v1876_v10   ;;  %v9743_v44 = vpop.permute.xlu0 %2236  ;;  %v9791_v10 = vmul.f32 %v9631_v52, %v8538_v34  ;;  %v14665_v50 = vld [vmem:[#allocation11_spill] sm:$0xff]  ;;  %v14669_v34 = vld [vmem:[#allocation17_spill] sm:$0xff] }
 0x23f   :  { %v9745_v17 = vpop.permute.xlu1 %1953  ;;  %v9795_v47 = vmul.f32 %v9646_v41, %v14665_v50  ;;  %v14671_v50 = vld [vmem:[#allocation19_spill] sm:$0xff] }
 0x242   :  { %2619 = vperm.xlu1 %7788, %v2513_v14   ;;  %2624 = vperm.xlu0 %7787, %v2514_v2   ;;  %v14666_v2 = vld [vmem:[#allocation9_spill] sm:$0xff] }
 0x243   :  { %v9753_v7 = vpop.permute.xlu0 %2241  ;;  %v9761_v43 = vpop.permute.xlu1 %1958  ;;  %v9799_v22 = vmul.f32 %v9631_v52, %v14666_v2  ;;  %v9819_v2 = vmul.f32 %v9667_v23, %v14671_v50  ;;  %v9837_v50 = vmul.f32 %v9667_v23, %v14674_v18 }
 0x246   :  { %2609 = vperm.xlu1 %7788, %v2511_v8   ;;  %2614 = vperm.xlu0 %7787, %v2512_v16   ;;  %v14668_v8 = vld [vmem:[#allocation16_spill] sm:$0xff]  ;;  %v9811_v16 = vmul.f32 %v9657_v46, %v14669_v34  ;;  %v14673_v34 = vld [vmem:[#allocation25_spill] sm:$0xff] }
 0x247   :  { %v9807_v33 = vmul.f32 %v9657_v46, %v14668_v8 }
 0x24a   :  { %2599 = vperm.xlu1 %7788, %v2509_v20   ;;  %2604 = vperm.xlu0 %7787, %v2510_v40   ;;  %v14670_v20 = vld [vmem:[#allocation14_spill] sm:$0xff] }
 0x24b   :  { %v1964_v15 = vpop.permute.xlu0 %1963  ;;  %v9815_v40 = vmul.f32 %v9646_v41, %v14670_v20  ;;  %v9833_v20 = vmul.f32 %v9681_v11, %v14673_v34 }
 0x24c   :  { %v2107_v54 = vmul.f32 %v1964_v15, %v14679_v3  ;;  %v2108_v5 = vmul.f32 %v1964_v15, %v14681_v55  ;;  %v2110_v18 = vmul.f32 %v1964_v15, %v14682_v6  ;;  %v2504_v55 = vld [vmem:[%s14660_s6 + $0x28] sm:$0xff] }
 0x24e   :  { %v1969_v14 = vpop.permute.xlu1 %1968  ;;  %2589 = vperm.xlu1 %7788, %v2507_v21   ;;  %2594 = vperm.xlu0 %7787, %v2508_v53   ;;  %v2505_v21 = vld [vmem:[%s14660_s6 + $0x30] sm:$0xff]  ;;  %v2506_v53 = vld [vmem:[%s14660_s6 + $0x38] sm:$0xff] }
 0x24f   :  { %v2247_v8 = vpop.permute.xlu0 %2246  ;;  %v2111_v19 = vmul.f32 %v1969_v14, %v14676_v12  ;;  %v2112_v58 = vmul.f32 %v1969_v14, %v14677_v25  ;;  %v2114_v51 = vmul.f32 %v1969_v14, %v14678_v63  ;;  %v2113_v13 = vmul.f32 %v1969_v14, %v14680_v1  ;;  %v14684_v25 = vld [vmem:[#allocation54_spill] sm:$0xff]  ;;  %v14685_v14 = vld [vmem:[#allocation29_spill] sm:$0xff] }
 0x250   :  { %v9852_v12 = vmul.f32 %v9712_v45, %v14683_v29  ;;  %v2109_v63 = vmul.f32 %v1964_v15, %v14684_v25  ;;  %v2503_v1 = vld [vmem:[%s14660_s6 + $0x20] sm:$0xff]  ;;  %v14687_v25 = vld [vmem:[#allocation51_spill] sm:$0xff] }
 0x251   :  { %v2106_v31 = vmul.f32 %v9761_v43, %v14687_v25  ;;  %v14695_v25 = vld [vmem:[#allocation46_spill] sm:$0xff] }
 0x252   :  { %v2257_v34 = vpop.permute.xlu1 %2256  ;;  %2579 = vperm.xlu1 %7788, %v2505_v21   ;;  %2584 = vperm.xlu0 %7787, %v2506_v53   ;;  %v14686_v21 = vld [vmem:[#allocation50_spill] sm:$0xff] }
 0x253   :  { %v2400_v36 = vadd.f32 %v2257_v34, %v2112_v58  ;;  %v2402_v62 = vadd.f32 %v2257_v34, %v2114_v51  ;;  %v2399_v42 = vadd.f32 %v2257_v34, %v2111_v19  ;;  %v2252_v3 = vpop.permute.xlu0 %2251  ;;  %v2401_v6 = vadd.f32 %v2257_v34, %v2113_v13  ;;  %v14689_v34 = vld [vmem:[#allocation48_spill] sm:$0xff] }
 0x254   :  { %v9863_v51 = vmul.f32 %v9698_v38, %v14685_v14  ;;  %v2396_v19 = vadd.f32 %v2252_v3, %v2108_v5  ;;  %v2398_v58 = vadd.f32 %v2252_v3, %v2110_v18  ;;  %v2395_v29 = vadd.f32 %v2252_v3, %v2107_v54  ;;  %v14690_v5 = vld [vmem:[#allocation33_spill] sm:$0xff]  ;;  %v2501_v18 = vld [vmem:[%s14660_s6 + $0x10] sm:$0xff] }
 0x255   :  { %2627 = vmatprep.subr.mxu0 %v2400_v36  ;;  %2788 = vmatprep.subr.mxu1 %v2402_v62  ;;  %v2397_v15 = vadd.f32 %v2252_v3, %v2109_v63  ;;  %v2104_v53 = vmul.f32 %v9761_v43, %v14686_v21  ;;  %v2091_v13 = vmul.f32 %v9720_v0, %v14688_v27  ;;  %v14691_v36 = vld [vmem:[#allocation49_spill] sm:$0xff] }
 0x256   :  { %2628 = vmatpush1.msra.mxu0 %v2399_v42  ;;  %2789 = vmatpush1.msra.mxu1 %v2401_v6  ;;  %v2103_v14 = vmul.f32 %v9761_v43, %v14689_v34  ;;  %v2088_v54 = vmul.f32 %v9712_v45, %v14690_v5  ;;  %v2105_v42 = vmul.f32 %v9761_v43, %v14691_v36  ;;  %v2502_v62 = vld [vmem:[%s14660_s6 + $0x18] sm:$0xff]  ;;  %v14694_v6 = vld [vmem:[#allocation47_spill] sm:$0xff]  ;;  %v2499_v5 = vld [vmem:[%s14660_s6] sm:$0xff] }
 0x257   :  { %2569 = vperm.xlu1 %7788, %v2503_v1   ;;  %2574 = vperm.xlu0 %7787, %v2504_v55   ;;  %v2392_v27 = vadd.f32 %v2247_v8, %v2104_v53  ;;  %v2394_v63 = vadd.f32 %v2247_v8, %v2106_v31  ;;  %v14692_v1 = vld [vmem:[#allocation44_spill] sm:$0xff]  ;;  %v14693_v3 = vld [vmem:[#allocation45_spill] sm:$0xff]  ;;  %v2102_v21 = vmul.f32 %v9745_v17, %v14694_v6  ;;  %v14697_v36 = vld [vmem:[#allocation43_spill] sm:$0xff] }
 0x258   :  { %2629 = vmatprep.subr.mxu0 %v2396_v19  ;;  %2790 = vmatprep.subr.mxu1 %v2398_v58  ;;  %v2099_v55 = vmul.f32 %v9745_v17, %v14692_v1  ;;  %v2100_v43 = vmul.f32 %v9745_v17, %v14693_v3  ;;  %v2101_v34 = vmul.f32 %v9745_v17, %v14695_v25  ;;  %v2500_v17 = vld [vmem:[%s14660_s6 + $0x8] sm:$0xff]  ;;  %v14700_v1 = vld [vmem:[#allocation37_spill] sm:$0xff] }
 0x259   :  { %2630 = vmatpush1.msra.mxu0 %v2395_v29  ;;  %2791 = vmatpush1.msra.mxu1 %v2397_v15  ;;  %v2391_v19 = vadd.f32 %v2247_v8, %v2103_v14  ;;  %v2393_v58 = vadd.f32 %v2247_v8, %v2105_v42  ;;  %v2390_v29 = vadd.f32 %v9753_v7, %v2102_v21  ;;  %v14696_v15 = vld [vmem:[#allocation42_spill] sm:$0xff] }
 0x25a   :  { %2631 = vmatprep.subr.mxu0 %v2392_v27  ;;  %2792 = vmatprep.subr.mxu1 %v2394_v63  ;;  %v2388_v31 = vadd.f32 %v9753_v7, %v2100_v43  ;;  %v2096_v53 = vmul.f32 %v9732_v37, %v14696_v15  ;;  %v2387_v8 = vadd.f32 %v9753_v7, %v2099_v55  ;;  %v14699_v27 = vld [vmem:[#allocation41_spill] sm:$0xff]  ;;  %v14701_v43 = vld [vmem:[#allocation40_spill] sm:$0xff]  ;;  %v14702_v21 = vld [vmem:[#allocation38_spill] sm:$0xff] }
 0x25b   :  { %2559 = vperm.xlu1 %7788, %v2501_v18   ;;  %2564 = vperm.xlu0 %7787, %v2502_v62   ;;  %v2389_v14 = vadd.f32 %v9753_v7, %v2101_v34  ;;  %v2098_v42 = vmul.f32 %v9732_v37, %v14697_v36  ;;  %v14698_v18 = vld [vmem:[#allocation39_spill] sm:$0xff]  ;;  %v2097_v63 = vmul.f32 %v9732_v37, %v14699_v27  ;;  %v14704_v15 = vld [vmem:[#allocation34_spill] sm:$0xff] }
 0x25c   :  { %2632 = vmatpush1.msra.mxu0 %v2391_v19  ;;  %2793 = vmatpush1.msra.mxu1 %v2393_v58  ;;  %v2095_v62 = vmul.f32 %v9732_v37, %v14698_v18  ;;  %v2092_v3 = vmul.f32 %v9720_v0, %v14700_v1  ;;  %v2384_v55 = vadd.f32 %v9743_v44, %v2096_v53  ;;  %v14706_v36 = vld [vmem:[#allocation30_spill] sm:$0xff]  ;;  %v14707_v18 = vld [vmem:[#allocation28_spill] sm:$0xff] }
 0x25d   :  { %2633 = vmatprep.subr.mxu0 %v2388_v31  ;;  %2794 = vmatprep.subr.mxu1 %v2390_v29  ;;  %v2386_v7 = vadd.f32 %v9743_v44, %v2098_v42  ;;  %v2094_v6 = vmul.f32 %v9720_v0, %v14701_v43  ;;  %v2093_v25 = vmul.f32 %v9720_v0, %v14702_v21  ;;  %v14703_v31 = vld [vmem:[#allocation35_spill] sm:$0xff]  ;;  %v14708_v27 = vld [vmem:[#allocation26_spill] sm:$0xff]  ;;  %v14709_v1 = vld [vmem:[#allocation24_spill] sm:$0xff] }
 0x25e   :  { %2634 = vmatpush1.msra.mxu0 %v2387_v8  ;;  %2795 = vmatpush1.msra.mxu1 %v2389_v14  ;;  %v2383_v37 = vadd.f32 %v9743_v44, %v2095_v62  ;;  %v2385_v34 = vadd.f32 %v9743_v44, %v2097_v63  ;;  %v2380_v19 = vadd.f32 %v9730_v39, %v2092_v3  ;;  %v14705_v8 = vld [vmem:[#allocation32_spill] sm:$0xff]  ;;  %v14712_v21 = vld [vmem:[#allocation18_spill] sm:$0xff] }
 0x25f   :  { %2549 = vperm.xlu1 %7788, %v2499_v5   ;;  %2554 = vperm.xlu0 %7787, %v2500_v17   ;;  %v2382_v58 = vadd.f32 %v9730_v39, %v2094_v6  ;;  %v2090_v29 = vmul.f32 %v9712_v45, %v14703_v31  ;;  %v2089_v53 = vmul.f32 %v9712_v45, %v14704_v15  ;;  %v14711_v43 = vld [vmem:[#allocation20_spill] sm:$0xff]  ;;  %v14716_v15 = vld [vmem:[#allocation10_spill] sm:$0xff] }
 0x260   :  { %2635 = vmatprep.subr.mxu0 %v2384_v55  ;;  %2796 = vmatprep.subr.mxu1 %v2386_v7  ;;  %v2379_v0 = vadd.f32 %v9730_v39, %v2091_v13  ;;  %v2381_v5 = vadd.f32 %v9730_v39, %v2093_v25  ;;  %v2376_v44 = vadd.f32 %v9718_v57, %v2088_v54  ;;  %v14710_v55 = vld [vmem:[#allocation21_spill] sm:$0xff]  ;;  %v14715_v31 = vld [vmem:[#allocation12_spill] sm:$0xff] }
 0x261   :  { %2636 = vmatpush1.msra.mxu0 %v2383_v37  ;;  %2797 = vmatpush1.msra.mxu1 %v2385_v34  ;;  %v2378_v17 = vadd.f32 %v9718_v57, %v2090_v29  ;;  %v2086_v14 = vmul.f32 %v9698_v38, %v14705_v8  ;;  %v2085_v42 = vmul.f32 %v9698_v38, %v14706_v36  ;;  %v14713_v37 = vld [vmem:[#allocation15_spill] sm:$0xff]  ;;  %v14719_v8 = vld [vmem:[#allocation5_spill] sm:$0xff]  ;;  %v14720_v36 = vld [vmem:[#allocation4_spill] sm:$0xff] }
 0x262   :  { %2637 = vmatprep.subr.mxu0 %v2380_v19  ;;  %2798 = vmatprep.subr.mxu1 %v2382_v58  ;;  %v2375_v45 = vadd.f32 %v9718_v57, %v9852_v12  ;;  %v2377_v13 = vadd.f32 %v9718_v57, %v2089_v53  ;;  %v2372_v39 = vadd.f32 %v9707_v48, %v9863_v51  ;;  %v14714_v19 = vld [vmem:[#allocation13_spill] sm:$0xff] }
 0x263   :  { %2638 = vmatpush1.msra.mxu0 %v2379_v0  ;;  %2799 = vmatpush1.msra.mxu1 %v2381_v5  ;;  %v2374_v54 = vadd.f32 %v9707_v48, %v2086_v14  ;;  %v2082_v62 = vmul.f32 %v9681_v11, %v14707_v18  ;;  %v2081_v38 = vmul.f32 %v9681_v11, %v14708_v27  ;;  %v14717_v0 = vld [vmem:[#allocation8_spill] sm:$0xff]  ;;  %v14724_v18 = vld [vmem:[#allocation2_spill] sm:$0xff]  ;;  %v14726_v27 = vld [vmem:[#allocation129_spill] sm:$0xff] }
 0x264   :  { %2639 = vmatprep.subr.mxu0 %v2376_v44  ;;  %2800 = vmatprep.subr.mxu1 %v2378_v17  ;;  %v2371_v12 = vadd.f32 %v9707_v48, %v9841_v4  ;;  %v2373_v57 = vadd.f32 %v9707_v48, %v2085_v42  ;;  %v2368_v51 = vadd.f32 %v9690_v32, %v9833_v20  ;;  %v14718_v44 = vld [vmem:[#allocation7_spill] sm:$0xff]  ;;  %v14721_v42 = vld [vmem:[#allocation126_spill] sm:$0xff] }
 0x265   :  { %2640 = vmatpush1.msra.mxu0 %v2375_v45  ;;  %2801 = vmatpush1.msra.mxu1 %v2377_v13  ;;  %v2370_v63 = vadd.f32 %v9690_v32, %v2082_v62  ;;  %v2078_v3 = vmul.f32 %v9667_v23, %v14709_v1  ;;  %v2077_v11 = vmul.f32 %v9667_v23, %v14710_v55  ;;  %v14722_v13 = vld [vmem:[#allocation3_spill] sm:$0xff]  ;;  %v14725_v62 = vld [vmem:[#allocation128_spill] sm:$0xff] }
 0x266   :  { %2641 = vmatprep.subr.mxu0 %v2372_v39  ;;  %2802 = vmatprep.subr.mxu1 %v2374_v54  ;;  %v2367_v4 = vadd.f32 %v9690_v32, %v9823_v56  ;;  %v2369_v48 = vadd.f32 %v9690_v32, %v2081_v38  ;;  %v2364_v20 = vadd.f32 %v9678_v24, %v9837_v50  ;;  %v14723_v39 = vld [vmem:[#allocation124_spill] sm:$0xff]  ;;  %v14727_v38 = vld [vmem:[#allocation125_spill] sm:$0xff] }
 0x267   :  { %2642 = vmatpush1.msra.mxu0 %v2371_v12  ;;  %2803 = vmatpush1.msra.mxu1 %v2373_v57  ;;  %v2366_v7 = vadd.f32 %v9678_v24, %v2078_v3  ;;  %v2074_v6 = vmul.f32 %v9657_v46, %v14711_v43  ;;  %v2073_v23 = vmul.f32 %v9657_v46, %v14712_v21  ;;  %v14728_v57 = vld [vmem:[#allocation127_spill] sm:$0xff] }
 0x268   :  { %2643 = vmatprep.subr.mxu0 %v2368_v51  ;;  %2804 = vmatprep.subr.mxu1 %v2370_v63  ;;  %v2363_v56 = vadd.f32 %v9678_v24, %v9819_v2  ;;  %v2365_v32 = vadd.f32 %v9678_v24, %v2077_v11  ;;  %v2360_v50 = vadd.f32 %v9669_v26, %v9811_v16 }
 0x269   :  { %2644 = vmatpush1.msra.mxu0 %v2367_v4  ;;  %2805 = vmatpush1.msra.mxu1 %v2369_v48  ;;  %v2362_v25 = vadd.f32 %v9669_v26, %v2074_v6  ;;  %v2070_v34 = vmul.f32 %v9646_v41, %v14713_v37  ;;  %v2069_v46 = vmul.f32 %v9646_v41, %v14714_v19  ;;  %v14730_v37 = vld [vmem:[#allocation90_spill] sm:$0xff]  ;;  %v14731_v19 = vld [vmem:[#allocation89_spill] sm:$0xff] }
 0x26a   :  { %2645 = vmatprep.subr.mxu0 %v2364_v20  ;;  %2806 = vmatprep.subr.mxu1 %v2366_v7  ;;  %v2359_v2 = vadd.f32 %v9669_v26, %v9807_v33  ;;  %v2361_v24 = vadd.f32 %v9669_v26, %v2073_v23  ;;  %v2356_v16 = vadd.f32 %v9655_v60, %v9815_v40 }
 0x26b   :  { %2646 = vmatpush1.msra.mxu0 %v2363_v56  ;;  %2807 = vmatpush1.msra.mxu1 %v2365_v32  ;;  %v2358_v58 = vadd.f32 %v9655_v60, %v2070_v34  ;;  %v2066_v29 = vmul.f32 %v9631_v52, %v14715_v31  ;;  %v2065_v41 = vmul.f32 %v9631_v52, %v14716_v15  ;;  %v14734_v31 = vld [vmem:[#allocation93_spill] sm:$0xff]  ;;  %v14735_v15 = vld [vmem:[#allocation94_spill] sm:$0xff] }
 0x26c   :  { %2647 = vmatprep.subr.mxu0 %v2360_v50  ;;  %2808 = vmatprep.subr.mxu1 %v2362_v25  ;;  %v2355_v33 = vadd.f32 %v9655_v60, %v9795_v47  ;;  %v2357_v26 = vadd.f32 %v9655_v60, %v2069_v46  ;;  %v2352_v40 = vadd.f32 %v9643_v28, %v9799_v22  ;;  %v14729_v50 = vld [vmem:[#allocation88_spill] sm:$0xff] }
 0x26d   :  { %2648 = vmatpush1.msra.mxu0 %v2359_v2  ;;  %2809 = vmatpush1.msra.mxu1 %v2361_v24  ;;  %v2354_v53 = vadd.f32 %v9643_v28, %v2066_v29  ;;  %v2062_v5 = vmul.f32 %v9607_v61, %v14717_v0  ;;  %v2061_v52 = vmul.f32 %v9607_v61, %v14718_v44  ;;  %v14732_v2 = vld [vmem:[#allocation91_spill] sm:$0xff]  ;;  %v14738_v0 = vld [vmem:[#allocation98_spill] sm:$0xff]  ;;  %v14739_v44 = vld [vmem:[#allocation97_spill] sm:$0xff] }
 0x26e   :  { %2649 = vmatprep.subr.mxu0 %v2356_v16  ;;  %2810 = vmatprep.subr.mxu1 %v2358_v58  ;;  %v2351_v47 = vadd.f32 %v9643_v28, %v9791_v10  ;;  %v2353_v60 = vadd.f32 %v9643_v28, %v2065_v41  ;;  %v2348_v22 = vadd.f32 %v9623_v9, %v9803_v49  ;;  %v14733_v16 = vld [vmem:[#allocation92_spill] sm:$0xff] }
 0x26f   :  { %2650 = vmatpush1.msra.mxu0 %v2355_v33  ;;  %2811 = vmatpush1.msra.mxu1 %v2357_v26  ;;  %v2350_v17 = vadd.f32 %v9623_v9, %v2062_v5  ;;  %v2058_v14 = vmul.f32 %v9582_v59, %v14719_v8  ;;  %v2057_v61 = vmul.f32 %v9582_v59, %v14720_v36  ;;  %v14736_v33 = vld [vmem:[#allocation95_spill] sm:$0xff] }
 0x270   :  { %2651 = vmatprep.subr.mxu0 %v2352_v40  ;;  %2812 = vmatprep.subr.mxu1 %v2354_v53  ;;  %v2347_v10 = vadd.f32 %v9623_v9, %v9779_v35  ;;  %v2349_v28 = vadd.f32 %v9623_v9, %v2061_v52  ;;  %v2344_v49 = vadd.f32 %v14721_v42, %v9783_v30  ;;  %v14737_v40 = vld [vmem:[#allocation96_spill] sm:$0xff] }
 0x271   :  { %2652 = vmatpush1.msra.mxu0 %v2351_v47  ;;  %2813 = vmatpush1.msra.mxu1 %v2353_v60  ;;  %v2346_v45 = vadd.f32 %v14721_v42, %v2058_v14  ;;  %v2054_v54 = vmul.f32 %v14723_v39, %v14722_v13  ;;  %v2053_v59 = vmul.f32 %v14723_v39, %v14724_v18  ;;  %v14740_v47 = vld [vmem:[#allocation99_spill] sm:$0xff]  ;;  %v14742_v39 = vld [vmem:[#allocation104_spill] sm:$0xff]  ;;  %v14743_v18 = vld [vmem:[#allocation105_spill] sm:$0xff] }
 0x272   :  { %2653 = vmatprep.subr.mxu0 %v2348_v22  ;;  %2814 = vmatprep.subr.mxu1 %v2350_v17  ;;  %v2343_v35 = vadd.f32 %v14721_v42, %v14725_v62  ;;  %v2345_v9 = vadd.f32 %v14721_v42, %v2057_v61  ;;  %v2340_v30 = vadd.f32 %v14727_v38, %v14726_v27  ;;  %v14744_v62 = vld [vmem:[#allocation102_spill] sm:$0xff] }
 0x273   :  { %2654 = vmatpush1.msra.mxu0 %v2347_v10  ;;  %2815 = vmatpush1.msra.mxu1 %v2349_v28  ;;  %v2342_v12 = vadd.f32 %v14727_v38, %v2054_v54  ;;  %v2339_v51 = vadd.f32 %v14727_v38, %v14728_v57  ;;  %v2341_v63 = vadd.f32 %v14727_v38, %v2053_v59  ;;  %v14746_v38 = vld [vmem:[#allocation121_spill] sm:$0xff] }
 0x274   :  { %2655 = vmatprep.subr.mxu0 %v2344_v49  ;;  %2816 = vmatprep.subr.mxu1 %v2346_v45  ;;  %v14741_v45 = vld [vmem:[#allocation100_spill] sm:$0xff] }
 0x275   :  { %2656 = vmatpush1.msra.mxu0 %v2343_v35  ;;  %2817 = vmatpush1.msra.mxu1 %v2345_v9  ;;  %v14745_v9 = vld [vmem:[#allocation108_spill] sm:$0xff] }
 0x276   :  { %2657 = vmatprep.subr.mxu0 %v2340_v30  ;;  %2818 = vmatprep.subr.mxu1 %v2342_v12  ;;  %v14747_v12 = vld [vmem:[#allocation123_spill] sm:$0xff] }
 0x277   :  { %v2009_v1 = vpop.permute.xlu1 %2008  ;;  %2658 = vmatpush1.msra.mxu0 %v2339_v51  ;;  %2819 = vmatpush1.msra.mxu1 %v2341_v63  ;;  %v14748_v51 = vld [vmem:[#allocation110_spill] sm:$0xff] }
 0x278   :  { %v10037_v25 = vmul.f32 %v2009_v1, %v14729_v50  ;;  %v10040_v34 = vmul.f32 %v2009_v1, %v14730_v37  ;;  %v10043_v46 = vmul.f32 %v2009_v1, %v14731_v19  ;;  %v10046_v24 = vmul.f32 %v2009_v1, %v14732_v2  ;;  %v14749_v1 = vld [vmem:[#allocation112_spill] sm:$0xff]  ;;  %v14752_v2 = vld [vmem:[#allocation113_spill] sm:$0xff] }
 0x27c   :  { %v2014_v3 = vpop.permute.xlu1 %2013 }
 0x27d   :  { %v2147_v58 = vmul.f32 %v2014_v3, %v14733_v16  ;;  %v2149_v29 = vmul.f32 %v2014_v3, %v14734_v31  ;;  %v2148_v41 = vmul.f32 %v2014_v3, %v14735_v15  ;;  %v2150_v26 = vmul.f32 %v2014_v3, %v14736_v33 }
 0x280   :  { %v2019_v55 = vpop.permute.xlu1 %2018  ;;  %v2302_v11 = vpop.permute.xlu0 %2301 }
 0x281   :  { %v2151_v53 = vmul.f32 %v2019_v55, %v14737_v40  ;;  %v2153_v5 = vmul.f32 %v2019_v55, %v14738_v0  ;;  %v2152_v52 = vmul.f32 %v2019_v55, %v14739_v44  ;;  %v2154_v60 = vmul.f32 %v2019_v55, %v14740_v47  ;;  %v14750_v55 = vld [vmem:[#allocation120_spill] sm:$0xff] }
 0x282   :  { %v10056_v8 = vadd.f32 %v2302_v11, %v2148_v41  ;;  %v10058_v14 = vadd.f32 %v2302_v11, %v2150_v26  ;;  %v10060_v36 = vadd.f32 %v2302_v11, %v2147_v58  ;;  %v10062_v61 = vadd.f32 %v2302_v11, %v2149_v29  ;;  %v14753_v29 = vld [vmem:[#allocation117_spill] sm:$0xff]  ;;  %v14754_v41 = vld [vmem:[#allocation119_spill] sm:$0xff]  ;;  %v14755_v26 = vld [vmem:[#allocation116_spill] sm:$0xff] }
 0x284   :  { %v2307_v4 = vpop.permute.xlu0 %2306 }
 0x285   :  { %v10022_v48 = vpop.permute.xlu1 %2023  ;;  %v10064_v10 = vadd.f32 %v2307_v4, %v2152_v52  ;;  %v10066_v28 = vadd.f32 %v2307_v4, %v2154_v60  ;;  %v10068_v42 = vadd.f32 %v2307_v4, %v2151_v53  ;;  %v10070_v49 = vadd.f32 %v2307_v4, %v2153_v5  ;;  %v14751_v4 = vld [vmem:[#allocation122_spill] sm:$0xff]  ;;  %v14757_v60 = vld [vmem:[#allocation115_spill] sm:$0xff] }
 0x286   :  { %v10074_v13 = vmul.f32 %v10022_v48, %v14741_v45  ;;  %v10084_v35 = vmul.f32 %v10022_v48, %v14744_v62  ;;  %v14756_v53 = vld [vmem:[#allocation118_spill] sm:$0xff] }
 0x287   :  { %v14758_v45 = vld [vmem:[#allocation114_spill] sm:$0xff] }
 0x289   :  { %v10024_v20 = vpop.permute.xlu1 %2028  ;;  %v10026_v7 = vpop.permute.xlu0 %2311 }
 0x28a   :  { %v10078_v54 = vmul.f32 %v10024_v20, %v14742_v39  ;;  %v2160_v59 = vmul.f32 %v10024_v20, %v14743_v18 }
 0x28d   :  { %v10028_v43 = vpop.permute.xlu0 %2316  ;;  %v10030_v6 = vpop.permute.xlu1 %2033 }
 0x28e   :  { %v2163_v27 = vmul.f32 %v10030_v6, %v14745_v9  ;;  %v2164_v63 = vmul.f32 %v10030_v6, %v14748_v51  ;;  %v14760_v51 = vld [vmem:[#allocation109_spill] sm:$0xff] }
 0x291   :  { %v2039_v21 = vpop.permute.xlu1 %2038  ;;  %v10032_v23 = vpop.permute.xlu0 %2321 }
 0x292   :  { %v2167_v3 = vmul.f32 %v2039_v21, %v14749_v1  ;;  %v2168_v16 = vmul.f32 %v2039_v21, %v14752_v2  ;;  %v2169_v39 = vmul.f32 %v2039_v21, %v14758_v45  ;;  %v2165_v1 = vmul.f32 %v10030_v6, %v14760_v51 }
 0x295   :  { %v2044_v56 = vpop.permute.xlu1 %2043  ;;  %v10034_v32 = vpop.permute.xlu0 %2326 }
 0x296   :  { %v2172_v15 = vmul.f32 %v2044_v56, %v14753_v29  ;;  %v2174_v33 = vmul.f32 %v2044_v56, %v14754_v41  ;;  %v2171_v40 = vmul.f32 %v2044_v56, %v14755_v26  ;;  %v2173_v0 = vmul.f32 %v2044_v56, %v14756_v53  ;;  %v14765_v26 = vld [vmem:[#allocation83_spill] sm:$0xff] }
 0x297   :  { %v2456_v56 = vadd.f32 %v10034_v32, %v2168_v16  ;;  %v2447_v41 = vadd.f32 %v10028_v43, %v10078_v54 }
 0x299   :  { %v2049_v22 = vpop.permute.xlu1 %2048  ;;  %v2332_v17 = vpop.permute.xlu0 %2331 }
 0x29a   :  { %v2176_v30 = vmul.f32 %v2049_v22, %v14746_v38  ;;  %v2178_v57 = vmul.f32 %v2049_v22, %v14747_v12  ;;  %v2175_v11 = vmul.f32 %v2049_v22, %v14750_v55  ;;  %v2177_v50 = vmul.f32 %v2049_v22, %v14751_v4  ;;  %v14759_v12 = vld [vmem:[#allocation111_spill] sm:$0xff] }
 0x29b   :  { %v2460_v52 = vadd.f32 %v2332_v17, %v2172_v15  ;;  %v2462_v47 = vadd.f32 %v2332_v17, %v2174_v33  ;;  %v2170_v22 = vmul.f32 %v2039_v21, %v14757_v60  ;;  %v2459_v9 = vadd.f32 %v2332_v17, %v2171_v40  ;;  %v14761_v4 = vld [vmem:[#allocation107_spill] sm:$0xff]  ;;  %v14764_v15 = vld [vmem:[#allocation101_spill] sm:$0xff]  ;;  %v14770_v60 = vld [vmem:[#allocation82_spill] sm:$0xff] }
 0x29c   :  { %v2461_v38 = vadd.f32 %v2332_v17, %v2173_v0  ;;  %v2455_v21 = vadd.f32 %v10034_v32, %v2167_v3  ;;  %v2457_v55 = vadd.f32 %v10034_v32, %v2169_v39  ;;  %v2452_v17 = vadd.f32 %v10032_v23, %v2164_v63  ;;  %v14766_v40 = vld [vmem:[#allocation85_spill] sm:$0xff] }
 0x29d   :  { %v10095_v37 = vpop.permute.xlu1 %2003  ;;  %v2337_v19 = vpop.permute.xlu0 %2336  ;;  %v2451_v3 = vadd.f32 %v10032_v23, %v2163_v27  ;;  %v2448_v63 = vadd.f32 %v10028_v43, %v2160_v59  ;;  %v2443_v33 = vadd.f32 %v10026_v7, %v10074_v13 }
 0x29e   :  { %v2464_v58 = vadd.f32 %v2337_v19, %v2176_v30  ;;  %v2466_v31 = vadd.f32 %v2337_v19, %v2178_v57  ;;  %v2463_v5 = vadd.f32 %v2337_v19, %v2175_v11  ;;  %v2465_v44 = vadd.f32 %v2337_v19, %v2177_v50  ;;  %v14762_v19 = vld [vmem:[#allocation106_spill] sm:$0xff] }
 0x29f   :  { %v2458_v30 = vadd.f32 %v10034_v32, %v2170_v22  ;;  %v2166_v57 = vmul.f32 %v10030_v6, %v14759_v12  ;;  %v2162_v50 = vmul.f32 %v10024_v20, %v14761_v4  ;;  %v2161_v2 = vmul.f32 %v10024_v20, %v14762_v19  ;;  %v14773_v12 = vld [vmem:[#allocation77_spill] sm:$0xff] }
 0x2a0   :  { %2659 = vmatprep.subr.mxu0 %v2464_v58  ;;  %2820 = vmatprep.subr.mxu1 %v2466_v31  ;;  %v2453_v32 = vadd.f32 %v10032_v23, %v2165_v1  ;;  %v14763_v31 = vld [vmem:[#allocation103_spill] sm:$0xff]  ;;  %v2157_v20 = vmul.f32 %v10022_v48, %v14764_v15  ;;  %v2141_v53 = vmul.f32 %v10095_v37, %v14766_v40  ;;  %v14775_v1 = vld [vmem:[#allocation78_spill] sm:$0xff] }
 0x2a1   :  { %v10104_v18 = vpop.permute.xlu1 %1998  ;;  %2660 = vmatpush2.msra.mxu0 %v2463_v5  ;;  %2821 = vmatpush2.msra.mxu1 %v2465_v44  ;;  %v2297_v62 = vpop.permute.xlu0 %2296  ;;  %v2454_v11 = vadd.f32 %v10032_v23, %v2166_v57  ;;  %v2450_v58 = vadd.f32 %v10028_v43, %v2162_v50  ;;  %v2158_v29 = vmul.f32 %v10022_v48, %v14763_v31  ;;  %v14767_v5 = vld [vmem:[#allocation80_spill] sm:$0xff]  ;;  %v14768_v44 = vld [vmem:[#allocation86_spill] sm:$0xff] }
 0x2a2   :  { %2661 = vmatprep.subr.mxu0 %v2460_v52  ;;  %2822 = vmatprep.subr.mxu1 %v2462_v47  ;;  %v2449_v27 = vadd.f32 %v10028_v43, %v2161_v2  ;;  %v2444_v23 = vadd.f32 %v10026_v7, %v10084_v35  ;;  %v2139_v48 = vmul.f32 %v10095_v37, %v14765_v26  ;;  %v14769_v52 = vld [vmem:[#allocation87_spill] sm:$0xff] }
 0x2a3   :  { %2662 = vmatpush2.msra.mxu0 %v2459_v9  ;;  %2823 = vmatpush2.msra.mxu1 %v2461_v38  ;;  %v2446_v59 = vadd.f32 %v10026_v7, %v2158_v29  ;;  %v2445_v54 = vadd.f32 %v10026_v7, %v2157_v20  ;;  %v2135_v35 = vmul.f32 %v10104_v18, %v14767_v5  ;;  %v14771_v38 = vld [vmem:[#allocation81_spill] sm:$0xff] }
 0x2a4   :  { %2663 = vmatprep.subr.mxu0 %v2456_v56  ;;  %2824 = vmatprep.subr.mxu1 %v2458_v30  ;;  %v2140_v13 = vmul.f32 %v10095_v37, %v14768_v44  ;;  %v2142_v47 = vmul.f32 %v10095_v37, %v14769_v52  ;;  %v2137_v22 = vmul.f32 %v10104_v18, %v14770_v60  ;;  %v14772_v56 = vld [vmem:[#allocation76_spill] sm:$0xff]  ;;  %v14788_v52 = vld [vmem:[#allocation67_spill] sm:$0xff] }
 0x2a5   :  { %v1994_v16 = vpop.permute.xlu1 %1993  ;;  %2664 = vmatpush2.msra.mxu0 %v2455_v21  ;;  %2825 = vmatpush2.msra.mxu1 %v2457_v55  ;;  %v2292_v6 = vpop.permute.xlu0 %2291  ;;  %v2432_v45 = vadd.f32 %v2297_v62, %v10043_v46  ;;  %v2434_v7 = vadd.f32 %v2297_v62, %v10046_v24  ;;  %v2431_v39 = vadd.f32 %v2297_v62, %v10037_v25  ;;  %v14774_v24 = vld [vmem:[#allocation84_spill] sm:$0xff]  ;;  %v14776_v21 = vld [vmem:[#allocation79_spill] sm:$0xff] }
 0x2a6   :  { %2665 = vmatprep.subr.mxu0 %v2452_v17  ;;  %2826 = vmatprep.subr.mxu1 %v2454_v11  ;;  %v2433_v9 = vadd.f32 %v2297_v62, %v10040_v34  ;;  %v2136_v37 = vmul.f32 %v10104_v18, %v14771_v38  ;;  %v2131_v30 = vmul.f32 %v1994_v16, %v14772_v56  ;;  %v14777_v55 = vld [vmem:[#allocation71_spill] sm:$0xff]  ;;  %v14778_v11 = vld [vmem:[#allocation74_spill] sm:$0xff]  ;;  %v14787_v44 = vld [vmem:[#allocation64_spill] sm:$0xff] }
 0x2a7   :  { %2666 = vmatpush2.msra.mxu0 %v2451_v3  ;;  %2827 = vmatpush2.msra.mxu1 %v2453_v32  ;;  %v2133_v57 = vmul.f32 %v1994_v16, %v14773_v12  ;;  %v2428_v25 = vadd.f32 %v2292_v6, %v2140_v13  ;;  %v2430_v34 = vadd.f32 %v2292_v6, %v2142_v47  ;;  %v14781_v3 = vld [vmem:[#allocation75_spill] sm:$0xff]  ;;  %v14789_v38 = vld [vmem:[#allocation61_spill] sm:$0xff] }
 0x2a8   :  { %2667 = vmatprep.subr.mxu0 %v2448_v63  ;;  %2828 = vmatprep.subr.mxu1 %v2450_v58  ;;  %v2429_v62 = vadd.f32 %v2292_v6, %v2141_v53  ;;  %v14782_v63 = vld [vmem:[#allocation69_spill] sm:$0xff]  ;;  %v14786_v53 = vld [vmem:[#allocation72_spill] sm:$0xff] }
 0x2a9   :  { %v1989_v0 = vpop.permute.xlu1 %1988  ;;  %2668 = vmatpush2.msra.mxu0 %v2447_v41  ;;  %2829 = vmatpush2.msra.mxu1 %v2449_v27  ;;  %v2287_v43 = vpop.permute.xlu0 %2286  ;;  %v14783_v41 = vld [vmem:[#allocation70_spill] sm:$0xff]  ;;  %v14790_v56 = vld [vmem:[#allocation65_spill] sm:$0xff] }
 0x2aa   :  { %2669 = vmatprep.subr.mxu0 %v2444_v23  ;;  %2830 = vmatprep.subr.mxu1 %v2446_v59  ;;  %v2127_v17 = vmul.f32 %v1989_v0, %v14777_v55  ;;  %v2425_v19 = vadd.f32 %v2287_v43, %v2137_v22  ;;  %v2130_v32 = vmul.f32 %v1989_v0, %v14781_v3  ;;  %v14784_v23 = vld [vmem:[#allocation62_spill] sm:$0xff]  ;;  %v2469_v55 = vld [vmem:[%s14661_s7 + $0x10] sm:$0xff] }
 0x2ab   :  { %2670 = vmatpush2.msra.mxu0 %v2443_v33  ;;  %2831 = vmatpush2.msra.mxu1 %v2445_v54  ;;  %v14785_v33 = vld [vmem:[#allocation66_spill] sm:$0xff] }
 0x2ac   :  { %2671 = vmatprep.subr.mxu0 %v10064_v10  ;;  %2832 = vmatprep.subr.mxu1 %v10066_v28  ;;  %v2138_v10 = vmul.f32 %v10104_v18, %v14774_v24  ;;  %v2427_v28 = vadd.f32 %v2292_v6, %v2139_v48  ;;  %v2129_v18 = vmul.f32 %v1989_v0, %v14778_v11  ;;  %v14780_v6 = vld [vmem:[#allocation73_spill] sm:$0xff]  ;;  %v2471_v11 = vld [vmem:[%s14661_s7 + $0x20] sm:$0xff] }
 0x2ad   :  { %v1984_v51 = vpop.permute.xlu1 %1983  ;;  %2672 = vmatpush2.msra.mxu0 %v10068_v42  ;;  %2833 = vmatpush2.msra.mxu1 %v10070_v49  ;;  %v2282_v46 = vpop.permute.xlu0 %2281  ;;  %v2132_v42 = vmul.f32 %v1994_v16, %v14775_v1  ;;  %v2134_v49 = vmul.f32 %v1994_v16, %v14776_v21  ;;  %v2128_v16 = vmul.f32 %v1989_v0, %v14780_v6  ;;  %v2467_v21 = vld [vmem:[%s14661_s7] sm:$0xff]  ;;  %v2481_v6 = vld [vmem:[%s14661_s7 + $0x70] sm:$0xff] }
 0x2ae   :  { %2673 = vmatprep.subr.mxu0 %v10056_v8  ;;  %2834 = vmatprep.subr.mxu1 %v10058_v14  ;;  %v2424_v8 = vadd.f32 %v2287_v43, %v2136_v37  ;;  %v2426_v50 = vadd.f32 %v2287_v43, %v2138_v10  ;;  %v2125_v58 = vmul.f32 %v1984_v51, %v14782_v63  ;;  %v14792_v10 = vld [vmem:[#allocation63_spill] sm:$0xff]  ;;  %v2483_v3 = vld [vmem:[%s14661_s7 + $0x80] sm:$0xff]  ;;  %v2485_v63 = vld [vmem:[%s14661_s7 + $0x90] sm:$0xff] }
 0x2af   :  { %2674 = vmatpush2.msra.mxu0 %v10060_v36  ;;  %2835 = vmatpush2.msra.mxu1 %v10062_v61  ;;  %v2423_v36 = vadd.f32 %v2287_v43, %v2135_v35  ;;  %v14779_v61 = vld [vmem:[#allocation68_spill] sm:$0xff]  ;;  %v2420_v31 = vadd.f32 %v2282_v46, %v2132_v42  ;;  %v2422_v29 = vadd.f32 %v2282_v46, %v2134_v49  ;;  %v2470_v49 = vld [vmem:[%s14661_s7 + $0x18] sm:$0xff] }
 0x2b0   :  { %2675 = vmatprep.subr.mxu0 %v2432_v45  ;;  %2836 = vmatprep.subr.mxu1 %v2434_v7  ;;  %v2123_v2 = vmul.f32 %v1984_v51, %v14779_v61  ;;  %v2419_v15 = vadd.f32 %v2282_v46, %v2131_v30  ;;  %v2421_v20 = vadd.f32 %v2282_v46, %v2133_v57  ;;  %v14791_v46 = vld [vmem:[#allocation60_spill] sm:$0xff]  ;;  %v2479_v61 = vld [vmem:[%s14661_s7 + $0x60] sm:$0xff] }
 0x2b1   :  { %v1979_v14 = vpop.permute.xlu1 %1978  ;;  %2676 = vmatpush2.msra.mxu0 %v2431_v39  ;;  %2837 = vmatpush2.msra.mxu1 %v2433_v9  ;;  %v2277_v4 = vpop.permute.xlu0 %2276  ;;  %v2124_v27 = vmul.f32 %v1984_v51, %v14783_v41  ;;  %v2126_v0 = vmul.f32 %v1984_v51, %v14786_v53  ;;  %v2491_v41 = vld [vmem:[%s14661_s7 + $0xc0] sm:$0xff] }
 0x2b2   :  { %2677 = vmatprep.subr.mxu0 %v2428_v25  ;;  %2838 = vmatprep.subr.mxu1 %v2430_v34  ;;  %v2119_v59 = vmul.f32 %v1979_v14, %v14784_v23  ;;  %v2121_v26 = vmul.f32 %v1979_v14, %v14785_v33  ;;  %v2416_v43 = vadd.f32 %v2277_v4, %v2128_v16  ;;  %v2484_v16 = vld [vmem:[%s14661_s7 + $0x88] sm:$0xff]  ;;  %v2493_v23 = vld [vmem:[%s14661_s7 + $0xd0] sm:$0xff]  ;;  %v2495_v33 = vld [vmem:[%s14661_s7 + $0xe0] sm:$0xff] }
 0x2b3   :  { %2678 = vmatpush2.msra.mxu0 %v2427_v28  ;;  %2839 = vmatpush2.msra.mxu1 %v2429_v62  ;;  %v2418_v54 = vadd.f32 %v2277_v4, %v2130_v32  ;;  %v2415_v5 = vadd.f32 %v2277_v4, %v2127_v17  ;;  %v2417_v35 = vadd.f32 %v2277_v4, %v2129_v18  ;;  %v2472_v17 = vld [vmem:[%s14661_s7 + $0x28] sm:$0xff]  ;;  %v2474_v18 = vld [vmem:[%s14661_s7 + $0x38] sm:$0xff]  ;;  %v2475_v4 = vld [vmem:[%s14661_s7 + $0x40] sm:$0xff] }
 0x2b4   :  { %2679 = vmatprep.subr.mxu0 %v2424_v8  ;;  %2840 = vmatprep.subr.mxu1 %v2426_v50  ;;  %v2120_v13 = vmul.f32 %v1979_v14, %v14787_v44  ;;  %v2122_v47 = vmul.f32 %v1979_v14, %v14788_v52  ;;  %v2473_v8 = vld [vmem:[%s14661_s7 + $0x30] sm:$0xff]  ;;  %v2476_v14 = vld [vmem:[%s14661_s7 + $0x48] sm:$0xff]  ;;  %v2478_v50 = vld [vmem:[%s14661_s7 + $0x58] sm:$0xff] }
 0x2b5   :  { %v1974_v48 = vpop.permute.xlu1 %1973  ;;  %2680 = vmatpush2.msra.mxu0 %v2423_v36  ;;  %2841 = vmatpush2.msra.mxu1 %v2425_v19  ;;  %v2272_v40 = vpop.permute.xlu0 %2271  ;;  %v2477_v36 = vld [vmem:[%s14661_s7 + $0x50] sm:$0xff]  ;;  %v2480_v19 = vld [vmem:[%s14661_s7 + $0x68] sm:$0xff]  ;;  %v2486_v32 = vld [vmem:[%s14661_s7 + $0x98] sm:$0xff] }
 0x2b6   :  { %2681 = vmatprep.subr.mxu0 %v2420_v31  ;;  %2842 = vmatprep.subr.mxu1 %v2422_v29  ;;  %v2412_v60 = vadd.f32 %v2272_v40, %v2124_v27  ;;  %v2414_v22 = vadd.f32 %v2272_v40, %v2126_v0  ;;  %v2411_v45 = vadd.f32 %v2272_v40, %v2123_v2  ;;  %v2482_v2 = vld [vmem:[%s14661_s7 + $0x78] sm:$0xff]  ;;  %v2487_v31 = vld [vmem:[%s14661_s7 + $0xa0] sm:$0xff] }
 0x2b7   :  { %2682 = vmatpush2.msra.mxu0 %v2419_v15  ;;  %2843 = vmatpush2.msra.mxu1 %v2421_v20  ;;  %v2413_v9 = vadd.f32 %v2272_v40, %v2125_v58  ;;  %v2116_v37 = vmul.f32 %v1974_v48, %v14789_v38  ;;  %v2118_v30 = vmul.f32 %v1974_v48, %v14790_v56  ;;  %v2488_v58 = vld [vmem:[%s14661_s7 + $0xa8] sm:$0xff]  ;;  %v2490_v29 = vld [vmem:[%s14661_s7 + $0xb8] sm:$0xff]  ;;  %v2489_v15 = vld [vmem:[%s14661_s7 + $0xb0] sm:$0xff]  ;;  %v14793_v40 = vmov 0.0  }
 0x2b8   :  { %2683 = vmatprep.subr.mxu0 %v2416_v43  ;;  %2844 = vmatprep.subr.mxu1 %v2418_v54  ;;  %v2115_v24 = vmul.f32 %v1974_v48, %v14791_v46  ;;  %v2117_v25 = vmul.f32 %v1974_v48, %v14792_v10  ;;  %v2492_v20 = vld [vmem:[%s14661_s7 + $0xc8] sm:$0xff]  ;;  %v2494_v27 = vld [vmem:[%s14661_s7 + $0xd8] sm:$0xff]  ;;  %v2497_v48 = vld [vmem:[%s14661_s7 + $0xf0] sm:$0xff] }
 0x2b9   :  { %v2262_v7 = vpop.permute.xlu1 %2261  ;;  %2684 = vmatpush2.msra.mxu0 %v2415_v5  ;;  %2845 = vmatpush2.msra.mxu1 %v2417_v35  ;;  %v2267_v39 = vpop.permute.xlu0 %2266 }
 0x2ba   :  { %2685 = vmatprep.subr.mxu0 %v2412_v60  ;;  %2846 = vmatprep.subr.mxu1 %v2414_v22  ;;  %v2408_v12 = vadd.f32 %v2267_v39, %v2120_v13  ;;  %v2410_v57 = vadd.f32 %v2267_v39, %v2122_v47  ;;  %v2407_v51 = vadd.f32 %v2267_v39, %v2119_v59  ;;  %v2496_v59 = vld [vmem:[%s14661_s7 + $0xe8] sm:$0xff] }
 0x2bb   :  { %2686 = vmatpush2.msra.mxu0 %v2411_v45  ;;  %2847 = vmatpush2.msra.mxu1 %v2413_v9  ;;  %v2409_v34 = vadd.f32 %v2267_v39, %v2121_v26  ;;  %v2404_v28 = vadd.f32 %v2262_v7, %v2116_v37  ;;  %v2406_v62 = vadd.f32 %v2262_v7, %v2118_v30  ;;  %v2498_v26 = vld [vmem:[%s14661_s7 + $0xf8] sm:$0xff] }
 0x2bc   :  { %2687 = vmatprep.subr.mxu0 %v2408_v12  ;;  %2848 = vmatprep.subr.mxu1 %v2410_v57  ;;  %v2403_v1 = vadd.f32 %v2262_v7, %v2115_v24  ;;  %v2405_v42 = vadd.f32 %v2262_v7, %v2117_v25 }
 0x2bd   :  { %2688 = vmatpush2.msra.mxu0 %v2407_v51  ;;  %2849 = vmatpush2.msra.mxu1 %v2409_v34  ;;  %v10280_v53 = vpop.permute.xlu1 %2619  ;;  %v10282_v0 = vpop.permute.xlu0 %2624 }
 0x2be   :  { %2689 = vmatprep.subr.mxu0 %v2404_v28  ;;  %2850 = vmatprep.subr.mxu1 %v2406_v62 }
 0x2bf   :  { %2690 = vmatpush2.msra.mxu0 %v2403_v1  ;;  %2851 = vmatpush2.msra.mxu1 %v2405_v42 }
 0x2c0   :  { %2692 = vmatmul.mubr.f32.vlgmr.msra.gmra.mxu0 %v2467_v21  ;;  %2853 = vmatmul.mubr.f32.vlgmr.msra.gmra.mxu1 %v2467_v21 }
 0x2c1   :  { %2697 = vmatprep.mubr.f32.mxu0 %v2470_v49  ;;  %2858 = vmatprep.mubr.f32.mxu1 %v2470_v49  ;;  %v10284_v43 = vpop.permute.xlu1 %2609  ;;  %v10286_v54 = vpop.permute.xlu0 %2614 }
 0x2c4   :  { %2698 = vmatmul.mubr.f32.gmra.mxu0 %v2469_v55  ;;  %2859 = vmatmul.mubr.f32.gmra.mxu1 %v2469_v55 }
 0x2c5   :  { %2703 = vmatprep.mubr.f32.mxu0 %v2472_v17  ;;  %2864 = vmatprep.mubr.f32.mxu1 %v2472_v17  ;;  %v10292_v52 = vpop.permute.xlu1 %2599  ;;  %v10294_v47 = vpop.permute.xlu0 %2604 }
 0x2c8   :  { %2704 = vmatmul.mubr.f32.gmra.mxu0 %v2471_v11  ;;  %2865 = vmatmul.mubr.f32.gmra.mxu1 %v2471_v11 }
 0x2c9   :  { %2709 = vmatprep.mubr.f32.mxu0 %v2474_v18  ;;  %2870 = vmatprep.mubr.f32.mxu1 %v2474_v18  ;;  %v2590_v38 = vpop.permute.xlu1 %2589  ;;  %v10302_v37 = vpop.permute.xlu0 %2594 }
 0x2cc   :  { %2710 = vmatmul.mubr.f32.gmra.mxu0 %v2473_v8  ;;  %2871 = vmatmul.mubr.f32.gmra.mxu1 %v2473_v8 }
 0x2cd   :  { %2715 = vmatprep.mubr.f32.mxu0 %v2476_v14  ;;  %2876 = vmatprep.mubr.f32.mxu1 %v2476_v14  ;;  %v10310_v24 = vpop.permute.xlu1 %2579  ;;  %v2585_v10 = vpop.permute.xlu0 %2584 }
 0x2d0   :  { %2716 = vmatmul.mubr.f32.gmra.mxu0 %v2475_v4  ;;  %2877 = vmatmul.mubr.f32.gmra.mxu1 %v2475_v4 }
 0x2d1   :  { %2721 = vmatprep.mubr.f32.mxu0 %v2478_v50  ;;  %2882 = vmatprep.mubr.f32.mxu1 %v2478_v50 }
 0x2d2   :  { %v10320_v21 = vpop.permute.xlu1 %2569  ;;  %v10322_v49 = vpop.permute.xlu0 %2574 }
 0x2d4   :  { %2722 = vmatmul.mubr.f32.gmra.mxu0 %v2477_v36  ;;  %2883 = vmatmul.mubr.f32.gmra.mxu1 %v2477_v36 }
 0x2d5   :  { %2727 = vmatprep.mubr.f32.mxu0 %v2480_v19  ;;  %2888 = vmatprep.mubr.f32.mxu1 %v2480_v19 }
 0x2d6   :  { %v10336_v4 = vpop.permute.xlu1 %2559  ;;  %v10338_v50 = vpop.permute.xlu0 %2564 }
 0x2d8   :  { %2728 = vmatmul.mubr.f32.gmra.mxu0 %v2479_v61  ;;  %2889 = vmatmul.mubr.f32.gmra.mxu1 %v2479_v61 }
 0x2d9   :  { %2733 = vmatprep.mubr.f32.mxu0 %v2482_v2  ;;  %2894 = vmatprep.mubr.f32.mxu1 %v2482_v2 }
 0x2dc   :  { %2734 = vmatmul.mubr.f32.gmra.mxu0 %v2481_v6  ;;  %2895 = vmatmul.mubr.f32.gmra.mxu1 %v2481_v6 }
 0x2dd   :  { %2739 = vmatprep.mubr.f32.mxu0 %v2484_v16  ;;  %2900 = vmatprep.mubr.f32.mxu1 %v2484_v16 }
 0x2e0   :  { %2740 = vmatmul.mubr.f32.gmra.mxu0 %v2483_v3  ;;  %2901 = vmatmul.mubr.f32.gmra.mxu1 %v2483_v3 }
 0x2e1   :  { %2745 = vmatprep.mubr.f32.mxu0 %v2486_v32  ;;  %2906 = vmatprep.mubr.f32.mxu1 %v2486_v32 }
 0x2e4   :  { %2746 = vmatmul.mubr.f32.gmra.mxu0 %v2485_v63  ;;  %2907 = vmatmul.mubr.f32.gmra.mxu1 %v2485_v63 }
 0x2e5   :  { %2751 = vmatprep.mubr.f32.mxu0 %v2488_v58  ;;  %2912 = vmatprep.mubr.f32.mxu1 %v2488_v58  ;;  %v10340_v58 = vpop.permute.xlu1 %2549 }
 0x2e6   :  { %14800 = vst [vmem:[#allocation19_spill] sm:$0xff] %v10340_v58 }
 0x2e8   :  { %2752 = vmatmul.mubr.f32.gmra.mxu0 %v2487_v31  ;;  %2913 = vmatmul.mubr.f32.gmra.mxu1 %v2487_v31  ;;  %v10342_v31 = vpop.permute.xlu0 %2554 }
 0x2e9   :  { %2757 = vmatprep.mubr.f32.mxu0 %v2490_v29  ;;  %2918 = vmatprep.mubr.f32.mxu1 %v2490_v29  ;;  %14801 = vst [vmem:[#allocation23_spill] sm:$0xff] %v10342_v31 }
 0x2ec   :  { %2758 = vmatmul.mubr.f32.gmra.mxu0 %v2489_v15  ;;  %2919 = vmatmul.mubr.f32.gmra.mxu1 %v2489_v15 }
 0x2ed   :  { %2763 = vmatprep.mubr.f32.mxu0 %v2492_v20  ;;  %2924 = vmatprep.mubr.f32.mxu1 %v2492_v20 }
 0x2f0   :  { %2764 = vmatmul.mubr.f32.gmra.mxu0 %v2491_v41  ;;  %2925 = vmatmul.mubr.f32.gmra.mxu1 %v2491_v41 }
 0x2f1   :  { %2769 = vmatprep.mubr.f32.mxu0 %v2494_v27  ;;  %2930 = vmatprep.mubr.f32.mxu1 %v2494_v27 }
 0x2f4   :  { %2770 = vmatmul.mubr.f32.gmra.mxu0 %v2493_v23  ;;  %2931 = vmatmul.mubr.f32.gmra.mxu1 %v2493_v23 }
 0x2f5   :  { %2775 = vmatprep.mubr.f32.mxu0 %v2496_v59  ;;  %2936 = vmatprep.mubr.f32.mxu1 %v2496_v59 }
 0x2f8   :  { %2776 = vmatmul.mubr.f32.gmra.mxu0 %v2495_v33  ;;  %2937 = vmatmul.mubr.f32.gmra.mxu1 %v2495_v33 }
 0x2f9   :  { %2781 = vmatprep.mubr.f32.mxu0 %v2498_v26  ;;  %2942 = vmatprep.mubr.f32.mxu1 %v2498_v26 }
 0x2fc   :  { %2782 = vmatmul.mubr.f32.gmra.mxu0 %v2497_v48  ;;  %2943 = vmatmul.mubr.f32.gmra.mxu1 %v2497_v48 }
 0x2fd   :  { %3758 = vmatprep.mubr.f32.mxu0 %v14793_v40  ;;  %3829 = vmatprep.mubr.f32.mxu1 %v14793_v40 }
 0x380   :  { %v2693_v5 = vpop.f32.mrf.mxu0  ;;  %v10288_v35 = vpop.f32.mrf.mxu1 }
 0x381   :  { %14794 = vst [vmem:[#allocation11_spill] sm:$0xff] %v10288_v35  ;;  %v10349_v27 = vadd.f32 %v2693_v5, %v10340_v58 }
 0x382   :  { %v2695_v44 = vpop.f32.mrf.mxu0  ;;  %v10290_v13 = vpop.f32.mrf.mxu1 }
 0x383   :  { %14795 = vst [vmem:[#allocation9_spill] sm:$0xff] %v10290_v13  ;;  %14802 = vst [vmem:[#allocation25_spill] sm:$0xff] %v10349_v27  ;;  %v10352_v23 = vadd.f32 %v2695_v44, %v10340_v58 }
 0x384   :  { %v2699_v60 = vpop.f32.mrf.mxu0  ;;  %v10296_v22 = vpop.f32.mrf.mxu1 }
 0x385   :  { %14796 = vst [vmem:[#allocation6_spill] sm:$0xff] %v10296_v22  ;;  %14803 = vst [vmem:[#allocation22_spill] sm:$0xff] %v10352_v23  ;;  %v10355_v59 = vadd.f32 %v2699_v60, %v10342_v31 }
 0x386   :  { %v2701_v45 = vpop.f32.mrf.mxu0  ;;  %v10298_v7 = vpop.f32.mrf.mxu1 }
 0x387   :  { %14797 = vst [vmem:[#allocation16_spill] sm:$0xff] %v10298_v7  ;;  %14804 = vst [vmem:[#allocation27_spill] sm:$0xff] %v10355_v59 }
 0x388   :  { %v2705_v39 = vpop.f32.mrf.mxu0  ;;  %v10300_v9 = vpop.f32.mrf.mxu1 }
 0x38a   :  { %v2707_v56 = vpop.f32.mrf.mxu0  ;;  %v10304_v30 = vpop.f32.mrf.mxu1 }
 0x38b   :  { %14798 = vst [vmem:[#allocation17_spill] sm:$0xff] %v10304_v30  ;;  %v10368_v44 = vadd.f32 %v2707_v56, %v10336_v4 }
 0x38c   :  { %v2711_v12 = vpop.f32.mrf.mxu0  ;;  %v10306_v57 = vpop.f32.mrf.mxu1 }
 0x38d   :  { %14808 = vst [vmem:[#allocation52_spill] sm:$0xff] %v10368_v44 }
 0x38e   :  { %v2713_v51 = vpop.f32.mrf.mxu0  ;;  %v10308_v46 = vpop.f32.mrf.mxu1 }
 0x38f   :  { %14799 = vst [vmem:[#allocation14_spill] sm:$0xff] %v10308_v46 }
 0x390   :  { %v2717_v25 = vpop.f32.mrf.mxu0  ;;  %v10312_v34 = vpop.f32.mrf.mxu1 }
 0x392   :  { %v2719_v28 = vpop.f32.mrf.mxu0  ;;  %v10314_v62 = vpop.f32.mrf.mxu1 }
 0x394   :  { %v10316_v1 = vpop.f32.mrf.mxu0  ;;  %v10318_v42 = vpop.f32.mrf.mxu1 }
 0x395   :  { %v10405_v13 = vadd.f32 %v10316_v1, %v10322_v49 }
 0x396   :  { %v10324_v55 = vpop.f32.mrf.mxu0  ;;  %v10326_v17 = vpop.f32.mrf.mxu1 }
 0x398   :  { %v10328_v11 = vpop.f32.mrf.mxu0  ;;  %v10330_v18 = vpop.f32.mrf.mxu1 }
 0x39a   :  { %v10332_v8 = vpop.f32.mrf.mxu0  ;;  %v10334_v14 = vpop.f32.mrf.mxu1 }
 0x39c   :  { %v2735_v36 = vpop.f32.mrf.mxu0  ;;  %v2896_v19 = vpop.f32.mrf.mxu1 }
 0x39d   :  { %v2736_v61 = vadd.f32 %v2735_v36, %v2585_v10  ;;  %v2897_v3 = vadd.f32 %v2896_v19, %v2585_v10  ;;  %v10358_v36 = vadd.f32 %v2701_v45, %v10342_v31  ;;  %v10361_v19 = vadd.f32 %v2705_v39, %v10336_v4 }
 0x39e   :  { %v2737_v2 = vpop.f32.mrf.mxu0  ;;  %v2898_v6 = vpop.f32.mrf.mxu1  ;;  %v10373_v45 = vadd.f32 %v2711_v12, %v10338_v50  ;;  %v10376_v39 = vadd.f32 %v2713_v51, %v10338_v50  ;;  %v10390_v12 = vadd.f32 %v2719_v28, %v10320_v21 }
 0x39f   :  { %v2738_v16 = vadd.f32 %v2737_v2, %v2585_v10  ;;  %v10344_v29 = vmax.f32 %v2736_v61, 0.0  ;;  %v2899_v33 = vadd.f32 %v2898_v6, %v2585_v10  ;;  %14805 = vst [vmem:[#allocation55_spill] sm:$0xff] %v10358_v36  ;;  %14806 = vst [vmem:[#allocation58_spill] sm:$0xff] %v10361_v19  ;;  %v10370_v2 = vmax.f32 %v2897_v3, 0.0 }
 0x3a0   :  { %v2741_v32 = vpop.f32.mrf.mxu0  ;;  %v2902_v63 = vpop.f32.mrf.mxu1 }
 0x3a1   :  { %v10346_v15 = vmax.f32 %v2738_v16, 0.0  ;;  %v2742_v20 = vadd.f32 %v2741_v32, %v2590_v38  ;;  %v2903_v41 = vadd.f32 %v2902_v63, %v2590_v38  ;;  %v10384_v56 = vmax.f32 %v2899_v33, 0.0 }
 0x3a2   :  { %v2743_v26 = vpop.f32.mrf.mxu0  ;;  %v2904_v48 = vpop.f32.mrf.mxu1 }
 0x3a3   :  { %v3048_v61 = vadd.f32 %v10346_v15, %v10344_v29  ;;  %v10365_v5 = vmax.f32 %v2742_v20, 0.0  ;;  %v2744_v60 = vadd.f32 %v2743_v26, %v2590_v38  ;;  %v2905_v10 = vadd.f32 %v2904_v48, %v2590_v38 }
 0x3a4   :  { %v2747_v6 = vpop.f32.mrf.mxu0  ;;  %v2908_v16 = vpop.f32.mrf.mxu1  ;;  %v10378_v32 = vmax.f32 %v2903_v41, 0.0  ;;  %v10382_v20 = vadd.f32 %v2717_v25, %v10320_v21 }
 0x3a5   :  { %14807 = vst [vmem:[#allocation59_spill] sm:$0xff] %v10365_v5  ;;  %v2748_v63 = vadd.f32 %v2747_v6, %v10302_v37  ;;  %v10386_v3 = vmax.f32 %v2744_v60, 0.0  ;;  %v3049_v48 = vadd.f32 %v3048_v61, %v10370_v2  ;;  %v3125_v51 = vmul.f32 %v10365_v5, %v10365_v5 }
 0x3a6   :  { %14809 = vst [vmem:[#allocation57_spill] sm:$0xff] %v10378_v32  ;;  %v2749_v38 = vpop.f32.mrf.mxu0  ;;  %v2910_v26 = vpop.f32.mrf.mxu1  ;;  %v2909_v41 = vadd.f32 %v2908_v16, %v10302_v37  ;;  %v10400_v60 = vmax.f32 %v2905_v10, 0.0  ;;  %v3127_v16 = vmul.f32 %v10378_v32, %v10378_v32 }
 0x3a7   :  { %14810 = vst [vmem:[#allocation53_spill] sm:$0xff] %v10386_v3  ;;  %v2750_v6 = vadd.f32 %v2749_v38, %v10302_v37  ;;  %v3053_v25 = vadd.f32 %v10386_v3, %v10365_v5  ;;  %v3126_v33 = vmul.f32 %v10386_v3, %v10386_v3  ;;  %v3050_v28 = vadd.f32 %v3049_v48, %v10384_v56 }
 0x3a8   :  { %14811 = vst [vmem:[#allocation56_spill] sm:$0xff] %v10400_v60  ;;  %v2753_v40 = vpop.f32.mrf.mxu0  ;;  %v2914_v61 = vpop.f32.mrf.mxu1  ;;  %v10409_v38 = vmax.f32 %v2748_v63, 0.0  ;;  %v2911_v5 = vadd.f32 %v2910_v26, %v10302_v37  ;;  %v10416_v35 = vmax.f32 %v2909_v41, 0.0 }
 0x3a9   :  { %v10411_v7 = vmax.f32 %v2750_v6, 0.0  ;;  %v2754_v10 = vadd.f32 %v2753_v40, %v10292_v52  ;;  %3051 = vadd.xlane.f32.xlu0 %v3050_v28  ;;  %v3054_v48 = vadd.f32 %v3053_v25, %v10378_v32  ;;  %v3197_v23 = vadd.f32 %v3126_v33, %v3125_v51 }
 0x3aa   :  { %14812 = vst [vmem:[#allocation31_spill] sm:$0xff] %v10409_v38  ;;  %v2755_v3 = vpop.f32.mrf.mxu0  ;;  %v2916_v27 = vpop.f32.mrf.mxu1  ;;  %14814 = vst [vmem:[#allocation29_spill] sm:$0xff] %v10416_v35  ;;  %v2915_v63 = vadd.f32 %v2914_v61, %v10292_v52  ;;  %v3128_v28 = vmul.f32 %v10400_v60, %v10400_v60  ;;  %v2732_v51 = vadd.f32 %v10332_v8, %v10310_v24 }
 0x3ab   :  { %14813 = vst [vmem:[#allocation54_spill] sm:$0xff] %v10411_v7  ;;  %v3058_v1 = vadd.f32 %v10411_v7, %v10409_v38  ;;  %v2756_v6 = vadd.f32 %v2755_v3, %v10292_v52  ;;  %v2917_v58 = vadd.f32 %v2916_v27, %v10292_v52  ;;  %v3055_v40 = vadd.f32 %v3054_v48, %v10400_v60 }
 0x3ac   :  { %v2759_v37 = vpop.f32.mrf.mxu0  ;;  %v2920_v26 = vpop.f32.mrf.mxu1  ;;  %v3198_v25 = vadd.f32 %v3197_v23, %v3127_v16  ;;  %v10432_v3 = vmax.f32 %v2911_v5, 0.0  ;;  %v10434_v52 = vmax.f32 %v2754_v10, 0.0  ;;  %v10439_v23 = vadd.f32 %v10324_v55, %v10322_v49 }
 0x3ad   :  { %v10428_v41 = vmax.f32 %v2756_v6, 0.0  ;;  %v2760_v33 = vadd.f32 %v2759_v37, %v10294_v47  ;;  %v2921_v61 = vadd.f32 %v2920_v26, %v10294_v47  ;;  %3056 = vadd.xlane.f32.xlu0 %v3055_v40  ;;  %v3059_v60 = vadd.f32 %v3058_v1, %v10416_v35 }
 0x3ae   :  { %14816 = vst [vmem:[#allocation51_spill] sm:$0xff] %v10432_v3  ;;  %14817 = vst [vmem:[#allocation36_spill] sm:$0xff] %v10434_v52  ;;  %v2761_v27 = vpop.f32.mrf.mxu0  ;;  %v2922_v48 = vpop.f32.mrf.mxu1  ;;  %v3199_v32 = vadd.f32 %v3198_v25, %v3128_v28  ;;  %v10443_v8 = vadd.f32 %v10328_v11, %v10310_v24  ;;  %v10447_v5 = vadd.f32 %v10330_v18, %v10310_v24  ;;  %v10449_v16 = vmax.f32 %v2915_v63, 0.0 }
 0x3af   :  { %14815 = vst [vmem:[#allocation50_spill] sm:$0xff] %v10428_v41  ;;  %v3130_v10 = vmul.f32 %v10411_v7, %v10411_v7  ;;  %v10453_v6 = vmax.f32 %v2917_v58, 0.0  ;;  %v2762_v1 = vadd.f32 %v2761_v27, %v10294_v47  ;;  %v3060_v26 = vadd.f32 %v3059_v60, %v10432_v3 }
 0x3b0   :  { %14818 = vst [vmem:[#allocation48_spill] sm:$0xff] %v10449_v16  ;;  %3200 = vadd.xlane.f32.xlu1 %v3199_v32  ;;  %v2765_v55 = vpop.f32.mrf.mxu0  ;;  %v2926_v37 = vpop.f32.mrf.mxu1  ;;  %v10457_v11 = vmax.f32 %v2732_v51, 0.0  ;;  %v3134_v18 = vmul.f32 %v10428_v41, %v10428_v41  ;;  %v10461_v40 = vmax.f32 %v2760_v33, 0.0  ;;  %v10463_v63 = vmax.f32 %v2921_v61, 0.0 }
 0x3b1   :  { %14819 = vst [vmem:[#allocation33_spill] sm:$0xff] %v10453_v6  ;;  %v3129_v58 = vmul.f32 %v10409_v38, %v10409_v38  ;;  %v3131_v28 = vmul.f32 %v10416_v35, %v10416_v35  ;;  %v3133_v32 = vmul.f32 %v10434_v52, %v10434_v52  ;;  %v10471_v25 = vmax.f32 %v2762_v1, 0.0  ;;  %3061 = vadd.xlane.f32.xlu0 %v3060_v26 }
 0x3b2   :  { %14820 = vst [vmem:[#allocation49_spill] sm:$0xff] %v10463_v63  ;;  %v2767_v60 = vpop.f32.mrf.mxu0  ;;  %v2928_v51 = vpop.f32.mrf.mxu1  ;;  %v3135_v33 = vmul.f32 %v10449_v16, %v10449_v16  ;;  %v3063_v61 = vadd.f32 %v10428_v41, %v10434_v52  ;;  %v2923_v27 = vadd.f32 %v2922_v48, %v10294_v47  ;;  %v3136_v35 = vmul.f32 %v10453_v6, %v10453_v6 }
 0x3b3   :  { %14821 = vst [vmem:[#allocation44_spill] sm:$0xff] %v10471_v25  ;;  %v2768_v7 = vadd.f32 %v2767_v60, %v10284_v43  ;;  %v2766_v38 = vadd.f32 %v2765_v55, %v10284_v43  ;;  %v2927_v1 = vadd.f32 %v2926_v37, %v10284_v43  ;;  %v3202_v26 = vadd.f32 %v3130_v10, %v3129_v58 }
 0x3b4   :  { %v2771_v30 = vpop.f32.mrf.mxu0  ;;  %v2932_v59 = vpop.f32.mrf.mxu1  ;;  %v3207_v36 = vadd.f32 %v3134_v18, %v3133_v32  ;;  %v3137_v22 = vmul.f32 %v10461_v40, %v10461_v40  ;;  %v3139_v41 = vmul.f32 %v10463_v63, %v10463_v63  ;;  %v3138_v47 = vmul.f32 %v10471_v25, %v10471_v25 }
 0x3b5   :  { %v10489_v48 = vmax.f32 %v2768_v7, 0.0  ;;  %v3132_v55 = vmul.f32 %v10432_v3, %v10432_v3  ;;  %v3203_v60 = vadd.f32 %v3202_v26, %v3131_v28  ;;  %v2772_v10 = vadd.f32 %v2771_v30, %v10286_v54 }
 0x3b6   :  { %v2773_v37 = vpop.f32.mrf.mxu0  ;;  %v2934_v58 = vpop.f32.mrf.mxu1  ;;  %v3068_v18 = vadd.f32 %v10471_v25, %v10461_v40  ;;  %v10496_v32 = vmax.f32 %v2923_v27, 0.0  ;;  %v2929_v52 = vadd.f32 %v2928_v51, %v10284_v43  ;;  %v3064_v31 = vadd.f32 %v3063_v61, %v10449_v16 }
 0x3b7   :  { %v10500_v46 = vmax.f32 %v2766_v38, 0.0  ;;  %v10502_v7 = vmax.f32 %v2927_v1, 0.0  ;;  %v3204_v19 = vadd.f32 %v3203_v60, %v3132_v55  ;;  %v2774_v28 = vadd.f32 %v2773_v37, %v10286_v54 }
 0x3b8   :  { %v2777_v26 = vpop.f32.mrf.mxu0  ;;  %v2938_v30 = vpop.f32.mrf.mxu1  ;;  %v3212_v3 = vadd.f32 %v3138_v47, %v3137_v22  ;;  %v2933_v44 = vadd.f32 %v2932_v59, %v10286_v54  ;;  %v3065_v25 = vadd.f32 %v3064_v31, %v10453_v6  ;;  %v3208_v27 = vadd.f32 %v3207_v36, %v3135_v33 }
 0x3b9   :  { %v3142_v43 = vmul.f32 %v10489_v48, %v10489_v48  ;;  %3205 = vadd.xlane.f32.xlu1 %v3204_v19  ;;  %v10509_v51 = vmax.f32 %v2772_v10, 0.0  ;;  %v10511_v38 = vmax.f32 %v2774_v28, 0.0  ;;  %v2935_v61 = vadd.f32 %v2934_v58, %v10286_v54 }
 0x3ba   :  { %v2779_v1 = vpop.f32.mrf.mxu0  ;;  %v2940_v55 = vpop.f32.mrf.mxu1  ;;  %v3140_v22 = vmul.f32 %v10496_v32, %v10496_v32  ;;  %v10516_v47 = vmax.f32 %v2929_v52, 0.0  ;;  %3066 = vadd.xlane.f32.xlu0 %v3065_v25  ;;  %v3209_v31 = vadd.f32 %v3208_v27, %v3136_v35  ;;  %v3069_v59 = vadd.f32 %v3068_v18, %v10463_v63 }
 0x3bb   :  { %v3141_v36 = vmul.f32 %v10500_v46, %v10500_v46  ;;  %v3073_v19 = vadd.f32 %v10489_v48, %v10500_v46  ;;  %v3146_v54 = vmul.f32 %v10511_v38, %v10511_v38  ;;  %v2780_v33 = vadd.f32 %v2779_v1, %v10280_v53 }
 0x3bc   :  { %v2783_v60 = vpop.f32.mrf.mxu0  ;;  %v2944_v10 = vpop.f32.mrf.mxu1  ;;  %v3143_v52 = vmul.f32 %v10502_v7, %v10502_v7  ;;  %v10528_v25 = vmax.f32 %v2933_v44, 0.0  ;;  %v2778_v35 = vadd.f32 %v2777_v26, %v10280_v53  ;;  %v3070_v37 = vadd.f32 %v3069_v59, %v10496_v32 }
 0x3bd   :  { %v3217_v58 = vadd.f32 %v3142_v43, %v3141_v36  ;;  %v3145_v18 = vmul.f32 %v10509_v51, %v10509_v51  ;;  %v10534_v28 = vmax.f32 %v2935_v61, 0.0  ;;  %3210 = vadd.xlane.f32.xlu1 %v3209_v31  ;;  %v3213_v27 = vadd.f32 %v3212_v3, %v3139_v41 }
 0x3be   :  { %v2785_v1 = vpop.f32.mrf.mxu0  ;;  %v3144_v16 = vmul.f32 %v10516_v47, %v10516_v47  ;;  %v3078_v44 = vadd.f32 %v10511_v38, %v10509_v51  ;;  %3071 = vadd.xlane.f32.xlu0 %v3070_v37  ;;  %v10540_v6 = vmax.f32 %v2780_v33, 0.0  ;;  %v2784_v26 = vadd.f32 %v2783_v60, %v10282_v0  ;;  %v2946_v31 = vpop.f32.mrf.mxu1 }
 0x3bf   :  { %v3222_v43 = vadd.f32 %v3146_v54, %v3145_v18  ;;  %v3214_v59 = vadd.f32 %v3213_v27, %v3140_v22  ;;  %v2945_v36 = vadd.f32 %v2944_v10, %v10282_v0  ;;  %v3074_v61 = vadd.f32 %v3073_v19, %v10502_v7 }
 0x3c0   :  { %v3147_v41 = vmul.f32 %v10528_v25, %v10528_v25  ;;  %v10547_v3 = vmax.f32 %v2778_v35, 0.0  ;;  %v10549_v63 = vmax.f32 %v2784_v26, 0.0  ;;  %v2786_v37 = vadd.f32 %v2785_v1, %v10282_v0 }
 0x3c1   :  { %v3148_v33 = vmul.f32 %v10534_v28, %v10534_v28  ;;  %v2939_v54 = vadd.f32 %v2938_v30, %v10280_v53  ;;  %3215 = vadd.xlane.f32.xlu1 %v3214_v59  ;;  %v3075_v22 = vadd.f32 %v3074_v61, %v10516_v47  ;;  %v3218_v60 = vadd.f32 %v3217_v58, %v3143_v52 }
 0x3c2   :  { %v3083_v19 = vadd.f32 %v10540_v6, %v10547_v3  ;;  %v10558_v10 = vmax.f32 %v2786_v37, 0.0  ;;  %v2947_v35 = vadd.f32 %v2946_v31, %v10282_v0  ;;  %v3079_v18 = vadd.f32 %v3078_v44, %v10528_v25 }
 0x3c3   :  { %v3150_v27 = vmul.f32 %v10540_v6, %v10540_v6  ;;  %v10564_v1 = vmax.f32 %v2945_v36, 0.0  ;;  %3076 = vadd.xlane.f32.xlu0 %v3075_v22  ;;  %v3219_v30 = vadd.f32 %v3218_v60, %v3144_v16  ;;  %v3223_v26 = vadd.f32 %v3222_v43, %v3147_v41 }
 0x3c4   :  { %v3153_v52 = vmul.f32 %v10549_v63, %v10549_v63  ;;  %v3088_v58 = vadd.f32 %v10558_v10, %v10549_v63  ;;  %v3154_v59 = vmul.f32 %v10558_v10, %v10558_v10  ;;  %v3080_v0 = vadd.f32 %v3079_v18, %v10534_v28 }
 0x3c5   :  { %v3149_v44 = vmul.f32 %v10547_v3, %v10547_v3  ;;  %v10575_v61 = vmax.f32 %v2939_v54, 0.0  ;;  %v2941_v36 = vadd.f32 %v2940_v55, %v10280_v53  ;;  %3220 = vadd.xlane.f32.xlu1 %v3219_v30  ;;  %v3224_v16 = vadd.f32 %v3223_v26, %v3148_v33 }
 0x3c6   :  { %v10579_v43 = vmax.f32 %v10443_v8, 0.0  ;;  %v3232_v31 = vadd.f32 %v3154_v59, %v3153_v52  ;;  %v10581_v41 = vmax.f32 %v2947_v35, 0.0  ;;  %v3089_v37 = vadd.f32 %v3088_v58, %v10564_v1 }
 0x3c7   :  { %v3122_v22 = vmul.f32 %v10346_v15, %v10346_v15  ;;  %v3227_v60 = vadd.f32 %v3150_v27, %v3149_v44  ;;  %v3155_v54 = vmul.f32 %v10564_v1, %v10564_v1  ;;  %3081 = vadd.xlane.f32.xlu0 %v3080_v0  ;;  %v3084_v53 = vadd.f32 %v3083_v19, %v10575_v61 }
 0x3c8   :  { %v2885_v55 = vadd.f32 %v10318_v42, %v10322_v49  ;;  %v10592_v8 = vmax.f32 %v10439_v23, 0.0  ;;  %v3043_v33 = vadd.f32 %v10457_v11, %v10579_v43  ;;  %v3090_v35 = vadd.f32 %v3089_v37, %v10581_v41 }
 0x3c9   :  { %v3121_v18 = vmul.f32 %v10344_v29, %v10344_v29  ;;  %v3151_v27 = vmul.f32 %v10575_v61, %v10575_v61  ;;  %v10601_v30 = vmax.f32 %v2941_v36, 0.0  ;;  %3225 = vadd.xlane.f32.xlu1 %v3224_v16  ;;  %v3233_v19 = vadd.f32 %v3232_v31, %v3155_v54 }
 0x3ca   :  { %v10604_v42 = vmax.f32 %v10405_v13, 0.0  ;;  %v10607_v23 = vmax.f32 %v10447_v5, 0.0  ;;  %v3118_v26 = vmul.f32 %v10457_v11, %v10457_v11  ;;  %v2893_v52 = vadd.f32 %v10334_v14, %v10310_v24 }
 0x3cb   :  { %v3156_v58 = vmul.f32 %v10581_v41, %v10581_v41  ;;  %v3085_v59 = vadd.f32 %v3084_v53, %v10601_v30  ;;  %3091 = vadd.xlane.f32.xlu0 %v3090_v35  ;;  %v3228_v0 = vadd.f32 %v3227_v60, %v3151_v27  ;;  %v3192_v44 = vadd.f32 %v3122_v22, %v3121_v18 }
 0x3cc   :  { %v2879_v13 = vadd.f32 %v10312_v34, %v10320_v21  ;;  %v10619_v5 = vmax.f32 %v10390_v12, 0.0  ;;  %v3038_v36 = vadd.f32 %v10592_v8, %v10604_v42  ;;  %v3117_v24 = vmul.f32 %v10579_v43, %v10579_v43 }
 0x3cd   :  { %v3123_v14 = vmul.f32 %v10370_v2, %v10370_v2  ;;  %v3152_v16 = vmul.f32 %v10601_v30, %v10601_v30  ;;  %3086 = vadd.xlane.f32.xlu1 %v3085_v59  ;;  %v3234_v31 = vadd.f32 %v3233_v19, %v3156_v58  ;;  %v3044_v37 = vadd.f32 %v3043_v33, %v10607_v23 }
 0x3ce   :  { %14822 = vst [vmem:[#allocation45_spill] sm:$0xff] %v10619_v5  ;;  %v10631_v34 = vmax.f32 %v10382_v20, 0.0  ;;  %v10633_v12 = vmax.f32 %v2885_v55, 0.0  ;;  %v3114_v22 = vmul.f32 %v10592_v8, %v10592_v8  ;;  %v2887_v60 = vadd.f32 %v10326_v17, %v10322_v49 }
 0x3cf   :  { %v10639_v54 = vmax.f32 %v2893_v52, 0.0  ;;  %v3229_v53 = vadd.f32 %v3228_v0, %v3152_v16  ;;  %3235 = vadd.xlane.f32.xlu0 %v3234_v31  ;;  %v3193_v35 = vadd.f32 %v3192_v44, %v3123_v14  ;;  %v3187_v18 = vadd.f32 %v3118_v26, %v3117_v24  ;;  %v14829_v14 = vld [vmem:[#allocation52_spill] sm:$0xff] }
 0x3d0   :  { %14823 = vst [vmem:[#allocation47_spill] sm:$0xff] %v10631_v34  ;;  %14824 = vst [vmem:[#allocation46_spill] sm:$0xff] %v10633_v12  ;;  %v2873_v33 = vadd.f32 %v10306_v57, %v10338_v50  ;;  %v10644_v20 = vmax.f32 %v10376_v39, 0.0  ;;  %v3033_v55 = vadd.f32 %v10619_v5, %v10631_v34  ;;  %v3113_v27 = vmul.f32 %v10604_v42, %v10604_v42 }
 0x3d1   :  { %v3119_v49 = vmul.f32 %v10607_v23, %v10607_v23  ;;  %3230 = vadd.xlane.f32.xlu1 %v3229_v53  ;;  %v3124_v17 = vmul.f32 %v10384_v56, %v10384_v56  ;;  %v3045_v19 = vadd.f32 %v3044_v37, %v10639_v54  ;;  %v3039_v57 = vadd.f32 %v3038_v36, %v10633_v12  ;;  %v14831_v37 = vld [vmem:[#allocation58_spill] sm:$0xff] }
 0x3d2   :  { %14825 = vst [vmem:[#allocation42_spill] sm:$0xff] %v10644_v20  ;;  %v10657_v39 = vmax.f32 %v10373_v45, 0.0  ;;  %v10659_v26 = vmax.f32 %v2879_v13, 0.0  ;;  %v3110_v52 = vmul.f32 %v10619_v5, %v10619_v5  ;;  %v2881_v58 = vadd.f32 %v10314_v62, %v10320_v21 }
 0x3d3   :  { %v10665_v59 = vmax.f32 %v2887_v60, 0.0  ;;  %v3194_v0 = vadd.f32 %v3193_v35, %v3124_v17  ;;  %3046 = vadd.xlane.f32.xlu0 %v3045_v19  ;;  %v3188_v44 = vadd.f32 %v3187_v18, %v3119_v49  ;;  %v3182_v24 = vadd.f32 %v3114_v22, %v3113_v27  ;;  %v14834_v35 = vld [vmem:[#allocation14_spill] sm:$0xff] }
 0x3d4   :  { %14826 = vst [vmem:[#allocation43_spill] sm:$0xff] %v10657_v39  ;;  %14827 = vst [vmem:[#allocation39_spill] sm:$0xff] %v10659_v26  ;;  %v2867_v36 = vadd.f32 %v10300_v9, %v10336_v4  ;;  %v10670_v45 = vmax.f32 %v14829_v14, 0.0  ;;  %v3028_v13 = vadd.f32 %v10644_v20, %v10657_v39  ;;  %v3109_v16 = vmul.f32 %v10631_v34, %v10631_v34  ;;  %v14838_v14 = vld [vmem:[#allocation55_spill] sm:$0xff]  ;;  %v14847_v34 = vld [vmem:[#allocation22_spill] sm:$0xff] }
 0x3d5   :  { %14828 = vst [vmem:[#allocation41_spill] sm:$0xff] %v10665_v59  ;;  %v3115_v62 = vmul.f32 %v10633_v12, %v10633_v12  ;;  %3195 = vadd.xlane.f32.xlu1 %v3194_v0  ;;  %v3120_v21 = vmul.f32 %v10639_v54, %v10639_v54  ;;  %v3040_v31 = vadd.f32 %v3039_v57, %v10665_v59  ;;  %v10683_v22 = vmax.f32 %v14831_v37, 0.0  ;;  %v14836_v57 = vld [vmem:[#allocation23_spill] sm:$0xff]  ;;  %v14837_v0 = vld [vmem:[#allocation6_spill] sm:$0xff] }
 0x3d6   :  { %14830 = vst [vmem:[#allocation37_spill] sm:$0xff] %v10670_v45  ;;  %v3034_v9 = vadd.f32 %v3033_v55, %v10659_v26  ;;  %v10685_v60 = vmax.f32 %v2873_v33, 0.0  ;;  %v3106_v53 = vmul.f32 %v10644_v20, %v10644_v20  ;;  %v2875_v18 = vadd.f32 %v14834_v35, %v10338_v50 }
 0x3d7   :  { %14832 = vst [vmem:[#allocation40_spill] sm:$0xff] %v10683_v22  ;;  %v10691_v27 = vmax.f32 %v2881_v58, 0.0  ;;  %v3189_v49 = vadd.f32 %v3188_v44, %v3120_v21  ;;  %3041 = vadd.xlane.f32.xlu0 %v3040_v31  ;;  %v3183_v17 = vadd.f32 %v3182_v24, %v3115_v62  ;;  %v3177_v19 = vadd.f32 %v3110_v52, %v3109_v16  ;;  %v14840_v24 = vld [vmem:[#allocation27_spill] sm:$0xff]  ;;  %v14843_v31 = vld [vmem:[#allocation17_spill] sm:$0xff] }
 0x3d8   :  { %14833 = vst [vmem:[#allocation38_spill] sm:$0xff] %v10685_v60  ;;  %v2861_v55 = vadd.f32 %v14837_v0, %v14836_v57  ;;  %v10696_v37 = vmax.f32 %v14838_v14, 0.0  ;;  %v3023_v33 = vadd.f32 %v10670_v45, %v10683_v22  ;;  %v3105_v20 = vmul.f32 %v10657_v39, %v10657_v39 }
 0x3d9   :  { %14835 = vst [vmem:[#allocation35_spill] sm:$0xff] %v10691_v27  ;;  %v3111_v50 = vmul.f32 %v10659_v26, %v10659_v26  ;;  %3190 = vadd.xlane.f32.xlu1 %v3189_v49  ;;  %v3116_v58 = vmul.f32 %v10665_v59, %v10665_v59  ;;  %v3035_v52 = vadd.f32 %v3034_v9, %v10691_v27  ;;  %v10709_v16 = vmax.f32 %v14840_v24, 0.0  ;;  %v14845_v9 = vld [vmem:[#allocation19_spill] sm:$0xff]  ;;  %v2545_v59 = vld [vmem:[%s14859_s30 + $0x70] sm:$0xff] }
 0x3da   :  { %14839 = vst [vmem:[#allocation34_spill] sm:$0xff] %v10696_v37  ;;  %v3029_v44 = vadd.f32 %v3028_v13, %v10685_v60  ;;  %v10711_v62 = vmax.f32 %v2867_v36, 0.0  ;;  %v3102_v21 = vmul.f32 %v10670_v45, %v10670_v45  ;;  %v2869_v35 = vadd.f32 %v14843_v31, %v10336_v4  ;;  %v14846_v26 = vld [vmem:[#allocation11_spill] sm:$0xff] }
 0x3db   :  { %14841 = vst [vmem:[#allocation32_spill] sm:$0xff] %v10709_v16  ;;  %v10717_v0 = vmax.f32 %v2875_v18, 0.0  ;;  %v3184_v49 = vadd.f32 %v3183_v17, %v3116_v58  ;;  %3036 = vadd.xlane.f32.xlu0 %v3035_v52  ;;  %v3178_v14 = vadd.f32 %v3177_v19, %v3111_v50  ;;  %v3172_v39 = vadd.f32 %v3106_v53, %v3105_v20  ;;  %v14849_v53 = vld [vmem:[#allocation25_spill] sm:$0xff]  ;;  %v14852_v50 = vld [vmem:[#allocation16_spill] sm:$0xff] }
 0x3dc   :  { %14842 = vst [vmem:[#allocation30_spill] sm:$0xff] %v10711_v62  ;;  %v2855_v13 = vadd.f32 %v14846_v26, %v14845_v9  ;;  %v10722_v24 = vmax.f32 %v14847_v34, 0.0  ;;  %v3018_v36 = vadd.f32 %v10696_v37, %v10709_v16  ;;  %v3101_v45 = vmul.f32 %v10683_v22, %v10683_v22 }
 0x3dd   :  { %14844 = vst [vmem:[#allocation28_spill] sm:$0xff] %v10717_v0  ;;  %v3107_v4 = vmul.f32 %v10685_v60, %v10685_v60  ;;  %3185 = vadd.xlane.f32.xlu1 %v3184_v49  ;;  %v3112_v18 = vmul.f32 %v10691_v27, %v10691_v27  ;;  %v3030_v20 = vadd.f32 %v3029_v44, %v10717_v0  ;;  %v10735_v34 = vmax.f32 %v14849_v53, 0.0 }
 0x3de   :  { %14848 = vst [vmem:[#allocation26_spill] sm:$0xff] %v10722_v24  ;;  %v3024_v26 = vadd.f32 %v3023_v33, %v10711_v62  ;;  %v10737_v17 = vmax.f32 %v2861_v55, 0.0  ;;  %v3098_v19 = vmul.f32 %v10696_v37, %v10696_v37  ;;  %v2863_v58 = vadd.f32 %v14852_v50, %v14836_v57  ;;  %v2527_v37 = vld [vmem:[%s14858_s10 + $0x60] sm:$0xff] }
 0x3df   :  { %14850 = vst [vmem:[#allocation24_spill] sm:$0xff] %v10735_v34  ;;  %v10743_v52 = vmax.f32 %v2869_v35, 0.0  ;;  %v3179_v31 = vadd.f32 %v3178_v14, %v3112_v18  ;;  %3031 = vadd.xlane.f32.xlu0 %v3030_v20  ;;  %v3173_v49 = vadd.f32 %v3172_v39, %v3107_v4  ;;  %v3167_v22 = vadd.f32 %v3102_v21, %v3101_v45  ;;  %v14855_v14 = vld [vmem:[#allocation9_spill] sm:$0xff] }
 0x3e0   :  { %14851 = vst [vmem:[#allocation21_spill] sm:$0xff] %v10737_v17  ;;  %v3013_v33 = vadd.f32 %v10722_v24, %v10735_v34  ;;  %v3094_v44 = vmul.f32 %v10722_v24, %v10722_v24  ;;  %v3097_v55 = vmul.f32 %v10709_v16, %v10709_v16  ;;  %v3103_v53 = vmul.f32 %v10711_v62, %v10711_v62 }
 0x3e1   :  { %14853 = vst [vmem:[#allocation20_spill] sm:$0xff] %v10743_v52  ;;  %3180 = vadd.xlane.f32.xlu1 %v3179_v31  ;;  %v3108_v57 = vmul.f32 %v10717_v0, %v10717_v0  ;;  %v3025_v35 = vadd.f32 %v3024_v26, %v10743_v52  ;;  %v3019_v39 = vadd.f32 %v3018_v36, %v10737_v17  ;;  %v10759_v21 = vmax.f32 %v2855_v13, 0.0 }
 0x3e2   :  { %v3093_v45 = vmul.f32 %v10735_v34, %v10735_v34  ;;  %v2857_v4 = vadd.f32 %v14855_v14, %v14845_v9  ;;  %v10763_v18 = vmax.f32 %v2863_v58, 0.0  ;;  %v3168_v50 = vadd.f32 %v3167_v22, %v3103_v53 }
 0x3e3   :  { %14854 = vst [vmem:[#allocation18_spill] sm:$0xff] %v10759_v21  ;;  %v3174_v20 = vadd.f32 %v3173_v49, %v3108_v57  ;;  %3026 = vadd.xlane.f32.xlu0 %v3025_v35  ;;  %v3162_v31 = vadd.f32 %v3098_v19, %v3097_v55  ;;  %v3099_v24 = vmul.f32 %v10737_v17, %v10737_v17 }
 0x3e4   :  { %14856 = vst [vmem:[#allocation15_spill] sm:$0xff] %v10763_v18  ;;  %v3104_v36 = vmul.f32 %v10743_v52, %v10743_v52  ;;  %v3020_v26 = vadd.f32 %v3019_v39, %v10763_v18  ;;  %v3014_v13 = vadd.f32 %v3013_v33, %v10759_v21  ;;  %v3157_v34 = vadd.f32 %v3094_v44, %v3093_v45 }
 0x3e5   :  { %3175 = vadd.xlane.f32.xlu1 %v3174_v20  ;;  %v3095_v9 = vmul.f32 %v10759_v21, %v10759_v21  ;;  %v10773_v58 = vmax.f32 %v2857_v4, 0.0  ;;  %v3163_v22 = vadd.f32 %v3162_v31, %v3099_v24  ;;  %v3100_v19 = vmul.f32 %v10763_v18, %v10763_v18 }
 0x3e6   :  { %v3169_v49 = vadd.f32 %v3168_v50, %v3104_v36 }
 0x3e7   :  { %14857 = vst [vmem:[#allocation13_spill] sm:$0xff] %v10773_v58  ;;  %3021 = vadd.xlane.f32.xlu0 %v3020_v26  ;;  %v3015_v55 = vadd.f32 %v3014_v13, %v10773_v58  ;;  %v3158_v53 = vadd.f32 %v3157_v34, %v3095_v9  ;;  %v3164_v57 = vadd.f32 %v3163_v22, %v3100_v19 }
 0x3e8   :  { %v3096_v33 = vmul.f32 %v10773_v58, %v10773_v58 }
 0x3e9   :  { %3170 = vadd.xlane.f32.xlu1 %v3169_v49 }
 0x3ea   :  { %v3159_v44 = vadd.f32 %v3158_v53, %v3096_v33 }
 0x3eb   :  { %3016 = vadd.xlane.f32.xlu0 %v3015_v55 }
 0x3ed   :  { %3165 = vadd.xlane.f32.xlu1 %v3164_v57 }
 0x3ef   :  { %3160 = vadd.xlane.f32.xlu0 %v3159_v44 }
 0x432   :  { %v10780_v35 = vpop.xlane.xlu0 %3051 }
 0x436   :  { %v3057_v39 = vpop.xlane.xlu0 %3056 }
 0x437   :  { %v3245_v45 = vmul.f32 0.001953125, %v3057_v39 }
 0x439   :  { %v3201_v24 = vpop.xlane.xlu1 %3200  ;;  %v3277_v14 = vmul.f32 %v3245_v45, %v3245_v45 }
 0x43a   :  { %v3261_v4 = vmul.f32 0.001953125, %v3201_v24  ;;  %v3062_v20 = vpop.xlane.xlu0 %3061 }
 0x43b   :  { %v10782_v36 = vmul.f32 0.001953125, %v3062_v20 }
 0x43c   :  { %v3293_v50 = vsub.f32 %v3261_v4, %v3277_v14 }
 0x43d   :  { %v3278_v26 = vmul.f32 %v10782_v36, %v10782_v36 }
 0x43e   :  { %v3309_v31 = vmax.f32 %v3293_v50, 0.0 }
 0x440   :  { %v3325_v34 = vadd.f32 1e-05, %v3309_v31 }
 0x442   :  { %7856 = vrsqrt.f32 %v3325_v34  ;;  %v3206_v13 = vpop.xlane.xlu1 %3205 }
 0x443   :  { %v3262_v9 = vmul.f32 0.001953125, %v3206_v13  ;;  %v3067_v49 = vpop.xlane.xlu0 %3066 }
 0x444   :  { %v10786_v22 = vmul.f32 0.001953125, %v3067_v49  ;;  %v2523_v49 = vld [vmem:[%s14858_s10 + $0x40] sm:$0xff] }
 0x445   :  { %v3294_v19 = vsub.f32 %v3262_v9, %v3278_v26 }
 0x446   :  { %v3279_v55 = vmul.f32 %v10786_v22, %v10786_v22  ;;  %v3211_v53 = vpop.xlane.xlu1 %3210 }
 0x447   :  { %v3310_v57 = vmax.f32 %v3294_v19, 0.0  ;;  %v3263_v33 = vmul.f32 0.001953125, %v3211_v53  ;;  %v3072_v44 = vpop.xlane.xlu0 %3071 }
 0x448   :  { %v10790_v39 = vmul.f32 0.001953125, %v3072_v44 }
 0x449   :  { %v3326_v24 = vadd.f32 1e-05, %v3310_v57  ;;  %v3295_v14 = vsub.f32 %v3263_v33, %v3279_v55 }
 0x44a   :  { %v3280_v4 = vmul.f32 %v10790_v39, %v10790_v39  ;;  %v3216_v20 = vpop.xlane.xlu1 %3215 }
 0x44b   :  { %7858 = vrsqrt.f32 %v3326_v24  ;;  %v3311_v50 = vmax.f32 %v3295_v14, 0.0  ;;  %v3264_v31 = vmul.f32 0.001953125, %v3216_v20 }
 0x44c   :  { %v3077_v34 = vpop.xlane.xlu0 %3076 }
 0x44d   :  { %v3327_v26 = vadd.f32 1e-05, %v3311_v50  ;;  %v3296_v13 = vsub.f32 %v3264_v31, %v3280_v4  ;;  %v10794_v9 = vmul.f32 0.001953125, %v3077_v34  ;;  %v2539_v50 = vld [vmem:[%s14859_s30 + $0x40] sm:$0xff] }
 0x44e   :  { %v3221_v53 = vpop.xlane.xlu1 %3220 }
 0x44f   :  { %v7857_v19 = vpop.eup %7856  ;;  %7860 = vrsqrt.f32 %v3327_v26  ;;  %v3312_v55 = vmax.f32 %v3296_v13, 0.0  ;;  %v3281_v57 = vmul.f32 %v10794_v9, %v10794_v9  ;;  %v3265_v33 = vmul.f32 0.001953125, %v3221_v53 }
 0x450   :  { %v3082_v44 = vpop.xlane.xlu0 %3081  ;;  %v10801_v24 = vmul.f32 %v7857_v19, %v2523_v49 }
 0x451   :  { %v3328_v14 = vadd.f32 1e-05, %v3312_v55  ;;  %v3297_v20 = vsub.f32 %v3265_v33, %v3281_v57  ;;  %v10803_v4 = vmul.f32 0.001953125, %v3082_v44  ;;  %v2524_v33 = vld [vmem:[%s14858_s10 + $0x48] sm:$0xff] }
 0x452   :  { %v3226_v31 = vpop.xlane.xlu1 %3225  ;;  %v3373_v34 = vmul.f32 %v10801_v24, %v3245_v45 }
 0x453   :  { %7862 = vrsqrt.f32 %v3328_v14  ;;  %v3313_v26 = vmax.f32 %v3297_v20, 0.0  ;;  %v3282_v13 = vmul.f32 %v10803_v4, %v10803_v4  ;;  %v3266_v53 = vmul.f32 0.001953125, %v3226_v31 }
 0x454   :  { %v10811_v58 = vpop.xlane.xlu0 %3091  ;;  %v3389_v49 = vsub.f32 %v2539_v50, %v3373_v34  ;;  %v2540_v50 = vld [vmem:[%s14859_s30 + $0x48] sm:$0xff]  ;;  %v10826_v34 = vmul.f32 0.001953125, %v10780_v35 }
 0x455   :  { %v3329_v19 = vadd.f32 1e-05, %v3313_v26  ;;  %v3298_v55 = vsub.f32 %v3266_v53, %v3282_v13 }
 0x456   :  { %v3087_v57 = vpop.xlane.xlu1 %3086  ;;  %3583 = vperm.xlu0 %7787, %v3389_v49   ;;  %v2525_v49 = vld [vmem:[%s14858_s10 + $0x50] sm:$0xff] }
 0x457   :  { %7864 = vrsqrt.f32 %v3329_v19  ;;  %v3314_v44 = vmax.f32 %v3298_v55, 0.0  ;;  %v10816_v45 = vmul.f32 0.001953125, %v3087_v57 }
 0x458   :  { %v7859_v14 = vpop.eup %7858  ;;  %v10818_v20 = vpop.xlane.xlu0 %3235 }
 0x459   :  { %v3330_v21 = vadd.f32 1e-05, %v3314_v44  ;;  %v10820_v31 = vmul.f32 %v7859_v14, %v2524_v33  ;;  %v3283_v26 = vmul.f32 %v10816_v45, %v10816_v45 }
 0x45a   :  { %v3231_v18 = vpop.xlane.xlu1 %3230 }
 0x45b   :  { %v3267_v13 = vmul.f32 0.001953125, %v3231_v18  ;;  %v3374_v53 = vmul.f32 %v10820_v31, %v10782_v36  ;;  %7866 = vrsqrt.f32 %v3330_v21  ;;  %v3276_v18 = vmul.f32 %v10826_v34, %v10826_v34  ;;  %v2541_v36 = vld [vmem:[%s14859_s30 + $0x50] sm:$0xff]  ;;  %v2526_v21 = vld [vmem:[%s14858_s10 + $0x58] sm:$0xff] }
 0x45c   :  { %v7861_v19 = vpop.eup %7860  ;;  %v3047_v55 = vpop.xlane.xlu0 %3046 }
 0x45d   :  { %v3299_v57 = vsub.f32 %v3267_v13, %v3283_v26  ;;  %v3390_v33 = vsub.f32 %v2540_v50, %v3374_v53  ;;  %v10835_v44 = vmul.f32 0.001953125, %v3047_v55  ;;  %v10837_v14 = vmul.f32 %v7861_v19, %v2525_v49 }
 0x45e   :  { %v3196_v35 = vpop.xlane.xlu1 %3195 }
 0x45f   :  { %v3315_v17 = vmax.f32 %v3299_v57, 0.0  ;;  %v3260_v16 = vmul.f32 0.001953125, %v3196_v35  ;;  %3588 = vperm.xlu0 %7787, %v3390_v33   ;;  %v3375_v26 = vmul.f32 %v10837_v14, %v10786_v22  ;;  %v3275_v19 = vmul.f32 %v10835_v44, %v10835_v44 }
 0x460   :  { %v7863_v50 = vpop.eup %7862  ;;  %v3042_v13 = vpop.xlane.xlu0 %3041 }
 0x461   :  { %v3331_v53 = vadd.f32 1e-05, %v3315_v17  ;;  %v3292_v49 = vsub.f32 %v3260_v16, %v3276_v18  ;;  %v10851_v55 = vmul.f32 0.001953125, %v3042_v13  ;;  %v3391_v33 = vsub.f32 %v2541_v36, %v3375_v26  ;;  %v2542_v16 = vld [vmem:[%s14859_s30 + $0x58] sm:$0xff] }
 0x462   :  { %v3191_v57 = vpop.xlane.xlu1 %3190  ;;  %v10853_v35 = vmul.f32 %v7863_v50, %v2526_v21 }
 0x463   :  { %7868 = vrsqrt.f32 %v3331_v53  ;;  %v3308_v62 = vmax.f32 %v3292_v49, 0.0  ;;  %v3259_v52 = vmul.f32 0.001953125, %v3191_v57  ;;  %3593 = vperm.xlu0 %7787, %v3391_v33   ;;  %v3274_v22 = vmul.f32 %v10851_v55, %v10851_v55  ;;  %v2543_v33 = vld [vmem:[%s14859_s30 + $0x60] sm:$0xff] }
 0x464   :  { %v7865_v17 = vpop.eup %7864  ;;  %v3376_v18 = vmul.f32 %v10853_v35, %v10790_v39  ;;  %v3037_v36 = vpop.xlane.xlu0 %3036 }
 0x465   :  { %v3324_v21 = vadd.f32 1e-05, %v3308_v62  ;;  %v3291_v50 = vsub.f32 %v3259_v52, %v3275_v19  ;;  %v10865_v26 = vmul.f32 0.001953125, %v3037_v36  ;;  %v10867_v13 = vmul.f32 %v7865_v17, %v2527_v37 }
 0x466   :  { %v3186_v53 = vpop.xlane.xlu1 %3185  ;;  %v3392_v49 = vsub.f32 %v2542_v16, %v3376_v18  ;;  %v2528_v16 = vld [vmem:[%s14858_s10 + $0x68] sm:$0xff]  ;;  %v10882_v18 = vmul.f32 0.001953125, %v10811_v58 }
 0x467   :  { %7870 = vrsqrt.f32 %v3324_v21  ;;  %v3307_v57 = vmax.f32 %v3291_v50, 0.0  ;;  %v3258_v0 = vmul.f32 0.001953125, %v3186_v53  ;;  %v3377_v39 = vmul.f32 %v10867_v13, %v10794_v9 }
 0x468   :  { %3598 = vperm.xlu0 %7787, %v3392_v49   ;;  %v3032_v60 = vpop.xlane.xlu0 %3031  ;;  %v7867_v62 = vpop.eup %7866  ;;  %v3273_v37 = vmul.f32 %v10865_v26, %v10865_v26  ;;  %v3268_v53 = vmul.f32 0.001953125, %v10818_v20  ;;  %v3284_v58 = vmul.f32 %v10882_v18, %v10882_v18 }
 0x469   :  { %v3323_v52 = vadd.f32 1e-05, %v3307_v57  ;;  %v3290_v19 = vsub.f32 %v3258_v0, %v3274_v22  ;;  %v10876_v17 = vmul.f32 0.001953125, %v3032_v60  ;;  %v3393_v21 = vsub.f32 %v2543_v33, %v3377_v39  ;;  %v2529_v39 = vld [vmem:[%s14858_s10 + $0x70] sm:$0xff] }
 0x46a   :  { %v3181_v36 = vpop.xlane.xlu1 %3180  ;;  %v10885_v22 = vmul.f32 %v7867_v62, %v2528_v16 }
 0x46b   :  { %7872 = vrsqrt.f32 %v3323_v52  ;;  %v3306_v9 = vmax.f32 %v3290_v19, 0.0  ;;  %v3257_v50 = vmul.f32 0.001953125, %v3181_v36  ;;  %v3272_v57 = vmul.f32 %v10876_v17, %v10876_v17 }
 0x46c   :  { %3603 = vperm.xlu0 %7787, %v3393_v21   ;;  %v3027_v0 = vpop.xlane.xlu0 %3026  ;;  %v3300_v19 = vsub.f32 %v3268_v53, %v3284_v58  ;;  %v3378_v36 = vmul.f32 %v10885_v22, %v10803_v4  ;;  %v2522_v53 = vld [vmem:[%s14858_s10 + $0x38] sm:$0xff] }
 0x46d   :  { %v3322_v60 = vadd.f32 1e-05, %v3306_v9  ;;  %v3289_v49 = vsub.f32 %v3257_v50, %v3273_v37  ;;  %v10889_v27 = vmul.f32 0.001953125, %v3027_v0 }
 0x46e   :  { %v3176_v33 = vpop.xlane.xlu1 %3175  ;;  %v3316_v4 = vmax.f32 %v3300_v19, 0.0 }
 0x46f   :  { %7874 = vrsqrt.f32 %v3322_v60  ;;  %v3305_v20 = vmax.f32 %v3289_v49, 0.0  ;;  %v3256_v52 = vmul.f32 0.001953125, %v3176_v33  ;;  %v3271_v37 = vmul.f32 %v10889_v27, %v10889_v27  ;;  %v2544_v60 = vld [vmem:[%s14859_s30 + $0x68] sm:$0xff] }
 0x470   :  { %v7869_v62 = vpop.eup %7868  ;;  %v3022_v16 = vpop.xlane.xlu0 %3021 }
 0x471   :  { %v3321_v21 = vadd.f32 1e-05, %v3305_v20  ;;  %v3288_v9 = vsub.f32 %v3256_v52, %v3272_v57  ;;  %v3363_v50 = vmul.f32 %v7869_v62, %v2529_v39  ;;  %v10900_v0 = vmul.f32 0.001953125, %v3022_v16 }
 0x472   :  { %v3171_v49 = vpop.xlane.xlu1 %3170  ;;  %v3394_v20 = vsub.f32 %v2544_v60, %v3378_v36 }
 0x473   :  { %7876 = vrsqrt.f32 %v3321_v21  ;;  %v3304_v58 = vmax.f32 %v3288_v9, 0.0  ;;  %v3255_v33 = vmul.f32 0.001953125, %v3171_v49  ;;  %3469 = vperm.xlu0 %7787, %v3363_v50   ;;  %v3379_v57 = vmul.f32 %v3363_v50, %v10816_v45  ;;  %v2521_v21 = vld [vmem:[%s14858_s10 + $0x30] sm:$0xff] }
 0x474   :  { %v7871_v5 = vpop.eup %7870  ;;  %v3270_v62 = vmul.f32 %v10900_v0, %v10900_v0 }
 0x475   :  { %v3320_v39 = vadd.f32 1e-05, %v3304_v58  ;;  %v3287_v52 = vsub.f32 %v3255_v33, %v3271_v37  ;;  %v3356_v16 = vmul.f32 %v7871_v5, %v2522_v53  ;;  %v3332_v37 = vadd.f32 1e-05, %v3316_v4  ;;  %v2538_v53 = vld [vmem:[%s14859_s30 + $0x38] sm:$0xff]  ;;  %v2520_v58 = vld [vmem:[%s14858_s10 + $0x28] sm:$0xff] }
 0x476   :  { %v3166_v12 = vpop.xlane.xlu1 %3165  ;;  %v3395_v9 = vsub.f32 %v2545_v59, %v3379_v57  ;;  %v2537_v57 = vld [vmem:[%s14859_s30 + $0x30] sm:$0xff] }
 0x477   :  { %7878 = vrsqrt.f32 %v3320_v39  ;;  %v3303_v19 = vmax.f32 %v3287_v52, 0.0  ;;  %v3254_v36 = vmul.f32 0.001953125, %v3166_v12  ;;  %3434 = vperm.xlu1 %7788, %v3356_v16   ;;  %3608 = vperm.xlu0 %7787, %v3394_v20   ;;  %v3372_v5 = vmul.f32 %v3356_v16, %v10826_v34  ;;  %v2519_v39 = vld [vmem:[%s14858_s10 + $0x20] sm:$0xff]  ;;  %v2536_v16 = vld [vmem:[%s14859_s30 + $0x28] sm:$0xff] }
 0x478   :  { %v7873_v45 = vpop.eup %7872 }
 0x479   :  { %v3319_v50 = vadd.f32 1e-05, %v3303_v19  ;;  %v3286_v60 = vsub.f32 %v3254_v36, %v3270_v62  ;;  %v10918_v49 = vmul.f32 %v7873_v45, %v2521_v21  ;;  %v3388_v4 = vsub.f32 %v2538_v53, %v3372_v5  ;;  %v2518_v21 = vld [vmem:[%s14858_s10 + $0x18] sm:$0xff] }
 0x47b   :  { %7880 = vrsqrt.f32 %v3319_v50  ;;  %v3302_v12 = vmax.f32 %v3286_v60, 0.0  ;;  %3439 = vperm.xlu1 %7788, %v10801_v24   ;;  %3613 = vperm.xlu0 %7787, %v3395_v9   ;;  %v3371_v34 = vmul.f32 %v10918_v49, %v10835_v44  ;;  %v2517_v9 = vld [vmem:[%s14858_s10 + $0x10] sm:$0xff] }
 0x47c   :  { %v7875_v59 = vpop.eup %7874  ;;  %7882 = vrsqrt.f32 %v3332_v37 }
 0x47d   :  { %v3318_v33 = vadd.f32 1e-05, %v3302_v12  ;;  %v10929_v20 = vmul.f32 %v7875_v59, %v2520_v58  ;;  %v3387_v52 = vsub.f32 %v2537_v57, %v3371_v34  ;;  %v2534_v12 = vld [vmem:[%s14859_s30 + $0x18] sm:$0xff] }
 0x47f   :  { %7884 = vrsqrt.f32 %v3318_v33  ;;  %3444 = vperm.xlu1 %7788, %v10820_v31   ;;  %3578 = vperm.xlu0 %7787, %v3388_v4   ;;  %v3370_v62 = vmul.f32 %v10929_v20, %v10851_v55  ;;  %v3017_v31 = vpop.xlane.xlu0 %3016  ;;  %v2535_v55 = vld [vmem:[%s14859_s30 + $0x20] sm:$0xff] }
 0x480   :  { %v7877_v24 = vpop.eup %7876  ;;  %v3237_v59 = vmul.f32 0.001953125, %v3017_v31 }
 0x481   :  { %v3353_v44 = vmul.f32 %v7877_v24, %v2519_v39  ;;  %v3386_v36 = vsub.f32 %v2536_v16, %v3370_v62  ;;  %v2533_v24 = vld [vmem:[%s14859_s30 + $0x10] sm:$0xff] }
 0x483   :  { %3449 = vperm.xlu1 %7788, %v10837_v14   ;;  %3573 = vperm.xlu0 %7787, %v3387_v52   ;;  %v3369_v45 = vmul.f32 %v3353_v44, %v10865_v26  ;;  %v2530_v26 = vld [vmem:[%s14858_s10 + $0x78] sm:$0xff]  ;;  %v3161_v58 = vpop.xlane.xlu0 %3160  ;;  %v3269_v52 = vmul.f32 %v3237_v59, %v3237_v59 }
 0x484   :  { %v7879_v19 = vpop.eup %7878  ;;  %v3253_v4 = vmul.f32 0.001953125, %v3161_v58 }
 0x485   :  { %v3352_v37 = vmul.f32 %v7879_v19, %v2518_v21  ;;  %v3385_v60 = vsub.f32 %v2535_v55, %v3369_v45  ;;  %v2546_v19 = vld [vmem:[%s14859_s30 + $0x78] sm:$0xff]  ;;  %v2515_v55 = vld [vmem:[%s14858_s10] sm:$0xff] }
 0x486   :  { %v3285_v62 = vsub.f32 %v3253_v4, %v3269_v52  ;;  %v14862_v52 = vld [vmem:[#allocation57_spill] sm:$0xff] }
 0x487   :  { %3454 = vperm.xlu1 %7788, %v10853_v35   ;;  %3568 = vperm.xlu0 %7787, %v3386_v36   ;;  %v3368_v5 = vmul.f32 %v3352_v37, %v10876_v17  ;;  %v2516_v35 = vld [vmem:[%s14858_s10 + $0x8] sm:$0xff] }
 0x488   :  { %v7881_v50 = vpop.eup %7880  ;;  %v3301_v31 = vmax.f32 %v3285_v62, 0.0 }
 0x489   :  { %v7883_v14 = vpop.eup %7882  ;;  %v3351_v53 = vmul.f32 %v7881_v50, %v2517_v9  ;;  %v3384_v34 = vsub.f32 %v2534_v12, %v3368_v5 }
 0x48a   :  { %v3364_v17 = vmul.f32 %v7883_v14, %v2530_v26  ;;  %v2531_v14 = vld [vmem:[%s14859_s30] sm:$0xff] }
 0x48b   :  { %3459 = vperm.xlu1 %7788, %v10867_v13   ;;  %3563 = vperm.xlu0 %7787, %v3385_v60   ;;  %v3367_v57 = vmul.f32 %v3351_v53, %v10889_v27  ;;  %v2532_v27 = vld [vmem:[%s14859_s30 + $0x8] sm:$0xff] }
 0x48c   :  { %v7885_v33 = vpop.eup %7884  ;;  %v3380_v13 = vmul.f32 %v3364_v17, %v10882_v18  ;;  %v3686_v18 = vld [vmem:[%s14860_s27] sm:$0x7] }
 0x48d   :  { %v3350_v39 = vmul.f32 %v7885_v33, %v2516_v35  ;;  %v3383_v16 = vsub.f32 %v2533_v24, %v3367_v57 }
 0x48e   :  { %v3396_v36 = vsub.f32 %v2546_v19, %v3380_v13 }
 0x48f   :  { %3464 = vperm.xlu1 %7788, %v10885_v22   ;;  %3558 = vperm.xlu0 %7787, %v3384_v34   ;;  %v3366_v21 = vmul.f32 %v3350_v39, %v10900_v0  ;;  %v3317_v0 = vadd.f32 1e-05, %v3301_v31 }
 0x491   :  { %v3382_v22 = vsub.f32 %v2532_v27, %v3366_v21  ;;  %7886 = vrsqrt.f32 %v3317_v0  ;;  %v14864_v21 = vld [vmem:[#allocation56_spill] sm:$0xff] }
 0x493   :  { %3474 = vperm.xlu1 %7788, %v3364_v17   ;;  %3553 = vperm.xlu0 %7787, %v3383_v16   ;;  %v14863_v16 = vld [vmem:[#allocation53_spill] sm:$0xff] }
 0x497   :  { %3618 = vperm.xlu1 %7788, %v3396_v36   ;;  %3548 = vperm.xlu0 %7787, %v3382_v22  }
 0x49b   :  { %3429 = vperm.xlu1 %7788, %v10918_v49   ;;  %3691 = vperm.xlu0 %7787, %v3686_v18  }
 0x49e   :  { %v7887_v45 = vpop.eup %7886 }
 0x49f   :  { %3424 = vperm.xlu1 %7788, %v10929_v20   ;;  %v3349_v9 = vmul.f32 %v7887_v45, %v2515_v55 }
 0x4a1   :  { %v3365_v50 = vmul.f32 %v3349_v9, %v3237_v59 }
 0x4a3   :  { %3419 = vperm.xlu1 %7788, %v3353_v44   ;;  %v3381_v49 = vsub.f32 %v2531_v14, %v3365_v50 }
 0x4a7   :  { %3414 = vperm.xlu1 %7788, %v3352_v37  }
 0x4ab   :  { %3409 = vperm.xlu1 %7788, %v3351_v53  }
 0x4af   :  { %3404 = vperm.xlu1 %7788, %v3350_v39   ;;  %v14861_v39 = vld [vmem:[#allocation59_spill] sm:$0xff] }
 0x4b3   :  { %3399 = vperm.xlu1 %7788, %v3349_v9  }
 0x4b7   :  { %3543 = vperm.xlu1 %7788, %v3381_v49  }
 0x4d1   :  { %v3584_v60 = vpop.permute.xlu0 %3583 }
 0x4da   :  { %v10990_v20 = vpop.permute.xlu0 %3588 }
 0x4de   :  { %v10992_v44 = vpop.permute.xlu0 %3593 }
 0x4e3   :  { %v10994_v37 = vpop.permute.xlu0 %3598 }
 0x4e7   :  { %v10996_v26 = vpop.permute.xlu0 %3603 }
 0x4ee   :  { %v3470_v58 = vpop.permute.xlu0 %3469 }
 0x4ef   :  { %v3533_v27 = vmul.f32 %v3470_v58, %v10547_v3  ;;  %v3535_v31 = vmul.f32 %v3470_v58, %v10575_v61  ;;  %v3534_v36 = vmul.f32 %v3470_v58, %v10540_v6  ;;  %v3536_v22 = vmul.f32 %v3470_v58, %v10601_v30  ;;  %v14866_v58 = vld [vmem:[#allocation29_spill] sm:$0xff] }
 0x4f2   :  { %v3435_v5 = vpop.permute.xlu1 %3434  ;;  %v10998_v35 = vpop.permute.xlu0 %3608 }
 0x4f3   :  { %v11015_v18 = vmul.f32 %v3435_v5, %v10344_v29  ;;  %v11018_v0 = vmul.f32 %v3435_v5, %v10370_v2  ;;  %v3506_v45 = vmul.f32 %v3435_v5, %v10346_v15  ;;  %v3508_v55 = vmul.f32 %v3435_v5, %v10384_v56  ;;  %v14867_v5 = vld [vmem:[#allocation54_spill] sm:$0xff] }
 0x4f6   :  { %v3440_v53 = vpop.permute.xlu1 %3439  ;;  %v3614_v17 = vpop.permute.xlu0 %3613 }
 0x4f7   :  { %v3509_v24 = vmul.f32 %v3440_v53, %v14861_v39  ;;  %v3511_v62 = vmul.f32 %v3440_v53, %v14862_v52  ;;  %v3510_v13 = vmul.f32 %v3440_v53, %v14863_v16  ;;  %v3512_v19 = vmul.f32 %v3440_v53, %v14864_v21  ;;  %v14865_v53 = vld [vmem:[#allocation31_spill] sm:$0xff] }
 0x4f8   :  { %v3678_v50 = vadd.f32 %v3614_v17, %v3534_v36  ;;  %v3680_v14 = vadd.f32 %v3614_v17, %v3536_v22  ;;  %v3677_v3 = vadd.f32 %v3614_v17, %v3533_v27  ;;  %v3679_v49 = vadd.f32 %v3614_v17, %v3535_v31  ;;  %v14868_v52 = vld [vmem:[#allocation51_spill] sm:$0xff] }
 0x4f9   :  { %v11022_v61 = vadd.f32 %v3584_v60, %v3510_v13  ;;  %v11024_v6 = vadd.f32 %v3584_v60, %v3512_v19  ;;  %v11026_v30 = vadd.f32 %v3584_v60, %v3509_v24  ;;  %v11028_v29 = vadd.f32 %v3584_v60, %v3511_v62 }
 0x4fa   :  { %v3445_v12 = vpop.permute.xlu1 %3444  ;;  %v11004_v34 = vpop.permute.xlu0 %3578 }
 0x4fb   :  { %v11031_v2 = vmul.f32 %v3445_v12, %v14865_v53  ;;  %v11034_v15 = vmul.f32 %v3445_v12, %v14866_v58  ;;  %v3514_v39 = vmul.f32 %v3445_v12, %v14867_v5  ;;  %v11040_v17 = vmul.f32 %v3445_v12, %v14868_v52 }
 0x4fc   :  { %v11049_v27 = vadd.f32 %v11004_v34, %v3506_v45  ;;  %v11052_v31 = vadd.f32 %v11004_v34, %v3508_v55 }
 0x4fe   :  { %v11000_v59 = vpop.permute.xlu1 %3449  ;;  %v11036_v56 = vpop.permute.xlu0 %3573 }
 0x502   :  { %v11002_v33 = vpop.permute.xlu1 %3454  ;;  %v11064_v58 = vpop.permute.xlu0 %3568 }
 0x503   :  { %v3521_v45 = vmul.f32 %v11002_v33, %v10461_v40 }
 0x506   :  { %v3460_v4 = vpop.permute.xlu1 %3459 }
 0x507   :  { %v3526_v55 = vmul.f32 %v3460_v4, %v10489_v48  ;;  %v3528_v53 = vmul.f32 %v3460_v4, %v10516_v47  ;;  %v3525_v5 = vmul.f32 %v3460_v4, %v10500_v46  ;;  %v3524_v47 = vmul.f32 %v11002_v33, %v10496_v32 }
 0x50a   :  { %v3465_v57 = vpop.permute.xlu1 %3464 }
 0x50b   :  { %v3530_v21 = vmul.f32 %v3465_v57, %v10511_v38  ;;  %v3532_v19 = vmul.f32 %v3465_v57, %v10534_v28  ;;  %v14870_v38 = vld [vmem:[#allocation50_spill] sm:$0xff] }
 0x50c   :  { %v3518_v28 = vmul.f32 %v11000_v59, %v14870_v38 }
 0x50d   :  { %v3674_v40 = vadd.f32 %v10998_v35, %v3530_v21  ;;  %v3676_v48 = vadd.f32 %v10998_v35, %v3532_v19  ;;  %v3649_v21 = vadd.f32 %v11004_v34, %v11015_v18  ;;  %v11090_v19 = vpop.permute.xlu0 %3563 }
 0x50e   :  { %v3475_v9 = vpop.permute.xlu1 %3474 }
 0x50f   :  { %v3537_v16 = vmul.f32 %v3475_v9, %v10549_v63  ;;  %v3539_v24 = vmul.f32 %v3475_v9, %v10564_v1  ;;  %v3538_v60 = vmul.f32 %v3475_v9, %v10558_v10  ;;  %v3540_v62 = vmul.f32 %v3475_v9, %v10581_v41  ;;  %v14869_v1 = vld [vmem:[#allocation36_spill] sm:$0xff] }
 0x510   :  { %v3517_v10 = vmul.f32 %v11000_v59, %v14869_v1  ;;  %v3529_v41 = vmul.f32 %v3465_v57, %v10509_v51  ;;  %v3531_v9 = vmul.f32 %v3465_v57, %v10528_v25  ;;  %v3527_v51 = vmul.f32 %v3460_v4, %v10502_v7  ;;  %v14871_v57 = vld [vmem:[#allocation44_spill] sm:$0xff] }
 0x511   :  { %v3522_v52 = vmul.f32 %v11002_v33, %v14871_v57  ;;  %v14880_v57 = vld [vmem:[#allocation35_spill] sm:$0xff] }
 0x512   :  { %v3619_v13 = vpop.permute.xlu1 %3618  ;;  %v3673_v7 = vadd.f32 %v10998_v35, %v3529_v41  ;;  %v3675_v4 = vadd.f32 %v10998_v35, %v3531_v9  ;;  %v3661_v41 = vadd.f32 %v10992_v44, %v3517_v10 }
 0x513   :  { %v3682_v12 = vadd.f32 %v3619_v13, %v3538_v60  ;;  %v3684_v36 = vadd.f32 %v3619_v13, %v3540_v62  ;;  %v3681_v63 = vadd.f32 %v3619_v13, %v3537_v16  ;;  %v3683_v22 = vadd.f32 %v3619_v13, %v3539_v24  ;;  %v14872_v16 = vld [vmem:[#allocation49_spill] sm:$0xff]  ;;  %v14874_v62 = vld [vmem:[#allocation48_spill] sm:$0xff] }
 0x514   :  { %v3523_v46 = vmul.f32 %v11002_v33, %v14872_v16  ;;  %v14873_v24 = vld [vmem:[#allocation33_spill] sm:$0xff]  ;;  %v3519_v32 = vmul.f32 %v11000_v59, %v14874_v62  ;;  %v3669_v33 = vadd.f32 %v10996_v26, %v3525_v5  ;;  %v3666_v35 = vadd.f32 %v10994_v37, %v3522_v52 }
 0x515   :  { %3694 = vmatprep.subr.mxu0 %v3682_v12  ;;  %3765 = vmatprep.subr.mxu1 %v3684_v36  ;;  %v3520_v60 = vmul.f32 %v11000_v59, %v14873_v24  ;;  %v3665_v59 = vadd.f32 %v10994_v37, %v3521_v45  ;;  %v3658_v36 = vadd.f32 %v10990_v20, %v3514_v39  ;;  %v14885_v62 = vld [vmem:[#allocation37_spill] sm:$0xff] }
 0x516   :  { %3695 = vmatpush1.msra.mxu0 %v3681_v63  ;;  %3766 = vmatpush1.msra.mxu1 %v3683_v22  ;;  %v3430_v25 = vpop.permute.xlu1 %3429  ;;  %v3667_v12 = vadd.f32 %v10994_v37, %v3523_v46  ;;  %v3663_v9 = vadd.f32 %v10992_v44, %v3519_v32  ;;  %v3660_v39 = vadd.f32 %v10990_v20, %v11040_v17  ;;  %v14883_v46 = vld [vmem:[#allocation38_spill] sm:$0xff] }
 0x517   :  { %3696 = vmatprep.subr.mxu0 %v3678_v50  ;;  %3767 = vmatprep.subr.mxu1 %v3680_v14  ;;  %v3670_v50 = vadd.f32 %v10996_v26, %v3526_v55  ;;  %v3672_v14 = vadd.f32 %v10996_v26, %v3528_v53  ;;  %v3664_v63 = vadd.f32 %v10992_v44, %v3520_v60  ;;  %v14878_v53 = vld [vmem:[#allocation47_spill] sm:$0xff] }
 0x518   :  { %3697 = vmatpush1.msra.mxu0 %v3677_v3  ;;  %3768 = vmatpush1.msra.mxu1 %v3679_v49  ;;  %v3671_v3 = vadd.f32 %v10996_v26, %v3527_v51  ;;  %v3668_v49 = vadd.f32 %v10994_v37, %v3524_v47  ;;  %v3662_v26 = vadd.f32 %v10992_v44, %v3518_v28  ;;  %v14875_v28 = vld [vmem:[#allocation46_spill] sm:$0xff]  ;;  %v14879_v51 = vld [vmem:[#allocation39_spill] sm:$0xff] }
 0x519   :  { %3698 = vmatprep.subr.mxu0 %v3674_v40  ;;  %3769 = vmatprep.subr.mxu1 %v3676_v48  ;;  %v3502_v22 = vmul.f32 %v3430_v25, %v10457_v11  ;;  %v3501_v18 = vmul.f32 %v3430_v25, %v10579_v43  ;;  %v3503_v37 = vmul.f32 %v3430_v25, %v10607_v23  ;;  %v14882_v48 = vld [vmem:[#allocation43_spill] sm:$0xff] }
 0x51a   :  { %v3425_v13 = vpop.permute.xlu1 %3424  ;;  %3699 = vmatpush1.msra.mxu0 %v3673_v7  ;;  %3770 = vmatpush1.msra.mxu1 %v3675_v4  ;;  %v3504_v38 = vmul.f32 %v3430_v25, %v10639_v54  ;;  %v3657_v11 = vadd.f32 %v10990_v20, %v11031_v2  ;;  %v3659_v43 = vadd.f32 %v10990_v20, %v11034_v15  ;;  %v3559_v54 = vpop.permute.xlu0 %3558  ;;  %v14876_v20 = vld [vmem:[#allocation41_spill] sm:$0xff] }
 0x51b   :  { %3700 = vmatprep.subr.mxu0 %v3670_v50  ;;  %3771 = vmatprep.subr.mxu1 %v3672_v14  ;;  %v3651_v44 = vadd.f32 %v11004_v34, %v11018_v0  ;;  %v3497_v23 = vmul.f32 %v3425_v13, %v10604_v42  ;;  %v3646_v10 = vadd.f32 %v11036_v56, %v3502_v22  ;;  %v14877_v0 = vld [vmem:[#allocation45_spill] sm:$0xff]  ;;  %v14890_v22 = vld [vmem:[#allocation32_spill] sm:$0xff] }
 0x51c   :  { %3701 = vmatpush1.msra.mxu0 %v3669_v33  ;;  %3772 = vmatpush1.msra.mxu1 %v3671_v3  ;;  %v3498_v17 = vmul.f32 %v3425_v13, %v10592_v8  ;;  %v3499_v45 = vmul.f32 %v3425_v13, %v14875_v28  ;;  %v3645_v2 = vadd.f32 %v11036_v56, %v3501_v18  ;;  %v14887_v3 = vld [vmem:[#allocation40_spill] sm:$0xff] }
 0x51d   :  { %3702 = vmatprep.subr.mxu0 %v3666_v35  ;;  %3773 = vmatprep.subr.mxu1 %v3668_v49  ;;  %v3500_v15 = vmul.f32 %v3425_v13, %v14876_v20  ;;  %v3648_v42 = vadd.f32 %v11036_v56, %v3504_v38  ;;  %v3647_v34 = vadd.f32 %v11036_v56, %v3503_v37  ;;  %v14881_v56 = vld [vmem:[#allocation42_spill] sm:$0xff]  ;;  %v14886_v13 = vld [vmem:[#allocation20_spill] sm:$0xff] }
 0x51e   :  { %v3420_v1 = vpop.permute.xlu1 %3419  ;;  %3703 = vmatpush1.msra.mxu0 %v3665_v59  ;;  %3774 = vmatpush1.msra.mxu1 %v3667_v12  ;;  %v3554_v50 = vpop.permute.xlu0 %3553  ;;  %v14888_v49 = vld [vmem:[#allocation30_spill] sm:$0xff] }
 0x51f   :  { %3704 = vmatprep.subr.mxu0 %v3662_v26  ;;  %3775 = vmatprep.subr.mxu1 %v3664_v63  ;;  %v3494_v8 = vmul.f32 %v3420_v1, %v14877_v0  ;;  %v3493_v5 = vmul.f32 %v3420_v1, %v14878_v53  ;;  %v3495_v25 = vmul.f32 %v3420_v1, %v14879_v51 }
 0x520   :  { %3705 = vmatpush1.msra.mxu0 %v3661_v41  ;;  %3776 = vmatpush1.msra.mxu1 %v3663_v9  ;;  %v3496_v52 = vmul.f32 %v3420_v1, %v14880_v57  ;;  %v14891_v1 = vld [vmem:[#allocation21_spill] sm:$0xff]  ;;  %v14892_v9 = vld [vmem:[#allocation15_spill] sm:$0xff]  ;;  %v3685_v57 = vld [vmem:[%s14161_s9] sm:$0x7] }
 0x521   :  { %3706 = vmatprep.subr.mxu0 %v3658_v36  ;;  %3777 = vmatprep.subr.mxu1 %v3660_v39  ;;  %v3637_v24 = vadd.f32 %v11090_v19, %v3493_v5  ;;  %v3639_v60 = vadd.f32 %v11090_v19, %v3495_v25 }
 0x522   :  { %v3415_v55 = vpop.permute.xlu1 %3414  ;;  %3707 = vmatpush1.msra.mxu0 %v3657_v11  ;;  %3778 = vmatpush1.msra.mxu1 %v3659_v43  ;;  %v3640_v14 = vadd.f32 %v11090_v19, %v3496_v52  ;;  %v3549_v11 = vpop.permute.xlu0 %3548  ;;  %v14897_v52 = vmov 0.0  }
 0x523   :  { %3708 = vmatprep.subr.mxu0 %v11022_v61  ;;  %3779 = vmatprep.subr.mxu1 %v11024_v6  ;;  %v3642_v61 = vadd.f32 %v11064_v58, %v3498_v17  ;;  %v3641_v6 = vadd.f32 %v11064_v58, %v3497_v23  ;;  %v3490_v40 = vmul.f32 %v3415_v55, %v14881_v56 }
 0x524   :  { %3709 = vmatpush1.msra.mxu0 %v11026_v30  ;;  %3780 = vmatpush1.msra.mxu1 %v11028_v29  ;;  %v3489_v47 = vmul.f32 %v3415_v55, %v14882_v48  ;;  %v3644_v30 = vadd.f32 %v11064_v58, %v3500_v15  ;;  %v3643_v29 = vadd.f32 %v11064_v58, %v3499_v45  ;;  %v14895_v15 = vld [vmem:[#allocation26_spill] sm:$0xff] }
 0x525   :  { %3710 = vmatprep.subr.mxu0 %v11049_v27  ;;  %3781 = vmatprep.subr.mxu1 %v11052_v31  ;;  %v3491_v7 = vmul.f32 %v3415_v55, %v14883_v46  ;;  %v3638_v27 = vadd.f32 %v11090_v19, %v3494_v8  ;;  %v14884_v31 = vld [vmem:[#allocation28_spill] sm:$0xff]  ;;  %v3634_v58 = vadd.f32 %v3559_v54, %v3490_v40  ;;  %v14889_v19 = vld [vmem:[#allocation34_spill] sm:$0xff] }
 0x526   :  { %v3410_v16 = vpop.permute.xlu1 %3409  ;;  %3711 = vmatpush1.msra.mxu0 %v3649_v21  ;;  %3782 = vmatpush1.msra.mxu1 %v3651_v44  ;;  %v3492_v4 = vmul.f32 %v3415_v55, %v14884_v31  ;;  %v3633_v12 = vadd.f32 %v3559_v54, %v3489_v47 }
 0x527   :  { %3712 = vmatprep.subr.mxu0 %v3646_v10  ;;  %3783 = vmatprep.subr.mxu1 %v3648_v42  ;;  %v3486_v32 = vmul.f32 %v3410_v16, %v14885_v62  ;;  %v3488_v33 = vmul.f32 %v3410_v16, %v14886_v13  ;;  %v3485_v35 = vmul.f32 %v3410_v16, %v14887_v3 }
 0x528   :  { %3713 = vmatpush1.msra.mxu0 %v3645_v2  ;;  %3784 = vmatpush1.msra.mxu1 %v3647_v34  ;;  %v3487_v21 = vmul.f32 %v3410_v16, %v14888_v49  ;;  %v3636_v36 = vadd.f32 %v3559_v54, %v3492_v4  ;;  %v3635_v26 = vadd.f32 %v3559_v54, %v3491_v7  ;;  %v14893_v54 = vld [vmem:[#allocation24_spill] sm:$0xff]  ;;  %v14894_v2 = vld [vmem:[#allocation18_spill] sm:$0xff]  ;;  %v14896_v34 = vld [vmem:[#allocation13_spill] sm:$0xff] }
 0x529   :  { %3714 = vmatprep.subr.mxu0 %v3642_v61  ;;  %3785 = vmatprep.subr.mxu1 %v3644_v30  ;;  %v3630_v39 = vadd.f32 %v3554_v50, %v3486_v32  ;;  %v3632_v38 = vadd.f32 %v3554_v50, %v3488_v33  ;;  %v3629_v44 = vadd.f32 %v3554_v50, %v3485_v35  ;;  %v3692_v61 = vpop.permute.xlu0 %3691 }
 0x52a   :  { %v3405_v59 = vpop.permute.xlu1 %3404  ;;  %3715 = vmatpush1.msra.mxu0 %v3641_v6  ;;  %3786 = vmatpush1.msra.mxu1 %v3643_v29  ;;  %v3631_v23 = vadd.f32 %v3554_v50, %v3487_v21 }
 0x52b   :  { %3716 = vmatprep.subr.mxu0 %v3638_v27  ;;  %3787 = vmatprep.subr.mxu1 %v3640_v14  ;;  %v3482_v63 = vmul.f32 %v3405_v59, %v14889_v19  ;;  %v3481_v18 = vmul.f32 %v3405_v59, %v14890_v22  ;;  %v3483_v41 = vmul.f32 %v3405_v59, %v14891_v1 }
 0x52c   :  { %3717 = vmatpush1.msra.mxu0 %v3637_v24  ;;  %3788 = vmatpush1.msra.mxu1 %v3639_v60  ;;  %v3484_v37 = vmul.f32 %v3405_v59, %v14892_v9 }
 0x52d   :  { %3718 = vmatprep.subr.mxu0 %v3634_v58  ;;  %3789 = vmatprep.subr.mxu1 %v3636_v36  ;;  %v3626_v10 = vadd.f32 %v3549_v11, %v3482_v63  ;;  %v3625_v45 = vadd.f32 %v3549_v11, %v3481_v18  ;;  %v3627_v55 = vadd.f32 %v3549_v11, %v3483_v41 }
 0x52e   :  { %v3400_v43 = vpop.permute.xlu1 %3399  ;;  %3719 = vmatpush1.msra.mxu0 %v3633_v12  ;;  %3790 = vmatpush1.msra.mxu1 %v3635_v26  ;;  %v3628_v17 = vadd.f32 %v3549_v11, %v3484_v37 }
 0x52f   :  { %3720 = vmatprep.subr.mxu0 %v3630_v39  ;;  %3791 = vmatprep.subr.mxu1 %v3632_v38  ;;  %v3477_v28 = vmul.f32 %v3400_v43, %v14893_v54  ;;  %v3479_v20 = vmul.f32 %v3400_v43, %v14894_v2  ;;  %v3478_v42 = vmul.f32 %v3400_v43, %v14895_v15  ;;  %v3687_v39 = vld [vmem:[%s14162_s11] sm:$0x7]  ;;  %v3946_v54 = vld [vmem:[%s14164_s14 + $0x78] sm:$0xff]  ;;  %v3940_v15 = vld [vmem:[%s14164_s14 + $0x48] sm:$0xff] }
 0x530   :  { %3721 = vmatpush1.msra.mxu0 %v3629_v44  ;;  %3792 = vmatpush1.msra.mxu1 %v3631_v23  ;;  %v3480_v0 = vmul.f32 %v3400_v43, %v14896_v34  ;;  %v3688_v43 = vld [vmem:[%s14163_s12] sm:$0x7]  ;;  %v3945_v23 = vld [vmem:[%s14164_s14 + $0x70] sm:$0xff]  ;;  %v3942_v2 = vld [vmem:[%s14164_s14 + $0x58] sm:$0xff] }
 0x531   :  { %3722 = vmatprep.subr.mxu0 %v3626_v10  ;;  %3793 = vmatprep.subr.mxu1 %v3628_v17  ;;  %v3943_v17 = vld [vmem:[%s14164_s14 + $0x60] sm:$0xff]  ;;  %v3938_v34 = vld [vmem:[%s14164_s14 + $0x38] sm:$0xff] }
 0x532   :  { %v3544_v8 = vpop.permute.xlu1 %3543  ;;  %3723 = vmatpush1.msra.mxu0 %v3625_v45  ;;  %3794 = vmatpush1.msra.mxu1 %v3627_v55  ;;  %v3944_v45 = vld [vmem:[%s14164_s14 + $0x68] sm:$0xff]  ;;  %v3939_v55 = vld [vmem:[%s14164_s14 + $0x40] sm:$0xff] }
 0x533   :  { %v3622_v53 = vadd.f32 %v3544_v8, %v3478_v42  ;;  %v3624_v5 = vadd.f32 %v3544_v8, %v3480_v0  ;;  %v3621_v51 = vadd.f32 %v3544_v8, %v3477_v28  ;;  %v3623_v25 = vadd.f32 %v3544_v8, %v3479_v20  ;;  %v3941_v28 = vld [vmem:[%s14164_s14 + $0x50] sm:$0xff]  ;;  %v3935_v42 = vld [vmem:[%s14164_s14 + $0x20] sm:$0xff]  ;;  %v3936_v8 = vld [vmem:[%s14164_s14 + $0x28] sm:$0xff] }
 0x534   :  { %v3937_v20 = vld [vmem:[%s14164_s14 + $0x30] sm:$0xff] }
 0x535   :  { %3724 = vmatprep.subr.mxu0 %v3622_v53  ;;  %3795 = vmatprep.subr.mxu1 %v3624_v5  ;;  %v3933_v0 = vld [vmem:[%s14164_s14 + $0x10] sm:$0xff]  ;;  %v3931_v53 = vld [vmem:[%s14164_s14] sm:$0xff]  ;;  %v3934_v5 = vld [vmem:[%s14164_s14 + $0x18] sm:$0xff] }
 0x536   :  { %3725 = vmatpush1.msra.mxu0 %v3621_v51  ;;  %3796 = vmatpush1.msra.mxu1 %v3623_v25  ;;  %v3932_v51 = vld [vmem:[%s14164_s14 + $0x8] sm:$0xff] }
 0x537   :  { %3759 = vmatmul.mubr.f32.vlgmr.msra.gmra.mxu0 %v3685_v57  ;;  %3830 = vmatmul.mubr.f32.vlgmr.msra.gmra.mxu1 %v3685_v57 }
 0x538   :  { %4184 = vmatprep.mubr.f32.mxu0 %v14897_v52  ;;  %4345 = vmatprep.mubr.f32.mxu1 %v14897_v52 }
 0x5f7   :  { %v3760_v6 = vpop.f32.mrf.mxu0  ;;  %v3831_v56 = vpop.f32.mrf.mxu1 }
 0x5f8   :  { %v3761_v40 = vadd.f32 %v3760_v6, %v3692_v61  ;;  %v3832_v48 = vadd.f32 %v3831_v56, %v3692_v61 }
 0x5f9   :  { %v3762_v47 = vpop.f32.mrf.mxu0  ;;  %v3833_v16 = vpop.f32.mrf.mxu1 }
 0x5fa   :  { %v11158_v30 = vmax.f32 %v3761_v40, 0.0  ;;  %v3763_v29 = vadd.f32 %v3762_v47, %v3692_v61  ;;  %v3834_v46 = vadd.f32 %v3833_v16, %v3692_v61  ;;  %v11160_v7 = vmax.f32 %v3832_v48, 0.0 }
 0x5fc   :  { %v3850_v27 = vmul.f32 %v11158_v30, %v11158_v30  ;;  %v11164_v31 = vmax.f32 %v3763_v29, 0.0  ;;  %v11166_v4 = vmax.f32 %v3834_v46, 0.0  ;;  %v3841_v50 = vsel %vm3840_vm2, %v11158_v30, 0.0 }
 0x5fd   :  { %v3852_v14 = vmul.f32 %v11160_v7, %v11160_v7  ;;  %v3844_v32 = vsel %vm3840_vm2, %v11160_v7, 0.0 }
 0x5fe   :  { %v3842_v24 = vsel %vm3840_vm2, %v11164_v31, 0.0  ;;  %v3851_v60 = vmul.f32 %v11164_v31, %v11164_v31  ;;  %v3854_v62 = vsel %vm3840_vm2, %v3850_v27, 0.0  ;;  %v3853_v33 = vmul.f32 %v11166_v4, %v11166_v4 }
 0x5ff   :  { %v3843_v58 = vadd.f32 %v3842_v24, %v3841_v50  ;;  %v3846_v49 = vsel %vm3840_vm2, %v11166_v4, 0.0  ;;  %v3857_v21 = vsel %vm3840_vm2, %v3852_v14, 0.0 }
 0x600   :  { %v3855_v13 = vsel %vm3840_vm2, %v3851_v60, 0.0  ;;  %v3859_v36 = vsel %vm3840_vm2, %v3853_v33, 0.0  ;;  %v3915_v33 = vld [vmem:[%s14165_s13] sm:$0xff] }
 0x601   :  { %v3845_v3 = vadd.f32 %v3844_v32, %v3843_v58  ;;  %v3856_v35 = vadd.f32 %v3855_v13, %v3854_v62 }
 0x603   :  { %v3847_v59 = vadd.f32 %v3846_v49, %v3845_v3  ;;  %v3858_v12 = vadd.f32 %v3857_v21, %v3856_v35  ;;  %v3916_v49 = vld [vmem:[%s14165_s13 + $0x8] sm:$0xff]  ;;  %v3917_v21 = vld [vmem:[%s14165_s13 + $0x10] sm:$0xff] }
 0x605   :  { %3848 = vadd.xlane.f32.xlu1 %v3847_v59  ;;  %v3860_v26 = vadd.f32 %v3859_v36, %v3858_v12  ;;  %v3918_v59 = vld [vmem:[%s14165_s13 + $0x18] sm:$0xff]  ;;  %v3919_v12 = vld [vmem:[%s14165_s13 + $0x20] sm:$0xff]  ;;  %v3920_v36 = vld [vmem:[%s14165_s13 + $0x28] sm:$0xff] }
 0x607   :  { %3861 = vadd.xlane.f32.xlu0 %v3860_v26  ;;  %v3921_v26 = vld [vmem:[%s14165_s13 + $0x30] sm:$0xff] }
 0x68e   :  { %v3849_v19 = vpop.xlane.xlu1 %3848 }
 0x68f   :  { %v3863_v63 = vmul.f32 0.001953125, %v3849_v19  ;;  %v3922_v19 = vld [vmem:[%s14165_s13 + $0x38] sm:$0xff] }
 0x690   :  { %v3862_v22 = vpop.xlane.xlu0 %3861 }
 0x691   :  { %v3865_v18 = vmul.f32 %v3863_v63, %v3863_v63  ;;  %v3864_v1 = vmul.f32 0.001953125, %v3862_v22  ;;  %v3924_v22 = vld [vmem:[%s14165_s13 + $0x48] sm:$0xff] }
 0x693   :  { %v3866_v41 = vsub.f32 %v3864_v1, %v3865_v18  ;;  %v3925_v18 = vld [vmem:[%s14165_s13 + $0x50] sm:$0xff]  ;;  %v3926_v1 = vld [vmem:[%s14165_s13 + $0x58] sm:$0xff] }
 0x695   :  { %v3867_v9 = vmax.f32 %v3866_v41, 0.0  ;;  %v3927_v41 = vld [vmem:[%s14165_s13 + $0x60] sm:$0xff] }
 0x697   :  { %v3868_v37 = vadd.f32 1e-05, %v3867_v9  ;;  %v3928_v9 = vld [vmem:[%s14165_s13 + $0x68] sm:$0xff] }
 0x699   :  { %7888 = vrsqrt.f32 %v3868_v37  ;;  %v3929_v37 = vld [vmem:[%s14165_s13 + $0x70] sm:$0xff] }
 0x6a6   :  { %v7889_v38 = vpop.eup %7888 }
 0x6a7   :  { %v3870_v11 = vmul.f32 %v7889_v38, %v3687_v39  ;;  %v3930_v39 = vld [vmem:[%s14165_s13 + $0x78] sm:$0xff] }
 0x6a9   :  { %3875 = vperm.xlu0 %7787, %v3870_v11   ;;  %v3871_v44 = vmul.f32 %v3870_v11, %v3863_v63  ;;  %v3923_v63 = vld [vmem:[%s14165_s13 + $0x40] sm:$0xff] }
 0x6ab   :  { %v3872_v10 = vsub.f32 %v3688_v43, %v3871_v44 }
 0x6ad   :  { %4051 = vperm.xlu0 %7787, %v3945_v23   ;;  %3884 = vperm.xlu1 %7788, %v3872_v10  }
 0x6b1   :  { %4041 = vperm.xlu0 %7787, %v3943_v17   ;;  %4056 = vperm.xlu1 %7788, %v3946_v54  }
 0x6b5   :  { %4031 = vperm.xlu0 %7787, %v3941_v28   ;;  %4046 = vperm.xlu1 %7788, %v3944_v45  }
 0x6b9   :  { %4021 = vperm.xlu0 %7787, %v3939_v55   ;;  %4036 = vperm.xlu1 %7788, %v3942_v2  }
 0x6bd   :  { %4011 = vperm.xlu0 %7787, %v3937_v20   ;;  %4026 = vperm.xlu1 %7788, %v3940_v15  }
 0x6c1   :  { %4001 = vperm.xlu0 %7787, %v3935_v42   ;;  %4016 = vperm.xlu1 %7788, %v3938_v34  }
 0x6c5   :  { %3991 = vperm.xlu0 %7787, %v3933_v0   ;;  %4006 = vperm.xlu1 %7788, %v3936_v8  }
 0x6c9   :  { %3981 = vperm.xlu0 %7787, %v3931_v53   ;;  %3996 = vperm.xlu1 %7788, %v3934_v5  }
 0x6cd   :  { %3986 = vperm.xlu1 %7788, %v3932_v51  }
 0x724   :  { %v3876_v25 = vpop.permute.xlu0 %3875 }
 0x725   :  { %v3878_v57 = vmul.f32 %v3876_v25, %v11158_v30  ;;  %v3879_v61 = vmul.f32 %v3876_v25, %v11164_v31  ;;  %v3880_v6 = vmul.f32 %v3876_v25, %v11160_v7  ;;  %v3881_v56 = vmul.f32 %v3876_v25, %v11166_v4 }
 0x728   :  { %v3885_v40 = vpop.permute.xlu1 %3884  ;;  %v11360_v38 = vpop.permute.xlu0 %4051 }
 0x729   :  { %v3887_v48 = vadd.f32 %v3885_v40, %v3878_v57  ;;  %v3888_v47 = vadd.f32 %v3885_v40, %v3879_v61  ;;  %v3889_v16 = vadd.f32 %v3885_v40, %v3880_v6  ;;  %v3890_v29 = vadd.f32 %v3885_v40, %v3881_v56 }
 0x72b   :  { %v7744_v46 = vmul.f32 -1.442695, %v3887_v48  ;;  %v7745_v27 = vmul.f32 -1.442695, %v3888_v47  ;;  %v7746_v50 = vmul.f32 -1.442695, %v3889_v16 }
 0x72c   :  { %v7747_v14 = vmul.f32 -1.442695, %v3890_v29  ;;  %v11362_v11 = vpop.permute.xlu1 %4056  ;;  %v11364_v43 = vpop.permute.xlu0 %4041 }
 0x72d   :  { %7890 = vpow2.f32 %v7744_v46 }
 0x72e   :  { %7892 = vpow2.f32 %v7745_v27 }
 0x72f   :  { %7894 = vpow2.f32 %v7746_v50 }
 0x730   :  { %7896 = vpow2.f32 %v7747_v14  ;;  %v11366_v44 = vpop.permute.xlu1 %4046  ;;  %v11370_v54 = vpop.permute.xlu0 %4031 }
 0x734   :  { %v11372_v28 = vpop.permute.xlu1 %4036  ;;  %v4022_v34 = vpop.permute.xlu0 %4021 }
 0x738   :  { %v11380_v0 = vpop.permute.xlu1 %4026  ;;  %v11388_v61 = vpop.permute.xlu0 %4011 }
 0x73a   :  { %v7891_v30 = vpop.eup %7890 }
 0x73b   :  { %v7893_v24 = vpop.eup %7892  ;;  %v3903_v31 = vadd.f32 1.0, %v7891_v30 }
 0x73c   :  { %v7895_v60 = vpop.eup %7894  ;;  %v3904_v7 = vadd.f32 1.0, %v7893_v24  ;;  %v4017_v6 = vpop.permute.xlu1 %4016 }
 0x73d   :  { %v7897_v58 = vpop.eup %7896  ;;  %v3905_v4 = vadd.f32 1.0, %v7895_v60  ;;  %7898 = vrcp.f32 %v3903_v31  ;;  %v11396_v46 = vpop.permute.xlu0 %4001 }
 0x73e   :  { %v3906_v62 = vadd.f32 1.0, %v7897_v58  ;;  %7900 = vrcp.f32 %v3904_v7 }
 0x73f   :  { %7902 = vrcp.f32 %v3905_v4 }
 0x740   :  { %7904 = vrcp.f32 %v3906_v62  ;;  %v11398_v27 = vpop.permute.xlu1 %4006 }
 0x741   :  { %v11408_v7 = vpop.permute.xlu0 %3991 }
 0x744   :  { %v11410_v58 = vpop.permute.xlu1 %3996 }
 0x74a   :  { %v7899_v32 = vpop.eup %7898 }
 0x74b   :  { %v7901_v13 = vpop.eup %7900 }
 0x74c   :  { %v7903_v3 = vpop.eup %7902  ;;  %7748 = vmatprep.subr.msk.mxu0 %vm3840_vm2, %v7901_v13 }
 0x74d   :  { %v7905_v35 = vpop.eup %7904  ;;  %7749 = vmatpush1.msk.msra.mxu0 %vm3840_vm2, %v7899_v32 }
 0x74e   :  { %7766 = vmatprep.subr.msk.mxu1 %vm3840_vm2, %v7905_v35  ;;  %7750 = vmatmul.mubr.msk.f32.vlgmr.msra.gmra.mxu0 %vm4059_vm3, %v3915_v33 }
 0x74f   :  { %7767 = vmatpush1.msk.msra.mxu1 %vm3840_vm2, %v7903_v3  ;;  %4190 = vmatprep.mubr.f32.mxu0 %v14897_v52 }
 0x750   :  { %7768 = vmatmul.mubr.msk.f32.vlgmr.msra.gmra.mxu1 %vm4059_vm3, %v3915_v33 }
 0x751   :  { %4351 = vmatprep.mubr.f32.mxu1 %v14897_v52 }
 0x752   :  { %7751 = vmatmul.mubr.msk.f32.gmra.mxu0 %vm4059_vm3, %v3916_v49 }
 0x753   :  { %4196 = vmatprep.mubr.f32.mxu0 %v14897_v52 }
 0x754   :  { %7769 = vmatmul.mubr.msk.f32.gmra.mxu1 %vm4059_vm3, %v3916_v49 }
 0x755   :  { %4357 = vmatprep.mubr.f32.mxu1 %v14897_v52 }
 0x756   :  { %7752 = vmatmul.mubr.msk.f32.gmra.mxu0 %vm4059_vm3, %v3917_v21 }
 0x757   :  { %4202 = vmatprep.mubr.f32.mxu0 %v14897_v52 }
 0x758   :  { %7770 = vmatmul.mubr.msk.f32.gmra.mxu1 %vm4059_vm3, %v3917_v21 }
 0x759   :  { %4363 = vmatprep.mubr.f32.mxu1 %v14897_v52 }
 0x75a   :  { %7753 = vmatmul.mubr.msk.f32.gmra.mxu0 %vm4059_vm3, %v3918_v59 }
 0x75b   :  { %4208 = vmatprep.mubr.f32.mxu0 %v14897_v52 }
 0x75c   :  { %7771 = vmatmul.mubr.msk.f32.gmra.mxu1 %vm4059_vm3, %v3918_v59  ;;  %v11414_v59 = vpop.permute.xlu0 %3981 }
 0x75d   :  { %4369 = vmatprep.mubr.f32.mxu1 %v14897_v52  ;;  %14903 = vst [vmem:[#allocation4_spill] sm:$0xff] %v11414_v59 }
 0x75e   :  { %7754 = vmatmul.mubr.msk.f32.gmra.mxu0 %vm4059_vm3, %v3919_v12 }
 0x75f   :  { %4214 = vmatprep.mubr.f32.mxu0 %v14897_v52 }
 0x760   :  { %7772 = vmatmul.mubr.msk.f32.gmra.mxu1 %vm4059_vm3, %v3919_v12  ;;  %v11416_v12 = vpop.permute.xlu1 %3986 }
 0x761   :  { %4375 = vmatprep.mubr.f32.mxu1 %v14897_v52  ;;  %14904 = vst [vmem:[#allocation126_spill] sm:$0xff] %v11416_v12 }
 0x762   :  { %7755 = vmatmul.mubr.msk.f32.gmra.mxu0 %vm4059_vm3, %v3920_v36 }
 0x763   :  { %4220 = vmatprep.mubr.f32.mxu0 %v14897_v52 }
 0x764   :  { %7773 = vmatmul.mubr.msk.f32.gmra.mxu1 %vm4059_vm3, %v3920_v36 }
 0x765   :  { %4381 = vmatprep.mubr.f32.mxu1 %v14897_v52 }
 0x766   :  { %7756 = vmatmul.mubr.msk.f32.gmra.mxu0 %vm4059_vm3, %v3921_v26 }
 0x767   :  { %4226 = vmatprep.mubr.f32.mxu0 %v14897_v52 }
 0x768   :  { %7774 = vmatmul.mubr.msk.f32.gmra.mxu1 %vm4059_vm3, %v3921_v26 }
 0x769   :  { %4387 = vmatprep.mubr.f32.mxu1 %v14897_v52 }
 0x76a   :  { %7757 = vmatmul.mubr.msk.f32.gmra.mxu0 %vm4059_vm3, %v3922_v19 }
 0x76b   :  { %4232 = vmatprep.mubr.f32.mxu0 %v14897_v52 }
 0x76c   :  { %7775 = vmatmul.mubr.msk.f32.gmra.mxu1 %vm4059_vm3, %v3922_v19 }
 0x76d   :  { %4393 = vmatprep.mubr.f32.mxu1 %v14897_v52 }
 0x76e   :  { %7758 = vmatmul.mubr.msk.f32.gmra.mxu0 %vm4059_vm3, %v3923_v63 }
 0x76f   :  { %4238 = vmatprep.mubr.f32.mxu0 %v14897_v52 }
 0x770   :  { %7776 = vmatmul.mubr.msk.f32.gmra.mxu1 %vm4059_vm3, %v3923_v63 }
 0x771   :  { %4399 = vmatprep.mubr.f32.mxu1 %v14897_v52 }
 0x772   :  { %7759 = vmatmul.mubr.msk.f32.gmra.mxu0 %vm4059_vm3, %v3924_v22 }
 0x773   :  { %4244 = vmatprep.mubr.f32.mxu0 %v14897_v52 }
 0x774   :  { %7777 = vmatmul.mubr.msk.f32.gmra.mxu1 %vm4059_vm3, %v3924_v22 }
 0x775   :  { %4405 = vmatprep.mubr.f32.mxu1 %v14897_v52 }
 0x776   :  { %7760 = vmatmul.mubr.msk.f32.gmra.mxu0 %vm4059_vm3, %v3925_v18 }
 0x777   :  { %4250 = vmatprep.mubr.f32.mxu0 %v14897_v52 }
 0x778   :  { %7778 = vmatmul.mubr.msk.f32.gmra.mxu1 %vm4059_vm3, %v3925_v18 }
 0x779   :  { %4411 = vmatprep.mubr.f32.mxu1 %v14897_v52 }
 0x77a   :  { %7761 = vmatmul.mubr.msk.f32.gmra.mxu0 %vm4059_vm3, %v3926_v1 }
 0x77b   :  { %4256 = vmatprep.mubr.f32.mxu0 %v14897_v52 }
 0x77c   :  { %7779 = vmatmul.mubr.msk.f32.gmra.mxu1 %vm4059_vm3, %v3926_v1 }
 0x77d   :  { %4417 = vmatprep.mubr.f32.mxu1 %v14897_v52 }
 0x77e   :  { %7762 = vmatmul.mubr.msk.f32.gmra.mxu0 %vm4059_vm3, %v3927_v41 }
 0x77f   :  { %4262 = vmatprep.mubr.f32.mxu0 %v14897_v52 }
 0x780   :  { %7780 = vmatmul.mubr.msk.f32.gmra.mxu1 %vm4059_vm3, %v3927_v41 }
 0x781   :  { %4423 = vmatprep.mubr.f32.mxu1 %v14897_v52 }
 0x782   :  { %7763 = vmatmul.mubr.msk.f32.gmra.mxu0 %vm4059_vm3, %v3928_v9 }
 0x783   :  { %4268 = vmatprep.mubr.f32.mxu0 %v14897_v52 }
 0x784   :  { %7781 = vmatmul.mubr.msk.f32.gmra.mxu1 %vm4059_vm3, %v3928_v9 }
 0x785   :  { %4429 = vmatprep.mubr.f32.mxu1 %v14897_v52 }
 0x786   :  { %7764 = vmatmul.mubr.msk.f32.gmra.mxu0 %vm4059_vm3, %v3929_v37 }
 0x787   :  { %4274 = vmatprep.mubr.f32.mxu0 %v14897_v52 }
 0x788   :  { %7782 = vmatmul.mubr.msk.f32.gmra.mxu1 %vm4059_vm3, %v3929_v37 }
 0x789   :  { %4435 = vmatprep.mubr.f32.mxu1 %v14897_v52 }
 0x78a   :  { %7765 = vmatmul.mubr.msk.f32.gmra.mxu0 %vm4059_vm3, %v3930_v39 }
 0x78b   :  { %5530 = vmatprep.mubr.f32.mxu0 %v14897_v52 }
 0x78c   :  { %7783 = vmatmul.mubr.msk.f32.gmra.mxu1 %vm4059_vm3, %v3930_v39 }
 0x78d   :  { %5787 = vmatprep.mubr.f32.mxu1 %v14897_v52 }
 0x80e   :  { %v4186_v23 = vpop.f32.mrf.mxu0 }
 0x80f   :  { %v11423_v19 = vadd.f32 %v4186_v23, %v11414_v59 }
 0x810   :  { %v11368_v10 = vpop.f32.mrf.mxu1  ;;  %v4188_v17 = vpop.f32.mrf.mxu0 }
 0x811   :  { %14898 = vst [vmem:[#allocation12_spill] sm:$0xff] %v11368_v10  ;;  %14905 = vst [vmem:[#allocation3_spill] sm:$0xff] %v11423_v19  ;;  %v11426_v63 = vadd.f32 %v4188_v17, %v11414_v59 }
 0x812   :  { %v11374_v45 = vpop.f32.mrf.mxu1  ;;  %v4192_v55 = vpop.f32.mrf.mxu0 }
 0x813   :  { %14899 = vst [vmem:[#allocation10_spill] sm:$0xff] %v11374_v45  ;;  %14906 = vst [vmem:[#allocation124_spill] sm:$0xff] %v11426_v63  ;;  %v11429_v9 = vadd.f32 %v4192_v55, %v11416_v12 }
 0x814   :  { %v11376_v2 = vpop.f32.mrf.mxu1  ;;  %v4194_v20 = vpop.f32.mrf.mxu0 }
 0x815   :  { %14900 = vst [vmem:[#allocation8_spill] sm:$0xff] %v11376_v2  ;;  %v11432_v37 = vadd.f32 %v4194_v20, %v11416_v12 }
 0x816   :  { %v11378_v15 = vpop.f32.mrf.mxu1  ;;  %v4198_v42 = vpop.f32.mrf.mxu0 }
 0x817   :  { %14901 = vst [vmem:[#allocation7_spill] sm:$0xff] %v11378_v15  ;;  %v11437_v23 = vadd.f32 %v4198_v42, %v11408_v7 }
 0x818   :  { %v11382_v8 = vpop.f32.mrf.mxu1  ;;  %v4200_v53 = vpop.f32.mrf.mxu0 }
 0x819   :  { %v11444_v55 = vadd.f32 %v4200_v53, %v11408_v7 }
 0x81a   :  { %v11384_v5 = vpop.f32.mrf.mxu1  ;;  %v4204_v51 = vpop.f32.mrf.mxu0 }
 0x81b   :  { %14902 = vst [vmem:[#allocation5_spill] sm:$0xff] %v11384_v5  ;;  %v11447_v20 = vadd.f32 %v4204_v51, %v11410_v58 }
 0x81c   :  { %v11386_v25 = vpop.f32.mrf.mxu1  ;;  %v4206_v57 = vpop.f32.mrf.mxu0 }
 0x81e   :  { %v11390_v56 = vpop.f32.mrf.mxu1  ;;  %v4210_v40 = vpop.f32.mrf.mxu0 }
 0x81f   :  { %v11459_v53 = vadd.f32 %v4210_v40, %v11396_v46 }
 0x820   :  { %v11392_v48 = vpop.f32.mrf.mxu1  ;;  %v4212_v47 = vpop.f32.mrf.mxu0 }
 0x822   :  { %v11394_v16 = vpop.f32.mrf.mxu1  ;;  %v4216_v29 = vpop.f32.mrf.mxu0 }
 0x824   :  { %v4377_v50 = vpop.f32.mrf.mxu1  ;;  %v4218_v14 = vpop.f32.mrf.mxu0 }
 0x825   :  { %v4219_v42 = vadd.f32 %v4218_v14, %v11398_v27 }
 0x826   :  { %v11400_v30 = vpop.f32.mrf.mxu1  ;;  %v11402_v24 = vpop.f32.mrf.mxu0 }
 0x828   :  { %v11404_v31 = vpop.f32.mrf.mxu1  ;;  %v11406_v60 = vpop.f32.mrf.mxu0 }
 0x82a   :  { %v11412_v4 = vpop.f32.mrf.mxu1  ;;  %v4228_v62 = vpop.f32.mrf.mxu0 }
 0x82b   :  { %v4229_v32 = vadd.f32 %v4228_v62, %v4017_v6 }
 0x82c   :  { %v4389_v13 = vpop.f32.mrf.mxu1  ;;  %v4230_v33 = vpop.f32.mrf.mxu0 }
 0x82d   :  { %v4231_v3 = vadd.f32 %v4230_v33, %v4017_v6  ;;  %v4390_v35 = vadd.f32 %v4389_v13, %v4017_v6  ;;  %v11418_v36 = vmax.f32 %v4229_v32, 0.0 }
 0x82e   :  { %v4391_v49 = vpop.f32.mrf.mxu1  ;;  %v4234_v21 = vpop.f32.mrf.mxu0 }
 0x82f   :  { %v11420_v26 = vmax.f32 %v4231_v3, 0.0  ;;  %v4392_v22 = vadd.f32 %v4391_v49, %v4017_v6  ;;  %v4235_v18 = vadd.f32 %v4234_v21, %v4022_v34  ;;  %v11439_v32 = vmax.f32 %v4390_v35, 0.0 }
 0x830   :  { %v4395_v1 = vpop.f32.mrf.mxu1  ;;  %v4236_v41 = vpop.f32.mrf.mxu0  ;;  %v11450_v3 = vadd.f32 %v4206_v57, %v11410_v58 }
 0x831   :  { %v4541_v39 = vadd.f32 %v11420_v26, %v11418_v36  ;;  %v4396_v62 = vadd.f32 %v4395_v1, %v4022_v34  ;;  %v11441_v17 = vmax.f32 %v4235_v18, 0.0  ;;  %v4237_v6 = vadd.f32 %v4236_v41, %v4022_v34 }
 0x832   :  { %v4397_v13 = vpop.f32.mrf.mxu1  ;;  %v4240_v33 = vpop.f32.mrf.mxu0  ;;  %v11453_v21 = vmax.f32 %v4392_v22, 0.0 }
 0x833   :  { %14907 = vst [vmem:[#allocation2_spill] sm:$0xff] %v11441_v17  ;;  %v4398_v49 = vadd.f32 %v4397_v13, %v4022_v34  ;;  %v11455_v35 = vmax.f32 %v4237_v6, 0.0  ;;  %v4542_v41 = vadd.f32 %v4541_v39, %v11439_v32  ;;  %v4618_v51 = vmul.f32 %v11441_v17, %v11441_v17 }
 0x834   :  { %14908 = vst [vmem:[#allocation128_spill] sm:$0xff] %v11453_v21  ;;  %v4401_v18 = vpop.f32.mrf.mxu1  ;;  %v4242_v1 = vpop.f32.mrf.mxu0  ;;  %v11463_v52 = vmax.f32 %v4396_v62, 0.0  ;;  %v4241_v34 = vadd.f32 %v4240_v33, %v11380_v0  ;;  %v11473_v13 = vadd.f32 %v4212_v47, %v11396_v46  ;;  %v11476_v62 = vadd.f32 %v4216_v29, %v11398_v27 }
 0x835   :  { %14909 = vst [vmem:[#allocation129_spill] sm:$0xff] %v11455_v35  ;;  %v4546_v57 = vadd.f32 %v11455_v35, %v11441_v17  ;;  %v4619_v14 = vmul.f32 %v11455_v35, %v11455_v35  ;;  %v4243_v22 = vadd.f32 %v4242_v1, %v11380_v0  ;;  %v4543_v40 = vadd.f32 %v4542_v41, %v11453_v21 }
 0x836   :  { %14910 = vst [vmem:[#allocation125_spill] sm:$0xff] %v11463_v52  ;;  %v4403_v6 = vpop.f32.mrf.mxu1  ;;  %v4246_v39 = vpop.f32.mrf.mxu0  ;;  %v11479_v33 = vadd.f32 %v4377_v50, %v11398_v27  ;;  %v11481_v45 = vmax.f32 %v4398_v49, 0.0  ;;  %v11483_v17 = vmax.f32 %v4219_v42, 0.0  ;;  %v4223_v47 = vadd.f32 %v11402_v24, %v11388_v61 }
 0x837   :  { %v4690_v35 = vadd.f32 %v4619_v14, %v4618_v51  ;;  %v11485_v15 = vmax.f32 %v4243_v22, 0.0  ;;  %4544 = vadd.xlane.f32.xlu1 %v4543_v40  ;;  %v4547_v41 = vadd.f32 %v4546_v57, %v11463_v52  ;;  %v11490_v29 = vmax.f32 %v4241_v34, 0.0 }
 0x838   :  { %14911 = vst [vmem:[#allocation127_spill] sm:$0xff] %v11481_v45  ;;  %v4407_v1 = vpop.f32.mrf.mxu1  ;;  %v4248_v10 = vpop.f32.mrf.mxu0  ;;  %v4402_v50 = vadd.f32 %v4401_v18, %v11380_v0  ;;  %v4620_v42 = vmul.f32 %v11463_v52, %v11463_v52  ;;  %v4404_v51 = vadd.f32 %v4403_v6, %v11380_v0  ;;  %v4247_v14 = vadd.f32 %v4246_v39, %v11370_v54 }
 0x839   :  { %14912 = vst [vmem:[#allocation88_spill] sm:$0xff] %v11485_v15  ;;  %14913 = vst [vmem:[#allocation90_spill] sm:$0xff] %v11490_v29  ;;  %v4249_v49 = vadd.f32 %v4248_v10, %v11370_v54  ;;  %v4548_v57 = vadd.f32 %v4547_v41, %v11481_v45  ;;  %v4225_v24 = vadd.f32 %v11406_v60, %v11388_v61  ;;  %v11511_v60 = vmax.f32 %v4223_v47, 0.0 }
 0x83a   :  { %v4409_v22 = vpop.f32.mrf.mxu1  ;;  %v4252_v40 = vpop.f32.mrf.mxu0  ;;  %v4621_v34 = vmul.f32 %v11481_v45, %v11481_v45  ;;  %v4551_v10 = vadd.f32 %v11485_v15, %v11490_v29  ;;  %v4408_v18 = vadd.f32 %v4407_v1, %v11370_v54  ;;  %v4623_v0 = vmul.f32 %v11485_v15, %v11485_v15 }
 0x83b   :  { %v11508_v6 = vmax.f32 %v4249_v49, 0.0  ;;  %v4410_v39 = vadd.f32 %v4409_v22, %v11370_v54  ;;  %4549 = vadd.xlane.f32.xlu1 %v4548_v57  ;;  %v4691_v59 = vadd.f32 %v4690_v35, %v4620_v42  ;;  %v11515_v45 = vadd.f32 %v11404_v31, %v11388_v61 }
 0x83c   :  { %v4413_v52 = vpop.f32.mrf.mxu1  ;;  %v4254_v41 = vpop.f32.mrf.mxu0  ;;  %v4622_v1 = vmul.f32 %v11490_v29, %v11490_v29  ;;  %v11519_v63 = vmax.f32 %v4402_v50, 0.0  ;;  %v11521_v15 = vmax.f32 %v4404_v51, 0.0  ;;  %v11523_v49 = vmax.f32 %v4247_v14, 0.0 }
 0x83d   :  { %14914 = vst [vmem:[#allocation89_spill] sm:$0xff] %v11508_v6  ;;  %v4255_v54 = vadd.f32 %v4254_v41, %v11372_v28  ;;  %v4692_v57 = vadd.f32 %v4691_v59, %v4621_v34  ;;  %v11526_v47 = vmax.f32 %v4225_v24, 0.0  ;;  %v11528_v42 = vmax.f32 %v4408_v18, 0.0 }
 0x83e   :  { %14915 = vst [vmem:[#allocation91_spill] sm:$0xff] %v11519_v63  ;;  %14916 = vst [vmem:[#allocation92_spill] sm:$0xff] %v11521_v15  ;;  %v4415_v22 = vpop.f32.mrf.mxu1  ;;  %v4258_v35 = vpop.f32.mrf.mxu0  ;;  %v4253_v31 = vadd.f32 %v4252_v40, %v11372_v28  ;;  %v4414_v19 = vadd.f32 %v4413_v52, %v11372_v28  ;;  %v4695_v29 = vadd.f32 %v4623_v0, %v4622_v1  ;;  %v11534_v51 = vmax.f32 %v4410_v39, 0.0 }
 0x83f   :  { %14917 = vst [vmem:[#allocation93_spill] sm:$0xff] %v11523_v49  ;;  %14918 = vst [vmem:[#allocation94_spill] sm:$0xff] %v11528_v42  ;;  %v4627_v50 = vmul.f32 %v11508_v6, %v11508_v6  ;;  %4693 = vadd.xlane.f32.xlu0 %v4692_v57  ;;  %v4552_v41 = vadd.f32 %v4551_v10, %v11519_v63  ;;  %v4624_v24 = vmul.f32 %v11519_v63, %v11519_v63 }
 0x840   :  { %14919 = vst [vmem:[#allocation95_spill] sm:$0xff] %v11534_v51  ;;  %v4419_v14 = vpop.f32.mrf.mxu1  ;;  %v4260_v59 = vpop.f32.mrf.mxu0  ;;  %v11539_v34 = vmax.f32 %v4255_v54, 0.0  ;;  %v4259_v40 = vadd.f32 %v4258_v35, %v11364_v43  ;;  %v4625_v18 = vmul.f32 %v11521_v15, %v11521_v15  ;;  %v4626_v0 = vmul.f32 %v11523_v49, %v11523_v49 }
 0x841   :  { %v4261_v52 = vadd.f32 %v4260_v59, %v11364_v43  ;;  %v4556_v39 = vadd.f32 %v11508_v6, %v11523_v49  ;;  %v4553_v10 = vadd.f32 %v4552_v41, %v11521_v15  ;;  %v4628_v54 = vmul.f32 %v11528_v42, %v11528_v42 }
 0x842   :  { %14920 = vst [vmem:[#allocation96_spill] sm:$0xff] %v11539_v34  ;;  %v4421_v1 = vpop.f32.mrf.mxu1  ;;  %v4264_v57 = vpop.f32.mrf.mxu0  ;;  %v11552_v63 = vmax.f32 %v4253_v31, 0.0  ;;  %v11554_v35 = vmax.f32 %v4414_v19, 0.0  ;;  %v4416_v59 = vadd.f32 %v4415_v22, %v11372_v28  ;;  %v4700_v5 = vadd.f32 %v4627_v50, %v4626_v0 }
 0x843   :  { %v4629_v2 = vmul.f32 %v11534_v51, %v11534_v51  ;;  %4554 = vadd.xlane.f32.xlu1 %v4553_v10  ;;  %v4696_v12 = vadd.f32 %v4695_v29, %v4624_v24  ;;  %v4265_v6 = vadd.f32 %v4264_v57, %v11366_v44  ;;  %v4631_v15 = vmul.f32 %v11539_v34, %v11539_v34 }
 0x844   :  { %14921 = vst [vmem:[#allocation98_spill] sm:$0xff] %v11552_v63  ;;  %14922 = vst [vmem:[#allocation97_spill] sm:$0xff] %v11554_v35  ;;  %v4425_v41 = vpop.f32.mrf.mxu1  ;;  %v4266_v49 = vpop.f32.mrf.mxu0  ;;  %v11562_v21 = vmax.f32 %v4259_v40, 0.0  ;;  %v4420_v19 = vadd.f32 %v4419_v14, %v11364_v43  ;;  %v11565_v31 = vmax.f32 %v4261_v52, 0.0  ;;  %v4561_v28 = vadd.f32 %v11539_v34, %v11552_v63 }
 0x845   :  { %v4422_v22 = vadd.f32 %v4421_v1, %v11364_v43  ;;  %v4697_v50 = vadd.f32 %v4696_v12, %v4625_v18  ;;  %v4557_v29 = vadd.f32 %v4556_v39, %v11528_v42  ;;  %v4630_v10 = vmul.f32 %v11552_v63, %v11552_v63 }
 0x846   :  { %14923 = vst [vmem:[#allocation99_spill] sm:$0xff] %v11562_v21  ;;  %14924 = vst [vmem:[#allocation100_spill] sm:$0xff] %v11565_v31  ;;  %v4427_v24 = vpop.f32.mrf.mxu1  ;;  %v4270_v0 = vpop.f32.mrf.mxu0  ;;  %v4632_v40 = vmul.f32 %v11554_v35, %v11554_v35  ;;  %v11575_v57 = vmax.f32 %v4416_v59, 0.0  ;;  %v4267_v14 = vadd.f32 %v4266_v49, %v11366_v44  ;;  %v11578_v52 = vmax.f32 %v4265_v6, 0.0 }
 0x847   :  { %4698 = vadd.xlane.f32.xlu0 %v4697_v50  ;;  %v4426_v43 = vadd.f32 %v4425_v41, %v11366_v44  ;;  %v4558_v12 = vadd.f32 %v4557_v29, %v11534_v51  ;;  %v4701_v18 = vadd.f32 %v4700_v5, %v4628_v54  ;;  %v4705_v42 = vadd.f32 %v4631_v15, %v4630_v10 }
 0x848   :  { %14925 = vst [vmem:[#allocation104_spill] sm:$0xff] %v11575_v57  ;;  %14926 = vst [vmem:[#allocation105_spill] sm:$0xff] %v11578_v52  ;;  %v4431_v39 = vpop.f32.mrf.mxu1  ;;  %v4272_v1 = vpop.f32.mrf.mxu0  ;;  %v4634_v34 = vmul.f32 %v11562_v21, %v11562_v21  ;;  %v4635_v59 = vmul.f32 %v11565_v31, %v11565_v31  ;;  %v11586_v63 = vmax.f32 %v4267_v14, 0.0  ;;  %v11588_v49 = vmax.f32 %v4420_v19, 0.0 }
 0x849   :  { %v11590_v6 = vmax.f32 %v4422_v22, 0.0  ;;  %4559 = vadd.xlane.f32.xlu1 %v4558_v12  ;;  %v4702_v41 = vadd.f32 %v4701_v18, %v4629_v2  ;;  %v4562_v50 = vadd.f32 %v4561_v28, %v11554_v35  ;;  %v4566_v15 = vadd.f32 %v11565_v31, %v11562_v21 }
 0x84a   :  { %v4433_v5 = vpop.f32.mrf.mxu1  ;;  %v4276_v54 = vpop.f32.mrf.mxu0  ;;  %v4639_v29 = vmul.f32 %v11586_v63, %v11586_v63  ;;  %v4428_v10 = vadd.f32 %v4427_v24, %v11366_v44  ;;  %v4273_v14 = vadd.f32 %v4272_v1, %v11360_v38  ;;  %v4633_v19 = vmul.f32 %v11575_v57, %v11575_v57 }
 0x84b   :  { %v4638_v2 = vmul.f32 %v11578_v52, %v11578_v52  ;;  %v11603_v22 = vmax.f32 %v4426_v43, 0.0  ;;  %4703 = vadd.xlane.f32.xlu0 %v4702_v41  ;;  %v4563_v28 = vadd.f32 %v4562_v50, %v11575_v57  ;;  %v4710_v18 = vadd.f32 %v4635_v59, %v4634_v34 }
 0x84c   :  { %v4437_v12 = vpop.f32.mrf.mxu1  ;;  %v4271_v51 = vadd.f32 %v4270_v0, %v11360_v38  ;;  %v4706_v35 = vadd.f32 %v4705_v42, %v4632_v40  ;;  %v4277_v44 = vadd.f32 %v4276_v54, %v11362_v11  ;;  %v4278_v24 = vpop.f32.mrf.mxu0  ;;  %v4636_v1 = vmul.f32 %v11588_v49, %v11588_v49 }
 0x84d   :  { %v4637_v21 = vmul.f32 %v11590_v6, %v11590_v6  ;;  %v4571_v43 = vadd.f32 %v11586_v63, %v11578_v52  ;;  %v4715_v41 = vadd.f32 %v4639_v29, %v4638_v2  ;;  %4564 = vadd.xlane.f32.xlu1 %v4563_v28  ;;  %v11614_v50 = vmax.f32 %v4428_v10, 0.0 }
 0x84e   :  { %v11616_v34 = vmax.f32 %v4273_v14, 0.0  ;;  %v4707_v0 = vadd.f32 %v4706_v35, %v4633_v19  ;;  %v4567_v42 = vadd.f32 %v4566_v15, %v11588_v49  ;;  %v4439_v40 = vpop.f32.mrf.mxu1  ;;  %v4640_v59 = vmul.f32 %v11603_v22, %v11603_v22 }
 0x84f   :  { %v4432_v54 = vadd.f32 %v4431_v39, %v11360_v38  ;;  %v4438_v57 = vadd.f32 %v4437_v12, %v11362_v11  ;;  %v4279_v31 = vadd.f32 %v4278_v24, %v11362_v11  ;;  %v11624_v52 = vmax.f32 %v4271_v51, 0.0 }
 0x850   :  { %4708 = vadd.xlane.f32.xlu0 %v4707_v0  ;;  %v11626_v29 = vmax.f32 %v4277_v44, 0.0  ;;  %v4568_v10 = vadd.f32 %v4567_v42, %v11590_v6  ;;  %v4711_v35 = vadd.f32 %v4710_v18, %v4636_v1  ;;  %v4440_v15 = vadd.f32 %v4439_v40, %v11362_v11 }
 0x851   :  { %v11629_v14 = vmax.f32 %v4279_v31, 0.0  ;;  %v4572_v19 = vadd.f32 %v4571_v43, %v11603_v22  ;;  %v4716_v2 = vadd.f32 %v4715_v41, %v4640_v59  ;;  %v4641_v39 = vmul.f32 %v11614_v50, %v11614_v50 }
 0x852   :  { %v4576_v51 = vadd.f32 %v11616_v34, %v11624_v52  ;;  %v4643_v28 = vmul.f32 %v11616_v34, %v11616_v34  ;;  %4569 = vadd.xlane.f32.xlu1 %v4568_v10  ;;  %v4712_v12 = vadd.f32 %v4711_v35, %v4637_v21  ;;  %v4536_v31 = vadd.f32 %v11526_v47, %v11511_v60 }
 0x853   :  { %v11641_v18 = vmax.f32 %v4438_v57, 0.0  ;;  %v4581_v11 = vadd.f32 %v11629_v14, %v11626_v29  ;;  %v4573_v44 = vadd.f32 %v4572_v19, %v11614_v50  ;;  %v4642_v24 = vmul.f32 %v11624_v52, %v11624_v52 }
 0x854   :  { %v11648_v1 = vmax.f32 %v4432_v54, 0.0  ;;  %v4434_v43 = vadd.f32 %v4433_v5, %v11360_v38  ;;  %4713 = vadd.xlane.f32.xlu0 %v4712_v12  ;;  %v4717_v41 = vadd.f32 %v4716_v2, %v4641_v39  ;;  %v11652_v21 = vmax.f32 %v11476_v62, 0.0 }
 0x855   :  { %v4386_v57 = vadd.f32 %v11412_v4, %v11388_v61  ;;  %v11656_v0 = vmax.f32 %v4440_v15, 0.0  ;;  %v4582_v42 = vadd.f32 %v4581_v11, %v11641_v18  ;;  %v11660_v40 = vmax.f32 %v11515_v45, 0.0 }
 0x856   :  { %v4720_v59 = vadd.f32 %v4643_v28, %v4642_v24  ;;  %v4647_v54 = vmul.f32 %v11629_v14, %v11629_v14  ;;  %4574 = vadd.xlane.f32.xlu1 %v4573_v44  ;;  %v4577_v38 = vadd.f32 %v4576_v51, %v11648_v1  ;;  %v11666_v62 = vmax.f32 %v11459_v53, 0.0 }
 0x857   :  { %v11669_v5 = vmax.f32 %v11473_v13, 0.0  ;;  %v4531_v61 = vadd.f32 %v11483_v17, %v11652_v21  ;;  %v4583_v4 = vadd.f32 %v4582_v42, %v11656_v0  ;;  %v4644_v45 = vmul.f32 %v11648_v1, %v11648_v1 }
 0x858   :  { %v11676_v10 = vmax.f32 %v4434_v43, 0.0  ;;  %v4646_v35 = vmul.f32 %v11626_v29, %v11626_v29  ;;  %4718 = vadd.xlane.f32.xlu0 %v4717_v41  ;;  %v4537_v53 = vadd.f32 %v4536_v31, %v11660_v40  ;;  %v4372_v13 = vadd.f32 %v11392_v48, %v11396_v46 }
 0x859   :  { %14927 = vst [vmem:[#allocation102_spill] sm:$0xff] %v11669_v5  ;;  %v11684_v15 = vmax.f32 %v11479_v33, 0.0  ;;  %v4380_v19 = vadd.f32 %v11400_v30, %v11398_v27  ;;  %v11688_v2 = vmax.f32 %v4386_v57, 0.0  ;;  %v4615_v39 = vmul.f32 %v11420_v26, %v11420_v26 }
 0x85a   :  { %v4725_v51 = vadd.f32 %v4647_v54, %v4646_v35  ;;  %v4578_v28 = vadd.f32 %v4577_v38, %v11676_v10  ;;  %4584 = vadd.xlane.f32.xlu1 %v4583_v4  ;;  %v4721_v12 = vadd.f32 %v4720_v59, %v4644_v45  ;;  %v4366_v31 = vadd.f32 %v11386_v25, %v11410_v58 }
 0x85b   :  { %v11696_v48 = vmax.f32 %v11450_v3, 0.0  ;;  %v4526_v33 = vadd.f32 %v11669_v5, %v11666_v62  ;;  %v4532_v27 = vadd.f32 %v4531_v61, %v11684_v15  ;;  %v4614_v30 = vmul.f32 %v11418_v36, %v11418_v36 }
 0x85c   :  { %v4645_v11 = vmul.f32 %v11676_v10, %v11676_v10  ;;  %v4648_v44 = vmul.f32 %v11641_v18, %v11641_v18  ;;  %4579 = vadd.xlane.f32.xlu0 %v4578_v28  ;;  %v4538_v25 = vadd.f32 %v4537_v53, %v11688_v2  ;;  %v11709_v3 = vmax.f32 %v11447_v20, 0.0 }
 0x85d   :  { %14928 = vst [vmem:[#allocation108_spill] sm:$0xff] %v11696_v48  ;;  %v11711_v24 = vmax.f32 %v4372_v13, 0.0  ;;  %v4374_v43 = vadd.f32 %v11394_v16, %v11396_v46  ;;  %v11715_v41 = vmax.f32 %v4380_v19, 0.0  ;;  %v4611_v57 = vmul.f32 %v11526_v47, %v11526_v47 }
 0x85e   :  { %v4685_v42 = vadd.f32 %v4615_v39, %v4614_v30  ;;  %v4722_v59 = vadd.f32 %v4721_v12, %v4645_v11  ;;  %4539 = vadd.xlane.f32.xlu1 %v4538_v25  ;;  %v4726_v54 = vadd.f32 %v4725_v51, %v4648_v44  ;;  %v11720_v38 = vmax.f32 %v11437_v23, 0.0  ;;  %v14935_v11 = vld [vmem:[#allocation126_spill] sm:$0xff] }
 0x85f   :  { %v11723_v20 = vmax.f32 %v11444_v55, 0.0  ;;  %v4521_v61 = vadd.f32 %v11696_v48, %v11709_v3  ;;  %v4527_v16 = vadd.f32 %v4526_v33, %v11711_v24  ;;  %v4610_v46 = vmul.f32 %v11511_v60, %v11511_v60 }
 0x860   :  { %14929 = vst [vmem:[#allocation121_spill] sm:$0xff] %v11720_v38  ;;  %v4616_v4 = vmul.f32 %v11439_v32, %v11439_v32  ;;  %v4649_v45 = vmul.f32 %v11656_v0, %v11656_v0  ;;  %4723 = vadd.xlane.f32.xlu0 %v4722_v59  ;;  %v4533_v23 = vadd.f32 %v4532_v27, %v11715_v41  ;;  %v11737_v35 = vmax.f32 %v4366_v31, 0.0  ;;  %v14934_v27 = vld [vmem:[#allocation128_spill] sm:$0xff] }
 0x861   :  { %14930 = vst [vmem:[#allocation123_spill] sm:$0xff] %v11723_v20  ;;  %v4360_v55 = vadd.f32 %v11382_v8, %v11408_v7  ;;  %v4368_v53 = vadd.f32 %v11390_v56, %v11410_v58  ;;  %v11741_v13 = vmax.f32 %v4374_v43, 0.0  ;;  %v4607_v19 = vmul.f32 %v11483_v17, %v11483_v17  ;;  %v14938_v43 = vld [vmem:[#allocation5_spill] sm:$0xff] }
 0x862   :  { %14931 = vst [vmem:[#allocation110_spill] sm:$0xff] %v11737_v35  ;;  %v4680_v39 = vadd.f32 %v4611_v57, %v4610_v46  ;;  %v4727_v51 = vadd.f32 %v4726_v54, %v4649_v45  ;;  %4534 = vadd.xlane.f32.xlu1 %v4533_v23  ;;  %v4686_v28 = vadd.f32 %v4685_v42, %v4616_v4  ;;  %v11746_v12 = vmax.f32 %v11429_v9, 0.0  ;;  %v14940_v4 = vld [vmem:[#allocation3_spill] sm:$0xff] }
 0x863   :  { %v11749_v33 = vmax.f32 %v11432_v37, 0.0  ;;  %v4516_v8 = vadd.f32 %v11723_v20, %v11720_v38  ;;  %v4522_v56 = vadd.f32 %v4521_v61, %v11737_v35  ;;  %v4606_v58 = vmul.f32 %v11652_v21, %v11652_v21  ;;  %v14936_v37 = vld [vmem:[#allocation8_spill] sm:$0xff] }
 0x864   :  { %14932 = vst [vmem:[#allocation112_spill] sm:$0xff] %v11746_v12  ;;  %v4612_v31 = vmul.f32 %v11660_v40, %v11660_v40  ;;  %v4617_v30 = vmul.f32 %v14934_v27, %v14934_v27  ;;  %4728 = vadd.xlane.f32.xlu0 %v4727_v51  ;;  %v4528_v9 = vadd.f32 %v4527_v16, %v11741_v13  ;;  %v11763_v25 = vmax.f32 %v4360_v55, 0.0  ;;  %v14942_v16 = vld [vmem:[#allocation124_spill] sm:$0xff] }
 0x865   :  { %14933 = vst [vmem:[#allocation120_spill] sm:$0xff] %v11749_v33  ;;  %v4354_v44 = vadd.f32 %v14936_v37, %v14935_v11  ;;  %v4362_v57 = vadd.f32 %v14938_v43, %v11408_v7  ;;  %v11767_v42 = vmax.f32 %v4368_v53, 0.0  ;;  %v4603_v59 = vmul.f32 %v11669_v5, %v11669_v5 }
 0x866   :  { %14937 = vst [vmem:[#allocation122_spill] sm:$0xff] %v11763_v25  ;;  %v4675_v54 = vadd.f32 %v4607_v19, %v4606_v58  ;;  %v4687_v61 = vadd.f32 %v4686_v28, %v4617_v30  ;;  %4529 = vadd.xlane.f32.xlu1 %v4528_v9  ;;  %v4681_v46 = vadd.f32 %v4680_v39, %v4612_v31  ;;  %v11772_v45 = vmax.f32 %v14940_v4, 0.0  ;;  %v14944_v28 = vld [vmem:[#allocation4_spill] sm:$0xff]  ;;  %v14947_v9 = vld [vmem:[#allocation7_spill] sm:$0xff] }
 0x867   :  { %14939 = vst [vmem:[#allocation113_spill] sm:$0xff] %v11767_v42  ;;  %v11775_v23 = vmax.f32 %v14942_v16, 0.0  ;;  %v4511_v55 = vadd.f32 %v11749_v33, %v11746_v12  ;;  %v4517_v7 = vadd.f32 %v4516_v8, %v11763_v25  ;;  %v4602_v53 = vmul.f32 %v11666_v62, %v11666_v62  ;;  %v14945_v58 = vld [vmem:[#allocation12_spill] sm:$0xff] }
 0x868   :  { %14941 = vst [vmem:[#allocation117_spill] sm:$0xff] %v11772_v45  ;;  %v4608_v19 = vmul.f32 %v11684_v15, %v11684_v15  ;;  %v4613_v39 = vmul.f32 %v11688_v2, %v11688_v2  ;;  %4688 = vadd.xlane.f32.xlu0 %v4687_v61  ;;  %v4523_v51 = vadd.f32 %v4522_v56, %v11767_v42  ;;  %v11789_v30 = vmax.f32 %v4354_v44, 0.0 }
 0x869   :  { %14943 = vst [vmem:[#allocation119_spill] sm:$0xff] %v11775_v23  ;;  %v4348_v31 = vadd.f32 %v14945_v58, %v14944_v28  ;;  %v4356_v8 = vadd.f32 %v14947_v9, %v14935_v11  ;;  %v11793_v37 = vmax.f32 %v4362_v57, 0.0  ;;  %v4599_v43 = vmul.f32 %v11696_v48, %v11696_v48 }
 0x86a   :  { %14946 = vst [vmem:[#allocation116_spill] sm:$0xff] %v11789_v30  ;;  %v4670_v4 = vadd.f32 %v4603_v59, %v4602_v53  ;;  %v4682_v16 = vadd.f32 %v4681_v46, %v4613_v39  ;;  %4524 = vadd.xlane.f32.xlu1 %v4523_v51  ;;  %v4676_v5 = vadd.f32 %v4675_v54, %v4608_v19  ;;  %v14950_v19 = vld [vmem:[#allocation10_spill] sm:$0xff] }
 0x86b   :  { %14948 = vst [vmem:[#allocation118_spill] sm:$0xff] %v11793_v37  ;;  %v4506_v56 = vadd.f32 %v11775_v23, %v11772_v45  ;;  %v4587_v61 = vmul.f32 %v11775_v23, %v11775_v23  ;;  %v4512_v44 = vadd.f32 %v4511_v55, %v11789_v30  ;;  %v4598_v11 = vmul.f32 %v11709_v3, %v11709_v3 }
 0x86c   :  { %v4604_v57 = vmul.f32 %v11711_v24, %v11711_v24  ;;  %v4609_v59 = vmul.f32 %v11715_v41, %v11715_v41  ;;  %4683 = vadd.xlane.f32.xlu0 %v4682_v16  ;;  %v4518_v54 = vadd.f32 %v4517_v7, %v11793_v37  ;;  %v4586_v46 = vmul.f32 %v11772_v45, %v11772_v45 }
 0x86d   :  { %v11811_v53 = vmax.f32 %v4348_v31, 0.0  ;;  %v4350_v55 = vadd.f32 %v14950_v19, %v14944_v28  ;;  %v11815_v39 = vmax.f32 %v4356_v8, 0.0  ;;  %v4595_v51 = vmul.f32 %v11723_v20, %v11723_v20 }
 0x86e   :  { %v4665_v58 = vadd.f32 %v4599_v43, %v4598_v11  ;;  %v4677_v9 = vadd.f32 %v4676_v5, %v4609_v59  ;;  %4519 = vadd.xlane.f32.xlu1 %v4518_v54  ;;  %v4671_v23 = vadd.f32 %v4670_v4, %v4604_v57  ;;  %v4650_v16 = vadd.f32 %v4587_v61, %v4586_v46 }
 0x86f   :  { %14949 = vst [vmem:[#allocation115_spill] sm:$0xff] %v11811_v53  ;;  %14951 = vst [vmem:[#allocation114_spill] sm:$0xff] %v11815_v39  ;;  %v4507_v7 = vadd.f32 %v4506_v56, %v11811_v53  ;;  %v4594_v45 = vmul.f32 %v11720_v38, %v11720_v38  ;;  %v4600_v31 = vmul.f32 %v11737_v35, %v11737_v35  ;;  %v11829_v43 = vmax.f32 %v4350_v55, 0.0 }
 0x870   :  { %v4605_v28 = vmul.f32 %v11741_v13, %v11741_v13  ;;  %4678 = vadd.xlane.f32.xlu0 %v4677_v9  ;;  %v4513_v8 = vadd.f32 %v4512_v44, %v11815_v39  ;;  %v4588_v5 = vmul.f32 %v11811_v53, %v11811_v53  ;;  %v4591_v4 = vmul.f32 %v11749_v33, %v11749_v33 }
 0x871   :  { %14952 = vst [vmem:[#allocation111_spill] sm:$0xff] %v11829_v43  ;;  %v4660_v56 = vadd.f32 %v4595_v51, %v4594_v45  ;;  %v4666_v11 = vadd.f32 %v4665_v58, %v4600_v31  ;;  %v4590_v57 = vmul.f32 %v11746_v12, %v11746_v12  ;;  %v4596_v59 = vmul.f32 %v11763_v25, %v11763_v25 }
 0x872   :  { %v4672_v61 = vadd.f32 %v4671_v23, %v4605_v28  ;;  %4514 = vadd.xlane.f32.xlu1 %v4513_v8  ;;  %v4601_v44 = vmul.f32 %v11767_v42, %v11767_v42  ;;  %v4508_v54 = vadd.f32 %v4507_v7, %v11829_v43  ;;  %v4651_v46 = vadd.f32 %v4650_v16, %v4588_v5 }
 0x873   :  { %v4589_v19 = vmul.f32 %v11829_v43, %v11829_v43  ;;  %v4655_v45 = vadd.f32 %v4591_v4, %v4590_v57  ;;  %v4661_v55 = vadd.f32 %v4660_v56, %v4596_v59  ;;  %v4592_v51 = vmul.f32 %v11789_v30, %v11789_v30 }
 0x874   :  { %4673 = vadd.xlane.f32.xlu0 %v4672_v61  ;;  %v4667_v23 = vadd.f32 %v4666_v11, %v4601_v44  ;;  %v4597_v58 = vmul.f32 %v11793_v37, %v11793_v37  ;;  %v4593_v16 = vmul.f32 %v11815_v39, %v11815_v39  ;;  %v3975_v37 = vld [vmem:[%s14167_s16 + $0x60] sm:$0xff] }
 0x875   :  { %v4652_v9 = vadd.f32 %v4651_v46, %v4589_v19  ;;  %v4656_v28 = vadd.f32 %v4655_v45, %v4592_v51 }
 0x876   :  { %4509 = vadd.xlane.f32.xlu1 %v4508_v54  ;;  %v4662_v31 = vadd.f32 %v4661_v55, %v4597_v58 }
 0x877   :  { %v4657_v7 = vadd.f32 %v4656_v28, %v4593_v16 }
 0x878   :  { %4668 = vadd.xlane.f32.xlu0 %v4667_v23 }
 0x87a   :  { %4653 = vadd.xlane.f32.xlu1 %v4652_v9 }
 0x87c   :  { %4663 = vadd.xlane.f32.xlu0 %v4662_v31 }
 0x880   :  { %4658 = vadd.xlane.f32.xlu0 %v4657_v7 }
 0x8c0   :  { %v11848_v8 = vpop.xlane.xlu1 %4544 }
 0x8c4   :  { %v4550_v5 = vpop.xlane.xlu1 %4549 }
 0x8c5   :  { %v4738_v4 = vmul.f32 0.001953125, %v4550_v5 }
 0x8c7   :  { %v4770_v56 = vmul.f32 %v4738_v4, %v4738_v4 }
 0x8c8   :  { %v4694_v61 = vpop.xlane.xlu0 %4693 }
 0x8c9   :  { %v4754_v11 = vmul.f32 0.001953125, %v4694_v61 }
 0x8cb   :  { %v4786_v57 = vsub.f32 %v4754_v11, %v4770_v56 }
 0x8cc   :  { %v4555_v59 = vpop.xlane.xlu1 %4554 }
 0x8cd   :  { %v4802_v44 = vmax.f32 %v4786_v57, 0.0  ;;  %v11850_v54 = vmul.f32 0.001953125, %v4555_v59 }
 0x8cf   :  { %v4818_v46 = vadd.f32 1e-05, %v4802_v44  ;;  %v4771_v19 = vmul.f32 %v11850_v54, %v11850_v54 }
 0x8d0   :  { %v4699_v45 = vpop.xlane.xlu0 %4698 }
 0x8d1   :  { %7906 = vrsqrt.f32 %v4818_v46  ;;  %v4755_v23 = vmul.f32 0.001953125, %v4699_v45 }
 0x8d2   :  { %v4560_v55 = vpop.xlane.xlu1 %4559 }
 0x8d3   :  { %v4787_v51 = vsub.f32 %v4755_v23, %v4771_v19  ;;  %v11854_v58 = vmul.f32 0.001953125, %v4560_v55  ;;  %v3955_v55 = vld [vmem:[%s14166_s15 + $0x40] sm:$0xff] }
 0x8d4   :  { %v4704_v9 = vpop.xlane.xlu0 %4703 }
 0x8d5   :  { %v4803_v31 = vmax.f32 %v4787_v51, 0.0  ;;  %v4772_v28 = vmul.f32 %v11854_v58, %v11854_v58  ;;  %v4756_v16 = vmul.f32 0.001953125, %v4704_v9 }
 0x8d6   :  { %v4565_v7 = vpop.xlane.xlu1 %4564 }
 0x8d7   :  { %v4819_v5 = vadd.f32 1e-05, %v4803_v31  ;;  %v4788_v56 = vsub.f32 %v4756_v16, %v4772_v28  ;;  %v11858_v61 = vmul.f32 0.001953125, %v4565_v7 }
 0x8d9   :  { %7908 = vrsqrt.f32 %v4819_v5  ;;  %v4804_v11 = vmax.f32 %v4788_v56, 0.0  ;;  %v4773_v57 = vmul.f32 %v11858_v61, %v11858_v61  ;;  %v4709_v59 = vpop.xlane.xlu0 %4708 }
 0x8da   :  { %v4757_v44 = vmul.f32 0.001953125, %v4709_v59  ;;  %v3971_v59 = vld [vmem:[%s14167_s16 + $0x40] sm:$0xff] }
 0x8db   :  { %v4820_v46 = vadd.f32 1e-05, %v4804_v11  ;;  %v4570_v19 = vpop.xlane.xlu1 %4569 }
 0x8dc   :  { %v4789_v45 = vsub.f32 %v4757_v44, %v4773_v57  ;;  %v11862_v23 = vmul.f32 0.001953125, %v4570_v19 }
 0x8dd   :  { %7910 = vrsqrt.f32 %v4820_v46  ;;  %v4714_v51 = vpop.xlane.xlu0 %4713 }
 0x8de   :  { %v7907_v9 = vpop.eup %7906  ;;  %v4805_v31 = vmax.f32 %v4789_v45, 0.0  ;;  %v4774_v28 = vmul.f32 %v11862_v23, %v11862_v23  ;;  %v4758_v16 = vmul.f32 0.001953125, %v4714_v51 }
 0x8df   :  { %v4575_v7 = vpop.xlane.xlu1 %4574  ;;  %v11869_v5 = vmul.f32 %v7907_v9, %v3955_v55 }
 0x8e0   :  { %v4821_v56 = vadd.f32 1e-05, %v4805_v31  ;;  %v4790_v11 = vsub.f32 %v4758_v16, %v4774_v28  ;;  %v11871_v57 = vmul.f32 0.001953125, %v4575_v7  ;;  %v3956_v28 = vld [vmem:[%s14166_s15 + $0x48] sm:$0xff] }
 0x8e1   :  { %v4719_v44 = vpop.xlane.xlu0 %4718  ;;  %v4866_v46 = vmul.f32 %v11869_v5, %v4738_v4 }
 0x8e2   :  { %7912 = vrsqrt.f32 %v4821_v56  ;;  %v4806_v19 = vmax.f32 %v4790_v11, 0.0  ;;  %v4775_v45 = vmul.f32 %v11871_v57, %v11871_v57  ;;  %v4759_v51 = vmul.f32 0.001953125, %v4719_v44  ;;  %v3957_v44 = vld [vmem:[%s14166_s15 + $0x50] sm:$0xff] }
 0x8e3   :  { %v4585_v53 = vpop.xlane.xlu1 %4584  ;;  %v4882_v55 = vsub.f32 %v3971_v59, %v4866_v46  ;;  %v3972_v59 = vld [vmem:[%s14167_s16 + $0x48] sm:$0xff] }
 0x8e4   :  { %v4822_v9 = vadd.f32 1e-05, %v4806_v19  ;;  %v4791_v31 = vsub.f32 %v4759_v51, %v4775_v45 }
 0x8e5   :  { %v4580_v16 = vpop.xlane.xlu0 %4579  ;;  %5076 = vperm.xlu1 %7788, %v4882_v55   ;;  %v11896_v55 = vmul.f32 0.001953125, %v4585_v53  ;;  %v3958_v53 = vld [vmem:[%s14166_s15 + $0x58] sm:$0xff] }
 0x8e6   :  { %v7909_v7 = vpop.eup %7908  ;;  %7914 = vrsqrt.f32 %v4822_v9  ;;  %v4807_v43 = vmax.f32 %v4791_v31, 0.0  ;;  %v11882_v4 = vmul.f32 0.001953125, %v4580_v16 }
 0x8e7   :  { %v4540_v56 = vpop.xlane.xlu1 %4539  ;;  %v11884_v11 = vmul.f32 %v7909_v7, %v3956_v28  ;;  %v3973_v7 = vld [vmem:[%s14167_s16 + $0x50] sm:$0xff] }
 0x8e8   :  { %v4823_v30 = vadd.f32 1e-05, %v4807_v43  ;;  %v4776_v51 = vmul.f32 %v11882_v4, %v11882_v4  ;;  %v11915_v39 = vmul.f32 0.001953125, %v4540_v56 }
 0x8e9   :  { %v4724_v46 = vpop.xlane.xlu0 %4723  ;;  %v4867_v19 = vmul.f32 %v11884_v11, %v11850_v54 }
 0x8ea   :  { %v7911_v45 = vpop.eup %7910  ;;  %v4760_v9 = vmul.f32 0.001953125, %v4724_v46  ;;  %7916 = vrsqrt.f32 %v4823_v30  ;;  %v11909_v30 = vmul.f32 0.001953125, %v11848_v8  ;;  %v3959_v8 = vld [vmem:[%s14166_s15 + $0x60] sm:$0xff] }
 0x8eb   :  { %v4883_v43 = vsub.f32 %v3972_v59, %v4867_v19  ;;  %v4535_v31 = vpop.xlane.xlu1 %4534  ;;  %v11898_v28 = vmul.f32 %v7911_v45, %v3957_v44  ;;  %v4777_v59 = vmul.f32 %v11896_v55, %v11896_v55 }
 0x8ec   :  { %v4792_v16 = vsub.f32 %v4760_v9, %v4776_v51  ;;  %v4769_v25 = vmul.f32 %v11909_v30, %v11909_v30 }
 0x8ed   :  { %v4729_v12 = vpop.xlane.xlu0 %4728  ;;  %5081 = vperm.xlu1 %7788, %v4883_v43   ;;  %v4868_v54 = vmul.f32 %v11898_v28, %v11854_v58 }
 0x8ee   :  { %v4808_v44 = vmax.f32 %v4792_v16, 0.0  ;;  %v4761_v46 = vmul.f32 0.001953125, %v4729_v12 }
 0x8ef   :  { %v7913_v19 = vpop.eup %7912  ;;  %v4884_v45 = vsub.f32 %v3973_v7, %v4868_v54  ;;  %v4530_v33 = vpop.xlane.xlu1 %4529  ;;  %v3974_v7 = vld [vmem:[%s14167_s16 + $0x58] sm:$0xff] }
 0x8f0   :  { %v4824_v51 = vadd.f32 1e-05, %v4808_v44  ;;  %v4793_v9 = vsub.f32 %v4761_v46, %v4777_v59  ;;  %v11913_v43 = vmul.f32 %v7913_v19, %v3958_v53  ;;  %v4768_v46 = vmul.f32 %v11915_v39, %v11915_v39 }
 0x8f1   :  { %v4689_v58 = vpop.xlane.xlu0 %4688  ;;  %5086 = vperm.xlu1 %7788, %v4884_v45  }
 0x8f2   :  { %7918 = vrsqrt.f32 %v4824_v51  ;;  %v4809_v12 = vmax.f32 %v4793_v9, 0.0  ;;  %v4753_v16 = vmul.f32 0.001953125, %v4689_v58  ;;  %v4869_v56 = vmul.f32 %v11913_v43, %v11858_v61 }
 0x8f3   :  { %v7915_v54 = vpop.eup %7914  ;;  %v11931_v51 = vmul.f32 0.001953125, %v4535_v31  ;;  %v4525_v61 = vpop.xlane.xlu1 %4524  ;;  %v11941_v31 = vmul.f32 0.001953125, %v4530_v33  ;;  %v3961_v33 = vld [vmem:[%s14166_s15 + $0x70] sm:$0xff] }
 0x8f4   :  { %v4825_v53 = vadd.f32 1e-05, %v4809_v12  ;;  %v4785_v59 = vsub.f32 %v4753_v16, %v4769_v25  ;;  %v11927_v44 = vmul.f32 %v7915_v54, %v3959_v8  ;;  %v4885_v45 = vsub.f32 %v3974_v7, %v4869_v56  ;;  %v3960_v7 = vld [vmem:[%s14166_s15 + $0x68] sm:$0xff] }
 0x8f5   :  { %v4684_v19 = vpop.xlane.xlu0 %4683 }
 0x8f6   :  { %7920 = vrsqrt.f32 %v4825_v53  ;;  %v4801_v9 = vmax.f32 %v4785_v59, 0.0  ;;  %v4752_v58 = vmul.f32 0.001953125, %v4684_v19  ;;  %5091 = vperm.xlu1 %7788, %v4885_v45   ;;  %v4870_v25 = vmul.f32 %v11927_v44, %v11862_v23 }
 0x8f7   :  { %v7917_v8 = vpop.eup %7916  ;;  %v4767_v53 = vmul.f32 %v11931_v51, %v11931_v51 }
 0x8f8   :  { %v4817_v12 = vadd.f32 1e-05, %v4801_v9  ;;  %v4784_v16 = vsub.f32 %v4752_v58, %v4768_v46  ;;  %v4886_v56 = vsub.f32 %v3975_v37, %v4870_v25  ;;  %v11945_v45 = vmul.f32 %v7917_v8, %v3960_v7  ;;  %v4520_v58 = vpop.xlane.xlu1 %4519 }
 0x8f9   :  { %v4679_v54 = vpop.xlane.xlu0 %4678  ;;  %v4766_v46 = vmul.f32 %v11941_v31, %v11941_v31  ;;  %v11952_v37 = vmul.f32 0.001953125, %v4525_v61  ;;  %v3962_v61 = vld [vmem:[%s14166_s15 + $0x78] sm:$0xff] }
 0x8fa   :  { %7922 = vrsqrt.f32 %v4817_v12  ;;  %v4800_v59 = vmax.f32 %v4784_v16, 0.0  ;;  %v4751_v19 = vmul.f32 0.001953125, %v4679_v54  ;;  %5096 = vperm.xlu1 %7788, %v4886_v56   ;;  %v4871_v8 = vmul.f32 %v11945_v45, %v11871_v57 }
 0x8fc   :  { %v4816_v23 = vadd.f32 1e-05, %v4800_v59  ;;  %v4783_v9 = vsub.f32 %v4751_v19, %v4767_v53  ;;  %v3976_v53 = vld [vmem:[%s14167_s16 + $0x68] sm:$0xff]  ;;  %v11959_v59 = vmul.f32 0.001953125, %v4520_v58 }
 0x8fd   :  { %v4674_v20 = vpop.xlane.xlu0 %4673 }
 0x8fe   :  { %7924 = vrsqrt.f32 %v4816_v23  ;;  %v4799_v25 = vmax.f32 %v4783_v9, 0.0  ;;  %v4750_v12 = vmul.f32 0.001953125, %v4674_v20  ;;  %v4765_v20 = vmul.f32 %v11952_v37, %v11952_v37 }
 0x8ff   :  { %v7919_v16 = vpop.eup %7918  ;;  %v4764_v38 = vmul.f32 %v11959_v59, %v11959_v59 }
 0x900   :  { %v4815_v7 = vadd.f32 1e-05, %v4799_v25  ;;  %v4782_v54 = vsub.f32 %v4750_v12, %v4766_v46  ;;  %v4856_v56 = vmul.f32 %v7919_v16, %v3961_v33  ;;  %v4515_v46 = vpop.xlane.xlu1 %4514  ;;  %v4887_v33 = vsub.f32 %v3976_v53, %v4871_v8 }
 0x901   :  { %v4669_v19 = vpop.xlane.xlu0 %4668  ;;  %v11977_v8 = vmul.f32 0.001953125, %v4515_v46  ;;  %v3953_v46 = vld [vmem:[%s14166_s15 + $0x30] sm:$0xff] }
 0x902   :  { %7926 = vrsqrt.f32 %v4815_v7  ;;  %v4798_v23 = vmax.f32 %v4782_v54, 0.0  ;;  %v4749_v57 = vmul.f32 0.001953125, %v4669_v19  ;;  %4962 = vperm.xlu1 %7788, %v4856_v56   ;;  %v4872_v58 = vmul.f32 %v4856_v56, %v11882_v4  ;;  %v3954_v7 = vld [vmem:[%s14166_s15 + $0x38] sm:$0xff]  ;;  %v3977_v54 = vld [vmem:[%s14167_s16 + $0x70] sm:$0xff] }
 0x903   :  { %v7921_v9 = vpop.eup %7920 }
 0x904   :  { %v4814_v25 = vadd.f32 1e-05, %v4798_v23  ;;  %v4781_v12 = vsub.f32 %v4749_v57, %v4765_v20  ;;  %v11967_v16 = vmul.f32 %v7921_v9, %v3962_v61  ;;  %v4888_v57 = vsub.f32 %v3977_v54, %v4872_v58  ;;  %v3978_v9 = vld [vmem:[%s14167_s16 + $0x78] sm:$0xff] }
 0x905   :  { %v4664_v35 = vpop.xlane.xlu0 %4663 }
 0x906   :  { %7928 = vrsqrt.f32 %v4814_v25  ;;  %v4797_v53 = vmax.f32 %v4781_v12, 0.0  ;;  %v4748_v19 = vmul.f32 0.001953125, %v4664_v35  ;;  %5101 = vperm.xlu1 %7788, %v4887_v33   ;;  %v4873_v56 = vmul.f32 %v11967_v16, %v11896_v55 }
 0x907   :  { %v7923_v4 = vpop.eup %7922  ;;  %v4763_v35 = vmul.f32 %v11977_v8, %v11977_v8 }
 0x908   :  { %v4813_v61 = vadd.f32 1e-05, %v4797_v53  ;;  %v4780_v20 = vsub.f32 %v4748_v19, %v4764_v38  ;;  %v4849_v23 = vmul.f32 %v7923_v4, %v3954_v7  ;;  %v4889_v55 = vsub.f32 %v3978_v9, %v4873_v56  ;;  %v3970_v53 = vld [vmem:[%s14167_s16 + $0x38] sm:$0xff]  ;;  %v3952_v19 = vld [vmem:[%s14166_s15 + $0x28] sm:$0xff]  ;;  %v4510_v9 = vpop.xlane.xlu1 %4509 }
 0x909   :  { %v4659_v42 = vpop.xlane.xlu0 %4658 }
 0x90a   :  { %7930 = vrsqrt.f32 %v4813_v61  ;;  %v4796_v33 = vmax.f32 %v4780_v20, 0.0  ;;  %v4747_v25 = vmul.f32 0.001953125, %v4659_v42  ;;  %4927 = vperm.xlu0 %7787, %v4849_v23   ;;  %5106 = vperm.xlu1 %7788, %v4888_v57   ;;  %v4865_v7 = vmul.f32 %v4849_v23, %v11909_v30  ;;  %v3969_v23 = vld [vmem:[%s14167_s16 + $0x30] sm:$0xff]  ;;  %v3951_v57 = vld [vmem:[%s14166_s15 + $0x20] sm:$0xff] }
 0x90b   :  { %v7925_v38 = vpop.eup %7924 }
 0x90c   :  { %v4812_v12 = vadd.f32 1e-05, %v4796_v33  ;;  %v4779_v58 = vsub.f32 %v4747_v25, %v4763_v35  ;;  %v4848_v54 = vmul.f32 %v7925_v38, %v3953_v46  ;;  %v4881_v61 = vsub.f32 %v3970_v53, %v4865_v7  ;;  %v3950_v25 = vld [vmem:[%s14166_s15 + $0x18] sm:$0xff]  ;;  %v3949_v7 = vld [vmem:[%s14166_s15 + $0x10] sm:$0xff] }
 0x90d   :  { %v4730_v53 = vmul.f32 0.001953125, %v4510_v9 }
 0x90e   :  { %7932 = vrsqrt.f32 %v4812_v12  ;;  %v4795_v4 = vmax.f32 %v4779_v58, 0.0  ;;  %4932 = vperm.xlu0 %7787, %v11869_v5   ;;  %5111 = vperm.xlu1 %7788, %v4889_v55   ;;  %v4864_v20 = vmul.f32 %v4848_v54, %v11915_v39  ;;  %v3968_v39 = vld [vmem:[%s14167_s16 + $0x28] sm:$0xff]  ;;  %v4654_v58 = vpop.xlane.xlu1 %4653 }
 0x90f   :  { %v7927_v42 = vpop.eup %7926 }
 0x910   :  { %v4811_v56 = vadd.f32 1e-05, %v4795_v4  ;;  %v4847_v30 = vmul.f32 %v7927_v42, %v3952_v19  ;;  %v4880_v46 = vsub.f32 %v3969_v23, %v4864_v20  ;;  %v4746_v19 = vmul.f32 0.001953125, %v4654_v58  ;;  %v3963_v58 = vld [vmem:[%s14167_s16] sm:$0xff] }
 0x911   :  { %v4762_v20 = vmul.f32 %v4730_v53, %v4730_v53 }
 0x912   :  { %7934 = vrsqrt.f32 %v4811_v56  ;;  %4937 = vperm.xlu0 %7787, %v11884_v11   ;;  %5071 = vperm.xlu1 %7788, %v4881_v61   ;;  %v4863_v35 = vmul.f32 %v4847_v30, %v11931_v51  ;;  %v3967_v51 = vld [vmem:[%s14167_s16 + $0x20] sm:$0xff]  ;;  %v3966_v56 = vld [vmem:[%s14167_s16 + $0x18] sm:$0xff]  ;;  %v3948_v61 = vld [vmem:[%s14166_s15 + $0x8] sm:$0xff] }
 0x913   :  { %v7929_v5 = vpop.eup %7928  ;;  %v4778_v23 = vsub.f32 %v4746_v19, %v4762_v20  ;;  %v5241_v19 = vld [vmem:[%s14168_s18 + $0xf8] sm:$0xff]  ;;  %v5235_v20 = vld [vmem:[%s14168_s18 + $0xc8] sm:$0xff] }
 0x914   :  { %v4846_v33 = vmul.f32 %v7929_v5, %v3951_v57  ;;  %v4879_v11 = vsub.f32 %v3968_v39, %v4863_v35 }
 0x916   :  { %4942 = vperm.xlu0 %7787, %v11898_v28   ;;  %5066 = vperm.xlu1 %7788, %v4880_v46   ;;  %v4862_v55 = vmul.f32 %v4846_v33, %v11941_v31  ;;  %v4794_v46 = vmax.f32 %v4778_v23, 0.0  ;;  %v5233_v23 = vld [vmem:[%s14168_s18 + $0xb8] sm:$0xff] }
 0x917   :  { %v7931_v38 = vpop.eup %7930 }
 0x918   :  { %v4845_v12 = vmul.f32 %v7931_v38, %v3950_v25  ;;  %v4878_v4 = vsub.f32 %v3967_v51, %v4862_v55  ;;  %v5215_v55 = vld [vmem:[%s14168_s18 + $0x28] sm:$0xff]  ;;  %v5213_v51 = vld [vmem:[%s14168_s18 + $0x18] sm:$0xff] }
 0x91a   :  { %4947 = vperm.xlu0 %7787, %v11913_v43   ;;  %5061 = vperm.xlu1 %7788, %v4879_v11   ;;  %v4861_v42 = vmul.f32 %v4845_v12, %v11952_v37  ;;  %v3965_v37 = vld [vmem:[%s14167_s16 + $0x10] sm:$0xff] }
 0x91b   :  { %v7933_v28 = vpop.eup %7932 }
 0x91c   :  { %v4844_v31 = vmul.f32 %v7933_v28, %v3949_v7  ;;  %v4877_v57 = vsub.f32 %v3966_v56, %v4861_v42  ;;  %v5211_v28 = vld [vmem:[%s14168_s18 + $0x8] sm:$0xff]  ;;  %v5237_v56 = vld [vmem:[%s14168_s18 + $0xd8] sm:$0xff] }
 0x91d   :  { %v5239_v42 = vld [vmem:[%s14168_s18 + $0xe8] sm:$0xff] }
 0x91e   :  { %4952 = vperm.xlu0 %7787, %v11927_v44   ;;  %5056 = vperm.xlu1 %7788, %v4878_v4   ;;  %v4860_v5 = vmul.f32 %v4844_v31, %v11959_v59  ;;  %v3964_v44 = vld [vmem:[%s14167_s16 + $0x8] sm:$0xff]  ;;  %v4810_v59 = vadd.f32 1e-05, %v4794_v46  ;;  %v5222_v4 = vld [vmem:[%s14168_s18 + $0x60] sm:$0xff] }
 0x91f   :  { %v7935_v43 = vpop.eup %7934  ;;  %v5210_v46 = vld [vmem:[%s14168_s18] sm:$0xff] }
 0x920   :  { %v4843_v9 = vmul.f32 %v7935_v43, %v3948_v61  ;;  %v4876_v35 = vsub.f32 %v3965_v37, %v4860_v5  ;;  %7936 = vrsqrt.f32 %v4810_v59  ;;  %v5218_v61 = vld [vmem:[%s14168_s18 + $0x40] sm:$0xff]  ;;  %v5216_v43 = vld [vmem:[%s14168_s18 + $0x30] sm:$0xff]  ;;  %v5231_v5 = vld [vmem:[%s14168_s18 + $0xa8] sm:$0xff] }
 0x921   :  { %v5229_v37 = vld [vmem:[%s14168_s18 + $0x98] sm:$0xff]  ;;  %v5238_v59 = vld [vmem:[%s14168_s18 + $0xe0] sm:$0xff] }
 0x922   :  { %4957 = vperm.xlu0 %7787, %v11945_v45   ;;  %5051 = vperm.xlu1 %7788, %v4877_v57   ;;  %v4859_v39 = vmul.f32 %v4843_v9, %v11977_v8  ;;  %v5225_v45 = vld [vmem:[%s14168_s18 + $0x78] sm:$0xff]  ;;  %v5223_v8 = vld [vmem:[%s14168_s18 + $0x68] sm:$0xff]  ;;  %v5214_v57 = vld [vmem:[%s14168_s18 + $0x20] sm:$0xff] }
 0x924   :  { %v4875_v25 = vsub.f32 %v3964_v44, %v4859_v39  ;;  %v5227_v39 = vld [vmem:[%s14168_s18 + $0x88] sm:$0xff]  ;;  %v5240_v44 = vld [vmem:[%s14168_s18 + $0xf0] sm:$0xff] }
 0x926   :  { %4967 = vperm.xlu0 %7787, %v11967_v16   ;;  %5046 = vperm.xlu1 %7788, %v4876_v35   ;;  %v5221_v16 = vld [vmem:[%s14168_s18 + $0x58] sm:$0xff] }
 0x92a   :  { %4922 = vperm.xlu0 %7787, %v4848_v54   ;;  %5041 = vperm.xlu1 %7788, %v4875_v25   ;;  %v5219_v54 = vld [vmem:[%s14168_s18 + $0x48] sm:$0xff] }
 0x92d   :  { %v7937_v38 = vpop.eup %7936 }
 0x92e   :  { %4917 = vperm.xlu0 %7787, %v4847_v30   ;;  %5383 = vperm.xlu1 %7788, %v5225_v45   ;;  %v3947_v30 = vld [vmem:[%s14166_s15] sm:$0xff]  ;;  %v5236_v45 = vld [vmem:[%s14168_s18 + $0xd0] sm:$0xff] }
 0x92f   :  { %v4842_v11 = vmul.f32 %v7937_v38, %v3947_v30  ;;  %v5230_v30 = vld [vmem:[%s14168_s18 + $0xa0] sm:$0xff] }
 0x932   :  { %4912 = vperm.xlu0 %7787, %v4846_v33   ;;  %5373 = vperm.xlu1 %7788, %v5223_v8   ;;  %v5217_v33 = vld [vmem:[%s14168_s18 + $0x38] sm:$0xff] }
 0x936   :  { %4907 = vperm.xlu0 %7787, %v4845_v12   ;;  %5363 = vperm.xlu1 %7788, %v5221_v16   ;;  %v4858_v12 = vmul.f32 %v4842_v11, %v4730_v53  ;;  %v5224_v53 = vld [vmem:[%s14168_s18 + $0x70] sm:$0xff]  ;;  %v5234_v16 = vld [vmem:[%s14168_s18 + $0xc0] sm:$0xff] }
 0x938   :  { %v4874_v7 = vsub.f32 %v3963_v58, %v4858_v12  ;;  %v5226_v12 = vld [vmem:[%s14168_s18 + $0x80] sm:$0xff] }
 0x93a   :  { %4902 = vperm.xlu0 %7787, %v4844_v31   ;;  %5353 = vperm.xlu1 %7788, %v5219_v54   ;;  %v5220_v31 = vld [vmem:[%s14168_s18 + $0x50] sm:$0xff] }
 0x93b   :  { %v5232_v54 = vld [vmem:[%s14168_s18 + $0xb0] sm:$0xff] }
 0x93e   :  { %4897 = vperm.xlu0 %7787, %v4843_v9   ;;  %5343 = vperm.xlu1 %7788, %v5217_v33   ;;  %v5212_v9 = vld [vmem:[%s14168_s18 + $0x10] sm:$0xff] }
 0x942   :  { %5333 = vperm.xlu1 %7788, %v5215_v55   ;;  %4892 = vperm.xlu0 %7787, %v4842_v11   ;;  %v5228_v11 = vld [vmem:[%s14168_s18 + $0x90] sm:$0xff] }
 0x946   :  { %5323 = vperm.xlu1 %7788, %v5213_v51   ;;  %5036 = vperm.xlu0 %7787, %v4874_v7  }
 0x94a   :  { %5313 = vperm.xlu1 %7788, %v5211_v28   ;;  %5378 = vperm.xlu0 %7787, %v5224_v53  }
 0x94e   :  { %5463 = vperm.xlu1 %7788, %v5241_v19   ;;  %5368 = vperm.xlu0 %7787, %v5222_v4  }
 0x952   :  { %5453 = vperm.xlu1 %7788, %v5239_v42   ;;  %5358 = vperm.xlu0 %7787, %v5220_v31  }
 0x956   :  { %5443 = vperm.xlu1 %7788, %v5237_v56   ;;  %5348 = vperm.xlu0 %7787, %v5218_v61  }
 0x95a   :  { %5433 = vperm.xlu1 %7788, %v5235_v20   ;;  %5338 = vperm.xlu0 %7787, %v5216_v43   ;;  %v14953_v43 = vld [vmem:[#allocation2_spill] sm:$0xff] }
 0x95e   :  { %5423 = vperm.xlu1 %7788, %v5233_v23   ;;  %5328 = vperm.xlu0 %7787, %v5214_v57   ;;  %v14954_v57 = vld [vmem:[#allocation125_spill] sm:$0xff] }
 0x960   :  { %v5077_v35 = vpop.permute.xlu1 %5076 }
 0x962   :  { %5413 = vperm.xlu1 %7788, %v5231_v5   ;;  %5318 = vperm.xlu0 %7787, %v5212_v9   ;;  %v14955_v9 = vld [vmem:[#allocation129_spill] sm:$0xff] }
 0x966   :  { %5403 = vperm.xlu1 %7788, %v5229_v37   ;;  %5308 = vperm.xlu0 %7787, %v5210_v46   ;;  %v14956_v46 = vld [vmem:[#allocation127_spill] sm:$0xff] }
 0x968   :  { %v12123_v25 = vpop.permute.xlu1 %5081 }
 0x96a   :  { %5393 = vperm.xlu1 %7788, %v5227_v39   ;;  %5458 = vperm.xlu0 %7787, %v5240_v44  }
 0x96c   :  { %v12128_v8 = vpop.permute.xlu1 %5086 }
 0x96e   :  { %5448 = vperm.xlu0 %7787, %v5238_v59  }
 0x971   :  { %v12136_v38 = vpop.permute.xlu1 %5091 }
 0x972   :  { %5438 = vperm.xlu0 %7787, %v5236_v45  }
 0x975   :  { %v12141_v33 = vpop.permute.xlu1 %5096 }
 0x976   :  { %5428 = vperm.xlu0 %7787, %v5234_v16  }
 0x97a   :  { %5418 = vperm.xlu0 %7787, %v5232_v54  }
 0x97d   :  { %v4963_v55 = vpop.permute.xlu1 %4962 }
 0x97e   :  { %5408 = vperm.xlu0 %7787, %v5230_v30   ;;  %v5027_v61 = vmul.f32 %v4963_v55, %v11616_v34  ;;  %v5029_v20 = vmul.f32 %v4963_v55, %v11676_v10  ;;  %v5026_v44 = vmul.f32 %v4963_v55, %v11624_v52  ;;  %v5028_v59 = vmul.f32 %v4963_v55, %v11648_v1 }
 0x981   :  { %v12149_v51 = vpop.permute.xlu1 %5101 }
 0x982   :  { %5398 = vperm.xlu0 %7787, %v5228_v11  }
 0x985   :  { %v4928_v58 = vpop.permute.xlu0 %4927  ;;  %v5107_v53 = vpop.permute.xlu1 %5106 }
 0x986   :  { %5388 = vperm.xlu0 %7787, %v5226_v12   ;;  %v12166_v16 = vmul.f32 %v4928_v58, %v11418_v36  ;;  %v12169_v34 = vmul.f32 %v4928_v58, %v11439_v32  ;;  %v5171_v10 = vadd.f32 %v5107_v53, %v5027_v61  ;;  %v5173_v54 = vadd.f32 %v5107_v53, %v5029_v20  ;;  %v14957_v32 = vld [vmem:[#allocation90_spill] sm:$0xff]  ;;  %v14958_v61 = vld [vmem:[#allocation91_spill] sm:$0xff] }
 0x987   :  { %v5170_v30 = vadd.f32 %v5107_v53, %v5026_v44  ;;  %v5172_v11 = vadd.f32 %v5107_v53, %v5028_v59  ;;  %v4999_v12 = vmul.f32 %v4928_v58, %v11420_v26  ;;  %v14959_v26 = vld [vmem:[#allocation88_spill] sm:$0xff] }
 0x989   :  { %v4933_v7 = vpop.permute.xlu0 %4932  ;;  %v5112_v4 = vpop.permute.xlu1 %5111 }
 0x98a   :  { %v5002_v23 = vmul.f32 %v4933_v7, %v14953_v43  ;;  %v5004_v5 = vmul.f32 %v4933_v7, %v14954_v57  ;;  %v5003_v37 = vmul.f32 %v4933_v7, %v14955_v9  ;;  %v5005_v39 = vmul.f32 %v4933_v7, %v14956_v46 }
 0x98b   :  { %v5001_v43 = vmul.f32 %v4928_v58, %v14934_v27  ;;  %v14960_v27 = vld [vmem:[#allocation92_spill] sm:$0xff] }
 0x98c   :  { %v12175_v52 = vadd.f32 %v5077_v35, %v5003_v37  ;;  %v12177_v1 = vadd.f32 %v5077_v35, %v5005_v39  ;;  %v12179_v55 = vadd.f32 %v5077_v35, %v5002_v23  ;;  %v12181_v36 = vadd.f32 %v5077_v35, %v5004_v5 }
 0x98d   :  { %v4938_v28 = vpop.permute.xlu0 %4937  ;;  %v12155_v56 = vpop.permute.xlu1 %5071 }
 0x98e   :  { %v12184_v57 = vmul.f32 %v4938_v28, %v14957_v32  ;;  %v12187_v20 = vmul.f32 %v4938_v28, %v14958_v61  ;;  %v12190_v9 = vmul.f32 %v4938_v28, %v14959_v26  ;;  %v12193_v58 = vmul.f32 %v4938_v28, %v14960_v27  ;;  %v14961_v26 = vld [vmem:[#allocation93_spill] sm:$0xff] }
 0x98f   :  { %v12202_v44 = vadd.f32 %v12155_v56, %v4999_v12  ;;  %v12205_v59 = vadd.f32 %v12155_v56, %v5001_v43 }
 0x991   :  { %v12151_v19 = vpop.permute.xlu0 %4942  ;;  %v12173_v7 = vpop.permute.xlu1 %5066 }
 0x995   :  { %v12153_v42 = vpop.permute.xlu0 %4947  ;;  %v12217_v48 = vpop.permute.xlu1 %5061 }
 0x999   :  { %v4953_v31 = vpop.permute.xlu0 %4952 }
 0x99d   :  { %v4958_v45 = vpop.permute.xlu0 %4957 }
 0x99e   :  { %v5023_v46 = vmul.f32 %v4958_v45, %v11586_v63  ;;  %v5025_v39 = vmul.f32 %v4958_v45, %v11614_v50  ;;  %v14963_v50 = vld [vmem:[#allocation89_spill] sm:$0xff] }
 0x99f   :  { %v5011_v12 = vmul.f32 %v12151_v19, %v14963_v50 }
 0x9a1   :  { %v4968_v53 = vpop.permute.xlu0 %4967 }
 0x9a2   :  { %v5030_v37 = vmul.f32 %v4968_v53, %v11626_v29  ;;  %v5032_v23 = vmul.f32 %v4968_v53, %v11641_v18  ;;  %v5031_v35 = vmul.f32 %v4968_v53, %v11629_v14  ;;  %v5033_v5 = vmul.f32 %v4968_v53, %v11656_v0  ;;  %v14962_v14 = vld [vmem:[#allocation105_spill] sm:$0xff]  ;;  %v14964_v53 = vld [vmem:[#allocation98_spill] sm:$0xff] }
 0x9a3   :  { %v5010_v18 = vmul.f32 %v12151_v19, %v14961_v26  ;;  %v5022_v27 = vmul.f32 %v4958_v45, %v14962_v14  ;;  %v5024_v0 = vmul.f32 %v4958_v45, %v11603_v22  ;;  %v5014_v43 = vmul.f32 %v12153_v42, %v14964_v53  ;;  %v14967_v45 = vld [vmem:[#allocation96_spill] sm:$0xff]  ;;  %v14969_v53 = vld [vmem:[#allocation97_spill] sm:$0xff] }
 0x9a4   :  { %v5175_v28 = vadd.f32 %v5112_v4, %v5031_v35  ;;  %v5177_v32 = vadd.f32 %v5112_v4, %v5033_v5  ;;  %v5174_v61 = vadd.f32 %v5112_v4, %v5030_v37  ;;  %v5176_v29 = vadd.f32 %v5112_v4, %v5032_v23  ;;  %v14965_v4 = vld [vmem:[#allocation100_spill] sm:$0xff]  ;;  %v14966_v35 = vld [vmem:[#allocation99_spill] sm:$0xff] }
 0x9a5   :  { %v12211_v63 = vpop.permute.xlu0 %4922  ;;  %v5019_v37 = vmul.f32 %v4953_v31, %v14965_v4  ;;  %v5021_v23 = vmul.f32 %v4953_v31, %v11590_v6  ;;  %v5018_v5 = vmul.f32 %v4953_v31, %v14966_v35  ;;  %v5020_v22 = vmul.f32 %v4953_v31, %v11588_v49 }
 0x9a6   :  { %5466 = vmatprep.subr.mxu0 %v5175_v28  ;;  %5723 = vmatprep.subr.mxu1 %v5177_v32  ;;  %v5015_v26 = vmul.f32 %v12153_v42, %v14967_v45  ;;  %v5167_v14 = vadd.f32 %v12149_v51, %v5023_v46  ;;  %v5169_v28 = vadd.f32 %v12149_v51, %v5025_v39  ;;  %v14968_v32 = vld [vmem:[#allocation104_spill] sm:$0xff]  ;;  %v14970_v46 = vld [vmem:[#allocation95_spill] sm:$0xff] }
 0x9a7   :  { %5467 = vmatpush1.msra.mxu0 %v5174_v61  ;;  %5724 = vmatpush1.msra.mxu1 %v5176_v29  ;;  %v5017_v50 = vmul.f32 %v12153_v42, %v14968_v32  ;;  %v5016_v6 = vmul.f32 %v12153_v42, %v14969_v53  ;;  %v5166_v49 = vadd.f32 %v12149_v51, %v5022_v27  ;;  %v14971_v61 = vld [vmem:[#allocation94_spill] sm:$0xff] }
 0x9a8   :  { %5468 = vmatprep.subr.mxu0 %v5171_v10  ;;  %5725 = vmatprep.subr.mxu1 %v5173_v54  ;;  %v5168_v31 = vadd.f32 %v12149_v51, %v5024_v0  ;;  %v5163_v10 = vadd.f32 %v12141_v33, %v5019_v37  ;;  %v5165_v54 = vadd.f32 %v12141_v33, %v5021_v23 }
 0x9a9   :  { %v4918_v4 = vpop.permute.xlu0 %4917  ;;  %5469 = vmatpush1.msra.mxu0 %v5170_v30  ;;  %5726 = vmatpush1.msra.mxu1 %v5172_v11  ;;  %v5013_v39 = vmul.f32 %v12151_v19, %v14970_v46  ;;  %v5012_v29 = vmul.f32 %v12151_v19, %v14971_v61  ;;  %v5162_v42 = vadd.f32 %v12141_v33, %v5018_v5  ;;  %v12241_v11 = vpop.permute.xlu1 %5056 }
 0x9aa   :  { %5470 = vmatprep.subr.mxu0 %v5167_v14  ;;  %5727 = vmatprep.subr.mxu1 %v5169_v28  ;;  %v5164_v30 = vadd.f32 %v12141_v33, %v5020_v22  ;;  %v5159_v51 = vadd.f32 %v12136_v38, %v5015_v26  ;;  %v5161_v27 = vadd.f32 %v12136_v38, %v5017_v50  ;;  %v14974_v28 = vld [vmem:[#allocation113_spill] sm:$0xff]  ;;  %v14975_v50 = vld [vmem:[#allocation110_spill] sm:$0xff] }
 0x9ab   :  { %5471 = vmatpush1.msra.mxu0 %v5166_v49  ;;  %5728 = vmatpush1.msra.mxu1 %v5168_v31  ;;  %v5142_v0 = vadd.f32 %v12155_v56, %v12166_v16  ;;  %v5158_v19 = vadd.f32 %v12136_v38, %v5014_v43  ;;  %v5160_v23 = vadd.f32 %v12136_v38, %v5016_v6  ;;  %v14976_v49 = vld [vmem:[#allocation121_spill] sm:$0xff] }
 0x9ac   :  { %5472 = vmatprep.subr.mxu0 %v5163_v10  ;;  %5729 = vmatprep.subr.mxu1 %v5165_v54  ;;  %v5144_v33 = vadd.f32 %v12155_v56, %v12169_v34  ;;  %v5155_v35 = vadd.f32 %v12128_v8, %v5011_v12  ;;  %v5157_v5 = vadd.f32 %v12128_v8, %v5013_v39  ;;  %v14978_v54 = vld [vmem:[#allocation118_spill] sm:$0xff] }
 0x9ad   :  { %v4913_v37 = vpop.permute.xlu0 %4912  ;;  %5473 = vmatpush1.msra.mxu0 %v5162_v42  ;;  %5730 = vmatpush1.msra.mxu1 %v5164_v30  ;;  %v5151_v22 = vadd.f32 %v12123_v25, %v12190_v9  ;;  %v5154_v16 = vadd.f32 %v12128_v8, %v5010_v18  ;;  %v5156_v43 = vadd.f32 %v12128_v8, %v5012_v29  ;;  %v12271_v18 = vpop.permute.xlu1 %5051  ;;  %v14979_v39 = vld [vmem:[#allocation122_spill] sm:$0xff]  ;;  %v14980_v29 = vld [vmem:[#allocation120_spill] sm:$0xff] }
 0x9ae   :  { %5474 = vmatprep.subr.mxu0 %v5159_v51  ;;  %5731 = vmatprep.subr.mxu1 %v5161_v27  ;;  %v5153_v38 = vadd.f32 %v12123_v25, %v12193_v58  ;;  %v4994_v56 = vmul.f32 %v12211_v63, %v11511_v60  ;;  %v4996_v34 = vmul.f32 %v12211_v63, %v11660_v40  ;;  %v14981_v30 = vld [vmem:[#allocation114_spill] sm:$0xff] }
 0x9af   :  { %5475 = vmatpush1.msra.mxu0 %v5158_v19  ;;  %5732 = vmatpush1.msra.mxu1 %v5160_v23  ;;  %v4995_v9 = vmul.f32 %v12211_v63, %v11526_v47  ;;  %v5150_v8 = vadd.f32 %v12123_v25, %v12184_v57  ;;  %v5152_v58 = vadd.f32 %v12123_v25, %v12187_v20  ;;  %v14972_v25 = vld [vmem:[#allocation102_spill] sm:$0xff]  ;;  %v14983_v23 = vld [vmem:[#allocation116_spill] sm:$0xff] }
 0x9b0   :  { %5476 = vmatprep.subr.mxu0 %v5155_v35  ;;  %5733 = vmatprep.subr.mxu1 %v5157_v5  ;;  %v4997_v60 = vmul.f32 %v12211_v63, %v11688_v2  ;;  %v4990_v40 = vmul.f32 %v4918_v4, %v11652_v21  ;;  %v4992_v45 = vmul.f32 %v4918_v4, %v11684_v15 }
 0x9b1   :  { %v4908_v12 = vpop.permute.xlu0 %4907  ;;  %5477 = vmatpush1.msra.mxu0 %v5154_v16  ;;  %5734 = vmatpush1.msra.mxu1 %v5156_v43  ;;  %v4991_v47 = vmul.f32 %v4918_v4, %v11483_v17  ;;  %v4986_v26 = vmul.f32 %v4913_v37, %v11666_v62  ;;  %v4993_v57 = vmul.f32 %v4918_v4, %v11715_v41 }
 0x9b2   :  { %5478 = vmatprep.subr.mxu0 %v5151_v22  ;;  %5735 = vmatprep.subr.mxu1 %v5153_v38  ;;  %v4987_v20 = vmul.f32 %v4913_v37, %v14972_v25  ;;  %v5139_v21 = vadd.f32 %v12173_v7, %v4995_v9  ;;  %v5138_v15 = vadd.f32 %v12173_v7, %v4994_v56 }
 0x9b3   :  { %5479 = vmatpush1.msra.mxu0 %v5150_v8  ;;  %5736 = vmatpush1.msra.mxu1 %v5152_v58  ;;  %v5140_v2 = vadd.f32 %v12173_v7, %v4996_v34  ;;  %v4988_v17 = vmul.f32 %v4913_v37, %v11711_v24  ;;  %v5141_v62 = vadd.f32 %v12173_v7, %v4997_v60  ;;  %v14985_v58 = vld [vmem:[#allocation119_spill] sm:$0xff] }
 0x9b4   :  { %5480 = vmatprep.subr.mxu0 %v12175_v52  ;;  %5737 = vmatprep.subr.mxu1 %v12177_v1  ;;  %v4989_v41 = vmul.f32 %v4913_v37, %v11741_v13  ;;  %v5135_v52 = vadd.f32 %v12217_v48, %v4991_v47  ;;  %v5134_v1 = vadd.f32 %v12217_v48, %v4990_v40  ;;  %v14982_v37 = vld [vmem:[#allocation112_spill] sm:$0xff]  ;;  %v14986_v40 = vld [vmem:[#allocation111_spill] sm:$0xff] }
 0x9b5   :  { %v4903_v63 = vpop.permute.xlu0 %4902  ;;  %5481 = vmatpush1.msra.mxu0 %v12179_v55  ;;  %5738 = vmatpush1.msra.mxu1 %v12181_v36  ;;  %v5136_v14 = vadd.f32 %v12217_v48, %v4992_v45  ;;  %v5137_v24 = vadd.f32 %v12217_v48, %v4993_v57  ;;  %v5131_v55 = vadd.f32 %v12241_v11, %v4987_v20  ;;  %v5047_v36 = vpop.permute.xlu1 %5046 }
 0x9b6   :  { %5482 = vmatprep.subr.mxu0 %v12202_v44  ;;  %5739 = vmatprep.subr.mxu1 %v12205_v59  ;;  %v5130_v7 = vadd.f32 %v12241_v11, %v4986_v26  ;;  %v4982_v13 = vmul.f32 %v4908_v12, %v11709_v3  ;;  %v14973_v44 = vld [vmem:[#allocation108_spill] sm:$0xff]  ;;  %v4985_v32 = vmul.f32 %v4908_v12, %v14974_v28  ;;  %v14977_v3 = vld [vmem:[#allocation123_spill] sm:$0xff] }
 0x9b7   :  { %5483 = vmatpush1.msra.mxu0 %v5142_v0  ;;  %5740 = vmatpush1.msra.mxu1 %v5144_v33  ;;  %v4983_v59 = vmul.f32 %v4908_v12, %v14973_v44  ;;  %v4984_v53 = vmul.f32 %v4908_v12, %v14975_v50  ;;  %v5133_v48 = vadd.f32 %v12241_v11, %v4989_v41  ;;  %v14984_v12 = vld [vmem:[#allocation117_spill] sm:$0xff]  ;;  %v5180_v41 = vld [vmem:[%s14169_s17 + $0x10] sm:$0xff]  ;;  %v5191_v28 = vld [vmem:[%s14169_s17 + $0x68] sm:$0xff] }
 0x9b8   :  { %5484 = vmatprep.subr.mxu0 %v5139_v21  ;;  %5741 = vmatprep.subr.mxu1 %v5141_v62  ;;  %v5132_v4 = vadd.f32 %v12241_v11, %v4988_v17  ;;  %v4978_v31 = vmul.f32 %v4903_v63, %v14976_v49  ;;  %v4979_v10 = vmul.f32 %v4903_v63, %v14977_v3  ;;  %v5178_v17 = vld [vmem:[%s14169_s17] sm:$0xff]  ;;  %v5179_v62 = vld [vmem:[%s14169_s17 + $0x8] sm:$0xff]  ;;  %v5189_v44 = vld [vmem:[%s14169_s17 + $0x58] sm:$0xff] }
 0x9b9   :  { %v4898_v6 = vpop.permute.xlu0 %4897  ;;  %5485 = vmatpush1.msra.mxu0 %v5138_v15  ;;  %5742 = vmatpush1.msra.mxu1 %v5140_v2  ;;  %v4981_v46 = vmul.f32 %v4903_v63, %v14978_v54  ;;  %v4980_v61 = vmul.f32 %v4903_v63, %v14979_v39  ;;  %v5127_v11 = vadd.f32 %v12271_v18, %v4983_v59  ;;  %v5042_v22 = vpop.permute.xlu1 %5041  ;;  %v14988_v63 = vmov 0.0   ;;  %v5190_v59 = vld [vmem:[%s14169_s17 + $0x60] sm:$0xff]  ;;  %v5193_v50 = vld [vmem:[%s14169_s17 + $0x78] sm:$0xff]  ;;  %v5200_v3 = vld [vmem:[%s14169_s17 + $0xb0] sm:$0xff] }
 0x9ba   :  { %5486 = vmatprep.subr.mxu0 %v5135_v52  ;;  %5743 = vmatprep.subr.mxu1 %v5137_v24  ;;  %v4975_v42 = vmul.f32 %v4898_v6, %v14980_v29  ;;  %v4977_v51 = vmul.f32 %v4898_v6, %v14981_v30  ;;  %v5129_v27 = vadd.f32 %v12271_v18, %v4985_v32  ;;  %v5181_v52 = vld [vmem:[%s14169_s17 + $0x18] sm:$0xff]  ;;  %v5184_v24 = vld [vmem:[%s14169_s17 + $0x30] sm:$0xff]  ;;  %v5198_v49 = vld [vmem:[%s14169_s17 + $0xa0] sm:$0xff] }
 0x9bb   :  { %5487 = vmatpush1.msra.mxu0 %v5134_v1  ;;  %5744 = vmatpush1.msra.mxu1 %v5136_v14  ;;  %v5126_v0 = vadd.f32 %v12271_v18, %v4982_v13  ;;  %v4974_v19 = vmul.f32 %v4898_v6, %v14982_v37  ;;  %v4976_v33 = vmul.f32 %v4898_v6, %v14983_v23  ;;  %v5182_v1 = vld [vmem:[%s14169_s17 + $0x20] sm:$0xff]  ;;  %v5183_v14 = vld [vmem:[%s14169_s17 + $0x28] sm:$0xff]  ;;  %v5188_v13 = vld [vmem:[%s14169_s17 + $0x50] sm:$0xff] }
 0x9bc   :  { %5488 = vmatprep.subr.mxu0 %v5131_v55  ;;  %5745 = vmatprep.subr.mxu1 %v5133_v48  ;;  %v5128_v5 = vadd.f32 %v12271_v18, %v4984_v53  ;;  %v5123_v16 = vadd.f32 %v5047_v36, %v4979_v10  ;;  %v5125_v43 = vadd.f32 %v5047_v36, %v4981_v46  ;;  %v14987_v18 = vld [vmem:[#allocation115_spill] sm:$0xff]  ;;  %v5185_v55 = vld [vmem:[%s14169_s17 + $0x38] sm:$0xff]  ;;  %v5192_v32 = vld [vmem:[%s14169_s17 + $0x70] sm:$0xff] }
 0x9bd   :  { %v4893_v35 = vpop.permute.xlu0 %4892  ;;  %5489 = vmatpush1.msra.mxu0 %v5130_v7  ;;  %5746 = vmatpush1.msra.mxu1 %v5132_v4  ;;  %v5122_v38 = vadd.f32 %v5047_v36, %v4978_v31  ;;  %v5124_v56 = vadd.f32 %v5047_v36, %v4980_v61  ;;  %v5119_v34 = vadd.f32 %v5042_v22, %v4975_v42  ;;  %v5186_v7 = vld [vmem:[%s14169_s17 + $0x40] sm:$0xff]  ;;  %v5187_v36 = vld [vmem:[%s14169_s17 + $0x48] sm:$0xff]  ;;  %v5196_v48 = vld [vmem:[%s14169_s17 + $0x90] sm:$0xff] }
 0x9be   :  { %5490 = vmatprep.subr.mxu0 %v5127_v11  ;;  %5747 = vmatprep.subr.mxu1 %v5129_v27  ;;  %v5121_v9 = vadd.f32 %v5042_v22, %v4977_v51  ;;  %v4970_v8 = vmul.f32 %v4893_v35, %v14984_v12  ;;  %v4971_v60 = vmul.f32 %v4893_v35, %v14985_v58  ;;  %v5194_v53 = vld [vmem:[%s14169_s17 + $0x80] sm:$0xff]  ;;  %v5195_v6 = vld [vmem:[%s14169_s17 + $0x88] sm:$0xff]  ;;  %v5197_v4 = vld [vmem:[%s14169_s17 + $0x98] sm:$0xff]  ;;  %v12479_v27 = vpop.permute.xlu1 %5383 }
 0x9bf   :  { %5491 = vmatpush1.msra.mxu0 %v5126_v0  ;;  %5748 = vmatpush1.msra.mxu1 %v5128_v5  ;;  %v4973_v45 = vmul.f32 %v4893_v35, %v14986_v40  ;;  %v4972_v47 = vmul.f32 %v4893_v35, %v14987_v18  ;;  %v5118_v57 = vadd.f32 %v5042_v22, %v4974_v19  ;;  %v5199_v31 = vld [vmem:[%s14169_s17 + $0xa8] sm:$0xff]  ;;  %v5201_v10 = vld [vmem:[%s14169_s17 + $0xb8] sm:$0xff]  ;;  %v5202_v54 = vld [vmem:[%s14169_s17 + $0xc0] sm:$0xff] }
 0x9c0   :  { %5492 = vmatprep.subr.mxu0 %v5123_v16  ;;  %5749 = vmatprep.subr.mxu1 %v5125_v43  ;;  %v5120_v25 = vadd.f32 %v5042_v22, %v4976_v33  ;;  %v5203_v46 = vld [vmem:[%s14169_s17 + $0xc8] sm:$0xff]  ;;  %v5204_v39 = vld [vmem:[%s14169_s17 + $0xd0] sm:$0xff]  ;;  %v5205_v61 = vld [vmem:[%s14169_s17 + $0xd8] sm:$0xff] }
 0x9c1   :  { %v5037_v26 = vpop.permute.xlu0 %5036  ;;  %5493 = vmatpush1.msra.mxu0 %v5122_v38  ;;  %5750 = vmatpush1.msra.mxu1 %v5124_v56  ;;  %v5206_v29 = vld [vmem:[%s14169_s17 + $0xe0] sm:$0xff]  ;;  %v5207_v42 = vld [vmem:[%s14169_s17 + $0xe8] sm:$0xff]  ;;  %v5208_v30 = vld [vmem:[%s14169_s17 + $0xf0] sm:$0xff] }
 0x9c2   :  { %5494 = vmatprep.subr.mxu0 %v5119_v34  ;;  %5751 = vmatprep.subr.mxu1 %v5121_v9  ;;  %v5115_v20 = vadd.f32 %v5037_v26, %v4971_v60  ;;  %v5117_v21 = vadd.f32 %v5037_v26, %v4973_v45  ;;  %v5114_v15 = vadd.f32 %v5037_v26, %v4970_v8  ;;  %v5209_v51 = vld [vmem:[%s14169_s17 + $0xf8] sm:$0xff]  ;;  %v12483_v37 = vpop.permute.xlu1 %5373 }
 0x9c3   :  { %5495 = vmatpush1.msra.mxu0 %v5118_v57  ;;  %5752 = vmatpush1.msra.mxu1 %v5120_v25  ;;  %v5116_v2 = vadd.f32 %v5037_v26, %v4972_v47 }
 0x9c4   :  { %5496 = vmatprep.subr.mxu0 %v5115_v20  ;;  %5753 = vmatprep.subr.mxu1 %v5117_v21 }
 0x9c5   :  { %5497 = vmatpush1.msra.mxu0 %v5114_v15  ;;  %5754 = vmatpush1.msra.mxu1 %v5116_v2  ;;  %v12477_v11 = vpop.permute.xlu0 %5378 }
 0x9c6   :  { %5531 = vmatmul.mubr.f32.vlgmr.msra.gmra.mxu0 %v5178_v17  ;;  %5788 = vmatmul.mubr.f32.vlgmr.msra.gmra.mxu1 %v5178_v17  ;;  %v12487_v23 = vpop.permute.xlu1 %5363 }
 0x9c7   :  { %5536 = vmatprep.mubr.f32.mxu0 %v14988_v63  ;;  %5793 = vmatprep.mubr.f32.mxu1 %v14988_v63 }
 0x9c9   :  { %v12481_v0 = vpop.permute.xlu0 %5368 }
 0x9ca   :  { %5537 = vmatmul.mubr.f32.gmra.mxu0 %v5179_v62  ;;  %5794 = vmatmul.mubr.f32.gmra.mxu1 %v5179_v62  ;;  %v12491_v35 = vpop.permute.xlu1 %5353 }
 0x9cb   :  { %5542 = vmatprep.mubr.f32.mxu0 %v14988_v63  ;;  %5799 = vmatprep.mubr.f32.mxu1 %v14988_v63 }
 0x9cd   :  { %v12485_v19 = vpop.permute.xlu0 %5358 }
 0x9ce   :  { %5543 = vmatmul.mubr.f32.gmra.mxu0 %v5180_v41  ;;  %5800 = vmatmul.mubr.f32.gmra.mxu1 %v5180_v41  ;;  %v12495_v22 = vpop.permute.xlu1 %5343 }
 0x9cf   :  { %5548 = vmatprep.mubr.f32.mxu0 %v14988_v63  ;;  %5805 = vmatprep.mubr.f32.mxu1 %v14988_v63 }
 0x9d1   :  { %v12489_v33 = vpop.permute.xlu0 %5348 }
 0x9d2   :  { %5549 = vmatmul.mubr.f32.gmra.mxu0 %v5181_v52  ;;  %5806 = vmatmul.mubr.f32.gmra.mxu1 %v5181_v52  ;;  %v12499_v43 = vpop.permute.xlu1 %5333 }
 0x9d3   :  { %5554 = vmatprep.mubr.f32.mxu0 %v14988_v63  ;;  %5811 = vmatprep.mubr.f32.mxu1 %v14988_v63 }
 0x9d5   :  { %v12493_v5 = vpop.permute.xlu0 %5338 }
 0x9d6   :  { %5555 = vmatmul.mubr.f32.gmra.mxu0 %v5182_v1  ;;  %5812 = vmatmul.mubr.f32.gmra.mxu1 %v5182_v1  ;;  %v5324_v56 = vpop.permute.xlu1 %5323 }
 0x9d7   :  { %5560 = vmatprep.mubr.f32.mxu0 %v14988_v63  ;;  %5817 = vmatprep.mubr.f32.mxu1 %v14988_v63 }
 0x9d9   :  { %v12497_v16 = vpop.permute.xlu0 %5328 }
 0x9da   :  { %5561 = vmatmul.mubr.f32.gmra.mxu0 %v5183_v14  ;;  %5818 = vmatmul.mubr.f32.gmra.mxu1 %v5183_v14  ;;  %v5314_v25 = vpop.permute.xlu1 %5313 }
 0x9db   :  { %5566 = vmatprep.mubr.f32.mxu0 %v14988_v63  ;;  %5823 = vmatprep.mubr.f32.mxu1 %v14988_v63 }
 0x9dd   :  { %v5319_v38 = vpop.permute.xlu0 %5318 }
 0x9de   :  { %5567 = vmatmul.mubr.f32.gmra.mxu0 %v5184_v24  ;;  %5824 = vmatmul.mubr.f32.gmra.mxu1 %v5184_v24 }
 0x9df   :  { %5572 = vmatprep.mubr.f32.mxu0 %v14988_v63  ;;  %5829 = vmatprep.mubr.f32.mxu1 %v14988_v63 }
 0x9e1   :  { %v5309_v34 = vpop.permute.xlu0 %5308 }
 0x9e2   :  { %5573 = vmatmul.mubr.f32.gmra.mxu0 %v5185_v55  ;;  %5830 = vmatmul.mubr.f32.gmra.mxu1 %v5185_v55 }
 0x9e3   :  { %5578 = vmatprep.mubr.f32.mxu0 %v14988_v63  ;;  %5835 = vmatprep.mubr.f32.mxu1 %v14988_v63 }
 0x9e6   :  { %5579 = vmatmul.mubr.f32.gmra.mxu0 %v5186_v7  ;;  %5836 = vmatmul.mubr.f32.gmra.mxu1 %v5186_v7 }
 0x9e7   :  { %5584 = vmatprep.mubr.f32.mxu0 %v14988_v63  ;;  %5841 = vmatprep.mubr.f32.mxu1 %v14988_v63 }
 0x9ea   :  { %5585 = vmatmul.mubr.f32.gmra.mxu0 %v5187_v36  ;;  %5842 = vmatmul.mubr.f32.gmra.mxu1 %v5187_v36 }
 0x9eb   :  { %5590 = vmatprep.mubr.f32.mxu0 %v14988_v63  ;;  %5847 = vmatprep.mubr.f32.mxu1 %v14988_v63 }
 0x9ee   :  { %5591 = vmatmul.mubr.f32.gmra.mxu0 %v5188_v13  ;;  %5848 = vmatmul.mubr.f32.gmra.mxu1 %v5188_v13 }
 0x9ef   :  { %5596 = vmatprep.mubr.f32.mxu0 %v14988_v63  ;;  %5853 = vmatprep.mubr.f32.mxu1 %v14988_v63 }
 0x9f2   :  { %5597 = vmatmul.mubr.f32.gmra.mxu0 %v5189_v44  ;;  %5854 = vmatmul.mubr.f32.gmra.mxu1 %v5189_v44 }
 0x9f3   :  { %5602 = vmatprep.mubr.f32.mxu0 %v14988_v63  ;;  %5859 = vmatprep.mubr.f32.mxu1 %v14988_v63 }
 0x9f6   :  { %5603 = vmatmul.mubr.f32.gmra.mxu0 %v5190_v59  ;;  %5860 = vmatmul.mubr.f32.gmra.mxu1 %v5190_v59 }
 0x9f7   :  { %5608 = vmatprep.mubr.f32.mxu0 %v14988_v63  ;;  %5865 = vmatprep.mubr.f32.mxu1 %v14988_v63 }
 0x9fa   :  { %5609 = vmatmul.mubr.f32.gmra.mxu0 %v5191_v28  ;;  %5866 = vmatmul.mubr.f32.gmra.mxu1 %v5191_v28 }
 0x9fb   :  { %5614 = vmatprep.mubr.f32.mxu0 %v14988_v63  ;;  %5871 = vmatprep.mubr.f32.mxu1 %v14988_v63 }
 0x9fe   :  { %5615 = vmatmul.mubr.f32.gmra.mxu0 %v5192_v32  ;;  %5872 = vmatmul.mubr.f32.gmra.mxu1 %v5192_v32 }
 0x9ff   :  { %5620 = vmatprep.mubr.f32.mxu0 %v14988_v63  ;;  %5877 = vmatprep.mubr.f32.mxu1 %v14988_v63 }
 0xa02   :  { %5621 = vmatmul.mubr.f32.gmra.mxu0 %v5193_v50  ;;  %5878 = vmatmul.mubr.f32.gmra.mxu1 %v5193_v50 }
 0xa03   :  { %5626 = vmatprep.mubr.f32.mxu0 %v14988_v63  ;;  %5883 = vmatprep.mubr.f32.mxu1 %v14988_v63 }
 0xa06   :  { %5627 = vmatmul.mubr.f32.gmra.mxu0 %v5194_v53  ;;  %5884 = vmatmul.mubr.f32.gmra.mxu1 %v5194_v53 }
 0xa07   :  { %5632 = vmatprep.mubr.f32.mxu0 %v14988_v63  ;;  %5889 = vmatprep.mubr.f32.mxu1 %v14988_v63 }
 0xa0a   :  { %5633 = vmatmul.mubr.f32.gmra.mxu0 %v5195_v6  ;;  %5890 = vmatmul.mubr.f32.gmra.mxu1 %v5195_v6 }
 0xa0b   :  { %5638 = vmatprep.mubr.f32.mxu0 %v14988_v63  ;;  %5895 = vmatprep.mubr.f32.mxu1 %v14988_v63 }
 0xa0e   :  { %5639 = vmatmul.mubr.f32.gmra.mxu0 %v5196_v48  ;;  %5896 = vmatmul.mubr.f32.gmra.mxu1 %v5196_v48 }
 0xa0f   :  { %5644 = vmatprep.mubr.f32.mxu0 %v14988_v63  ;;  %5901 = vmatprep.mubr.f32.mxu1 %v14988_v63 }
 0xa12   :  { %5645 = vmatmul.mubr.f32.gmra.mxu0 %v5197_v4  ;;  %5902 = vmatmul.mubr.f32.gmra.mxu1 %v5197_v4 }
 0xa13   :  { %5650 = vmatprep.mubr.f32.mxu0 %v14988_v63  ;;  %5907 = vmatprep.mubr.f32.mxu1 %v14988_v63 }
 0xa16   :  { %5651 = vmatmul.mubr.f32.gmra.mxu0 %v5198_v49  ;;  %5908 = vmatmul.mubr.f32.gmra.mxu1 %v5198_v49 }
 0xa17   :  { %5656 = vmatprep.mubr.f32.mxu0 %v14988_v63  ;;  %5913 = vmatprep.mubr.f32.mxu1 %v14988_v63 }
 0xa1a   :  { %5657 = vmatmul.mubr.f32.gmra.mxu0 %v5199_v31  ;;  %5914 = vmatmul.mubr.f32.gmra.mxu1 %v5199_v31 }
 0xa1b   :  { %5662 = vmatprep.mubr.f32.mxu0 %v14988_v63  ;;  %5919 = vmatprep.mubr.f32.mxu1 %v14988_v63 }
 0xa1e   :  { %5663 = vmatmul.mubr.f32.gmra.mxu0 %v5200_v3  ;;  %5920 = vmatmul.mubr.f32.gmra.mxu1 %v5200_v3 }
 0xa1f   :  { %5668 = vmatprep.mubr.f32.mxu0 %v14988_v63  ;;  %5925 = vmatprep.mubr.f32.mxu1 %v14988_v63 }
 0xa22   :  { %5669 = vmatmul.mubr.f32.gmra.mxu0 %v5201_v10  ;;  %5926 = vmatmul.mubr.f32.gmra.mxu1 %v5201_v10 }
 0xa23   :  { %5674 = vmatprep.mubr.f32.mxu0 %v14988_v63  ;;  %5931 = vmatprep.mubr.f32.mxu1 %v14988_v63 }
 0xa26   :  { %5675 = vmatmul.mubr.f32.gmra.mxu0 %v5202_v54  ;;  %5932 = vmatmul.mubr.f32.gmra.mxu1 %v5202_v54 }
 0xa27   :  { %5680 = vmatprep.mubr.f32.mxu0 %v14988_v63  ;;  %5937 = vmatprep.mubr.f32.mxu1 %v14988_v63 }
 0xa2a   :  { %5681 = vmatmul.mubr.f32.gmra.mxu0 %v5203_v46  ;;  %5938 = vmatmul.mubr.f32.gmra.mxu1 %v5203_v46 }
 0xa2b   :  { %5686 = vmatprep.mubr.f32.mxu0 %v14988_v63  ;;  %5943 = vmatprep.mubr.f32.mxu1 %v14988_v63 }
 0xa2e   :  { %5687 = vmatmul.mubr.f32.gmra.mxu0 %v5204_v39  ;;  %5944 = vmatmul.mubr.f32.gmra.mxu1 %v5204_v39 }
 0xa2f   :  { %5692 = vmatprep.mubr.f32.mxu0 %v14988_v63  ;;  %5949 = vmatprep.mubr.f32.mxu1 %v14988_v63 }
 0xa32   :  { %5693 = vmatmul.mubr.f32.gmra.mxu0 %v5205_v61  ;;  %5950 = vmatmul.mubr.f32.gmra.mxu1 %v5205_v61 }
 0xa33   :  { %5698 = vmatprep.mubr.f32.mxu0 %v14988_v63  ;;  %5955 = vmatprep.mubr.f32.mxu1 %v14988_v63 }
 0xa36   :  { %5699 = vmatmul.mubr.f32.gmra.mxu0 %v5206_v29  ;;  %5956 = vmatmul.mubr.f32.gmra.mxu1 %v5206_v29 }
 0xa37   :  { %5704 = vmatprep.mubr.f32.mxu0 %v14988_v63  ;;  %5961 = vmatprep.mubr.f32.mxu1 %v14988_v63 }
 0xa3a   :  { %5705 = vmatmul.mubr.f32.gmra.mxu0 %v5207_v42  ;;  %5962 = vmatmul.mubr.f32.gmra.mxu1 %v5207_v42 }
 0xa3b   :  { %5710 = vmatprep.mubr.f32.mxu0 %v14988_v63  ;;  %5967 = vmatprep.mubr.f32.mxu1 %v14988_v63 }
 0xa3e   :  { %5711 = vmatmul.mubr.f32.gmra.mxu0 %v5208_v30  ;;  %5968 = vmatmul.mubr.f32.gmra.mxu1 %v5208_v30 }
 0xa3f   :  { %5716 = vmatprep.mubr.f32.mxu0 %v14988_v63  ;;  %5973 = vmatprep.mubr.f32.mxu1 %v14988_v63 }
 0xa42   :  { %5717 = vmatmul.mubr.f32.gmra.mxu0 %v5209_v51  ;;  %5974 = vmatmul.mubr.f32.gmra.mxu1 %v5209_v51 }
 0xa86   :  { %v5532_v9 = vpop.f32.mrf.mxu0  ;;  %v5789_v12 = vpop.f32.mrf.mxu1 }
 0xa87   :  { %v5533_v8 = vadd.f32 %v5532_v9, %v5309_v34  ;;  %v5790_v58 = vadd.f32 %v5789_v12, %v5309_v34 }
 0xa88   :  { %v5534_v60 = vpop.f32.mrf.mxu0  ;;  %v5791_v40 = vpop.f32.mrf.mxu1 }
 0xa89   :  { %v5535_v45 = vadd.f32 %v5534_v60, %v5309_v34  ;;  %v12501_v18 = vmax.f32 %v5533_v8, 0.0  ;;  %v5792_v47 = vadd.f32 %v5791_v40, %v5309_v34  ;;  %v12505_v21 = vmax.f32 %v5790_v58, 0.0 }
 0xa8a   :  { %v5538_v26 = vpop.f32.mrf.mxu0  ;;  %v5795_v57 = vpop.f32.mrf.mxu1 }
 0xa8b   :  { %v12503_v20 = vmax.f32 %v5535_v45, 0.0  ;;  %v5539_v15 = vadd.f32 %v5538_v26, %v5314_v25  ;;  %v5796_v41 = vadd.f32 %v5795_v57, %v5314_v25  ;;  %v6268_v1 = vmul.f32 %v12501_v18, %v12501_v18 }
 0xa8c   :  { %v5540_v2 = vpop.f32.mrf.mxu0  ;;  %v5797_v17 = vpop.f32.mrf.mxu1  ;;  %v12513_v14 = vmax.f32 %v5792_v47, 0.0  ;;  %v6270_v28 = vmul.f32 %v12505_v21, %v12505_v21 }
 0xa8d   :  { %v6108_v63 = vadd.f32 %v12503_v20, %v12501_v18  ;;  %v6269_v62 = vmul.f32 %v12503_v20, %v12503_v20  ;;  %v5541_v52 = vadd.f32 %v5540_v2, %v5314_v25  ;;  %v5798_v24 = vadd.f32 %v5797_v17, %v5314_v25 }
 0xa8e   :  { %v5544_v55 = vpop.f32.mrf.mxu0  ;;  %v5801_v7 = vpop.f32.mrf.mxu1  ;;  %v12515_v36 = vmax.f32 %v5539_v15, 0.0  ;;  %v12522_v48 = vmax.f32 %v5796_v41, 0.0  ;;  %v6271_v29 = vmul.f32 %v12513_v14, %v12513_v14 }
 0xa8f   :  { %v12517_v13 = vmax.f32 %v5541_v52, 0.0  ;;  %v5545_v44 = vadd.f32 %v5544_v55, %v5319_v38  ;;  %v5802_v59 = vadd.f32 %v5801_v7, %v5319_v38  ;;  %v6396_v32 = vadd.f32 %v6269_v62, %v6268_v1 }
 0xa90   :  { %v5546_v50 = vpop.f32.mrf.mxu0  ;;  %v5803_v53 = vpop.f32.mrf.mxu1  ;;  %v6109_v6 = vadd.f32 %v6108_v63, %v12505_v21  ;;  %14989 = vst [vmem:[#allocation109_spill] sm:$0xff] %v12522_v48  ;;  %v12528_v31 = vmax.f32 %v5798_v24, 0.0  ;;  %v6272_v51 = vmul.f32 %v12515_v36, %v12515_v36  ;;  %v6274_v47 = vmul.f32 %v12522_v48, %v12522_v48 }
 0xa91   :  { %v6113_v4 = vadd.f32 %v12517_v13, %v12515_v36  ;;  %v6273_v49 = vmul.f32 %v12517_v13, %v12517_v13  ;;  %v12530_v3 = vmax.f32 %v5545_v44, 0.0  ;;  %v5547_v10 = vadd.f32 %v5546_v50, %v5319_v38 }
 0xa92   :  { %14990 = vst [vmem:[#allocation107_spill] sm:$0xff] %v12528_v31  ;;  %v5804_v54 = vadd.f32 %v5803_v53, %v5319_v38  ;;  %v5550_v46 = vpop.f32.mrf.mxu0  ;;  %v5807_v39 = vpop.f32.mrf.mxu1  ;;  %v6110_v61 = vadd.f32 %v6109_v6, %v12513_v14  ;;  %v12535_v42 = vmax.f32 %v5802_v59, 0.0  ;;  %v6397_v38 = vadd.f32 %v6396_v32, %v6270_v28 }
 0xa93   :  { %14991 = vst [vmem:[#allocation106_spill] sm:$0xff] %v12530_v3  ;;  %v5551_v30 = vadd.f32 %v5550_v46, %v5324_v56  ;;  %v12539_v34 = vmax.f32 %v5547_v10, 0.0  ;;  %v5808_v9 = vadd.f32 %v5807_v39, %v5324_v56  ;;  %v6114_v45 = vadd.f32 %v6113_v4, %v12522_v48 }
 0xa94   :  { %14992 = vst [vmem:[#allocation103_spill] sm:$0xff] %v12535_v42  ;;  %6111 = vadd.xlane.f32.xlu1 %v6110_v61  ;;  %v5552_v12 = vpop.f32.mrf.mxu0  ;;  %v5809_v8 = vpop.f32.mrf.mxu1  ;;  %v12541_v58 = vmax.f32 %v5804_v54, 0.0  ;;  %v6401_v26 = vadd.f32 %v6273_v49, %v6272_v51  ;;  %v6275_v57 = vmul.f32 %v12528_v31, %v12528_v31  ;;  %v6276_v25 = vmul.f32 %v12530_v3, %v12530_v3 }
 0xa95   :  { %14993 = vst [vmem:[#allocation101_spill] sm:$0xff] %v12539_v34  ;;  %v5553_v60 = vadd.f32 %v5552_v12, %v5324_v56  ;;  %v5810_v40 = vadd.f32 %v5809_v8, %v5324_v56  ;;  %v6278_v17 = vmul.f32 %v12535_v42, %v12535_v42  ;;  %v12552_v63 = vmax.f32 %v5551_v30, 0.0 }
 0xa96   :  { %14994 = vst [vmem:[#allocation83_spill] sm:$0xff] %v12541_v58  ;;  %v5556_v15 = vpop.f32.mrf.mxu0  ;;  %v5813_v2 = vpop.f32.mrf.mxu1  ;;  %v6398_v62 = vadd.f32 %v6397_v38, %v6271_v29  ;;  %v6277_v41 = vmul.f32 %v12539_v34, %v12539_v34  ;;  %v12558_v52 = vmax.f32 %v5808_v9, 0.0  ;;  %v6118_v44 = vadd.f32 %v12539_v34, %v12530_v3 }
 0xa97   :  { %14995 = vst [vmem:[#allocation85_spill] sm:$0xff] %v12552_v63  ;;  %v12554_v56 = vmax.f32 %v5553_v60, 0.0  ;;  %v5557_v1 = vadd.f32 %v5556_v15, %v12497_v16  ;;  %v5814_v24 = vadd.f32 %v5813_v2, %v12497_v16  ;;  %v6279_v59 = vmul.f32 %v12541_v58, %v12541_v58 }
 0xa98   :  { %14997 = vst [vmem:[#allocation86_spill] sm:$0xff] %v12558_v52  ;;  %v5558_v55 = vpop.f32.mrf.mxu0  ;;  %v5815_v7 = vpop.f32.mrf.mxu1  ;;  %v12566_v28 = vmax.f32 %v5810_v40, 0.0  ;;  %6399 = vadd.xlane.f32.xlu0 %v6398_v62  ;;  %v6115_v32 = vadd.f32 %v6114_v45, %v12528_v31  ;;  %v6280_v54 = vmul.f32 %v12552_v63, %v12552_v63  ;;  %v6402_v39 = vadd.f32 %v6401_v26, %v6274_v47 }
 0xa99   :  { %14996 = vst [vmem:[#allocation80_spill] sm:$0xff] %v12554_v56  ;;  %v6281_v50 = vmul.f32 %v12554_v56, %v12554_v56  ;;  %v12571_v53 = vmax.f32 %v5557_v1, 0.0  ;;  %v5559_v6 = vadd.f32 %v5558_v55, %v12497_v16  ;;  %v5816_v4 = vadd.f32 %v5815_v7, %v12497_v16 }
 0xa9a   :  { %14998 = vst [vmem:[#allocation87_spill] sm:$0xff] %v12566_v28  ;;  %v5562_v49 = vpop.f32.mrf.mxu0  ;;  %v5819_v10 = vpop.f32.mrf.mxu1  ;;  %v12577_v46 = vmax.f32 %v5814_v24, 0.0  ;;  %6116 = vadd.xlane.f32.xlu1 %v6115_v32  ;;  %v6406_v29 = vadd.f32 %v6277_v41, %v6276_v25  ;;  %v6282_v30 = vmul.f32 %v12558_v52, %v12558_v52  ;;  %v6123_v51 = vadd.f32 %v12554_v56, %v12552_v63 }
 0xa9b   :  { %14999 = vst [vmem:[#allocation82_spill] sm:$0xff] %v12571_v53  ;;  %v5563_v61 = vadd.f32 %v5562_v49, %v12499_v43  ;;  %v12584_v9 = vmax.f32 %v5559_v6, 0.0  ;;  %v6283_v8 = vmul.f32 %v12566_v28, %v12566_v28  ;;  %v6403_v38 = vadd.f32 %v6402_v39, %v6275_v57  ;;  %v12606_v6 = vpop.permute.xlu0 %5458 }
 0xa9c   :  { %15000 = vst [vmem:[#allocation81_spill] sm:$0xff] %v12577_v46  ;;  %v5564_v16 = vpop.f32.mrf.mxu0  ;;  %v5821_v12 = vpop.f32.mrf.mxu1  ;;  %v5820_v60 = vadd.f32 %v5819_v10, %v12499_v43  ;;  %v6119_v40 = vadd.f32 %v6118_v44, %v12535_v42  ;;  %v6411_v45 = vadd.f32 %v6281_v50, %v6280_v54  ;;  %v6284_v47 = vmul.f32 %v12571_v53, %v12571_v53 }
 0xa9d   :  { %15001 = vst [vmem:[#allocation76_spill] sm:$0xff] %v12584_v9  ;;  %v12592_v26 = vmax.f32 %v5816_v4, 0.0  ;;  %v5565_v25 = vadd.f32 %v5564_v16, %v12499_v43  ;;  %v6286_v62 = vmul.f32 %v12577_v46, %v12577_v46  ;;  %6404 = vadd.xlane.f32.xlu0 %v6403_v38  ;;  %v12597_v41 = vmax.f32 %v5563_v61, 0.0 }
 0xa9e   :  { %v5568_v15 = vpop.f32.mrf.mxu0  ;;  %v5825_v2 = vpop.f32.mrf.mxu1  ;;  %v6120_v57 = vadd.f32 %v6119_v40, %v12541_v58  ;;  %v5822_v1 = vadd.f32 %v5821_v12, %v12499_v43  ;;  %v6285_v24 = vmul.f32 %v12584_v9, %v12584_v9  ;;  %v6407_v7 = vadd.f32 %v6406_v29, %v6278_v17 }
 0xa9f   :  { %15002 = vst [vmem:[#allocation77_spill] sm:$0xff] %v12592_v26  ;;  %15003 = vst [vmem:[#allocation84_spill] sm:$0xff] %v12597_v41  ;;  %v12603_v55 = vmax.f32 %v5565_v25, 0.0  ;;  %v5569_v44 = vadd.f32 %v5568_v15, %v12493_v5  ;;  %v12608_v4 = vmax.f32 %v5820_v60, 0.0  ;;  %v5826_v49 = vadd.f32 %v5825_v2, %v12493_v5 }
 0xaa0   :  { %v5570_v32 = vpop.f32.mrf.mxu0  ;;  %v5827_v50 = vpop.f32.mrf.mxu1  ;;  %6121 = vadd.xlane.f32.xlu1 %v6120_v57  ;;  %v6124_v10 = vadd.f32 %v6123_v51, %v12558_v52  ;;  %v6128_v54 = vadd.f32 %v12584_v9, %v12571_v53  ;;  %v6287_v17 = vmul.f32 %v12592_v26, %v12592_v26  ;;  %v12617_v39 = vmax.f32 %v5822_v1, 0.0 }
 0xaa1   :  { %15004 = vst [vmem:[#allocation78_spill] sm:$0xff] %v12603_v55  ;;  %15005 = vst [vmem:[#allocation79_spill] sm:$0xff] %v12608_v4  ;;  %v5571_v43 = vadd.f32 %v5570_v32, %v12493_v5  ;;  %v6408_v61 = vadd.f32 %v6407_v7, %v6279_v59  ;;  %v6288_v12 = vmul.f32 %v12597_v41, %v12597_v41  ;;  %v12626_v25 = vmax.f32 %v5569_v44, 0.0 }
 0xaa2   :  { %15006 = vst [vmem:[#allocation71_spill] sm:$0xff] %v12617_v39  ;;  %v5574_v29 = vpop.f32.mrf.mxu0  ;;  %v5831_v16 = vpop.f32.mrf.mxu1  ;;  %v6289_v38 = vmul.f32 %v12603_v55, %v12603_v55  ;;  %v6125_v51 = vadd.f32 %v6124_v10, %v12566_v28  ;;  %v6416_v40 = vadd.f32 %v6285_v24, %v6284_v47  ;;  %v12628_v15 = vmax.f32 %v5826_v49, 0.0 }
 0xaa3   :  { %v12624_v60 = vmax.f32 %v5571_v43, 0.0  ;;  %6409 = vadd.xlane.f32.xlu0 %v6408_v61  ;;  %15008 = vst [vmem:[#allocation68_spill] sm:$0xff] %v12626_v25  ;;  %v6412_v2 = vadd.f32 %v6411_v45, %v6282_v30  ;;  %v6290_v1 = vmul.f32 %v12608_v4, %v12608_v4  ;;  %v6133_v7 = vadd.f32 %v12603_v55, %v12597_v41  ;;  %v12640_v43 = vpop.permute.xlu1 %5463  ;;  %v12642_v61 = vpop.permute.xlu0 %5448 }
 0xaa4   :  { %15009 = vst [vmem:[#allocation73_spill] sm:$0xff] %v12628_v15  ;;  %v5576_v59 = vpop.f32.mrf.mxu0  ;;  %v5833_v57 = vpop.f32.mrf.mxu1  ;;  %6126 = vadd.xlane.f32.xlu1 %v6125_v51  ;;  %v5828_v32 = vadd.f32 %v5827_v50, %v12493_v5  ;;  %v5575_v10 = vadd.f32 %v5574_v29, %v12495_v22  ;;  %v6291_v47 = vmul.f32 %v12617_v39, %v12617_v39 }
 0xaa5   :  { %15007 = vst [vmem:[#allocation74_spill] sm:$0xff] %v12624_v60  ;;  %v6413_v24 = vadd.f32 %v6412_v2, %v6283_v8  ;;  %v5832_v44 = vadd.f32 %v5831_v16, %v12495_v22  ;;  %v6129_v30 = vadd.f32 %v6128_v54, %v12577_v46  ;;  %v6421_v55 = vadd.f32 %v6289_v38, %v6288_v12 }
 0xaa6   :  { %v5580_v45 = vpop.f32.mrf.mxu0  ;;  %v5837_v49 = vpop.f32.mrf.mxu1  ;;  %v6293_v5 = vmul.f32 %v12624_v60, %v12624_v60  ;;  %v5577_v50 = vadd.f32 %v5576_v59, %v12495_v22  ;;  %v5834_v29 = vadd.f32 %v5833_v57, %v12495_v22  ;;  %v6292_v8 = vmul.f32 %v12626_v25, %v12626_v25 }
 0xaa7   :  { %v6294_v54 = vmul.f32 %v12628_v15, %v12628_v15  ;;  %6414 = vadd.xlane.f32.xlu0 %v6413_v24  ;;  %v6130_v16 = vadd.f32 %v6129_v30, %v12592_v26  ;;  %v6417_v51 = vadd.f32 %v6416_v40, %v6286_v62  ;;  %v12653_v12 = vmax.f32 %v5828_v32, 0.0  ;;  %v12677_v26 = vpop.permute.xlu0 %5438 }
 0xaa8   :  { %v5582_v2 = vpop.f32.mrf.mxu0  ;;  %v5839_v46 = vpop.f32.mrf.mxu1  ;;  %v12655_v38 = vmax.f32 %v5575_v10, 0.0  ;;  %v12657_v41 = vmax.f32 %v5577_v50, 0.0  ;;  %v5581_v22 = vadd.f32 %v5580_v45, %v12489_v33  ;;  %v12660_v59 = vmax.f32 %v5832_v44, 0.0 }
 0xaa9   :  { %15010 = vst [vmem:[#allocation75_spill] sm:$0xff] %v12653_v12  ;;  %6131 = vadd.xlane.f32.xlu1 %v6130_v16  ;;  %v6418_v57 = vadd.f32 %v6417_v51, %v6287_v17  ;;  %v5838_v9 = vadd.f32 %v5837_v49, %v12489_v33  ;;  %v6134_v24 = vadd.f32 %v6133_v7, %v12608_v4  ;;  %v12668_v50 = vmax.f32 %v5834_v29, 0.0  ;;  %v12675_v51 = vpop.permute.xlu1 %5453 }
 0xaaa   :  { %15011 = vst [vmem:[#allocation69_spill] sm:$0xff] %v12655_v38  ;;  %15012 = vst [vmem:[#allocation70_spill] sm:$0xff] %v12657_v41  ;;  %v5586_v30 = vpop.f32.mrf.mxu0  ;;  %v5843_v62 = vpop.f32.mrf.mxu1  ;;  %v6138_v40 = vadd.f32 %v12624_v60, %v12626_v25  ;;  %v6426_v32 = vadd.f32 %v6293_v5, %v6292_v8  ;;  %v6297_v10 = vmul.f32 %v12657_v41, %v12657_v41  ;;  %v12670_v44 = vmax.f32 %v5581_v22, 0.0 }
 0xaab   :  { %15013 = vst [vmem:[#allocation62_spill] sm:$0xff] %v12660_v59  ;;  %15014 = vst [vmem:[#allocation66_spill] sm:$0xff] %v12668_v50  ;;  %6419 = vadd.xlane.f32.xlu0 %v6418_v57  ;;  %v6135_v17 = vadd.f32 %v6134_v24, %v12617_v39  ;;  %v5583_v45 = vadd.f32 %v5582_v2, %v12489_v33  ;;  %v5840_v7 = vadd.f32 %v5839_v46, %v12489_v33 }
 0xaac   :  { %15015 = vst [vmem:[#allocation72_spill] sm:$0xff] %v12670_v44  ;;  %v5588_v49 = vpop.f32.mrf.mxu0  ;;  %v5845_v16 = vpop.f32.mrf.mxu1  ;;  %v6295_v5 = vmul.f32 %v12653_v12, %v12653_v12  ;;  %v6296_v29 = vmul.f32 %v12655_v38, %v12655_v38  ;;  %v6422_v8 = vadd.f32 %v6421_v55, %v6290_v1  ;;  %v5587_v22 = vadd.f32 %v5586_v30, %v12491_v35 }
 0xaad   :  { %v6298_v2 = vmul.f32 %v12660_v59, %v12660_v59  ;;  %v12686_v57 = vmax.f32 %v5838_v9, 0.0  ;;  %6136 = vadd.xlane.f32.xlu1 %v6135_v17  ;;  %v12688_v33 = vmax.f32 %v5583_v45, 0.0  ;;  %v12690_v46 = vmax.f32 %v5840_v7, 0.0 }
 0xaae   :  { %v5592_v24 = vpop.f32.mrf.mxu0  ;;  %v5849_v4 = vpop.f32.mrf.mxu1  ;;  %v6423_v39 = vadd.f32 %v6422_v8, %v6291_v47  ;;  %v5844_v60 = vadd.f32 %v5843_v62, %v12491_v35  ;;  %v6139_v25 = vadd.f32 %v6138_v40, %v12628_v15  ;;  %v5589_v55 = vadd.f32 %v5588_v49, %v12491_v35 }
 0xaaf   :  { %15016 = vst [vmem:[#allocation64_spill] sm:$0xff] %v12686_v57  ;;  %15017 = vst [vmem:[#allocation67_spill] sm:$0xff] %v12688_v33  ;;  %v6143_v1 = vadd.f32 %v12657_v41, %v12655_v38  ;;  %v6431_v30 = vadd.f32 %v6297_v10, %v6296_v29  ;;  %v6299_v9 = vmul.f32 %v12668_v50, %v12668_v50  ;;  %v12701_v47 = vmax.f32 %v5587_v22, 0.0  ;;  %v12714_v22 = vpop.permute.xlu0 %5428 }
 0xab0   :  { %15018 = vst [vmem:[#allocation61_spill] sm:$0xff] %v12690_v46  ;;  %v6300_v17 = vmul.f32 %v12670_v44, %v12670_v44  ;;  %v5594_v45 = vpop.f32.mrf.mxu0  ;;  %v5851_v7 = vpop.f32.mrf.mxu1  ;;  %6424 = vadd.xlane.f32.xlu0 %v6423_v39  ;;  %v6140_v62 = vadd.f32 %v6139_v25, %v12653_v12  ;;  %v12704_v40 = vmax.f32 %v5589_v55, 0.0  ;;  %v5846_v49 = vadd.f32 %v5845_v16, %v12491_v35 }
 0xab1   :  { %15019 = vst [vmem:[#allocation65_spill] sm:$0xff] %v12701_v47  ;;  %v6302_v10 = vmul.f32 %v12686_v57, %v12686_v57  ;;  %v6301_v29 = vmul.f32 %v12688_v33, %v12688_v33  ;;  %v6427_v8 = vadd.f32 %v6426_v32, %v6294_v54  ;;  %v5593_v15 = vadd.f32 %v5592_v24, %v12485_v19  ;;  %v12712_v39 = vpop.permute.xlu1 %5443 }
 0xab2   :  { %15020 = vst [vmem:[#allocation60_spill] sm:$0xff] %v12704_v40  ;;  %v5598_v41 = vpop.f32.mrf.mxu0  ;;  %v5855_v38 = vpop.f32.mrf.mxu1  ;;  %v6148_v25 = vadd.f32 %v12688_v33, %v12670_v44  ;;  %v6303_v35 = vmul.f32 %v12690_v46, %v12690_v46  ;;  %v12720_v16 = vmax.f32 %v5844_v60, 0.0  ;;  %6141 = vadd.xlane.f32.xlu1 %v6140_v62  ;;  %v5850_v55 = vadd.f32 %v5849_v4, %v12485_v19 }
 0xab3   :  { %v6305_v54 = vmul.f32 %v12704_v40, %v12704_v40  ;;  %v6428_v32 = vadd.f32 %v6427_v8, %v6295_v5  ;;  %v6144_v24 = vadd.f32 %v6143_v1, %v12660_v59  ;;  %v5595_v12 = vadd.f32 %v5594_v45, %v12485_v19 }
 0xab4   :  { %15021 = vst [vmem:[#allocation63_spill] sm:$0xff] %v12720_v16  ;;  %v5600_v53 = vpop.f32.mrf.mxu0  ;;  %v5857_v28 = vpop.f32.mrf.mxu1  ;;  %v6304_v33 = vmul.f32 %v12701_v47, %v12701_v47  ;;  %v12729_v44 = vmax.f32 %v5846_v49, 0.0  ;;  %v12731_v60 = vmax.f32 %v5593_v15, 0.0  ;;  %v5852_v62 = vadd.f32 %v5851_v7, %v12485_v19 }
 0xab5   :  { %v6436_v4 = vadd.f32 %v6301_v29, %v6300_v17  ;;  %6429 = vadd.xlane.f32.xlu0 %v6428_v32  ;;  %v12734_v52 = vmax.f32 %v5850_v55, 0.0  ;;  %v6145_v5 = vadd.f32 %v6144_v24, %v12668_v50  ;;  %v6432_v1 = vadd.f32 %v6431_v30, %v6298_v2  ;;  %v12746_v55 = vpop.permute.xlu1 %5433  ;;  %v12748_v32 = vpop.permute.xlu0 %5418 }
 0xab6   :  { %15022 = vst [vmem:[#allocation52_spill] sm:$0xff] %v12729_v44  ;;  %15023 = vst [vmem:[#allocation58_spill] sm:$0xff] %v12731_v60  ;;  %v5604_v8 = vpop.f32.mrf.mxu0  ;;  %v5861_v45 = vpop.f32.mrf.mxu1  ;;  %v6306_v59 = vmul.f32 %v12720_v16, %v12720_v16  ;;  %v6153_v49 = vadd.f32 %v12704_v40, %v12701_v47  ;;  %v12741_v56 = vmax.f32 %v5595_v12, 0.0  ;;  %v5599_v15 = vadd.f32 %v5598_v41, %v12487_v23 }
 0xab7   :  { %15024 = vst [vmem:[#allocation14_spill] sm:$0xff] %v12734_v52  ;;  %v6441_v19 = vadd.f32 %v6305_v54, %v6304_v33  ;;  %6146 = vadd.xlane.f32.xlu1 %v6145_v5  ;;  %v6433_v17 = vadd.f32 %v6432_v1, %v6299_v9  ;;  %v5856_v7 = vadd.f32 %v5855_v38, %v12487_v23  ;;  %v12754_v41 = vmax.f32 %v5852_v62, 0.0 }
 0xab8   :  { %15025 = vst [vmem:[#allocation23_spill] sm:$0xff] %v12741_v56  ;;  %v6149_v29 = vadd.f32 %v6148_v25, %v12686_v57  ;;  %v5606_v2 = vpop.f32.mrf.mxu0  ;;  %v5863_v30 = vpop.f32.mrf.mxu1  ;;  %v6307_v24 = vmul.f32 %v12729_v44, %v12729_v44  ;;  %v6308_v12 = vmul.f32 %v12731_v60, %v12731_v60  ;;  %v5601_v33 = vadd.f32 %v5600_v53, %v12487_v23 }
 0xab9   :  { %15026 = vst [vmem:[#allocation6_spill] sm:$0xff] %v12754_v41  ;;  %v6310_v38 = vmul.f32 %v12734_v52, %v12734_v52  ;;  %6434 = vadd.xlane.f32.xlu0 %v6433_v17  ;;  %v5858_v25 = vadd.f32 %v5857_v28, %v12487_v23  ;;  %v6437_v54 = vadd.f32 %v6436_v4, %v6302_v10  ;;  %v12763_v57 = vmax.f32 %v5599_v15, 0.0 }
 0xaba   :  { %v6150_v9 = vadd.f32 %v6149_v29, %v12690_v46  ;;  %v5610_v5 = vpop.f32.mrf.mxu0  ;;  %v5867_v1 = vpop.f32.mrf.mxu1  ;;  %v6309_v50 = vmul.f32 %v12741_v56, %v12741_v56  ;;  %v12765_v62 = vmax.f32 %v5601_v33, 0.0  ;;  %v5605_v53 = vadd.f32 %v5604_v8, %v12481_v0 }
 0xabb   :  { %15027 = vst [vmem:[#allocation55_spill] sm:$0xff] %v12763_v57  ;;  %v12768_v40 = vmax.f32 %v5856_v7, 0.0  ;;  %v6438_v17 = vadd.f32 %v6437_v54, %v6303_v35  ;;  %v5862_v29 = vadd.f32 %v5861_v45, %v12481_v0  ;;  %v6154_v23 = vadd.f32 %v6153_v49, %v12720_v16  ;;  %v12785_v46 = vpop.permute.xlu1 %5423  ;;  %v12787_v16 = vpop.permute.xlu0 %5408 }
 0xabc   :  { %15028 = vst [vmem:[#allocation27_spill] sm:$0xff] %v12765_v62  ;;  %6151 = vadd.xlane.f32.xlu1 %v6150_v9  ;;  %v5612_v28 = vpop.f32.mrf.mxu0  ;;  %v5869_v10 = vpop.f32.mrf.mxu1  ;;  %v6158_v4 = vadd.f32 %v12741_v56, %v12731_v60  ;;  %v6311_v15 = vmul.f32 %v12754_v41, %v12754_v41  ;;  %v12776_v33 = vmax.f32 %v5858_v25, 0.0  ;;  %v5607_v8 = vadd.f32 %v5606_v2, %v12481_v0 }
 0xabd   :  { %15029 = vst [vmem:[#allocation17_spill] sm:$0xff] %v12768_v40  ;;  %v6313_v7 = vmul.f32 %v12765_v62, %v12765_v62  ;;  %6439 = vadd.xlane.f32.xlu0 %v6438_v17  ;;  %v12781_v35 = vmax.f32 %v5605_v53, 0.0  ;;  %v6155_v45 = vadd.f32 %v6154_v23, %v12729_v44  ;;  %v5864_v49 = vadd.f32 %v5863_v30, %v12481_v0 }
 0xabe   :  { %15030 = vst [vmem:[#allocation19_spill] sm:$0xff] %v12776_v33  ;;  %v5616_v9 = vpop.f32.mrf.mxu0  ;;  %v5873_v54 = vpop.f32.mrf.mxu1  ;;  %v6446_v25 = vadd.f32 %v6309_v50, %v6308_v12  ;;  %v6312_v2 = vmul.f32 %v12763_v57, %v12763_v57  ;;  %v12791_v56 = vmax.f32 %v5607_v8, 0.0  ;;  %v6442_v60 = vadd.f32 %v6441_v19, %v6306_v59 }
 0xabf   :  { %15031 = vst [vmem:[#allocation11_spill] sm:$0xff] %v12781_v35  ;;  %v6314_v53 = vmul.f32 %v12768_v40, %v12768_v40  ;;  %v12795_v17 = vmax.f32 %v5862_v29, 0.0  ;;  %v5611_v0 = vadd.f32 %v5610_v5, %v12483_v37  ;;  %v5868_v30 = vadd.f32 %v5867_v1, %v12483_v37  ;;  %v12823_v58 = vpop.permute.xlu0 %5398 }
 0xac0   :  { %15032 = vst [vmem:[#allocation22_spill] sm:$0xff] %v12791_v56  ;;  %6156 = vadd.xlane.f32.xlu1 %v6155_v45  ;;  %v5618_v23 = vpop.f32.mrf.mxu0  ;;  %v5875_v44 = vpop.f32.mrf.mxu1  ;;  %v6163_v50 = vadd.f32 %v12765_v62, %v12763_v57  ;;  %v6315_v12 = vmul.f32 %v12776_v33, %v12776_v33  ;;  %v6443_v8 = vadd.f32 %v6442_v60, %v6307_v24  ;;  %v12806_v45 = vmax.f32 %v5864_v49, 0.0 }
 0xac1   :  { %15033 = vst [vmem:[#allocation25_spill] sm:$0xff] %v12795_v17  ;;  %v6159_v59 = vadd.f32 %v6158_v4, %v12734_v52  ;;  %v6451_v19 = vadd.f32 %v6313_v7, %v6312_v2  ;;  %v6316_v29 = vmul.f32 %v12781_v35, %v12781_v35  ;;  %v5613_v5 = vadd.f32 %v5612_v28, %v12483_v37  ;;  %v12821_v57 = vpop.permute.xlu1 %5413 }
 0xac2   :  { %15034 = vst [vmem:[#allocation16_spill] sm:$0xff] %v12806_v45  ;;  %v5622_v1 = vpop.f32.mrf.mxu0  ;;  %v5879_v47 = vpop.f32.mrf.mxu1  ;;  %v6317_v63 = vmul.f32 %v12791_v56, %v12791_v56  ;;  %6444 = vadd.xlane.f32.xlu0 %v6443_v8  ;;  %v5870_v60 = vadd.f32 %v5869_v10, %v12483_v37  ;;  %v6447_v24 = vadd.f32 %v6446_v25, %v6310_v38  ;;  %v12815_v7 = vmax.f32 %v5611_v0, 0.0 }
 0xac3   :  { %v6160_v62 = vadd.f32 %v6159_v59, %v12754_v41  ;;  %v6318_v4 = vmul.f32 %v12795_v17, %v12795_v17  ;;  %v12817_v49 = vmax.f32 %v5868_v30, 0.0  ;;  %v12819_v2 = vmax.f32 %v5613_v5, 0.0 }
 0xac4   :  { %15035 = vst [vmem:[#allocation9_spill] sm:$0xff] %v12815_v7  ;;  %v5624_v28 = vpop.f32.mrf.mxu0  ;;  %v5881_v52 = vpop.f32.mrf.mxu1  ;;  %v6448_v8 = vadd.f32 %v6447_v24, %v6311_v15  ;;  %v5617_v37 = vadd.f32 %v5616_v9, %v12477_v11  ;;  %v5874_v38 = vadd.f32 %v5873_v54, %v12477_v11  ;;  %v6164_v10 = vadd.f32 %v6163_v50, %v12768_v40 }
 0xac5   :  { %15036 = vst [vmem:[#allocation59_spill] sm:$0xff] %v12817_v49  ;;  %15037 = vst [vmem:[#allocation57_spill] sm:$0xff] %v12819_v2  ;;  %6161 = vadd.xlane.f32.xlu1 %v6160_v62  ;;  %v6168_v25 = vadd.f32 %v12791_v56, %v12781_v35  ;;  %v6319_v0 = vmul.f32 %v12806_v45, %v12806_v45  ;;  %v12832_v30 = vmax.f32 %v5870_v60, 0.0 }
 0xac6   :  { %v5619_v59 = vadd.f32 %v5618_v23, %v12477_v11  ;;  %v5628_v5 = vpop.f32.mrf.mxu0  ;;  %v5885_v41 = vpop.f32.mrf.mxu1  ;;  %v6456_v62 = vadd.f32 %v6317_v63, %v6316_v29  ;;  %v6321_v15 = vmul.f32 %v12819_v2, %v12819_v2  ;;  %6449 = vadd.xlane.f32.xlu0 %v6448_v8  ;;  %v6165_v9 = vadd.f32 %v6164_v10, %v12776_v33 }
 0xac7   :  { %15038 = vst [vmem:[#allocation53_spill] sm:$0xff] %v12832_v30  ;;  %v5876_v54 = vadd.f32 %v5875_v44, %v12477_v11  ;;  %v6320_v50 = vmul.f32 %v12815_v7, %v12815_v7  ;;  %v6322_v60 = vmul.f32 %v12817_v49, %v12817_v49  ;;  %v6452_v23 = vadd.f32 %v6451_v19, %v6314_v53 }
 0xac8   :  { %v12843_v24 = vmax.f32 %v5619_v59, 0.0  ;;  %v5630_v40 = vpop.f32.mrf.mxu0  ;;  %v5887_v56 = vpop.f32.mrf.mxu1  ;;  %v12845_v63 = vmax.f32 %v5617_v37, 0.0  ;;  %v12847_v29 = vmax.f32 %v5874_v38, 0.0  ;;  %v5623_v8 = vadd.f32 %v5622_v1, %v12479_v27 }
 0xac9   :  { %6166 = vadd.xlane.f32.xlu1 %v6165_v9  ;;  %v5880_v11 = vadd.f32 %v5879_v47, %v12479_v27  ;;  %v6173_v44 = vadd.f32 %v12819_v2, %v12815_v7  ;;  %v6323_v10 = vmul.f32 %v12832_v30, %v12832_v30  ;;  %v6453_v59 = vadd.f32 %v6452_v23, %v6315_v12  ;;  %v12856_v37 = vpop.permute.xlu1 %5403  ;;  %v5389_v38 = vpop.permute.xlu0 %5388 }
 0xaca   :  { %15039 = vst [vmem:[#allocation56_spill] sm:$0xff] %v12843_v24  ;;  %15040 = vst [vmem:[#allocation31_spill] sm:$0xff] %v12845_v63  ;;  %v6169_v53 = vadd.f32 %v6168_v25, %v12795_v17  ;;  %v5634_v19 = vpop.f32.mrf.mxu0  ;;  %v5891_v33 = vpop.f32.mrf.mxu1  ;;  %v6461_v35 = vadd.f32 %v6321_v15, %v6320_v50  ;;  %v6325_v1 = vmul.f32 %v12843_v24, %v12843_v24  ;;  %v12860_v9 = vmax.f32 %v5876_v54, 0.0 }
 0xacb   :  { %15041 = vst [vmem:[#allocation29_spill] sm:$0xff] %v12847_v29  ;;  %v5625_v47 = vadd.f32 %v5624_v28, %v12479_v27  ;;  %6454 = vadd.xlane.f32.xlu0 %v6453_v59  ;;  %v12863_v2 = vmax.f32 %v5623_v8, 0.0  ;;  %v5882_v25 = vadd.f32 %v5881_v52, %v12479_v27  ;;  %v6457_v23 = vadd.f32 %v6456_v62, %v6318_v4 }
 0xacc   :  { %15042 = vst [vmem:[#allocation54_spill] sm:$0xff] %v12860_v9  ;;  %v6170_v12 = vadd.f32 %v6169_v53, %v12806_v45  ;;  %v5636_v17 = vpop.f32.mrf.mxu0  ;;  %v5893_v7 = vpop.f32.mrf.mxu1  ;;  %v6324_v15 = vmul.f32 %v12845_v63, %v12845_v63  ;;  %v12871_v50 = vmul.f32 %v12847_v29, %v12847_v29  ;;  %v12873_v54 = vmax.f32 %v5880_v11, 0.0 }
 0xacd   :  { %15043 = vst [vmem:[#allocation51_spill] sm:$0xff] %v12863_v2  ;;  %v5629_v28 = vadd.f32 %v5628_v5, %v5389_v38  ;;  %v12875_v8 = vmax.f32 %v5625_v47, 0.0  ;;  %v6458_v59 = vadd.f32 %v6457_v23, %v6319_v0  ;;  %v5886_v53 = vadd.f32 %v5885_v41, %v5389_v38  ;;  %v5394_v23 = vpop.permute.xlu1 %5393 }
 0xace   :  { %15044 = vst [vmem:[#allocation36_spill] sm:$0xff] %v12873_v54  ;;  %6171 = vadd.xlane.f32.xlu1 %v6170_v12  ;;  %v6174_v27 = vadd.f32 %v6173_v44, %v12817_v49  ;;  %v5640_v52 = vpop.f32.mrf.mxu0  ;;  %v5897_v4 = vpop.f32.mrf.mxu1  ;;  %v6178_v62 = vadd.f32 %v12843_v24, %v12845_v63  ;;  %v6466_v45 = vadd.f32 %v6325_v1, %v6324_v15  ;;  %v12886_v47 = vmax.f32 %v5882_v25, 0.0 }
 0xacf   :  { %15045 = vst [vmem:[#allocation50_spill] sm:$0xff] %v12875_v8  ;;  %v12882_v34 = vmul.f32 %v12860_v9, %v12860_v9  ;;  %v5631_v11 = vadd.f32 %v5630_v40, %v5389_v38  ;;  %v6328_v5 = vmul.f32 %v12863_v2, %v12863_v2  ;;  %6459 = vadd.xlane.f32.xlu0 %v6458_v59  ;;  %v12893_v15 = vmax.f32 %v5629_v28, 0.0 }
 0xad0   :  { %v6175_v41 = vadd.f32 %v6174_v27, %v12832_v30  ;;  %v5888_v0 = vadd.f32 %v5887_v56, %v5389_v38  ;;  %v5642_v44 = vpop.f32.mrf.mxu0  ;;  %v5899_v12 = vpop.f32.mrf.mxu1  ;;  %v12891_v1 = vmul.f32 %v12873_v54, %v12873_v54  ;;  %v6462_v40 = vadd.f32 %v6461_v35, %v6322_v60 }
 0xad1   :  { %15046 = vst [vmem:[#allocation44_spill] sm:$0xff] %v12893_v15  ;;  %v12895_v49 = vmax.f32 %v5631_v11, 0.0  ;;  %v6329_v25 = vmul.f32 %v12875_v8, %v12875_v8  ;;  %v12899_v63 = vmax.f32 %v5886_v53, 0.0  ;;  %v5635_v59 = vadd.f32 %v5634_v19, %v5394_v23 }
 0xad2   :  { %6176 = vadd.xlane.f32.xlu1 %v6175_v41  ;;  %v5892_v56 = vadd.f32 %v5891_v33, %v5394_v23  ;;  %v5646_v38 = vpop.f32.mrf.mxu0  ;;  %v5903_v27 = vpop.f32.mrf.mxu1  ;;  %v12903_v24 = vmax.f32 %v5888_v0, 0.0  ;;  %v6463_v28 = vadd.f32 %v6462_v40, %v6323_v10  ;;  %v5637_v42 = vadd.f32 %v5636_v17, %v5394_v23 }
 0xad3   :  { %15047 = vst [vmem:[#allocation49_spill] sm:$0xff] %v12895_v49  ;;  %15048 = vst [vmem:[#allocation33_spill] sm:$0xff] %v12899_v63  ;;  %v6333_v30 = vmul.f32 %v12895_v49, %v12895_v49  ;;  %v6183_v35 = vadd.f32 %v12875_v8, %v12863_v2  ;;  %v12909_v60 = vmul.f32 %v12886_v47, %v12886_v47  ;;  %v12911_v53 = vmax.f32 %v5635_v59, 0.0 }
 0xad4   :  { %15049 = vst [vmem:[#allocation48_spill] sm:$0xff] %v12903_v24  ;;  %v5894_v19 = vadd.f32 %v5893_v7, %v5394_v23  ;;  %v5648_v33 = vpop.f32.mrf.mxu0  ;;  %v5905_v11 = vpop.f32.mrf.mxu1  ;;  %v6332_v41 = vmul.f32 %v12893_v15, %v12893_v15  ;;  %6464 = vadd.xlane.f32.xlu0 %v6463_v28  ;;  %v12915_v0 = vmax.f32 %v5892_v56, 0.0  ;;  %v12917_v10 = vmax.f32 %v5637_v42, 0.0 }
 0xad5   :  { %15050 = vst [vmem:[#allocation46_spill] sm:$0xff] %v12911_v53  ;;  %v6179_v17 = vadd.f32 %v6178_v62, %v12847_v29  ;;  %v6471_v40 = vadd.f32 %v6329_v25, %v6328_v5  ;;  %v6334_v8 = vmul.f32 %v12899_v63, %v12899_v63  ;;  %v6188_v59 = vadd.f32 %v12895_v49, %v12893_v15 }
 0xad6   :  { %15051 = vst [vmem:[#allocation41_spill] sm:$0xff] %v12915_v0  ;;  %15052 = vst [vmem:[#allocation45_spill] sm:$0xff] %v12917_v10  ;;  %v5641_v7 = vadd.f32 %v5640_v52, %v12823_v58  ;;  %v5652_v23 = vpop.f32.mrf.mxu0  ;;  %v5909_v2 = vpop.f32.mrf.mxu1  ;;  %v6476_v3 = vadd.f32 %v6333_v30, %v6332_v41  ;;  %v6335_v56 = vmul.f32 %v12903_v24, %v12903_v24  ;;  %v12931_v5 = vmax.f32 %v5894_v19, 0.0 }
 0xad7   :  { %v6180_v42 = vadd.f32 %v6179_v17, %v12860_v9  ;;  %v5898_v28 = vadd.f32 %v5897_v4, %v12823_v58  ;;  %v6336_v62 = vmul.f32 %v12911_v53, %v12911_v53  ;;  %v6184_v25 = vadd.f32 %v6183_v35, %v12873_v54 }
 0xad8   :  { %15053 = vst [vmem:[#allocation47_spill] sm:$0xff] %v12931_v5  ;;  %v5643_v15 = vadd.f32 %v5642_v44, %v12823_v58  ;;  %v5654_v52 = vpop.f32.mrf.mxu0  ;;  %v5911_v49 = vpop.f32.mrf.mxu1  ;;  %v6338_v30 = vmul.f32 %v12915_v0, %v12915_v0  ;;  %v6337_v41 = vmul.f32 %v12917_v10, %v12917_v10  ;;  %v5900_v4 = vadd.f32 %v5899_v12, %v12823_v58 }
 0xad9   :  { %6181 = vadd.xlane.f32.xlu0 %v6180_v42  ;;  %v6467_v17 = vadd.f32 %v6466_v45, %v12871_v50  ;;  %v12941_v29 = vmax.f32 %v5641_v7, 0.0  ;;  %v6185_v19 = vadd.f32 %v6184_v25, %v12886_v47  ;;  %v5647_v44 = vadd.f32 %v5646_v38, %v12856_v37 }
 0xada   :  { %v12944_v35 = vmax.f32 %v5643_v15, 0.0  ;;  %v5658_v9 = vpop.f32.mrf.mxu0  ;;  %v5915_v54 = vpop.f32.mrf.mxu1  ;;  %v12947_v31 = vmax.f32 %v5898_v28, 0.0  ;;  %v5904_v42 = vadd.f32 %v5903_v27, %v12856_v37  ;;  %v6189_v58 = vadd.f32 %v6188_v59, %v12899_v63 }
 0xadb   :  { %15054 = vst [vmem:[#allocation39_spill] sm:$0xff] %v12941_v29  ;;  %v6468_v48 = vadd.f32 %v6467_v17, %v12882_v34  ;;  %v6193_v45 = vadd.f32 %v12917_v10, %v12911_v53  ;;  %v6339_v50 = vmul.f32 %v12931_v5, %v12931_v5  ;;  %6186 = vadd.xlane.f32.xlu1 %v6185_v19  ;;  %v12956_v12 = vmax.f32 %v5900_v4, 0.0 }
 0xadc   :  { %15055 = vst [vmem:[#allocation35_spill] sm:$0xff] %v12944_v35  ;;  %15056 = vst [vmem:[#allocation42_spill] sm:$0xff] %v12947_v31  ;;  %v5649_v15 = vadd.f32 %v5648_v33, %v12856_v37  ;;  %v5660_v38 = vpop.f32.mrf.mxu0  ;;  %v5917_v7 = vpop.f32.mrf.mxu1  ;;  %v6341_v34 = vmul.f32 %v12944_v35, %v12944_v35  ;;  %v12961_v27 = vmax.f32 %v5647_v44, 0.0  ;;  %v6190_v59 = vadd.f32 %v6189_v58, %v12903_v24 }
 0xadd   :  { %15057 = vst [vmem:[#allocation43_spill] sm:$0xff] %v12956_v12  ;;  %6469 = vadd.xlane.f32.xlu0 %v6468_v48  ;;  %v5906_v28 = vadd.f32 %v5905_v11, %v12856_v37  ;;  %v6481_v25 = vadd.f32 %v6337_v41, %v6336_v62  ;;  %v6340_v17 = vmul.f32 %v12941_v29, %v12941_v29  ;;  %v12967_v4 = vmax.f32 %v5904_v42, 0.0 }
 0xade   :  { %15058 = vst [vmem:[#allocation38_spill] sm:$0xff] %v12961_v27  ;;  %v6472_v33 = vadd.f32 %v6471_v40, %v12891_v1  ;;  %v5664_v19 = vpop.f32.mrf.mxu0  ;;  %v5921_v63 = vpop.f32.mrf.mxu1  ;;  %v6342_v10 = vmul.f32 %v12947_v31, %v12947_v31  ;;  %v6198_v48 = vadd.f32 %v12944_v35, %v12941_v29  ;;  %v12974_v44 = vmax.f32 %v5649_v15, 0.0 }
 0xadf   :  { %15059 = vst [vmem:[#allocation28_spill] sm:$0xff] %v12967_v4  ;;  %v5653_v37 = vadd.f32 %v5652_v23, %v12787_v16  ;;  %v6343_v11 = vmul.f32 %v12956_v12, %v12956_v12  ;;  %6191 = vadd.xlane.f32.xlu1 %v6190_v59  ;;  %v5910_v1 = vadd.f32 %v5909_v2, %v12787_v16  ;;  %v12983_v53 = vmax.f32 %v5906_v28, 0.0 }
 0xae0   :  { %15060 = vst [vmem:[#allocation37_spill] sm:$0xff] %v12974_v44  ;;  %v6473_v62 = vadd.f32 %v6472_v33, %v12909_v60  ;;  %v6477_v40 = vadd.f32 %v6476_v3, %v6334_v8  ;;  %v5666_v41 = vpop.f32.mrf.mxu0  ;;  %v5923_v42 = vpop.f32.mrf.mxu1  ;;  %v6486_v58 = vadd.f32 %v6341_v34, %v6340_v17  ;;  %v6344_v24 = vmul.f32 %v12961_v27, %v12961_v27 }
 0xae1   :  { %15061 = vst [vmem:[#allocation20_spill] sm:$0xff] %v12983_v53  ;;  %v5655_v15 = vadd.f32 %v5654_v52, %v12787_v16  ;;  %v6346_v23 = vmul.f32 %v12967_v4, %v12967_v4  ;;  %v5912_v60 = vadd.f32 %v5911_v49, %v12787_v16  ;;  %v6482_v33 = vadd.f32 %v6481_v25, %v6338_v30 }
 0xae2   :  { %6474 = vadd.xlane.f32.xlu0 %v6473_v62  ;;  %v6478_v59 = vadd.f32 %v6477_v40, %v6335_v56  ;;  %v5670_v2 = vpop.f32.mrf.mxu0  ;;  %v5927_v3 = vpop.f32.mrf.mxu1  ;;  %v6345_v8 = vmul.f32 %v12974_v44, %v12974_v44  ;;  %v12991_v34 = vmax.f32 %v5653_v37, 0.0  ;;  %v5659_v28 = vadd.f32 %v5658_v9, %v12821_v57 }
 0xae3   :  { %v12993_v17 = vmax.f32 %v5655_v15, 0.0  ;;  %v12996_v52 = vmax.f32 %v5910_v1, 0.0  ;;  %v6483_v35 = vadd.f32 %v6482_v33, %v6339_v50  ;;  %v5916_v56 = vadd.f32 %v5915_v54, %v12821_v57 }
 0xae4   :  { %15062 = vst [vmem:[#allocation40_spill] sm:$0xff] %v12991_v34  ;;  %6479 = vadd.xlane.f32.xlu1 %v6478_v59  ;;  %v6194_v16 = vadd.f32 %v6193_v45, %v12915_v0  ;;  %v5672_v49 = vpop.f32.mrf.mxu0  ;;  %v5929_v30 = vpop.f32.mrf.mxu1  ;;  %v6203_v25 = vadd.f32 %v12974_v44, %v12961_v27  ;;  %v6347_v37 = vmul.f32 %v12983_v53, %v12983_v53  ;;  %v13004_v62 = vmax.f32 %v5912_v60, 0.0 }
 0xae5   :  { %15063 = vst [vmem:[#allocation30_spill] sm:$0xff] %v12993_v17  ;;  %15064 = vst [vmem:[#allocation34_spill] sm:$0xff] %v12996_v52  ;;  %v5661_v9 = vadd.f32 %v5660_v38, %v12821_v57  ;;  %v6349_v1 = vmul.f32 %v12993_v17, %v12993_v17  ;;  %v13009_v50 = vmax.f32 %v5659_v28, 0.0  ;;  %v5918_v45 = vadd.f32 %v5917_v7, %v12821_v57 }
 0xae6   :  { %15065 = vst [vmem:[#allocation32_spill] sm:$0xff] %v13004_v62  ;;  %6484 = vadd.xlane.f32.xlu0 %v6483_v35  ;;  %v6195_v54 = vadd.f32 %v6194_v16, %v12931_v5  ;;  %v5676_v40 = vpop.f32.mrf.mxu0  ;;  %v5933_v15 = vpop.f32.mrf.mxu1  ;;  %v6491_v59 = vadd.f32 %v6345_v8, %v6344_v24  ;;  %v6348_v33 = vmul.f32 %v12991_v34, %v12991_v34  ;;  %v13015_v60 = vmax.f32 %v5916_v56, 0.0 }
 0xae7   :  { %15066 = vst [vmem:[#allocation21_spill] sm:$0xff] %v13009_v50  ;;  %v6487_v0 = vadd.f32 %v6486_v58, %v6342_v10  ;;  %v6350_v38 = vmul.f32 %v12996_v52, %v12996_v52  ;;  %v6208_v35 = vadd.f32 %v12993_v17, %v12991_v34  ;;  %v13021_v28 = vmax.f32 %v5661_v9, 0.0 }
 0xae8   :  { %15067 = vst [vmem:[#allocation15_spill] sm:$0xff] %v13015_v60  ;;  %6196 = vadd.xlane.f32.xlu1 %v6195_v54  ;;  %v5665_v57 = vadd.f32 %v5664_v19, %v12748_v32  ;;  %v5678_v7 = vpop.f32.mrf.mxu0  ;;  %v5935_v16 = vpop.f32.mrf.mxu1  ;;  %v6351_v24 = vmul.f32 %v13004_v62, %v13004_v62  ;;  %v5922_v56 = vadd.f32 %v5921_v63, %v12748_v32  ;;  %v13030_v29 = vmax.f32 %v5918_v45, 0.0 }
 0xae9   :  { %15068 = vst [vmem:[#allocation24_spill] sm:$0xff] %v13021_v28  ;;  %v6488_v8 = vadd.f32 %v6487_v0, %v6343_v11  ;;  %v6199_v10 = vadd.f32 %v6198_v48, %v12947_v31  ;;  %v6496_v58 = vadd.f32 %v6349_v1, %v6348_v33  ;;  %v6352_v5 = vmul.f32 %v13009_v50, %v13009_v50 }
 0xaea   :  { %15069 = vst [vmem:[#allocation18_spill] sm:$0xff] %v13030_v29  ;;  %v5667_v9 = vadd.f32 %v5666_v41, %v12748_v32  ;;  %v5682_v54 = vpop.f32.mrf.mxu0  ;;  %v13033_v19 = vpop.f32.mrf.mxu1  ;;  %v6354_v44 = vmul.f32 %v13015_v60, %v13015_v60  ;;  %v5924_v63 = vadd.f32 %v5923_v42, %v12748_v32  ;;  %v6492_v48 = vadd.f32 %v6491_v59, %v6346_v23 }
 0xaeb   :  { %6489 = vadd.xlane.f32.xlu0 %v6488_v8  ;;  %v6200_v0 = vadd.f32 %v6199_v10, %v12956_v12  ;;  %v6353_v11 = vmul.f32 %v13021_v28, %v13021_v28  ;;  %v13041_v1 = vmax.f32 %v5665_v57, 0.0  ;;  %v5671_v41 = vadd.f32 %v5670_v2, %v12785_v46 }
 0xaec   :  { %v13043_v45 = vmax.f32 %v5667_v9, 0.0  ;;  %v5684_v33 = vpop.f32.mrf.mxu0  ;;  %v13046_v31 = vpop.f32.mrf.mxu1  ;;  %v13048_v27 = vmax.f32 %v5922_v56, 0.0  ;;  %v6493_v8 = vadd.f32 %v6492_v48, %v6347_v37  ;;  %v5928_v10 = vadd.f32 %v5927_v3, %v12785_v46 }
 0xaed   :  { %15070 = vst [vmem:[#allocation26_spill] sm:$0xff] %v13041_v1  ;;  %6201 = vadd.xlane.f32.xlu1 %v6200_v0  ;;  %v6204_v32 = vadd.f32 %v6203_v25, %v12967_v4  ;;  %v6213_v42 = vadd.f32 %v13021_v28, %v13009_v50  ;;  %v6355_v23 = vmul.f32 %v13030_v29, %v13030_v29  ;;  %v13056_v59 = vmax.f32 %v5924_v63, 0.0 }
 0xaee   :  { %15071 = vst [vmem:[#allocation13_spill] sm:$0xff] %v13043_v45  ;;  %15072 = vst [vmem:[#allocation128_spill] sm:$0xff] %v13048_v27  ;;  %v5673_v2 = vadd.f32 %v5672_v49, %v12785_v46  ;;  %v13059_v57 = vpop.f32.mrf.mxu0  ;;  %v13061_v56 = vpop.f32.mrf.mxu1  ;;  %v6357_v37 = vmul.f32 %v13043_v45, %v13043_v45  ;;  %v13065_v3 = vmax.f32 %v5671_v41, 0.0  ;;  %v5930_v9 = vadd.f32 %v5929_v30, %v12785_v46 }
 0xaef   :  { %15073 = vst [vmem:[#allocation126_spill] sm:$0xff] %v13056_v59  ;;  %6494 = vadd.xlane.f32.xlu0 %v6493_v8  ;;  %v6205_v25 = vadd.f32 %v6204_v32, %v12983_v53  ;;  %v6501_v0 = vadd.f32 %v6353_v11, %v6352_v5  ;;  %v6356_v63 = vmul.f32 %v13041_v1, %v13041_v1  ;;  %v13071_v48 = vmax.f32 %v5928_v10, 0.0 }
 0xaf0   :  { %15074 = vst [vmem:[#allocation8_spill] sm:$0xff] %v13065_v3  ;;  %v6497_v49 = vadd.f32 %v6496_v58, %v6350_v38  ;;  %v13073_v12 = vpop.f32.mrf.mxu0  ;;  %v13075_v4 = vpop.f32.mrf.mxu1  ;;  %v6358_v8 = vmul.f32 %v13048_v27, %v13048_v27  ;;  %v6218_v41 = vadd.f32 %v13043_v45, %v13041_v1  ;;  %v13081_v32 = vmax.f32 %v5673_v2, 0.0 }
 0xaf1   :  { %15075 = vst [vmem:[#allocation5_spill] sm:$0xff] %v13071_v48  ;;  %6206 = vadd.xlane.f32.xlu1 %v6205_v25  ;;  %v5677_v46 = vadd.f32 %v5676_v40, %v12714_v22  ;;  %v6359_v5 = vmul.f32 %v13056_v59, %v13056_v59  ;;  %v5934_v38 = vadd.f32 %v5933_v15, %v12714_v22  ;;  %v13094_v2 = vmax.f32 %v5930_v9, 0.0 }
 0xaf2   :  { %15076 = vst [vmem:[#allocation3_spill] sm:$0xff] %v13081_v32  ;;  %v6498_v30 = vadd.f32 %v6497_v49, %v6351_v24  ;;  %v6209_v58 = vadd.f32 %v6208_v35, %v12996_v52  ;;  %v13088_v11 = vpop.f32.mrf.mxu0  ;;  %v13090_v10 = vpop.f32.mrf.mxu1  ;;  %v6506_v53 = vadd.f32 %v6357_v37, %v6356_v63  ;;  %v6360_v25 = vmul.f32 %v13065_v3, %v13065_v3 }
 0xaf3   :  { %15077 = vst [vmem:[#allocation124_spill] sm:$0xff] %v13094_v2  ;;  %v5679_v40 = vadd.f32 %v5678_v7, %v12714_v22  ;;  %v6362_v17 = vmul.f32 %v13071_v48, %v13071_v48  ;;  %v5936_v35 = vadd.f32 %v5935_v16, %v12714_v22  ;;  %v6502_v24 = vadd.f32 %v6501_v0, %v6354_v44 }
 0xaf4   :  { %6499 = vadd.xlane.f32.xlu0 %v6498_v30  ;;  %v6210_v15 = vadd.f32 %v6209_v58, %v13004_v62  ;;  %v5696_v49 = vpop.f32.mrf.mxu0  ;;  %v13101_v52 = vpop.f32.mrf.mxu1  ;;  %v6361_v37 = vmul.f32 %v13081_v32, %v13081_v32  ;;  %v13105_v63 = vmax.f32 %v5677_v46, 0.0  ;;  %v5683_v7 = vadd.f32 %v5682_v54, %v12746_v55 }
 0xaf5   :  { %v13107_v9 = vmax.f32 %v5679_v40, 0.0  ;;  %v13110_v34 = vmax.f32 %v5934_v38, 0.0  ;;  %v6503_v30 = vadd.f32 %v6502_v24, %v6355_v23  ;;  %v5940_v22 = vadd.f32 %v13033_v19, %v12746_v55 }
 0xaf6   :  { %15078 = vst [vmem:[#allocation4_spill] sm:$0xff] %v13105_v63  ;;  %6211 = vadd.xlane.f32.xlu1 %v6210_v15  ;;  %v6214_v44 = vadd.f32 %v6213_v42, %v13015_v60  ;;  %v13115_v16 = vpop.f32.mrf.mxu0  ;;  %v13117_v0 = vpop.f32.mrf.mxu1  ;;  %v6223_v46 = vadd.f32 %v13081_v32, %v13065_v3  ;;  %v6363_v58 = vmul.f32 %v13094_v2, %v13094_v2  ;;  %v13123_v54 = vmax.f32 %v5936_v35, 0.0  ;;  %v15155_v3 = vld [vmem:[#allocation50_spill] sm:$0xff] }
 0xaf7   :  { %15079 = vst [vmem:[#allocation12_spill] sm:$0xff] %v13107_v9  ;;  %15080 = vst [vmem:[#allocation7_spill] sm:$0xff] %v13110_v34  ;;  %v5685_v38 = vadd.f32 %v5684_v33, %v12746_v55  ;;  %v6365_v23 = vmul.f32 %v13107_v9, %v13107_v9  ;;  %v13128_v19 = vmax.f32 %v5683_v7, 0.0  ;;  %v5942_v40 = vadd.f32 %v13046_v31, %v12746_v55 }
 0xaf8   :  { %15081 = vst [vmem:[#allocation10_spill] sm:$0xff] %v13123_v54  ;;  %6504 = vadd.xlane.f32.xlu0 %v6503_v30  ;;  %v6215_v42 = vadd.f32 %v6214_v44, %v13030_v29  ;;  %v13133_v15 = vpop.f32.mrf.mxu0  ;;  %v6511_v24 = vadd.f32 %v6361_v37, %v6360_v25  ;;  %v6364_v35 = vmul.f32 %v13105_v63, %v13105_v63  ;;  %v13141_v30 = vmax.f32 %v5940_v22, 0.0  ;;  %v5959_v55 = vpop.f32.mrf.mxu1 }
 0xaf9   :  { %15082 = vst [vmem:[#allocation2_spill] sm:$0xff] %v13128_v19  ;;  %v13137_v62 = vmax.f32 %v5685_v38, 0.0  ;;  %v6507_v33 = vadd.f32 %v6506_v53, %v6358_v8  ;;  %v6366_v60 = vmul.f32 %v13110_v34, %v13110_v34  ;;  %v5689_v7 = vadd.f32 %v13059_v57, %v12677_v26 }
 0xafa   :  { %15084 = vst [vmem:[#allocation129_spill] sm:$0xff] %v13141_v30  ;;  %6216 = vadd.xlane.f32.xlu1 %v6215_v42  ;;  %v5946_v31 = vadd.f32 %v13061_v56, %v12677_v26  ;;  %v6228_v25 = vadd.f32 %v13107_v9, %v13105_v63  ;;  %v6367_v37 = vmul.f32 %v13123_v54, %v13123_v54  ;;  %v5706_v44 = vpop.f32.mrf.mxu0  ;;  %v13154_v42 = vmax.f32 %v5942_v40, 0.0  ;;  %v15151_v9 = vld [vmem:[#allocation23_spill] sm:$0xff] }
 0xafb   :  { %15083 = vst [vmem:[#allocation125_spill] sm:$0xff] %v13137_v62  ;;  %v6508_v53 = vadd.f32 %v6507_v33, %v6359_v5  ;;  %v6219_v8 = vadd.f32 %v6218_v41, %v13048_v27  ;;  %v6516_v22 = vadd.f32 %v6365_v23, %v6364_v35  ;;  %v6368_v38 = vmul.f32 %v13128_v19, %v13128_v19  ;;  %v15152_v63 = vld [vmem:[#allocation55_spill] sm:$0xff] }
 0xafc   :  { %15085 = vst [vmem:[#allocation127_spill] sm:$0xff] %v13154_v42  ;;  %v5691_v57 = vadd.f32 %v13073_v12, %v12677_v26  ;;  %v6369_v56 = vmul.f32 %v13137_v62, %v13137_v62  ;;  %v5948_v5 = vadd.f32 %v13075_v4, %v12677_v26  ;;  %v6512_v41 = vadd.f32 %v6511_v24, %v6362_v17  ;;  %v5963_v12 = vpop.f32.mrf.mxu1  ;;  %v5708_v4 = vpop.f32.mrf.mxu0 }
 0xafd   :  { %6509 = vadd.xlane.f32.xlu0 %v6508_v53  ;;  %v6220_v29 = vadd.f32 %v6219_v8, %v13056_v59  ;;  %v6370_v23 = vmul.f32 %v13141_v30, %v13141_v30  ;;  %v13165_v35 = vmax.f32 %v5689_v7, 0.0  ;;  %v13167_v40 = vmax.f32 %v5946_v31, 0.0 }
 0xafe   :  { %v13169_v33 = vmax.f32 %v5691_v57, 0.0  ;;  %v6513_v28 = vadd.f32 %v6512_v41, %v6363_v58  ;;  %v5695_v53 = vadd.f32 %v13088_v11, %v12712_v39  ;;  %v5952_v8 = vadd.f32 %v13090_v10, %v12712_v39 }
 0xaff   :  { %15086 = vst [vmem:[#allocation90_spill] sm:$0xff] %v13165_v35  ;;  %15087 = vst [vmem:[#allocation91_spill] sm:$0xff] %v13167_v40  ;;  %6221 = vadd.xlane.f32.xlu1 %v6220_v29  ;;  %v6224_v26 = vadd.f32 %v6223_v46, %v13071_v48  ;;  %v6233_v17 = vadd.f32 %v13137_v62, %v13128_v19  ;;  %v6371_v24 = vmul.f32 %v13154_v42, %v13154_v42 }
 0xb00   :  { %15088 = vst [vmem:[#allocation88_spill] sm:$0xff] %v13169_v33  ;;  %v13180_v7 = vmax.f32 %v5948_v5, 0.0  ;;  %v5697_v29 = vadd.f32 %v5696_v49, %v12712_v39  ;;  %v6521_v58 = vadd.f32 %v6369_v56, %v6368_v38  ;;  %v6373_v11 = vmul.f32 %v13169_v33, %v13169_v33  ;;  %v5965_v49 = vpop.f32.mrf.mxu1 }
 0xb01   :  { %6514 = vadd.xlane.f32.xlu0 %v6513_v28  ;;  %v6225_v10 = vadd.f32 %v6224_v26, %v13094_v2  ;;  %v5954_v46 = vadd.f32 %v13101_v52, %v12712_v39  ;;  %v6372_v31 = vmul.f32 %v13165_v35, %v13165_v35  ;;  %v6374_v57 = vmul.f32 %v13167_v40, %v13167_v40  ;;  %v5712_v52 = vpop.f32.mrf.mxu0  ;;  %v15153_v2 = vld [vmem:[#allocation27_spill] sm:$0xff] }
 0xb02   :  { %15089 = vst [vmem:[#allocation92_spill] sm:$0xff] %v13180_v7  ;;  %v13192_v5 = vmax.f32 %v5697_v29, 0.0  ;;  %v6517_v41 = vadd.f32 %v6516_v22, %v6366_v60  ;;  %v6238_v38 = vadd.f32 %v13169_v33, %v13165_v35  ;;  %v13196_v56 = vmax.f32 %v5695_v53, 0.0 }
 0xb03   :  { %v13198_v28 = vmax.f32 %v5952_v8, 0.0  ;;  %6226 = vadd.xlane.f32.xlu1 %v6225_v10  ;;  %v5701_v39 = vadd.f32 %v13115_v16, %v12642_v61  ;;  %v6375_v26 = vmul.f32 %v13180_v7, %v13180_v7  ;;  %v5958_v60 = vadd.f32 %v13117_v0, %v12642_v61  ;;  %v5969_v0 = vpop.f32.mrf.mxu1 }
 0xb04   :  { %15090 = vst [vmem:[#allocation93_spill] sm:$0xff] %v13192_v5  ;;  %15091 = vst [vmem:[#allocation105_spill] sm:$0xff] %v13196_v56  ;;  %v6518_v50 = vadd.f32 %v6517_v41, %v6367_v37  ;;  %v6229_v22 = vadd.f32 %v6228_v25, %v13110_v34  ;;  %v6526_v29 = vadd.f32 %v6373_v11, %v6372_v31  ;;  %v13209_v8 = vmax.f32 %v5954_v46, 0.0 }
 0xb05   :  { %15092 = vst [vmem:[#allocation89_spill] sm:$0xff] %v13198_v28  ;;  %v6377_v53 = vmul.f32 %v13192_v5, %v13192_v5  ;;  %v5703_v10 = vadd.f32 %v13133_v15, %v12642_v61  ;;  %v13213_v16 = vmax.f32 %v5701_v39, 0.0  ;;  %v5960_v37 = vadd.f32 %v5959_v55, %v12642_v61  ;;  %v5714_v15 = vpop.f32.mrf.mxu0 }
 0xb06   :  { %15093 = vst [vmem:[#allocation98_spill] sm:$0xff] %v13209_v8  ;;  %6519 = vadd.xlane.f32.xlu0 %v6518_v50  ;;  %v6230_v59 = vadd.f32 %v6229_v22, %v13123_v54  ;;  %v6522_v41 = vadd.f32 %v6521_v58, %v6370_v23  ;;  %v6376_v25 = vmul.f32 %v13196_v56, %v13196_v56  ;;  %v13226_v39 = vmax.f32 %v5958_v60, 0.0 }
 0xb07   :  { %15094 = vst [vmem:[#allocation100_spill] sm:$0xff] %v13213_v16  ;;  %v6378_v11 = vmul.f32 %v13198_v28, %v13198_v28  ;;  %v13221_v46 = vmax.f32 %v5703_v10, 0.0  ;;  %v5707_v31 = vadd.f32 %v5706_v44, %v12675_v51  ;;  %v6243_v50 = vadd.f32 %v13192_v5, %v13196_v56 }
 0xb08   :  { %15096 = vst [vmem:[#allocation96_spill] sm:$0xff] %v13226_v39  ;;  %6231 = vadd.xlane.f32.xlu1 %v6230_v59  ;;  %v6523_v61 = vadd.f32 %v6522_v41, %v6371_v24  ;;  %v6234_v55 = vadd.f32 %v6233_v17, %v13141_v30  ;;  %v6531_v23 = vadd.f32 %v6377_v53, %v6376_v25  ;;  %v13231_v22 = vmax.f32 %v5960_v37, 0.0  ;;  %v5971_v24 = vpop.f32.mrf.mxu1 }
 0xb09   :  { %15095 = vst [vmem:[#allocation99_spill] sm:$0xff] %v13221_v46  ;;  %v6379_v58 = vmul.f32 %v13209_v8, %v13209_v8  ;;  %v5709_v10 = vadd.f32 %v5708_v4, %v12675_v51  ;;  %v6380_v44 = vmul.f32 %v13213_v16, %v13213_v16  ;;  %v13236_v27 = vmax.f32 %v5707_v31, 0.0  ;;  %v5718_v4 = vpop.f32.mrf.mxu0 }
 0xb0a   :  { %15097 = vst [vmem:[#allocation104_spill] sm:$0xff] %v13231_v22  ;;  %6524 = vadd.xlane.f32.xlu0 %v6523_v61  ;;  %v5964_v60 = vadd.f32 %v5963_v12, %v12675_v51  ;;  %v6235_v59 = vadd.f32 %v6234_v55, %v13154_v42  ;;  %v6381_v17 = vmul.f32 %v13221_v46, %v13221_v46 }
 0xb0b   :  { %15098 = vst [vmem:[#allocation97_spill] sm:$0xff] %v13236_v27  ;;  %v13242_v53 = vmax.f32 %v5709_v10, 0.0  ;;  %v5966_v37 = vadd.f32 %v5965_v49, %v12675_v51  ;;  %v6527_v41 = vadd.f32 %v6526_v29, %v6374_v57  ;;  %v6382_v25 = vmul.f32 %v13226_v39, %v13226_v39 }
 0xb0c   :  { %v6248_v31 = vadd.f32 %v13221_v46, %v13213_v16  ;;  %6236 = vadd.xlane.f32.xlu1 %v6235_v59  ;;  %v5713_v12 = vadd.f32 %v5712_v52, %v12606_v6  ;;  %v5970_v61 = vadd.f32 %v5969_v0, %v12606_v6  ;;  %v6383_v55 = vmul.f32 %v13231_v22, %v13231_v22  ;;  %v5975_v59 = vpop.f32.mrf.mxu1 }
 0xb0d   :  { %15099 = vst [vmem:[#allocation95_spill] sm:$0xff] %v13242_v53  ;;  %v6385_v10 = vmul.f32 %v13242_v53, %v13242_v53  ;;  %v6528_v51 = vadd.f32 %v6527_v41, %v6375_v26  ;;  %v6239_v57 = vadd.f32 %v6238_v38, %v13167_v40  ;;  %v6384_v49 = vmul.f32 %v13236_v27, %v13236_v27  ;;  %v5720_v26 = vpop.f32.mrf.mxu0 }
 0xb0e   :  { %v13258_v29 = vmax.f32 %v5964_v60, 0.0  ;;  %v13260_v45 = vmax.f32 %v5713_v12, 0.0  ;;  %v5715_v52 = vadd.f32 %v5714_v15, %v12606_v6  ;;  %v6536_v0 = vadd.f32 %v6381_v17, %v6380_v44 }
 0xb0f   :  { %v13263_v1 = vmax.f32 %v5966_v37, 0.0  ;;  %6529 = vadd.xlane.f32.xlu0 %v6528_v51  ;;  %v6240_v5 = vadd.f32 %v6239_v57, %v13180_v7  ;;  %v6532_v46 = vadd.f32 %v6531_v23, %v6378_v11  ;;  %v6541_v41 = vadd.f32 %v6385_v10, %v6384_v49 }
 0xb10   :  { %15100 = vst [vmem:[#allocation94_spill] sm:$0xff] %v13258_v29  ;;  %15101 = vst [vmem:[#allocation102_spill] sm:$0xff] %v13260_v45  ;;  %v13266_v38 = vmax.f32 %v5970_v61, 0.0  ;;  %v13268_v16 = vmax.f32 %v5715_v52, 0.0  ;;  %v5719_v60 = vadd.f32 %v5718_v4, %v12640_v43  ;;  %v5972_v12 = vadd.f32 %v5971_v24, %v12606_v6 }
 0xb11   :  { %15102 = vst [vmem:[#allocation108_spill] sm:$0xff] %v13263_v1  ;;  %6241 = vadd.xlane.f32.xlu1 %v6240_v5  ;;  %v6533_v15 = vadd.f32 %v6532_v46, %v6379_v58  ;;  %v5976_v44 = vadd.f32 %v5975_v59, %v12640_v43  ;;  %v6244_v17 = vadd.f32 %v6243_v50, %v13198_v28  ;;  %v5977_v58 = vpop.f32.mrf.mxu1 }
 0xb12   :  { %15103 = vst [vmem:[#allocation113_spill] sm:$0xff] %v13266_v38  ;;  %15104 = vst [vmem:[#allocation110_spill] sm:$0xff] %v13268_v16  ;;  %v6388_v37 = vmul.f32 %v13260_v45, %v13260_v45  ;;  %v6389_v11 = vmul.f32 %v13268_v16, %v13268_v16  ;;  %v13278_v23 = vmax.f32 %v5719_v60, 0.0  ;;  %v5721_v61 = vadd.f32 %v5720_v26, %v12640_v43 }
 0xb13   :  { %v6386_v5 = vmul.f32 %v13258_v29, %v13258_v29  ;;  %v6253_v6 = vadd.f32 %v13242_v53, %v13236_v27  ;;  %v6387_v46 = vmul.f32 %v13263_v1, %v13263_v1  ;;  %6534 = vadd.xlane.f32.xlu0 %v6533_v15  ;;  %v6245_v50 = vadd.f32 %v6244_v17, %v13209_v8 }
 0xb14   :  { %15105 = vst [vmem:[#allocation121_spill] sm:$0xff] %v13278_v23  ;;  %v6390_v24 = vmul.f32 %v13266_v38, %v13266_v38  ;;  %v6546_v4 = vadd.f32 %v6389_v11, %v6388_v37  ;;  %v13290_v10 = vmax.f32 %v5721_v61, 0.0  ;;  %v6537_v51 = vadd.f32 %v6536_v0, %v6382_v25 }
 0xb15   :  { %v13292_v57 = vmax.f32 %v5972_v12, 0.0  ;;  %v13294_v49 = vmax.f32 %v5976_v44, 0.0  ;;  %6246 = vadd.xlane.f32.xlu1 %v6245_v50  ;;  %v6249_v52 = vadd.f32 %v6248_v31, %v13226_v39  ;;  %v6542_v59 = vadd.f32 %v6541_v41, %v6386_v5 }
 0xb16   :  { %15106 = vst [vmem:[#allocation123_spill] sm:$0xff] %v13290_v10  ;;  %v6392_v26 = vmul.f32 %v13278_v23, %v13278_v23  ;;  %v6393_v60 = vmul.f32 %v13290_v10, %v13290_v10  ;;  %v5978_v15 = vadd.f32 %v5977_v58, %v12640_v43  ;;  %v6538_v17 = vadd.f32 %v6537_v51, %v6383_v55 }
 0xb17   :  { %15107 = vst [vmem:[#allocation118_spill] sm:$0xff] %v13292_v57  ;;  %15108 = vst [vmem:[#allocation122_spill] sm:$0xff] %v13294_v49  ;;  %v6258_v25 = vadd.f32 %v13268_v16, %v13260_v45  ;;  %v6250_v0 = vadd.f32 %v6249_v52, %v13231_v22  ;;  %v6254_v12 = vadd.f32 %v6253_v6, %v13258_v29 }
 0xb18   :  { %v6551_v44 = vadd.f32 %v6393_v60, %v6392_v26  ;;  %6539 = vadd.xlane.f32.xlu0 %v6538_v17  ;;  %v6543_v31 = vadd.f32 %v6542_v59, %v6387_v46  ;;  %v6547_v41 = vadd.f32 %v6546_v4, %v6390_v24  ;;  %v6391_v37 = vmul.f32 %v13292_v57, %v13292_v57 }
 0xb19   :  { %6251 = vadd.xlane.f32.xlu1 %v6250_v0  ;;  %v6394_v11 = vmul.f32 %v13294_v49, %v13294_v49  ;;  %v13310_v43 = vmax.f32 %v5978_v15, 0.0  ;;  %v6263_v55 = vadd.f32 %v13290_v10, %v13278_v23  ;;  %v6255_v61 = vadd.f32 %v6254_v12, %v13263_v1  ;;  %v15145_v23 = vld [vmem:[#allocation70_spill] sm:$0xff] }
 0xb1a   :  { %v6259_v5 = vadd.f32 %v6258_v25, %v13266_v38  ;;  %v6548_v6 = vadd.f32 %v6547_v41, %v6391_v37 }
 0xb1b   :  { %15109 = vst [vmem:[#allocation120_spill] sm:$0xff] %v13310_v43  ;;  %v6552_v46 = vadd.f32 %v6551_v44, %v6394_v11  ;;  %v6395_v58 = vmul.f32 %v13310_v43, %v13310_v43  ;;  %v6264_v51 = vadd.f32 %v6263_v55, %v13294_v49 }
 0xb1c   :  { %6544 = vadd.xlane.f32.xlu0 %v6543_v31  ;;  %v6260_v4 = vadd.f32 %v6259_v5, %v13292_v57 }
 0xb1d   :  { %6256 = vadd.xlane.f32.xlu1 %v6255_v61  ;;  %v6112_v50 = vpop.xlane.xlu1 %6111  ;;  %v6553_v52 = vadd.f32 %v6552_v46, %v6395_v58  ;;  %v6265_v60 = vadd.f32 %v6264_v51, %v13310_v43 }
 0xb1e   :  { %v6556_v24 = vmul.f32 0.001953125, %v6112_v50 }
 0xb20   :  { %6549 = vadd.xlane.f32.xlu0 %v6548_v6  ;;  %v6620_v59 = vmul.f32 %v6556_v24, %v6556_v24 }
 0xb21   :  { %6261 = vadd.xlane.f32.xlu1 %v6260_v4  ;;  %v6400_v26 = vpop.xlane.xlu0 %6399 }
 0xb22   :  { %v6588_v15 = vmul.f32 0.001953125, %v6400_v26 }
 0xb23   :  { %v6117_v17 = vpop.xlane.xlu1 %6116 }
 0xb24   :  { %6554 = vadd.xlane.f32.xlu0 %v6553_v52  ;;  %v6652_v25 = vsub.f32 %v6588_v15, %v6620_v59  ;;  %v13321_v0 = vmul.f32 0.001953125, %v6117_v17 }
 0xb25   :  { %6266 = vadd.xlane.f32.xlu1 %v6265_v60 }
 0xb26   :  { %v6684_v12 = vmax.f32 %v6652_v25, 0.0  ;;  %v6621_v44 = vmul.f32 %v13321_v0, %v13321_v0  ;;  %v6405_v31 = vpop.xlane.xlu0 %6404 }
 0xb27   :  { %v6589_v37 = vmul.f32 0.001953125, %v6405_v31 }
 0xb28   :  { %v6716_v41 = vadd.f32 1e-05, %v6684_v12 }
 0xb29   :  { %v6122_v11 = vpop.xlane.xlu1 %6121  ;;  %v6653_v55 = vsub.f32 %v6589_v37, %v6621_v44 }
 0xb2a   :  { %7938 = vrsqrt.f32 %v6716_v41  ;;  %v13325_v61 = vmul.f32 0.001953125, %v6122_v11 }
 0xb2b   :  { %v6685_v5 = vmax.f32 %v6653_v55, 0.0  ;;  %v5242_v55 = vld [vmem:[%s14170_s19] sm:$0xff] }
 0xb2c   :  { %v6622_v6 = vmul.f32 %v13325_v61, %v13325_v61  ;;  %v6410_v46 = vpop.xlane.xlu0 %6409 }
 0xb2d   :  { %v6590_v50 = vmul.f32 0.001953125, %v6410_v46  ;;  %v6127_v58 = vpop.xlane.xlu1 %6126  ;;  %v6717_v4 = vadd.f32 1e-05, %v6685_v5 }
 0xb2e   :  { %v13329_v51 = vmul.f32 0.001953125, %v6127_v58 }
 0xb2f   :  { %v6654_v52 = vsub.f32 %v6590_v50, %v6622_v6  ;;  %7940 = vrsqrt.f32 %v6717_v4 }
 0xb30   :  { %v6623_v59 = vmul.f32 %v13329_v51, %v13329_v51  ;;  %v6415_v26 = vpop.xlane.xlu0 %6414 }
 0xb31   :  { %v6686_v60 = vmax.f32 %v6654_v52, 0.0  ;;  %v6591_v15 = vmul.f32 0.001953125, %v6415_v26 }
 0xb32   :  { %v6132_v17 = vpop.xlane.xlu1 %6131 }
 0xb33   :  { %v6718_v25 = vadd.f32 1e-05, %v6686_v60  ;;  %v6655_v12 = vsub.f32 %v6591_v15, %v6623_v59  ;;  %v13333_v44 = vmul.f32 0.001953125, %v6132_v17  ;;  %v5274_v60 = vld [vmem:[%s14171_s20] sm:$0xff] }
 0xb34   :  { %v6420_v31 = vpop.xlane.xlu0 %6419 }
 0xb35   :  { %7942 = vrsqrt.f32 %v6718_v25  ;;  %v6687_v41 = vmax.f32 %v6655_v12, 0.0  ;;  %v6624_v37 = vmul.f32 %v13333_v44, %v13333_v44  ;;  %v6592_v11 = vmul.f32 0.001953125, %v6420_v31  ;;  %v5243_v31 = vld [vmem:[%s14170_s19 + $0x8] sm:$0xff] }
 0xb36   :  { %v6137_v5 = vpop.xlane.xlu1 %6136 }
 0xb37   :  { %v7939_v6 = vpop.eup %7938  ;;  %v6719_v46 = vadd.f32 1e-05, %v6687_v41  ;;  %v6656_v50 = vsub.f32 %v6592_v11, %v6624_v37  ;;  %v13340_v58 = vmul.f32 0.001953125, %v6137_v5 }
 0xb38   :  { %v6780_v4 = vmul.f32 %v7939_v6, %v5242_v55 }
 0xb39   :  { %7944 = vrsqrt.f32 %v6719_v46  ;;  %v6688_v52 = vmax.f32 %v6656_v50, 0.0  ;;  %v6625_v59 = vmul.f32 %v13340_v58, %v13340_v58  ;;  %v6425_v26 = vpop.xlane.xlu0 %6424 }
 0xb3a   :  { %v6593_v15 = vmul.f32 0.001953125, %v6425_v26  ;;  %6878 = vperm.xlu0 %7787, %v6780_v4   ;;  %v6812_v17 = vmul.f32 %v6780_v4, %v6556_v24  ;;  %v5275_v4 = vld [vmem:[%s14171_s20 + $0x8] sm:$0xff] }
 0xb3b   :  { %v6720_v25 = vadd.f32 1e-05, %v6688_v52  ;;  %v6142_v12 = vpop.xlane.xlu1 %6141 }
 0xb3c   :  { %v6657_v41 = vsub.f32 %v6593_v15, %v6625_v59  ;;  %v13350_v37 = vmul.f32 0.001953125, %v6142_v12  ;;  %v6844_v11 = vsub.f32 %v5274_v60, %v6812_v17  ;;  %v7941_v55 = vpop.eup %7940  ;;  %v5244_v60 = vld [vmem:[%s14170_s19 + $0x10] sm:$0xff] }
 0xb3d   :  { %7946 = vrsqrt.f32 %v6720_v25  ;;  %v6781_v50 = vmul.f32 %v7941_v55, %v5243_v31 }
 0xb3e   :  { %v6689_v5 = vmax.f32 %v6657_v41, 0.0  ;;  %v6626_v6 = vmul.f32 %v13350_v37, %v13350_v37  ;;  %v6430_v46 = vpop.xlane.xlu0 %6429  ;;  %7166 = vperm.xlu1 %7788, %v6844_v11  }
 0xb3f   :  { %v6594_v24 = vmul.f32 0.001953125, %v6430_v46  ;;  %6883 = vperm.xlu0 %7787, %v6781_v50   ;;  %v6813_v59 = vmul.f32 %v6781_v50, %v13321_v0 }
 0xb40   :  { %v6721_v52 = vadd.f32 1e-05, %v6689_v5  ;;  %v6147_v26 = vpop.xlane.xlu1 %6146 }
 0xb41   :  { %v6658_v15 = vsub.f32 %v6594_v24, %v6626_v6  ;;  %v13361_v17 = vmul.f32 0.001953125, %v6147_v26  ;;  %v6845_v31 = vsub.f32 %v5275_v4, %v6813_v59  ;;  %v5276_v6 = vld [vmem:[%s14171_s20 + $0x10] sm:$0xff]  ;;  %v5245_v4 = vld [vmem:[%s14170_s19 + $0x18] sm:$0xff] }
 0xb42   :  { %v7943_v25 = vpop.eup %7942  ;;  %7948 = vrsqrt.f32 %v6721_v52  ;;  %v6435_v12 = vpop.xlane.xlu0 %6434 }
 0xb43   :  { %v6690_v41 = vmax.f32 %v6658_v15, 0.0  ;;  %v6627_v11 = vmul.f32 %v13361_v17, %v13361_v17  ;;  %v6595_v55 = vmul.f32 0.001953125, %v6435_v12  ;;  %v6782_v5 = vmul.f32 %v7943_v25, %v5244_v60  ;;  %7171 = vperm.xlu1 %7788, %v6845_v31  }
 0xb45   :  { %v6152_v46 = vpop.xlane.xlu1 %6151  ;;  %v6722_v0 = vadd.f32 1e-05, %v6690_v41  ;;  %v6659_v50 = vsub.f32 %v6595_v55, %v6627_v11  ;;  %6888 = vperm.xlu0 %7787, %v6782_v5   ;;  %v6814_v24 = vmul.f32 %v6782_v5, %v13325_v61  ;;  %v5246_v41 = vld [vmem:[%s14170_s19 + $0x20] sm:$0xff]  ;;  %v5277_v5 = vld [vmem:[%s14171_s20 + $0x18] sm:$0xff] }
 0xb46   :  { %v13365_v28 = vmul.f32 0.001953125, %v6152_v46  ;;  %v7945_v52 = vpop.eup %7944  ;;  %v6440_v26 = vpop.xlane.xlu0 %6439 }
 0xb47   :  { %7950 = vrsqrt.f32 %v6722_v0  ;;  %v6691_v59 = vmax.f32 %v6659_v50, 0.0  ;;  %v6596_v15 = vmul.f32 0.001953125, %v6440_v26  ;;  %v6846_v12 = vsub.f32 %v5276_v6, %v6814_v24 }
 0xb48   :  { %v6628_v60 = vmul.f32 %v13365_v28, %v13365_v28  ;;  %v6783_v31 = vmul.f32 %v7945_v52, %v5245_v4 }
 0xb49   :  { %v6157_v25 = vpop.xlane.xlu1 %6156  ;;  %v6723_v61 = vadd.f32 1e-05, %v6691_v59  ;;  %7176 = vperm.xlu1 %7788, %v6846_v12   ;;  %v5278_v59 = vld [vmem:[%s14171_s20 + $0x20] sm:$0xff] }
 0xb4a   :  { %v6660_v11 = vsub.f32 %v6596_v15, %v6628_v60  ;;  %v13379_v55 = vmul.f32 0.001953125, %v6157_v25  ;;  %v7947_v46 = vpop.eup %7946  ;;  %6893 = vperm.xlu0 %7787, %v6783_v31   ;;  %v6815_v0 = vmul.f32 %v6783_v31, %v13329_v51  ;;  %v5247_v51 = vld [vmem:[%s14170_s19 + $0x28] sm:$0xff] }
 0xb4b   :  { %7952 = vrsqrt.f32 %v6723_v61  ;;  %v6445_v24 = vpop.xlane.xlu0 %6444  ;;  %v6784_v4 = vmul.f32 %v7947_v46, %v5246_v41 }
 0xb4c   :  { %v6692_v50 = vmax.f32 %v6660_v11, 0.0  ;;  %v6629_v6 = vmul.f32 %v13379_v55, %v13379_v55  ;;  %v6597_v52 = vmul.f32 0.001953125, %v6445_v24  ;;  %v6847_v26 = vsub.f32 %v5277_v5, %v6815_v0  ;;  %v5279_v24 = vld [vmem:[%s14171_s20 + $0x28] sm:$0xff] }
 0xb4d   :  { %v6816_v25 = vmul.f32 %v6784_v4, %v13333_v44 }
 0xb4e   :  { %v6724_v60 = vadd.f32 1e-05, %v6692_v50  ;;  %v6162_v15 = vpop.xlane.xlu1 %6161  ;;  %v6661_v12 = vsub.f32 %v6597_v52, %v6629_v6  ;;  %7181 = vperm.xlu1 %7788, %v6847_v26   ;;  %6898 = vperm.xlu0 %7787, %v6784_v4   ;;  %v5248_v26 = vld [vmem:[%s14170_s19 + $0x30] sm:$0xff] }
 0xb4f   :  { %v13394_v31 = vmul.f32 0.001953125, %v6162_v15  ;;  %v7949_v41 = vpop.eup %7948  ;;  %v6450_v61 = vpop.xlane.xlu0 %6449  ;;  %v6848_v11 = vsub.f32 %v5278_v59, %v6816_v25 }
 0xb50   :  { %7954 = vrsqrt.f32 %v6724_v60  ;;  %v6693_v5 = vmax.f32 %v6661_v12, 0.0  ;;  %v6598_v0 = vmul.f32 0.001953125, %v6450_v61  ;;  %v6785_v50 = vmul.f32 %v7949_v41, %v5247_v51 }
 0xb51   :  { %v6630_v46 = vmul.f32 %v13394_v31, %v13394_v31 }
 0xb52   :  { %v6167_v44 = vpop.xlane.xlu1 %6166  ;;  %v6725_v6 = vadd.f32 1e-05, %v6693_v5  ;;  %7186 = vperm.xlu1 %7788, %v6848_v11   ;;  %6903 = vperm.xlu0 %7787, %v6785_v50   ;;  %v6817_v4 = vmul.f32 %v6785_v50, %v13340_v58  ;;  %v5280_v58 = vld [vmem:[%s14171_s20 + $0x30] sm:$0xff] }
 0xb53   :  { %v6662_v52 = vsub.f32 %v6598_v0, %v6630_v46  ;;  %v13401_v15 = vmul.f32 0.001953125, %v6167_v44  ;;  %v5249_v44 = vld [vmem:[%s14170_s19 + $0x38] sm:$0xff] }
 0xb54   :  { %v7951_v59 = vpop.eup %7950  ;;  %7956 = vrsqrt.f32 %v6725_v6  ;;  %v6455_v51 = vpop.xlane.xlu0 %6454  ;;  %v6849_v12 = vsub.f32 %v5279_v24, %v6817_v4 }
 0xb55   :  { %v6694_v60 = vmax.f32 %v6662_v52, 0.0  ;;  %v6631_v25 = vmul.f32 %v13401_v15, %v13401_v15  ;;  %v6599_v41 = vmul.f32 0.001953125, %v6455_v51  ;;  %v6786_v61 = vmul.f32 %v7951_v59, %v5248_v26  ;;  %v5250_v51 = vld [vmem:[%s14170_s19 + $0x40] sm:$0xff] }
 0xb56   :  { %7191 = vperm.xlu1 %7788, %v6849_v12  }
 0xb57   :  { %v6726_v5 = vadd.f32 1e-05, %v6694_v60  ;;  %v6172_v46 = vpop.xlane.xlu1 %6171  ;;  %v6663_v11 = vsub.f32 %v6599_v41, %v6631_v25  ;;  %6908 = vperm.xlu0 %7787, %v6786_v61   ;;  %v6818_v50 = vmul.f32 %v6786_v61, %v13350_v37  ;;  %v5281_v61 = vld [vmem:[%s14171_s20 + $0x38] sm:$0xff] }
 0xb58   :  { %v13412_v0 = vmul.f32 0.001953125, %v6172_v46  ;;  %v7953_v24 = vpop.eup %7952  ;;  %v6460_v6 = vpop.xlane.xlu0 %6459 }
 0xb59   :  { %7958 = vrsqrt.f32 %v6726_v5  ;;  %v6695_v52 = vmax.f32 %v6663_v11, 0.0  ;;  %v6600_v26 = vmul.f32 0.001953125, %v6460_v6  ;;  %v6850_v59 = vsub.f32 %v5280_v58, %v6818_v50 }
 0xb5a   :  { %v6632_v4 = vmul.f32 %v13412_v0, %v13412_v0  ;;  %v6787_v25 = vmul.f32 %v7953_v24, %v5249_v44 }
 0xb5b   :  { %v6177_v60 = vpop.xlane.xlu1 %6176  ;;  %v6727_v37 = vadd.f32 1e-05, %v6695_v52  ;;  %7196 = vperm.xlu1 %7788, %v6850_v59   ;;  %v5282_v52 = vld [vmem:[%s14171_s20 + $0x40] sm:$0xff] }
 0xb5c   :  { %v6664_v12 = vsub.f32 %v6600_v26, %v6632_v4  ;;  %v13423_v41 = vmul.f32 0.001953125, %v6177_v60  ;;  %6913 = vperm.xlu0 %7787, %v6787_v25   ;;  %v6819_v46 = vmul.f32 %v6787_v25, %v13361_v17  ;;  %v5251_v17 = vld [vmem:[%s14170_s19 + $0x48] sm:$0xff] }
 0xb5d   :  { %v7955_v5 = vpop.eup %7954  ;;  %7960 = vrsqrt.f32 %v6727_v37  ;;  %v6465_v50 = vpop.xlane.xlu0 %6464 }
 0xb5e   :  { %v6696_v58 = vmax.f32 %v6664_v12, 0.0  ;;  %v6633_v11 = vmul.f32 %v13423_v41, %v13423_v41  ;;  %v6788_v44 = vmul.f32 %v7955_v5, %v5250_v51  ;;  %v6601_v24 = vmul.f32 0.001953125, %v6465_v50  ;;  %v5283_v5 = vld [vmem:[%s14171_s20 + $0x48] sm:$0xff] }
 0xb5f   :  { %v6851_v6 = vsub.f32 %v5281_v61, %v6819_v46 }
 0xb60   :  { %v6728_v4 = vadd.f32 1e-05, %v6696_v58  ;;  %v6820_v26 = vmul.f32 %v6788_v44, %v13365_v28  ;;  %v6665_v59 = vsub.f32 %v6601_v24, %v6633_v11  ;;  %6918 = vperm.xlu0 %7787, %v6788_v44   ;;  %v5252_v28 = vld [vmem:[%s14170_s19 + $0x50] sm:$0xff] }
 0xb61   :  { %7201 = vperm.xlu1 %7788, %v6851_v6   ;;  %v7957_v60 = vpop.eup %7956 }
 0xb62   :  { %7962 = vrsqrt.f32 %v6728_v4  ;;  %v6182_v25 = vpop.xlane.xlu0 %6181  ;;  %v6852_v51 = vsub.f32 %v5282_v52, %v6820_v26  ;;  %v6697_v37 = vmax.f32 %v6665_v59, 0.0  ;;  %v6789_v61 = vmul.f32 %v7957_v60, %v5251_v17  ;;  %v5284_v17 = vld [vmem:[%s14171_s20 + $0x50] sm:$0xff] }
 0xb63   :  { %v13438_v12 = vmul.f32 0.001953125, %v6182_v25  ;;  %v5253_v25 = vld [vmem:[%s14170_s19 + $0x58] sm:$0xff] }
 0xb64   :  { %v6729_v46 = vadd.f32 1e-05, %v6697_v37  ;;  %v6187_v58 = vpop.xlane.xlu1 %6186  ;;  %6923 = vperm.xlu0 %7787, %v6789_v61   ;;  %v6821_v11 = vmul.f32 %v6789_v61, %v13379_v55 }
 0xb65   :  { %7206 = vperm.xlu1 %7788, %v6852_v51   ;;  %v6634_v44 = vmul.f32 %v13438_v12, %v13438_v12  ;;  %v13449_v26 = vmul.f32 0.001953125, %v6187_v58 }
 0xb66   :  { %v7959_v50 = vpop.eup %7958  ;;  %v6470_v24 = vpop.xlane.xlu0 %6469  ;;  %7964 = vrsqrt.f32 %v6729_v46  ;;  %v6853_v52 = vsub.f32 %v5283_v5, %v6821_v11 }
 0xb67   :  { %v6602_v6 = vmul.f32 0.001953125, %v6470_v24  ;;  %v6790_v4 = vmul.f32 %v7959_v50, %v5252_v28  ;;  %v6635_v28 = vmul.f32 %v13449_v26, %v13449_v26 }
 0xb68   :  { %v13454_v60 = vpop.xlane.xlu1 %6191 }
 0xb69   :  { %v6666_v59 = vsub.f32 %v6602_v6, %v6634_v44  ;;  %7211 = vperm.xlu1 %7788, %v6853_v52   ;;  %6928 = vperm.xlu0 %7787, %v6790_v4   ;;  %v6822_v55 = vmul.f32 %v6790_v4, %v13394_v31  ;;  %v5285_v31 = vld [vmem:[%s14171_s20 + $0x58] sm:$0xff]  ;;  %v5254_v6 = vld [vmem:[%s14170_s19 + $0x60] sm:$0xff] }
 0xb6a   :  { %v7961_v51 = vpop.eup %7960 }
 0xb6b   :  { %v6698_v37 = vmax.f32 %v6666_v59, 0.0  ;;  %v6475_v61 = vpop.xlane.xlu0 %6474  ;;  %v6854_v5 = vsub.f32 %v5284_v17, %v6822_v55  ;;  %v6791_v58 = vmul.f32 %v7961_v51, %v5253_v25 }
 0xb6c   :  { %v6603_v46 = vmul.f32 0.001953125, %v6475_v61 }
 0xb6d   :  { %v6730_v11 = vadd.f32 1e-05, %v6698_v37  ;;  %v13462_v50 = vpop.xlane.xlu1 %6479  ;;  %7216 = vperm.xlu1 %7788, %v6854_v5   ;;  %6933 = vperm.xlu0 %7787, %v6791_v58   ;;  %v6823_v24 = vmul.f32 %v6791_v58, %v13401_v15  ;;  %v5286_v37 = vld [vmem:[%s14171_s20 + $0x60] sm:$0xff]  ;;  %v5255_v15 = vld [vmem:[%s14170_s19 + $0x68] sm:$0xff] }
 0xb6e   :  { %v6667_v44 = vsub.f32 %v6603_v46, %v6635_v28 }
 0xb6f   :  { %v7963_v52 = vpop.eup %7962  ;;  %7966 = vrsqrt.f32 %v6730_v11  ;;  %v13471_v4 = vpop.xlane.xlu0 %6484  ;;  %v6855_v59 = vsub.f32 %v5285_v31, %v6823_v24 }
 0xb70   :  { %v6699_v17 = vmax.f32 %v6667_v44, 0.0  ;;  %v6792_v25 = vmul.f32 %v7963_v52, %v5254_v6 }
 0xb71   :  { %v13473_v55 = vpop.xlane.xlu1 %6196  ;;  %7221 = vperm.xlu1 %7788, %v6855_v59  }
 0xb72   :  { %v6731_v51 = vadd.f32 1e-05, %v6699_v17  ;;  %6938 = vperm.xlu0 %7787, %v6792_v25   ;;  %v6824_v61 = vmul.f32 %v6792_v25, %v13412_v0  ;;  %v5256_v17 = vld [vmem:[%s14170_s19 + $0x70] sm:$0xff] }
 0xb73   :  { %v7965_v5 = vpop.eup %7964 }
 0xb74   :  { %7968 = vrsqrt.f32 %v6731_v51  ;;  %v6490_v28 = vpop.xlane.xlu0 %6489  ;;  %v6856_v46 = vsub.f32 %v5286_v37, %v6824_v61  ;;  %v6793_v58 = vmul.f32 %v7965_v5, %v5255_v15 }
 0xb75   :  { %v6606_v24 = vmul.f32 0.001953125, %v6490_v28  ;;  %v5287_v28 = vld [vmem:[%s14171_s20 + $0x68] sm:$0xff] }
 0xb76   :  { %v6202_v11 = vpop.xlane.xlu1 %6201  ;;  %7226 = vperm.xlu1 %7788, %v6856_v46   ;;  %6943 = vperm.xlu0 %7787, %v6793_v58   ;;  %v6825_v25 = vmul.f32 %v6793_v58, %v13423_v41 }
 0xb77   :  { %v6574_v31 = vmul.f32 0.001953125, %v6202_v11 }
 0xb78   :  { %v6495_v44 = vpop.xlane.xlu0 %6494 }
 0xb79   :  { %v6638_v6 = vmul.f32 %v6574_v31, %v6574_v31  ;;  %v6607_v37 = vmul.f32 0.001953125, %v6495_v44 }
 0xb7a   :  { %v6207_v52 = vpop.xlane.xlu1 %6206 }
 0xb7b   :  { %v6670_v59 = vsub.f32 %v6606_v24, %v6638_v6  ;;  %v6575_v8 = vmul.f32 0.001953125, %v6207_v52  ;;  %v5257_v24 = vld [vmem:[%s14170_s19 + $0x78] sm:$0xff]  ;;  %v6857_v6 = vsub.f32 %v5287_v28, %v6825_v25 }
 0xb7c   :  { %v7967_v0 = vpop.eup %7966 }
 0xb7d   :  { %v6702_v51 = vmax.f32 %v6670_v59, 0.0  ;;  %v6639_v15 = vmul.f32 %v6575_v8, %v6575_v8  ;;  %v13486_v61 = vpop.xlane.xlu0 %6499  ;;  %v6794_v5 = vmul.f32 %v7967_v0, %v5256_v17  ;;  %v5288_v59 = vld [vmem:[%s14171_s20 + $0x70] sm:$0xff] }
 0xb7f   :  { %v6734_v46 = vadd.f32 1e-05, %v6702_v51  ;;  %v6671_v11 = vsub.f32 %v6607_v37, %v6639_v15  ;;  %v13491_v39 = vpop.xlane.xlu1 %6211  ;;  %6948 = vperm.xlu1 %7788, %v6794_v5   ;;  %v6826_v52 = vmul.f32 %v6794_v5, %v13438_v12  ;;  %v5289_v12 = vld [vmem:[%s14171_s20 + $0x78] sm:$0xff] }
 0xb81   :  { %v7969_v41 = vpop.eup %7968  ;;  %7970 = vrsqrt.f32 %v6734_v46  ;;  %v6703_v58 = vmax.f32 %v6671_v11, 0.0  ;;  %v13496_v44 = vpop.xlane.xlu0 %6504  ;;  %v6858_v37 = vsub.f32 %v5288_v59, %v6826_v52  ;;  %v5260_v11 = vld [vmem:[%s14170_s19 + $0x90] sm:$0xff]  ;;  %v5261_v59 = vld [vmem:[%s14170_s19 + $0x98] sm:$0xff] }
 0xb82   :  { %v6795_v17 = vmul.f32 %v7969_v41, %v5257_v24 }
 0xb83   :  { %v6735_v0 = vadd.f32 1e-05, %v6703_v58  ;;  %v13502_v51 = vpop.xlane.xlu1 %6216  ;;  %7231 = vperm.xlu1 %7788, %v6857_v6  }
 0xb84   :  { %6953 = vperm.xlu0 %7787, %v6795_v17   ;;  %v6827_v15 = vmul.f32 %v6795_v17, %v13449_v26 }
 0xb85   :  { %7972 = vrsqrt.f32 %v6735_v0 }
 0xb86   :  { %v13505_v46 = vpop.xlane.xlu0 %6509  ;;  %v6859_v5 = vsub.f32 %v5289_v12, %v6827_v15 }
 0xb87   :  { %7236 = vperm.xlu1 %7788, %v6858_v37  }
 0xb88   :  { %v6222_v25 = vpop.xlane.xlu1 %6221 }
 0xb8a   :  { %v6515_v28 = vpop.xlane.xlu0 %6514 }
 0xb8b   :  { %7241 = vperm.xlu1 %7788, %v6859_v5   ;;  %v6611_v6 = vmul.f32 0.001953125, %v6515_v28 }
 0xb8c   :  { %v6227_v24 = vpop.xlane.xlu1 %6226 }
 0xb8d   :  { %v13513_v41 = vmul.f32 0.001953125, %v6227_v24 }
 0xb8e   :  { %v7971_v58 = vpop.eup %7970 }
 0xb8f   :  { %v13515_v26 = vmul.f32 %v7971_v58, %v5260_v11  ;;  %v6643_v52 = vmul.f32 %v13513_v41, %v13513_v41  ;;  %v6520_v17 = vpop.xlane.xlu0 %6519 }
 0xb90   :  { %v6612_v58 = vmul.f32 0.001953125, %v6520_v17 }
 0xb91   :  { %v13523_v0 = vmul.f32 %v13515_v26, %v6574_v31  ;;  %v6675_v37 = vsub.f32 %v6611_v6, %v6643_v52  ;;  %v6232_v15 = vpop.xlane.xlu1 %6231 }
 0xb92   :  { %v7973_v12 = vpop.eup %7972  ;;  %v13525_v5 = vmul.f32 0.001953125, %v6232_v15 }
 0xb93   :  { %v13527_v24 = vmul.f32 %v7973_v12, %v5261_v59  ;;  %v6707_v11 = vmax.f32 %v6675_v37, 0.0  ;;  %v6525_v28 = vpop.xlane.xlu0 %6524 }
 0xb94   :  { %v6644_v22 = vmul.f32 %v13525_v5, %v13525_v5  ;;  %v6613_v52 = vmul.f32 0.001953125, %v6525_v28 }
 0xb95   :  { %v13532_v29 = vmul.f32 %v13527_v24, %v6575_v8  ;;  %v6739_v1 = vadd.f32 1e-05, %v6707_v11  ;;  %v6237_v27 = vpop.xlane.xlu1 %6236 }
 0xb96   :  { %v6676_v31 = vsub.f32 %v6612_v58, %v6644_v22  ;;  %v13534_v38 = vmul.f32 0.001953125, %v6237_v27 }
 0xb97   :  { %7974 = vrsqrt.f32 %v6739_v1 }
 0xb98   :  { %v6708_v6 = vmax.f32 %v6676_v31, 0.0  ;;  %v6645_v59 = vmul.f32 %v13534_v38, %v13534_v38  ;;  %v6530_v37 = vpop.xlane.xlu0 %6529 }
 0xb99   :  { %v6614_v11 = vmul.f32 0.001953125, %v6530_v37 }
 0xb9a   :  { %v6740_v15 = vadd.f32 1e-05, %v6708_v6  ;;  %v6677_v17 = vsub.f32 %v6613_v52, %v6645_v59  ;;  %v6242_v12 = vpop.xlane.xlu1 %6241  ;;  %v5265_v59 = vld [vmem:[%s14170_s19 + $0xb8] sm:$0xff] }
 0xb9b   :  { %v13538_v53 = vmul.f32 0.001953125, %v6242_v12 }
 0xb9c   :  { %7976 = vrsqrt.f32 %v6740_v15  ;;  %v6709_v8 = vmax.f32 %v6677_v17, 0.0  ;;  %v6535_v57 = vpop.xlane.xlu0 %6534 }
 0xb9d   :  { %v6646_v27 = vmul.f32 %v13538_v53, %v13538_v53  ;;  %v6615_v45 = vmul.f32 0.001953125, %v6535_v57  ;;  %v13553_v57 = vmul.f32 0.001953125, %v6222_v25 }
 0xb9e   :  { %v6741_v22 = vadd.f32 1e-05, %v6709_v8  ;;  %v6247_v1 = vpop.xlane.xlu1 %6246 }
 0xb9f   :  { %v6678_v58 = vsub.f32 %v6614_v11, %v6646_v27  ;;  %v13542_v28 = vmul.f32 0.001953125, %v6247_v1 }
 0xba0   :  { %7978 = vrsqrt.f32 %v6741_v22 }
 0xba1   :  { %v6710_v31 = vmax.f32 %v6678_v58, 0.0  ;;  %v6647_v6 = vmul.f32 %v13542_v28, %v13542_v28  ;;  %v6540_v52 = vpop.xlane.xlu0 %6539 }
 0xba2   :  { %v6252_v37 = vpop.xlane.xlu1 %6251  ;;  %v6616_v1 = vmul.f32 0.001953125, %v6540_v52 }
 0xba3   :  { %v6742_v15 = vadd.f32 1e-05, %v6710_v31  ;;  %v6679_v17 = vsub.f32 %v6615_v45, %v6647_v6  ;;  %v13549_v12 = vmul.f32 0.001953125, %v6252_v37  ;;  %v5266_v31 = vld [vmem:[%s14170_s19 + $0xc0] sm:$0xff] }
 0xba4   :  { %v7975_v8 = vpop.eup %7974 }
 0xba5   :  { %v13551_v11 = vmul.f32 %v7975_v8, %v5265_v59  ;;  %7980 = vrsqrt.f32 %v6742_v15  ;;  %v6711_v27 = vmax.f32 %v6679_v17, 0.0  ;;  %v6545_v22 = vpop.xlane.xlu0 %6544  ;;  %v6648_v58 = vmul.f32 %v13549_v12, %v13549_v12 }
 0xba6   :  { %v6257_v56 = vpop.xlane.xlu1 %6256  ;;  %v6617_v15 = vmul.f32 0.001953125, %v6545_v22  ;;  %v6642_v17 = vmul.f32 %v13553_v57, %v13553_v57 }
 0xba7   :  { %v6743_v45 = vadd.f32 1e-05, %v6711_v27  ;;  %v13560_v6 = vmul.f32 0.001953125, %v6257_v56  ;;  %6993 = vperm.xlu0 %7787, %v13551_v11   ;;  %v6680_v59 = vsub.f32 %v6616_v1, %v6648_v58  ;;  %v5298_v56 = vld [vmem:[%s14171_s20 + $0xc0] sm:$0xff]  ;;  %v5267_v27 = vld [vmem:[%s14170_s19 + $0xc8] sm:$0xff]  ;;  %v13576_v58 = vmul.f32 0.001953125, %v13502_v51 }
 0xba8   :  { %v5299_v51 = vld [vmem:[%s14171_s20 + $0xc8] sm:$0xff] }
 0xba9   :  { %v7977_v37 = vpop.eup %7976  ;;  %7982 = vrsqrt.f32 %v6743_v45  ;;  %v6649_v25 = vmul.f32 %v13560_v6, %v13560_v6  ;;  %v6550_v52 = vpop.xlane.xlu0 %6549  ;;  %v6712_v16 = vmax.f32 %v6680_v59, 0.0  ;;  %v6610_v45 = vmul.f32 0.001953125, %v13505_v46 }
 0xbaa   :  { %v6804_v8 = vmul.f32 %v7977_v37, %v5266_v31  ;;  %v6262_v7 = vpop.xlane.xlu1 %6261  ;;  %v6618_v33 = vmul.f32 0.001953125, %v6550_v52  ;;  %v6641_v52 = vmul.f32 %v13576_v58, %v13576_v58 }
 0xbab   :  { %v6681_v1 = vsub.f32 %v6617_v15, %v6649_v25  ;;  %v13573_v22 = vmul.f32 0.001953125, %v6262_v7  ;;  %v6744_v59 = vadd.f32 1e-05, %v6712_v16  ;;  %v6674_v49 = vsub.f32 %v6610_v45, %v6642_v17 }
 0xbac   :  { %v6836_v31 = vmul.f32 %v6804_v8, %v13525_v5  ;;  %6998 = vperm.xlu0 %7787, %v6804_v8   ;;  %v13588_v8 = vmul.f32 0.001953125, %v13491_v39  ;;  %v6609_v39 = vmul.f32 0.001953125, %v13496_v44 }
 0xbad   :  { %v7979_v37 = vpop.eup %7978  ;;  %v6713_v40 = vmax.f32 %v6681_v1, 0.0  ;;  %v6650_v43 = vmul.f32 %v13573_v22, %v13573_v22  ;;  %7984 = vrsqrt.f32 %v6744_v59  ;;  %v6555_v7 = vpop.xlane.xlu0 %6554  ;;  %v6706_v1 = vmax.f32 %v6674_v49, 0.0 }
 0xbae   :  { %v6868_v10 = vsub.f32 %v5298_v56, %v6836_v31  ;;  %v6805_v15 = vmul.f32 %v7979_v37, %v5267_v27  ;;  %v6267_v25 = vpop.xlane.xlu1 %6266  ;;  %v5268_v56 = vld [vmem:[%s14170_s19 + $0xd0] sm:$0xff]  ;;  %v6640_v37 = vmul.f32 %v13588_v8, %v13588_v8 }
 0xbaf   :  { %v6745_v46 = vadd.f32 1e-05, %v6713_v40  ;;  %v6682_v5 = vsub.f32 %v6618_v33, %v6650_v43  ;;  %v13585_v16 = vmul.f32 0.001953125, %v6267_v25  ;;  %v6619_v40 = vmul.f32 0.001953125, %v6555_v7 }
 0xbb0   :  { %v6837_v17 = vmul.f32 %v6805_v15, %v13534_v38  ;;  %7286 = vperm.xlu1 %7788, %v6868_v10   ;;  %7003 = vperm.xlu0 %7787, %v6805_v15   ;;  %v6673_v25 = vsub.f32 %v6609_v39, %v6641_v52  ;;  %v5300_v10 = vld [vmem:[%s14171_s20 + $0xd0] sm:$0xff]  ;;  %v5269_v15 = vld [vmem:[%s14170_s19 + $0xd8] sm:$0xff] }
 0xbb1   :  { %7986 = vrsqrt.f32 %v6745_v46  ;;  %v6714_v27 = vmax.f32 %v6682_v5, 0.0  ;;  %v6651_v33 = vmul.f32 %v13585_v16, %v13585_v16  ;;  %v6738_v46 = vadd.f32 1e-05, %v6706_v1 }
 0xbb2   :  { %v7981_v43 = vpop.eup %7980  ;;  %v6869_v45 = vsub.f32 %v5299_v51, %v6837_v17  ;;  %v6608_v51 = vmul.f32 0.001953125, %v13486_v61  ;;  %v5270_v61 = vld [vmem:[%s14170_s19 + $0xe0] sm:$0xff] }
 0xbb3   :  { %v6806_v31 = vmul.f32 %v7981_v43, %v5268_v56  ;;  %v6746_v59 = vadd.f32 1e-05, %v6714_v27  ;;  %v6683_v38 = vsub.f32 %v6619_v40, %v6651_v33  ;;  %v13610_v27 = vmul.f32 0.001953125, %v13454_v60 }
 0xbb4   :  { %7291 = vperm.xlu1 %7788, %v6869_v45   ;;  %v6672_v40 = vsub.f32 %v6608_v51, %v6640_v37  ;;  %v6705_v33 = vmax.f32 %v6673_v25, 0.0  ;;  %v13623_v45 = vmul.f32 0.001953125, %v13473_v55  ;;  %v6604_v51 = vmul.f32 0.001953125, %v13462_v50  ;;  %v5303_v50 = vld [vmem:[%s14171_s20 + $0xe8] sm:$0xff] }
 0xbb5   :  { %v6838_v44 = vmul.f32 %v6806_v31, %v13538_v53  ;;  %7988 = vrsqrt.f32 %v6746_v59  ;;  %v6715_v49 = vmax.f32 %v6683_v38, 0.0  ;;  %7008 = vperm.xlu0 %7787, %v6806_v31   ;;  %v6879_v5 = vpop.permute.xlu0 %6878  ;;  %v5301_v53 = vld [vmem:[%s14171_s20 + $0xd8] sm:$0xff] }
 0xbb6   :  { %v7983_v7 = vpop.eup %7982  ;;  %v7036_v43 = vmul.f32 %v6879_v5, %v12501_v18  ;;  %v7037_v60 = vmul.f32 %v6879_v5, %v12503_v20  ;;  %v7038_v1 = vmul.f32 %v6879_v5, %v12505_v21  ;;  %v7039_v31 = vmul.f32 %v6879_v5, %v12513_v14  ;;  %v5271_v21 = vld [vmem:[%s14170_s19 + $0xe8] sm:$0xff] }
 0xbb7   :  { %v6870_v52 = vsub.f32 %v5300_v10, %v6838_v44  ;;  %v6807_v17 = vmul.f32 %v7983_v7, %v5269_v15  ;;  %v6747_v56 = vadd.f32 1e-05, %v6715_v49  ;;  %v6704_v10 = vmax.f32 %v6672_v40, 0.0  ;;  %v5302_v49 = vld [vmem:[%s14171_s20 + $0xe0] sm:$0xff] }
 0xbb8   :  { %v6737_v15 = vadd.f32 1e-05, %v6705_v33  ;;  %v6636_v14 = vmul.f32 %v13610_v27, %v13610_v27  ;;  %v6637_v5 = vmul.f32 %v13623_v45, %v13623_v45  ;;  %v15114_v33 = vld [vmem:[#allocation109_spill] sm:$0xff] }
 0xbb9   :  { %v6839_v39 = vmul.f32 %v6807_v17, %v13542_v28  ;;  %7990 = vrsqrt.f32 %v6747_v56  ;;  %7296 = vperm.xlu1 %7788, %v6870_v52   ;;  %7013 = vperm.xlu0 %7787, %v6807_v17   ;;  %v7167_v18 = vpop.permute.xlu1 %7166 }
 0xbba   :  { %7992 = vrsqrt.f32 %v6738_v46  ;;  %v7985_v59 = vpop.eup %7984  ;;  %v13626_v38 = vadd.f32 %v7167_v18, %v7036_v43  ;;  %v13628_v37 = vadd.f32 %v7167_v18, %v7038_v1  ;;  %v13630_v25 = vadd.f32 %v7167_v18, %v7037_v60  ;;  %v6884_v55 = vpop.permute.xlu0 %6883 }
 0xbbb   :  { %v6871_v28 = vsub.f32 %v5301_v53, %v6839_v39  ;;  %v6808_v20 = vmul.f32 %v7985_v59, %v5270_v61  ;;  %v13635_v44 = vadd.f32 %v7167_v18, %v7039_v31  ;;  %v6605_v46 = vmul.f32 0.001953125, %v13471_v4  ;;  %v5272_v4 = vld [vmem:[%s14170_s19 + $0xf0] sm:$0xff] }
 0xbbc   :  { %15110 = vst [vmem:[#allocation114_spill] sm:$0xff] %v13626_v38  ;;  %15111 = vst [vmem:[#allocation112_spill] sm:$0xff] %v13628_v37  ;;  %v7040_v56 = vmul.f32 %v6884_v55, %v12515_v36  ;;  %v7041_v40 = vmul.f32 %v6884_v55, %v12517_v13  ;;  %v7042_v53 = vmul.f32 %v6884_v55, %v15114_v33  ;;  %v6736_v43 = vadd.f32 1e-05, %v6704_v10 }
 0xbbd   :  { %15112 = vst [vmem:[#allocation116_spill] sm:$0xff] %v13630_v25  ;;  %15113 = vst [vmem:[#allocation117_spill] sm:$0xff] %v13635_v44  ;;  %7301 = vperm.xlu1 %7788, %v6871_v28   ;;  %v6840_v52 = vmul.f32 %v6808_v20, %v13549_v12  ;;  %7018 = vperm.xlu0 %7787, %v6808_v20   ;;  %7994 = vrsqrt.f32 %v6737_v15  ;;  %v15115_v12 = vld [vmem:[#allocation107_spill] sm:$0xff]  ;;  %v6668_v28 = vsub.f32 %v6604_v51, %v6636_v14 }
 0xbbe   :  { %v7987_v7 = vpop.eup %7986  ;;  %v7043_v61 = vmul.f32 %v6884_v55, %v15115_v12  ;;  %v7172_v60 = vpop.permute.xlu1 %7171  ;;  %v6669_v10 = vsub.f32 %v6605_v46, %v6637_v5  ;;  %7996 = vrsqrt.f32 %v6736_v43  ;;  %v5273_v55 = vld [vmem:[%s14170_s19 + $0xf8] sm:$0xff]  ;;  %v15120_v46 = vld [vmem:[#allocation106_spill] sm:$0xff] }
 0xbbf   :  { %v6809_v17 = vmul.f32 %v7987_v7, %v5271_v21  ;;  %v6872_v39 = vsub.f32 %v5302_v49, %v6840_v52  ;;  %v13658_v13 = vadd.f32 %v7172_v60, %v7040_v56  ;;  %v13660_v31 = vadd.f32 %v7172_v60, %v7042_v53  ;;  %v15121_v52 = vld [vmem:[#allocation103_spill] sm:$0xff] }
 0xbc0   :  { %v6889_v1 = vpop.permute.xlu0 %6888  ;;  %v13662_v18 = vadd.f32 %v7172_v60, %v7041_v40  ;;  %v13664_v21 = vadd.f32 %v7172_v60, %v7043_v61  ;;  %v6700_v14 = vmax.f32 %v6668_v28, 0.0  ;;  %v6701_v51 = vmax.f32 %v6669_v10, 0.0  ;;  %v5305_v61 = vld [vmem:[%s14171_s20 + $0xf8] sm:$0xff] }
 0xbc1   :  { %v6841_v36 = vmul.f32 %v6809_v17, %v13560_v6  ;;  %15116 = vst [vmem:[#allocation119_spill] sm:$0xff] %v13658_v13  ;;  %15117 = vst [vmem:[#allocation111_spill] sm:$0xff] %v13660_v31  ;;  %7306 = vperm.xlu1 %7788, %v6872_v39   ;;  %7023 = vperm.xlu0 %7787, %v6809_v17   ;;  %v5304_v6 = vld [vmem:[%s14171_s20 + $0xf0] sm:$0xff]  ;;  %v7044_v5 = vmul.f32 %v6889_v1, %v15120_v46  ;;  %v15122_v39 = vld [vmem:[#allocation101_spill] sm:$0xff] }
 0xbc2   :  { %15118 = vst [vmem:[#allocation115_spill] sm:$0xff] %v13662_v18  ;;  %v7989_v59 = vpop.eup %7988  ;;  %15119 = vst [vmem:[#allocation109_spill] sm:$0xff] %v13664_v21  ;;  %v7046_v17 = vmul.f32 %v6889_v1, %v15121_v52  ;;  %v6733_v52 = vadd.f32 1e-05, %v6701_v51  ;;  %v5297_v51 = vld [vmem:[%s14171_s20 + $0xb8] sm:$0xff]  ;;  %v15158_v31 = vld [vmem:[#allocation22_spill] sm:$0xff] }
 0xbc3   :  { %v6873_v15 = vsub.f32 %v5303_v50, %v6841_v36  ;;  %v6810_v20 = vmul.f32 %v7989_v59, %v5272_v4  ;;  %v7045_v50 = vmul.f32 %v6889_v1, %v15122_v39  ;;  %v15123_v4 = vld [vmem:[#allocation83_spill] sm:$0xff]  ;;  %v15160_v18 = vld [vmem:[#allocation54_spill] sm:$0xff] }
 0xbc4   :  { %v7177_v40 = vpop.permute.xlu1 %7176  ;;  %v7047_v12 = vmul.f32 %v6889_v1, %v15123_v4  ;;  %v15128_v1 = vld [vmem:[#allocation85_spill] sm:$0xff] }
 0xbc5   :  { %v6842_v49 = vmul.f32 %v6810_v20, %v13573_v22  ;;  %7311 = vperm.xlu1 %7788, %v6873_v15   ;;  %7028 = vperm.xlu0 %7787, %v6810_v20   ;;  %v6894_v56 = vpop.permute.xlu0 %6893  ;;  %v5264_v22 = vld [vmem:[%s14170_s19 + $0xb0] sm:$0xff]  ;;  %v13683_v60 = vadd.f32 %v7177_v40, %v7044_v5  ;;  %v13685_v36 = vadd.f32 %v7177_v40, %v7046_v17  ;;  %v6732_v15 = vadd.f32 1e-05, %v6700_v14 }
 0xbc6   :  { %v7991_v7 = vpop.eup %7990  ;;  %v13688_v28 = vadd.f32 %v7177_v40, %v7045_v50  ;;  %v13690_v10 = vadd.f32 %v7177_v40, %v7047_v12  ;;  %v7048_v20 = vmul.f32 %v6894_v56, %v15128_v1  ;;  %v6835_v40 = vmul.f32 %v13551_v11, %v13513_v41  ;;  %v5263_v12 = vld [vmem:[%s14170_s19 + $0xa8] sm:$0xff]  ;;  %v5262_v1 = vld [vmem:[%s14170_s19 + $0xa0] sm:$0xff] }
 0xbc7   :  { %v7993_v33 = vpop.eup %7992  ;;  %v6874_v53 = vsub.f32 %v5304_v6, %v6842_v49  ;;  %v6811_v43 = vmul.f32 %v7991_v7, %v5273_v55  ;;  %15124 = vst [vmem:[#allocation107_spill] sm:$0xff] %v13683_v60  ;;  %15125 = vst [vmem:[#allocation106_spill] sm:$0xff] %v13685_v36  ;;  %v15129_v6 = vld [vmem:[#allocation80_spill] sm:$0xff]  ;;  %v15130_v49 = vld [vmem:[#allocation86_spill] sm:$0xff]  ;;  %7998 = vrsqrt.f32 %v6732_v15 }
 0xbc8   :  { %15126 = vst [vmem:[#allocation103_spill] sm:$0xff] %v13688_v28  ;;  %15127 = vst [vmem:[#allocation101_spill] sm:$0xff] %v13690_v10  ;;  %v7049_v55 = vmul.f32 %v6894_v56, %v15129_v6  ;;  %v7050_v7 = vmul.f32 %v6894_v56, %v15130_v49  ;;  %v6802_v17 = vmul.f32 %v7993_v33, %v5264_v22  ;;  %8000 = vrsqrt.f32 %v6733_v52 }
 0xbc9   :  { %v6843_v59 = vmul.f32 %v6811_v43, %v13585_v16  ;;  %7316 = vperm.xlu1 %7788, %v6874_v53   ;;  %7033 = vperm.xlu0 %7787, %v6811_v43   ;;  %v13695_v46 = vpop.permute.xlu0 %6898  ;;  %v7182_v5 = vpop.permute.xlu1 %7181  ;;  %v15131_v16 = vld [vmem:[#allocation87_spill] sm:$0xff] }
 0xbca   :  { %v7051_v50 = vmul.f32 %v6894_v56, %v15131_v16  ;;  %v13700_v14 = vadd.f32 %v7182_v5, %v7048_v20  ;;  %v13702_v53 = vadd.f32 %v7182_v5, %v7050_v7  ;;  %v13704_v43 = vadd.f32 %v7182_v5, %v7049_v55  ;;  %v7995_v4 = vpop.eup %7994  ;;  %v5296_v20 = vld [vmem:[%s14171_s20 + $0xb0] sm:$0xff] }
 0xbcb   :  { %v6875_v39 = vsub.f32 %v5305_v61, %v6843_v59  ;;  %v6801_v56 = vmul.f32 %v7995_v4, %v5263_v12  ;;  %v6834_v22 = vmul.f32 %v6802_v17, %v13553_v57  ;;  %v6867_v61 = vsub.f32 %v5297_v51, %v6835_v40  ;;  %v7997_v59 = vpop.eup %7996  ;;  %v5295_v57 = vld [vmem:[%s14171_s20 + $0xa8] sm:$0xff] }
 0xbcc   :  { %15132 = vst [vmem:[#allocation83_spill] sm:$0xff] %v13700_v14  ;;  %15133 = vst [vmem:[#allocation85_spill] sm:$0xff] %v13702_v53  ;;  %v13712_v33 = vadd.f32 %v7182_v5, %v7051_v50  ;;  %v6800_v55 = vmul.f32 %v7997_v59, %v5262_v1  ;;  %v5259_v12 = vld [vmem:[%s14170_s19 + $0x88] sm:$0xff]  ;;  %v5292_v1 = vld [vmem:[%s14171_s20 + $0x90] sm:$0xff] }
 0xbcd   :  { %15134 = vst [vmem:[#allocation80_spill] sm:$0xff] %v13704_v43  ;;  %6988 = vperm.xlu0 %7787, %v6802_v17   ;;  %7321 = vperm.xlu1 %7788, %v6875_v39   ;;  %v13714_v41 = vpop.permute.xlu0 %6903  ;;  %v13716_v11 = vpop.permute.xlu1 %7186  ;;  %v6833_v15 = vmul.f32 %v6801_v56, %v13576_v58  ;;  %v6866_v49 = vsub.f32 %v5296_v20, %v6834_v22  ;;  %v5294_v39 = vld [vmem:[%s14171_s20 + $0xa0] sm:$0xff] }
 0xbce   :  { %15135 = vst [vmem:[#allocation86_spill] sm:$0xff] %v13712_v33  ;;  %v6832_v52 = vmul.f32 %v6800_v55, %v13588_v8  ;;  %v5293_v8 = vld [vmem:[%s14171_s20 + $0x98] sm:$0xff] }
 0xbcf   :  { %v6865_v17 = vsub.f32 %v5295_v57, %v6833_v15 }
 0xbd0   :  { %v6864_v50 = vsub.f32 %v5294_v39, %v6832_v52  ;;  %v13785_v39 = vld [vmem:[%s14173_s21] sm:$0xff] }
 0xbd1   :  { %6983 = vperm.xlu0 %7787, %v6801_v56   ;;  %7281 = vperm.xlu1 %7788, %v6867_v61   ;;  %v13725_v6 = vpop.permute.xlu1 %7191  ;;  %v6863_v56 = vsub.f32 %v5293_v8, %v13532_v29  ;;  %v5291_v29 = vld [vmem:[%s14171_s20 + $0x88] sm:$0xff]  ;;  %15136 = vst [vmem:[#allocation87_spill] sm:$0xff] %v13785_v39 }
 0xbd2   :  { %v13728_v7 = vpop.permute.xlu0 %6908 }
 0xbd4   :  { %v7999_v16 = vpop.eup %7998 }
 0xbd5   :  { %6978 = vperm.xlu0 %7787, %v6800_v55   ;;  %7276 = vperm.xlu1 %7788, %v6866_v49   ;;  %v8001_v4 = vpop.eup %8000  ;;  %v6862_v55 = vsub.f32 %v5292_v1, %v13523_v0  ;;  %v5290_v49 = vld [vmem:[%s14171_s20 + $0x80] sm:$0xff] }
 0xbd6   :  { %v13733_v5 = vpop.permute.xlu1 %7196  ;;  %v6797_v51 = vmul.f32 %v8001_v4, %v5259_v12 }
 0xbd7   :  { %v13740_v58 = vpop.permute.xlu0 %6913 }
 0xbd8   :  { %v6829_v20 = vmul.f32 %v6797_v51, %v13623_v45 }
 0xbd9   :  { %6973 = vperm.xlu0 %7787, %v13527_v24   ;;  %7271 = vperm.xlu1 %7788, %v6865_v17   ;;  %v5258_v24 = vld [vmem:[%s14170_s19 + $0x80] sm:$0xff] }
 0xbda   :  { %v6796_v61 = vmul.f32 %v7999_v16, %v5258_v24  ;;  %v6861_v52 = vsub.f32 %v5291_v29, %v6829_v20  ;;  %v15139_v20 = vld [vmem:[#allocation76_spill] sm:$0xff] }
 0xbdb   :  { %v13755_v22 = vpop.permute.xlu0 %6918 }
 0xbdc   :  { %v13742_v40 = vpop.permute.xlu1 %7201 }
 0xbdd   :  { %6968 = vperm.xlu0 %7787, %v13515_v26   ;;  %7266 = vperm.xlu1 %7788, %v6864_v50   ;;  %v6828_v26 = vmul.f32 %v6796_v61, %v13610_v27  ;;  %v7453_v27 = vld [vmem:[%s14172_s22] sm:$0xf]  ;;  %v7462_v50 = vcombine.high %v13785_v39, %v13785_v39  ;;  %v15144_v39 = vld [vmem:[#allocation69_spill] sm:$0xff] }
 0xbdf   :  { %v13773_v57 = vpop.permute.xlu0 %6923  ;;  %v6860_v45 = vsub.f32 %v5290_v49, %v6828_v26  ;;  %7528 = vmatprep.mubr.f32.mxu0 %v7462_v50  ;;  %7599 = vmatprep.mubr.f32.mxu1 %v7462_v50  ;;  %v15140_v26 = vld [vmem:[#allocation84_spill] sm:$0xff]  ;;  %v15141_v49 = vld [vmem:[#allocation78_spill] sm:$0xff] }
 0xbe0   :  { %v13757_v59 = vpop.permute.xlu1 %7206  ;;  %v13805_v29 = vmul.f32 %v13714_v41, %v15140_v26  ;;  %v15143_v50 = vld [vmem:[#allocation74_spill] sm:$0xff]  ;;  %v13825_v26 = vmul.f32 %v13740_v58, %v15145_v23 }
 0xbe1   :  { %6963 = vperm.xlu0 %7787, %v6797_v51   ;;  %7261 = vperm.xlu1 %7788, %v6863_v56   ;;  %v15150_v23 = vld [vmem:[#allocation58_spill] sm:$0xff] }
 0xbe4   :  { %v13765_v15 = vpop.permute.xlu1 %7211  ;;  %v13780_v17 = vpop.permute.xlu0 %6928 }
 0xbe5   :  { %6958 = vperm.xlu0 %7787, %v6796_v61   ;;  %7256 = vperm.xlu1 %7788, %v6862_v55   ;;  %v15137_v61 = vld [vmem:[#allocation82_spill] sm:$0xff]  ;;  %v13801_v55 = vmul.f32 %v13695_v46, %v15139_v20  ;;  %v13821_v20 = vmul.f32 %v13740_v58, %v15144_v39  ;;  %v15149_v39 = vld [vmem:[#allocation60_spill] sm:$0xff]  ;;  %v13845_v34 = vmul.f32 %v13780_v17, %v15150_v23  ;;  %v15157_v23 = vld [vmem:[#allocation11_spill] sm:$0xff] }
 0xbe6   :  { %v13797_v1 = vmul.f32 %v13695_v46, %v15137_v61  ;;  %v13817_v61 = vmul.f32 %v13728_v7, %v15143_v50  ;;  %v15148_v50 = vld [vmem:[#allocation65_spill] sm:$0xff]  ;;  %v13841_v54 = vmul.f32 %v13773_v57, %v15149_v39  ;;  %v15156_v39 = vld [vmem:[#allocation36_spill] sm:$0xff] }
 0xbe7   :  { %v13837_v19 = vmul.f32 %v13773_v57, %v15148_v50  ;;  %v15154_v50 = vld [vmem:[#allocation51_spill] sm:$0xff] }
 0xbe8   :  { %v13775_v0 = vpop.permute.xlu1 %7216  ;;  %v13791_v4 = vpop.permute.xlu0 %6933  ;;  %15138 = vst [vmem:[#allocation82_spill] sm:$0xff] %v13797_v1 }
 0xbe9   :  { %7246 = vperm.xlu0 %7787, %v6860_v45   ;;  %7251 = vperm.xlu1 %7788, %v6861_v52   ;;  %v13809_v52 = vmul.f32 %v13714_v41, %v15141_v49  ;;  %v15142_v45 = vld [vmem:[#allocation68_spill] sm:$0xff]  ;;  %v7081_v48 = vmul.f32 %v13791_v4, %v15153_v2 }
 0xbea   :  { %v15146_v49 = vld [vmem:[#allocation72_spill] sm:$0xff] }
 0xbeb   :  { %v13829_v30 = vmul.f32 %v13755_v22, %v15146_v49  ;;  %v13849_v49 = vmul.f32 %v13780_v17, %v15151_v9  ;;  %v15159_v9 = vld [vmem:[#allocation56_spill] sm:$0xff] }
 0xbec   :  { %v13787_v16 = vpop.permute.xlu1 %7221 }
 0xbed   :  { %7458 = vperm.xlu1 %7788, %v7453_v27   ;;  %v6939_v8 = vpop.permute.xlu0 %6938  ;;  %v13813_v27 = vmul.f32 %v13728_v7, %v15142_v45  ;;  %v15147_v45 = vld [vmem:[#allocation67_spill] sm:$0xff] }
 0xbee   :  { %v13833_v62 = vmul.f32 %v13755_v22, %v15147_v45  ;;  %v7080_v45 = vmul.f32 %v13791_v4, %v15152_v63  ;;  %v7084_v25 = vmul.f32 %v6939_v8, %v15157_v23  ;;  %v7085_v13 = vmul.f32 %v6939_v8, %v15158_v31  ;;  %v15165_v23 = vld [vmem:[#allocation53_spill] sm:$0xff] }
 0xbf1   :  { %v13793_v12 = vpop.permute.xlu1 %7226  ;;  %v6944_v51 = vpop.permute.xlu0 %6943 }
 0xbf2   :  { %v7091_v43 = vmul.f32 %v6944_v51, %v15165_v23 }
 0xbfa   :  { %v6949_v24 = vpop.permute.xlu1 %6948 }
 0xbfb   :  { %v7093_v21 = vmul.f32 %v6949_v24, %v15159_v9  ;;  %v7095_v36 = vmul.f32 %v6949_v24, %v15160_v18  ;;  %v15166_v18 = vld [vmem:[#allocation59_spill] sm:$0xff] }
 0xbfc   :  { %v7090_v1 = vmul.f32 %v6944_v51, %v15166_v18  ;;  %v15176_v18 = vld [vmem:[#allocation64_spill] sm:$0xff] }
 0xbfe   :  { %v7232_v56 = vpop.permute.xlu1 %7231 }
 0xbff   :  { %v6954_v35 = vpop.permute.xlu0 %6953 }
 0xc00   :  { %v7096_v32 = vmul.f32 %v6954_v35, %v15154_v50  ;;  %v7097_v37 = vmul.f32 %v6954_v35, %v15155_v3  ;;  %v7098_v38 = vmul.f32 %v6954_v35, %v15156_v39  ;;  %v7099_v44 = vmul.f32 %v6954_v35, %v12886_v47  ;;  %v15161_v50 = vld [vmem:[#allocation9_spill] sm:$0xff]  ;;  %v15163_v39 = vld [vmem:[#allocation31_spill] sm:$0xff] }
 0xc01   :  { %v7088_v53 = vmul.f32 %v6944_v51, %v15161_v50  ;;  %v15162_v3 = vld [vmem:[#allocation57_spill] sm:$0xff]  ;;  %v7092_v33 = vmul.f32 %v6949_v24, %v15163_v39  ;;  %v7379_v50 = vadd.f32 %v7232_v56, %v7091_v43 }
 0xc02   :  { %v7237_v42 = vpop.permute.xlu1 %7236  ;;  %v7089_v14 = vmul.f32 %v6944_v51, %v15162_v3  ;;  %v15164_v47 = vld [vmem:[#allocation29_spill] sm:$0xff]  ;;  %v15172_v51 = vld [vmem:[#allocation14_spill] sm:$0xff] }
 0xc03   :  { %v7094_v35 = vmul.f32 %v6949_v24, %v15164_v47  ;;  %v7381_v31 = vadd.f32 %v7237_v42, %v7093_v21  ;;  %v7383_v9 = vadd.f32 %v7237_v42, %v7095_v36  ;;  %v15168_v3 = vld [vmem:[#allocation25_spill] sm:$0xff]  ;;  %v7376_v39 = vadd.f32 %v7232_v56, %v7088_v53  ;;  %v15169_v21 = vld [vmem:[#allocation19_spill] sm:$0xff]  ;;  %v15171_v53 = vld [vmem:[#allocation6_spill] sm:$0xff] }
 0xc04   :  { %v7086_v24 = vmul.f32 %v6939_v8, %v15168_v3  ;;  %v7378_v47 = vadd.f32 %v7232_v56, %v7090_v1  ;;  %v7083_v36 = vmul.f32 %v13791_v4, %v15169_v21 }
 0xc06   :  { %v7242_v63 = vpop.permute.xlu1 %7241  ;;  %v7374_v43 = vadd.f32 %v13793_v12, %v7086_v24  ;;  %v15180_v24 = vld [vmem:[#allocation73_spill] sm:$0xff] }
 0xc07   :  { %v7384_v60 = vadd.f32 %v7242_v63, %v7096_v32  ;;  %v7386_v10 = vadd.f32 %v7242_v63, %v7098_v38  ;;  %v7385_v2 = vadd.f32 %v7242_v63, %v7097_v37  ;;  %v7387_v28 = vadd.f32 %v7242_v63, %v7099_v44  ;;  %v15167_v37 = vld [vmem:[#allocation16_spill] sm:$0xff] }
 0xc08   :  { %v7380_v32 = vadd.f32 %v7237_v42, %v7092_v33  ;;  %v7382_v38 = vadd.f32 %v7237_v42, %v7094_v35  ;;  %v7087_v44 = vmul.f32 %v6939_v8, %v15167_v37  ;;  %v7377_v63 = vadd.f32 %v7232_v56, %v7089_v14  ;;  %v15174_v35 = vld [vmem:[#allocation63_spill] sm:$0xff] }
 0xc09   :  { %7464 = vmatprep.subr.mxu0 %v7385_v2  ;;  %7535 = vmatprep.subr.mxu1 %v7387_v28  ;;  %v7373_v42 = vadd.f32 %v13793_v12, %v7085_v13  ;;  %v15170_v28 = vld [vmem:[#allocation17_spill] sm:$0xff]  ;;  %v7372_v14 = vadd.f32 %v13793_v12, %v7084_v25  ;;  %v7079_v33 = vmul.f32 %v13780_v17, %v15171_v53 }
 0xc0a   :  { %7465 = vmatpush1.msra.mxu0 %v7384_v60  ;;  %7536 = vmatpush1.msra.mxu1 %v7386_v10  ;;  %v7375_v60 = vadd.f32 %v13793_v12, %v7087_v44  ;;  %v7082_v10 = vmul.f32 %v13791_v4, %v15170_v28  ;;  %v7369_v8 = vadd.f32 %v13787_v16, %v7081_v48  ;;  %v15173_v12 = vld [vmem:[#allocation52_spill] sm:$0xff]  ;;  %v15178_v44 = vld [vmem:[#allocation62_spill] sm:$0xff] }
 0xc0b   :  { %7466 = vmatprep.subr.mxu0 %v7381_v31  ;;  %7537 = vmatprep.subr.mxu1 %v7383_v9  ;;  %v7371_v13 = vadd.f32 %v13787_v16, %v7083_v36  ;;  %v7078_v56 = vmul.f32 %v13780_v17, %v15172_v51  ;;  %v7368_v4 = vadd.f32 %v13787_v16, %v7080_v45  ;;  %v15175_v45 = vld [vmem:[#allocation61_spill] sm:$0xff]  ;;  %v15182_v36 = vld [vmem:[#allocation79_spill] sm:$0xff] }
 0xc0c   :  { %7467 = vmatpush1.msra.mxu0 %v7380_v32  ;;  %7538 = vmatpush1.msra.mxu1 %v7382_v38  ;;  %v7370_v25 = vadd.f32 %v13787_v16, %v7082_v10  ;;  %v7075_v1 = vmul.f32 %v13773_v57, %v15173_v12  ;;  %v7365_v2 = vadd.f32 %v13775_v0, %v13849_v49  ;;  %v15177_v32 = vld [vmem:[#allocation66_spill] sm:$0xff]  ;;  %v15184_v10 = vld [vmem:[#allocation81_spill] sm:$0xff]  ;;  %v15196_v12 = vld [vmem:[#allocation119_spill] sm:$0xff] }
 0xc0d   :  { %7468 = vmatprep.subr.mxu0 %v7377_v63  ;;  %7539 = vmatprep.subr.mxu1 %v7379_v50  ;;  %v7367_v48 = vadd.f32 %v13775_v0, %v7079_v33  ;;  %v7074_v23 = vmul.f32 %v13773_v57, %v15174_v35  ;;  %v7364_v17 = vadd.f32 %v13775_v0, %v13845_v34  ;;  %v15179_v63 = vld [vmem:[#allocation75_spill] sm:$0xff]  ;;  %v15191_v51 = vld [vmem:[#allocation101_spill] sm:$0xff] }
 0xc0e   :  { %7469 = vmatpush1.msra.mxu0 %v7376_v39  ;;  %7540 = vmatpush1.msra.mxu1 %v7378_v47  ;;  %v7366_v16 = vadd.f32 %v13775_v0, %v7078_v56  ;;  %v7071_v31 = vmul.f32 %v13755_v22, %v15175_v45  ;;  %v7361_v49 = vadd.f32 %v13765_v15, %v13841_v54  ;;  %v15181_v39 = vld [vmem:[#allocation71_spill] sm:$0xff]  ;;  %v15193_v56 = vld [vmem:[#allocation106_spill] sm:$0xff]  ;;  %v15199_v35 = vld [vmem:[#allocation117_spill] sm:$0xff] }
 0xc0f   :  { %7470 = vmatprep.subr.mxu0 %v7373_v42  ;;  %7541 = vmatprep.subr.mxu1 %v7375_v60  ;;  %v7363_v9 = vadd.f32 %v13765_v15, %v7075_v1  ;;  %v7070_v57 = vmul.f32 %v13755_v22, %v15176_v18  ;;  %v7360_v34 = vadd.f32 %v13765_v15, %v13837_v19  ;;  %v15183_v42 = vld [vmem:[#allocation77_spill] sm:$0xff] }
 0xc10   :  { %7471 = vmatpush1.msra.mxu0 %v7372_v14  ;;  %7542 = vmatpush1.msra.mxu1 %v7374_v43  ;;  %v7362_v0 = vadd.f32 %v13765_v15, %v7074_v23  ;;  %v7067_v38 = vmul.f32 %v13740_v58, %v15177_v32  ;;  %v7357_v54 = vadd.f32 %v13757_v59, %v13833_v62  ;;  %v15200_v23 = vld [vmem:[#allocation114_spill] sm:$0xff] }
 0xc11   :  { %7472 = vmatprep.subr.mxu0 %v7369_v8  ;;  %7543 = vmatprep.subr.mxu1 %v7371_v13  ;;  %v7359_v37 = vadd.f32 %v13757_v59, %v7071_v31  ;;  %v7066_v22 = vmul.f32 %v13740_v58, %v15178_v44  ;;  %v7356_v19 = vadd.f32 %v13757_v59, %v13829_v30  ;;  %v15188_v8 = vld [vmem:[#allocation83_spill] sm:$0xff] }
 0xc12   :  { %7473 = vmatpush1.msra.mxu0 %v7368_v4  ;;  %7544 = vmatpush1.msra.mxu1 %v7370_v25  ;;  %v7358_v15 = vadd.f32 %v13757_v59, %v7070_v57  ;;  %v7063_v50 = vmul.f32 %v13728_v7, %v15179_v63  ;;  %v7353_v62 = vadd.f32 %v13742_v40, %v13825_v26  ;;  %v15190_v13 = vld [vmem:[#allocation103_spill] sm:$0xff]  ;;  %v15195_v25 = vld [vmem:[#allocation109_spill] sm:$0xff] }
 0xc13   :  { %7474 = vmatprep.subr.mxu0 %v7365_v2  ;;  %7545 = vmatprep.subr.mxu1 %v7367_v48  ;;  %v7355_v3 = vadd.f32 %v13742_v40, %v7067_v38  ;;  %v7062_v58 = vmul.f32 %v13728_v7, %v15180_v24  ;;  %v7352_v30 = vadd.f32 %v13742_v40, %v13821_v20  ;;  %v15194_v4 = vld [vmem:[#allocation115_spill] sm:$0xff]  ;;  %v15198_v48 = vld [vmem:[#allocation116_spill] sm:$0xff] }
 0xc14   :  { %7475 = vmatpush1.msra.mxu0 %v7364_v17  ;;  %7546 = vmatpush1.msra.mxu1 %v7366_v16  ;;  %v7354_v59 = vadd.f32 %v13742_v40, %v7066_v22  ;;  %v7059_v47 = vmul.f32 %v13714_v41, %v15181_v39  ;;  %v7349_v26 = vadd.f32 %v13733_v5, %v13817_v61  ;;  %v15197_v2 = vld [vmem:[#allocation111_spill] sm:$0xff]  ;;  %v15201_v17 = vld [vmem:[#allocation112_spill] sm:$0xff] }
 0xc15   :  { %7476 = vmatprep.subr.mxu0 %v7361_v49  ;;  %7547 = vmatprep.subr.mxu1 %v7363_v9  ;;  %v7351_v21 = vadd.f32 %v13733_v5, %v7063_v50  ;;  %v7058_v7 = vmul.f32 %v13714_v41, %v15182_v36  ;;  %v7348_v20 = vadd.f32 %v13733_v5, %v13813_v27  ;;  %v15203_v22 = vld [vmem:[#allocation3_spill] sm:$0xff]  ;;  %v15205_v50 = vld [vmem:[#allocation124_spill] sm:$0xff] }
 0xc16   :  { %7477 = vmatpush1.msra.mxu0 %v7360_v34  ;;  %7548 = vmatpush1.msra.mxu1 %v7362_v0  ;;  %v7350_v40 = vadd.f32 %v13733_v5, %v7062_v58  ;;  %v7055_v60 = vmul.f32 %v13695_v46, %v15183_v42  ;;  %v7345_v61 = vadd.f32 %v13725_v6, %v13809_v52  ;;  %v15185_v52 = vld [vmem:[#allocation82_spill] sm:$0xff]  ;;  %v15207_v58 = vld [vmem:[#allocation12_spill] sm:$0xff] }
 0xc17   :  { %7478 = vmatprep.subr.mxu0 %v7357_v54  ;;  %7549 = vmatprep.subr.mxu1 %v7359_v37  ;;  %v7347_v28 = vadd.f32 %v13725_v6, %v7059_v47  ;;  %v7054_v41 = vmul.f32 %v13695_v46, %v15184_v10  ;;  %v7344_v27 = vadd.f32 %v13725_v6, %v13805_v29  ;;  %v15186_v46 = vld [vmem:[#allocation80_spill] sm:$0xff]  ;;  %v15209_v47 = vld [vmem:[#allocation10_spill] sm:$0xff] }
 0xc18   :  { %7479 = vmatpush1.msra.mxu0 %v7356_v19  ;;  %7550 = vmatpush1.msra.mxu1 %v7358_v15  ;;  %v7346_v5 = vadd.f32 %v13725_v6, %v7058_v7  ;;  %v7341_v14 = vadd.f32 %v13716_v11, %v13801_v55  ;;  %v7343_v43 = vadd.f32 %v13716_v11, %v7055_v60  ;;  %v15187_v6 = vld [vmem:[#allocation86_spill] sm:$0xff]  ;;  %v15189_v55 = vld [vmem:[#allocation85_spill] sm:$0xff]  ;;  %v15202_v37 = vld [vmem:[#allocation8_spill] sm:$0xff] }
 0xc19   :  { %7480 = vmatprep.subr.mxu0 %v7353_v62  ;;  %7551 = vmatprep.subr.mxu1 %v7355_v3  ;;  %v7340_v53 = vadd.f32 %v13716_v11, %v15185_v52  ;;  %v7342_v33 = vadd.f32 %v13716_v11, %v7054_v41  ;;  %v15192_v11 = vld [vmem:[#allocation107_spill] sm:$0xff]  ;;  %v15204_v15 = vld [vmem:[#allocation5_spill] sm:$0xff]  ;;  %v15206_v3 = vld [vmem:[#allocation4_spill] sm:$0xff] }
 0xc1a   :  { %7481 = vmatpush1.msra.mxu0 %v7352_v30  ;;  %7552 = vmatpush1.msra.mxu1 %v7354_v59  ;;  %v15208_v59 = vld [vmem:[#allocation7_spill] sm:$0xff]  ;;  %v15212_v60 = vld [vmem:[#allocation129_spill] sm:$0xff]  ;;  %v15214_v52 = vld [vmem:[#allocation90_spill] sm:$0xff] }
 0xc1b   :  { %7482 = vmatprep.subr.mxu0 %v7349_v26  ;;  %7553 = vmatprep.subr.mxu1 %v7351_v21  ;;  %v15210_v21 = vld [vmem:[#allocation2_spill] sm:$0xff] }
 0xc1c   :  { %7483 = vmatpush1.msra.mxu0 %v7348_v20  ;;  %7554 = vmatpush1.msra.mxu1 %v7350_v40  ;;  %v15211_v40 = vld [vmem:[#allocation125_spill] sm:$0xff] }
 0xc1d   :  { %7484 = vmatprep.subr.mxu0 %v7345_v61  ;;  %7555 = vmatprep.subr.mxu1 %v7347_v28  ;;  %v15213_v28 = vld [vmem:[#allocation127_spill] sm:$0xff] }
 0xc1e   :  { %7485 = vmatpush1.msra.mxu0 %v7344_v27  ;;  %7556 = vmatpush1.msra.mxu1 %v7346_v5 }
 0xc1f   :  { %7486 = vmatprep.subr.mxu0 %v7341_v14  ;;  %7557 = vmatprep.subr.mxu1 %v7343_v43 }
 0xc20   :  { %7487 = vmatpush1.msra.mxu0 %v7340_v53  ;;  %7558 = vmatpush1.msra.mxu1 %v7342_v33 }
 0xc21   :  { %7488 = vmatprep.subr.mxu0 %v15186_v46  ;;  %7559 = vmatprep.subr.mxu1 %v15187_v6 }
 0xc22   :  { %v6994_v29 = vpop.permute.xlu0 %6993  ;;  %7489 = vmatpush1.msra.mxu0 %v15188_v8  ;;  %7560 = vmatpush1.msra.mxu1 %v15189_v55  ;;  %v15216_v55 = vld [vmem:[#allocation123_spill] sm:$0xff] }
 0xc23   :  { %7490 = vmatprep.subr.mxu0 %v15190_v13  ;;  %7561 = vmatprep.subr.mxu1 %v15191_v51  ;;  %v13982_v44 = vmul.f32 %v6994_v29, %v15202_v37  ;;  %v13985_v19 = vmul.f32 %v6994_v29, %v15203_v22  ;;  %v13988_v63 = vmul.f32 %v6994_v29, %v15204_v15  ;;  %v15217_v51 = vld [vmem:[#allocation122_spill] sm:$0xff] }
 0xc24   :  { %7491 = vmatpush1.msra.mxu0 %v15192_v11  ;;  %7562 = vmatpush1.msra.mxu1 %v15193_v56  ;;  %v13991_v62 = vmul.f32 %v6994_v29, %v15205_v50  ;;  %v15215_v29 = vld [vmem:[#allocation121_spill] sm:$0xff]  ;;  %v15218_v56 = vld [vmem:[#allocation120_spill] sm:$0xff] }
 0xc25   :  { %7492 = vmatprep.subr.mxu0 %v15194_v4  ;;  %7563 = vmatprep.subr.mxu1 %v15195_v25  ;;  %v15223_v50 = vld [vmem:[#allocation105_spill] sm:$0xff] }
 0xc26   :  { %7493 = vmatpush1.msra.mxu0 %v15196_v12  ;;  %7564 = vmatpush1.msra.mxu1 %v15197_v2 }
 0xc27   :  { %v6999_v1 = vpop.permute.xlu0 %6998  ;;  %7494 = vmatprep.subr.mxu0 %v15198_v48  ;;  %7565 = vmatprep.subr.mxu1 %v15199_v35  ;;  %v15220_v48 = vld [vmem:[#allocation91_spill] sm:$0xff] }
 0xc28   :  { %7495 = vmatpush1.msra.mxu0 %v15200_v23  ;;  %7566 = vmatpush1.msra.mxu1 %v15201_v17  ;;  %v7132_v24 = vmul.f32 %v6999_v1, %v15206_v3  ;;  %v7133_v30 = vmul.f32 %v6999_v1, %v15207_v58  ;;  %v7134_v39 = vmul.f32 %v6999_v1, %v15208_v59  ;;  %v15221_v23 = vld [vmem:[#allocation92_spill] sm:$0xff] }
 0xc29   :  { %v7135_v26 = vmul.f32 %v6999_v1, %v15209_v47  ;;  %v15219_v1 = vld [vmem:[#allocation88_spill] sm:$0xff] }
 0xc2b   :  { %v7004_v16 = vpop.permute.xlu0 %7003  ;;  %v7287_v45 = vpop.permute.xlu1 %7286 }
 0xc2c   :  { %v7136_v36 = vmul.f32 %v7004_v16, %v15210_v21  ;;  %v7137_v42 = vmul.f32 %v7004_v16, %v15211_v40  ;;  %v7138_v61 = vmul.f32 %v7004_v16, %v15212_v60  ;;  %v7139_v10 = vmul.f32 %v7004_v16, %v15213_v28  ;;  %v15222_v16 = vld [vmem:[#allocation110_spill] sm:$0xff]  ;;  %v15229_v60 = vld [vmem:[#allocation97_spill] sm:$0xff]  ;;  %v15230_v28 = vld [vmem:[#allocation108_spill] sm:$0xff] }
 0xc2d   :  { %v14001_v41 = vadd.f32 %v7287_v45, %v7132_v24  ;;  %v14003_v27 = vadd.f32 %v7287_v45, %v7134_v39  ;;  %v14007_v14 = vadd.f32 %v7287_v45, %v7133_v30  ;;  %v14009_v43 = vadd.f32 %v7287_v45, %v7135_v26  ;;  %v15224_v24 = vld [vmem:[#allocation100_spill] sm:$0xff]  ;;  %v15225_v30 = vld [vmem:[#allocation102_spill] sm:$0xff]  ;;  %v15227_v26 = vld [vmem:[#allocation95_spill] sm:$0xff] }
 0xc2e   :  { %v15226_v39 = vld [vmem:[#allocation118_spill] sm:$0xff] }
 0xc2f   :  { %v7292_v31 = vpop.permute.xlu1 %7291 }
 0xc30   :  { %v7009_v49 = vpop.permute.xlu0 %7008  ;;  %v14005_v5 = vadd.f32 %v7292_v31, %v7136_v36  ;;  %v14012_v33 = vadd.f32 %v7292_v31, %v7138_v61  ;;  %v14014_v46 = vadd.f32 %v7292_v31, %v7137_v42  ;;  %v14016_v6 = vadd.f32 %v7292_v31, %v7139_v10 }
 0xc31   :  { %v7140_v53 = vmul.f32 %v7009_v49, %v15214_v52  ;;  %v14025_v2 = vmul.f32 %v7009_v49, %v15219_v1  ;;  %v7142_v35 = vmul.f32 %v7009_v49, %v15220_v48  ;;  %v14029_v17 = vmul.f32 %v7009_v49, %v15221_v23  ;;  %v15228_v49 = vld [vmem:[#allocation113_spill] sm:$0xff]  ;;  %v15234_v1 = vld [vmem:[#allocation96_spill] sm:$0xff] }
 0xc34   :  { %v13969_v9 = vpop.permute.xlu0 %7013  ;;  %v13971_v18 = vpop.permute.xlu1 %7296 }
 0xc35   :  { %v7144_v3 = vmul.f32 %v13969_v9, %v15223_v50  ;;  %v15237_v50 = vld [vmem:[#allocation89_spill] sm:$0xff] }
 0xc38   :  { %v13973_v57 = vpop.permute.xlu1 %7301  ;;  %v13975_v34 = vpop.permute.xlu0 %7018 }
 0xc39   :  { %v7148_v58 = vmul.f32 %v13975_v34, %v15224_v24  ;;  %v7150_v48 = vmul.f32 %v13975_v34, %v15234_v1  ;;  %v7146_v24 = vmul.f32 %v13969_v9, %v15237_v50  ;;  %v15248_v1 = vld [vmem:[#allocation34_spill] sm:$0xff] }
 0xc3c   :  { %v7024_v0 = vpop.permute.xlu0 %7023  ;;  %v13977_v32 = vpop.permute.xlu1 %7306 }
 0xc3d   :  { %v7153_v21 = vmul.f32 %v7024_v0, %v15227_v26  ;;  %v7152_v61 = vmul.f32 %v7024_v0, %v15229_v60  ;;  %v7155_v10 = vmul.f32 %v7024_v0, %v15230_v28  ;;  %v7430_v26 = vadd.f32 %v13971_v18, %v7142_v35  ;;  %v15239_v35 = vld [vmem:[#allocation13_spill] sm:$0xff]  ;;  %v15240_v60 = vld [vmem:[#allocation128_spill] sm:$0xff] }
 0xc40   :  { %v7029_v38 = vpop.permute.xlu0 %7028  ;;  %v13979_v54 = vpop.permute.xlu1 %7311 }
 0xc41   :  { %v7157_v45 = vmul.f32 %v7029_v38, %v15222_v16  ;;  %v7156_v59 = vmul.f32 %v7029_v38, %v15225_v30  ;;  %v7159_v47 = vmul.f32 %v7029_v38, %v15226_v39  ;;  %v7158_v36 = vmul.f32 %v7029_v38, %v15228_v49  ;;  %v15238_v49 = vld [vmem:[#allocation26_spill] sm:$0xff] }
 0xc42   :  { %v7441_v38 = vadd.f32 %v13979_v54, %v7153_v21  ;;  %v7438_v30 = vadd.f32 %v13977_v32, %v7150_v48  ;;  %v7432_v21 = vadd.f32 %v13973_v57, %v7144_v3  ;;  %v15249_v48 = vld [vmem:[#allocation32_spill] sm:$0xff] }
 0xc44   :  { %v7034_v7 = vpop.permute.xlu0 %7033  ;;  %v7317_v20 = vpop.permute.xlu1 %7316 }
 0xc45   :  { %v7160_v8 = vmul.f32 %v7034_v7, %v15215_v29  ;;  %v7161_v13 = vmul.f32 %v7034_v7, %v15216_v55  ;;  %v7162_v11 = vmul.f32 %v7034_v7, %v15217_v51  ;;  %v7163_v4 = vmul.f32 %v7034_v7, %v15218_v56  ;;  %v15232_v51 = vld [vmem:[#allocation99_spill] sm:$0xff]  ;;  %v15233_v56 = vld [vmem:[#allocation104_spill] sm:$0xff] }
 0xc46   :  { %v7445_v42 = vadd.f32 %v7317_v20, %v7157_v45  ;;  %v7444_v52 = vadd.f32 %v7317_v20, %v7156_v59  ;;  %v7447_v29 = vadd.f32 %v7317_v20, %v7159_v47  ;;  %v15235_v45 = vld [vmem:[#allocation93_spill] sm:$0xff]  ;;  %v7428_v59 = vadd.f32 %v13971_v18, %v7140_v53 }
 0xc47   :  { %v7429_v53 = vadd.f32 %v13971_v18, %v14025_v2 }
 0xc48   :  { %v14022_v25 = vpop.permute.xlu0 %6988  ;;  %v7322_v12 = vpop.permute.xlu1 %7321 }
 0xc49   :  { %v7448_v31 = vadd.f32 %v7322_v12, %v7160_v8  ;;  %v7450_v37 = vadd.f32 %v7322_v12, %v7162_v11  ;;  %v7449_v22 = vadd.f32 %v7322_v12, %v7161_v13  ;;  %v7451_v15 = vadd.f32 %v7322_v12, %v7163_v4  ;;  %v15231_v8 = vld [vmem:[#allocation94_spill] sm:$0xff] }
 0xc4a   :  { %v7154_v55 = vmul.f32 %v7024_v0, %v15231_v8  ;;  %v7446_v13 = vadd.f32 %v7317_v20, %v7158_v36  ;;  %v7149_v11 = vmul.f32 %v13975_v34, %v15232_v51  ;;  %v7151_v4 = vmul.f32 %v13975_v34, %v15233_v56 }
 0xc4b   :  { %7496 = vmatprep.subr.mxu0 %v7449_v22  ;;  %7567 = vmatprep.subr.mxu1 %v7451_v15  ;;  %v7443_v12 = vadd.f32 %v13979_v54, %v7155_v10  ;;  %v7440_v0 = vadd.f32 %v13979_v54, %v7152_v61  ;;  %v7124_v36 = vmul.f32 %v14022_v25, %v15238_v49  ;;  %v15241_v61 = vld [vmem:[#allocation126_spill] sm:$0xff]  ;;  %v15242_v10 = vld [vmem:[#allocation21_spill] sm:$0xff] }
 0xc4c   :  { %v6984_v7 = vpop.permute.xlu0 %6983  ;;  %v14040_v40 = vpop.permute.xlu1 %7281  ;;  %7497 = vmatpush2.msra.mxu0 %v7448_v31  ;;  %7568 = vmatpush2.msra.mxu1 %v7450_v37  ;;  %v7442_v20 = vadd.f32 %v13979_v54, %v7154_v55  ;;  %v7145_v31 = vmul.f32 %v13969_v9, %v15235_v45  ;;  %v15236_v37 = vld [vmem:[#allocation98_spill] sm:$0xff]  ;;  %v7437_v15 = vadd.f32 %v13977_v32, %v7149_v11  ;;  %v15244_v55 = vld [vmem:[#allocation15_spill] sm:$0xff]  ;;  %v15246_v11 = vld [vmem:[#allocation40_spill] sm:$0xff] }
 0xc4d   :  { %7498 = vmatprep.subr.mxu0 %v7445_v42  ;;  %7569 = vmatprep.subr.mxu1 %v7447_v29  ;;  %v7147_v22 = vmul.f32 %v13969_v9, %v15236_v37  ;;  %v7439_v34 = vadd.f32 %v13977_v32, %v7151_v4  ;;  %v7436_v54 = vadd.f32 %v13977_v32, %v7148_v58  ;;  %v15243_v29 = vld [vmem:[#allocation24_spill] sm:$0xff] }
 0xc4e   :  { %7499 = vmatpush2.msra.mxu0 %v7444_v52  ;;  %7570 = vmatpush2.msra.mxu1 %v7446_v13  ;;  %v7433_v39 = vadd.f32 %v13973_v57, %v7145_v31  ;;  %v7434_v9 = vadd.f32 %v13973_v57, %v7146_v24  ;;  %v7431_v42 = vadd.f32 %v13971_v18, %v14029_v17  ;;  %v15245_v18 = vld [vmem:[#allocation18_spill] sm:$0xff]  ;;  %v15252_v31 = vld [vmem:[#allocation28_spill] sm:$0xff]  ;;  %v15254_v24 = vld [vmem:[#allocation39_spill] sm:$0xff] }
 0xc4f   :  { %7500 = vmatprep.subr.mxu0 %v7441_v38  ;;  %7571 = vmatprep.subr.mxu1 %v7443_v12  ;;  %v7435_v47 = vadd.f32 %v13973_v57, %v7147_v22  ;;  %v7125_v3 = vmul.f32 %v14022_v25, %v15239_v35  ;;  %v7126_v57 = vmul.f32 %v14022_v25, %v15240_v60  ;;  %v15253_v22 = vld [vmem:[#allocation20_spill] sm:$0xff]  ;;  %v15260_v35 = vld [vmem:[#allocation41_spill] sm:$0xff]  ;;  %v15261_v60 = vld [vmem:[#allocation47_spill] sm:$0xff] }
 0xc50   :  { %v6979_v23 = vpop.permute.xlu0 %6978  ;;  %v14055_v16 = vpop.permute.xlu1 %7276  ;;  %7501 = vmatpush2.msra.mxu0 %v7440_v0  ;;  %7572 = vmatpush2.msra.mxu1 %v7442_v20  ;;  %v7127_v28 = vmul.f32 %v14022_v25, %v15241_v61  ;;  %v7120_v52 = vmul.f32 %v6984_v7, %v15242_v10  ;;  %v7121_v8 = vmul.f32 %v6984_v7, %v15243_v29  ;;  %v15251_v20 = vld [vmem:[#allocation37_spill] sm:$0xff] }
 0xc51   :  { %7502 = vmatprep.subr.mxu0 %v7437_v15  ;;  %7573 = vmatprep.subr.mxu1 %v7439_v34  ;;  %v7122_v2 = vmul.f32 %v6984_v7, %v15244_v55  ;;  %v7123_v17 = vmul.f32 %v6984_v7, %v15245_v18  ;;  %v7416_v13 = vadd.f32 %v14040_v40, %v13982_v44  ;;  %v15247_v44 = vld [vmem:[#allocation30_spill] sm:$0xff] }
 0xc52   :  { %7503 = vmatpush2.msra.mxu0 %v7436_v54  ;;  %7574 = vmatpush2.msra.mxu1 %v7438_v30  ;;  %v7418_v38 = vadd.f32 %v14040_v40, %v13988_v63  ;;  %v7116_v56 = vmul.f32 %v6979_v23, %v15246_v11  ;;  %v7417_v4 = vadd.f32 %v14040_v40, %v13985_v19  ;;  %v15255_v54 = vld [vmem:[#allocation35_spill] sm:$0xff]  ;;  %v15256_v30 = vld [vmem:[#allocation42_spill] sm:$0xff]  ;;  %v15262_v11 = vld [vmem:[#allocation49_spill] sm:$0xff] }
 0xc53   :  { %7504 = vmatprep.subr.mxu0 %v7433_v39  ;;  %7575 = vmatprep.subr.mxu1 %v7435_v47  ;;  %v7419_v7 = vadd.f32 %v14040_v40, %v13991_v62  ;;  %v7117_v12 = vmul.f32 %v6979_v23, %v15247_v44  ;;  %v7118_v63 = vmul.f32 %v6979_v23, %v15248_v1  ;;  %v15250_v62 = vld [vmem:[#allocation38_spill] sm:$0xff]  ;;  %v15264_v44 = vld [vmem:[#allocation44_spill] sm:$0xff]  ;;  %v15265_v1 = vld [vmem:[#allocation33_spill] sm:$0xff] }
 0xc54   :  { %v6974_v58 = vpop.permute.xlu0 %6973  ;;  %v7272_v32 = vpop.permute.xlu1 %7271  ;;  %7505 = vmatpush2.msra.mxu0 %v7432_v21  ;;  %7576 = vmatpush2.msra.mxu1 %v7434_v9  ;;  %v7119_v0 = vmul.f32 %v6979_v23, %v15249_v48  ;;  %v7413_v19 = vadd.f32 %v14055_v16, %v7125_v3  ;;  %v7415_v23 = vadd.f32 %v14055_v16, %v7127_v28 }
 0xc55   :  { %7506 = vmatprep.subr.mxu0 %v7429_v53  ;;  %7577 = vmatprep.subr.mxu1 %v7431_v42  ;;  %v7112_v40 = vmul.f32 %v6974_v58, %v15250_v62  ;;  %v7113_v45 = vmul.f32 %v6974_v58, %v15251_v20  ;;  %v7114_v37 = vmul.f32 %v6974_v58, %v15252_v31  ;;  %v15259_v53 = vld [vmem:[#allocation45_spill] sm:$0xff] }
 0xc56   :  { %7507 = vmatpush2.msra.mxu0 %v7428_v59  ;;  %7578 = vmatpush2.msra.mxu1 %v7430_v26  ;;  %v7408_v15 = vadd.f32 %v7272_v32, %v7120_v52  ;;  %v7409_v34 = vadd.f32 %v7272_v32, %v7121_v8  ;;  %v7411_v50 = vadd.f32 %v7272_v32, %v7123_v17 }
 0xc57   :  { %7508 = vmatprep.subr.mxu0 %v14014_v46  ;;  %7579 = vmatprep.subr.mxu1 %v14016_v6  ;;  %v7412_v46 = vadd.f32 %v14055_v16, %v7124_v36  ;;  %v7414_v6 = vadd.f32 %v14055_v16, %v7126_v57  ;;  %v15257_v16 = vld [vmem:[#allocation43_spill] sm:$0xff] }
 0xc58   :  { %v6969_v25 = vpop.permute.xlu0 %6968  ;;  %v7267_v51 = vpop.permute.xlu1 %7266  ;;  %7509 = vmatpush2.msra.mxu0 %v14005_v5  ;;  %7580 = vmatpush2.msra.mxu1 %v14012_v33 }
 0xc59   :  { %7510 = vmatprep.subr.mxu0 %v14007_v14  ;;  %7581 = vmatprep.subr.mxu1 %v14009_v43  ;;  %v7115_v14 = vmul.f32 %v6974_v58, %v15253_v22  ;;  %v7410_v43 = vadd.f32 %v7272_v32, %v7122_v2  ;;  %v7110_v59 = vmul.f32 %v6969_v25, %v15256_v30  ;;  %v15258_v58 = vld [vmem:[#allocation46_spill] sm:$0xff] }
 0xc5a   :  { %7511 = vmatpush2.msra.mxu0 %v14001_v41  ;;  %7582 = vmatpush2.msra.mxu1 %v14003_v27  ;;  %v7108_v41 = vmul.f32 %v6969_v25, %v15254_v24  ;;  %v7109_v27 = vmul.f32 %v6969_v25, %v15255_v54  ;;  %v7111_v39 = vmul.f32 %v6969_v25, %v15257_v16 }
 0xc5b   :  { %7512 = vmatprep.subr.mxu0 %v7417_v4  ;;  %7583 = vmatprep.subr.mxu1 %v7419_v7  ;;  %v7404_v47 = vadd.f32 %v7267_v51, %v7116_v56  ;;  %v7406_v26 = vadd.f32 %v7267_v51, %v7118_v63  ;;  %v7405_v32 = vadd.f32 %v7267_v51, %v7117_v12  ;;  %v15263_v4 = vld [vmem:[#allocation48_spill] sm:$0xff] }
 0xc5c   :  { %v6964_v5 = vpop.permute.xlu0 %6963  ;;  %v7262_v33 = vpop.permute.xlu1 %7261  ;;  %7513 = vmatpush2.msra.mxu0 %v7416_v13  ;;  %7584 = vmatpush2.msra.mxu1 %v7418_v38  ;;  %v7407_v36 = vadd.f32 %v7267_v51, %v7119_v0 }
 0xc5d   :  { %7514 = vmatprep.subr.mxu0 %v7413_v19  ;;  %7585 = vmatprep.subr.mxu1 %v7415_v23  ;;  %v7104_v49 = vmul.f32 %v6964_v5, %v15258_v58  ;;  %v7105_v42 = vmul.f32 %v6964_v5, %v15259_v53  ;;  %v7106_v3 = vmul.f32 %v6964_v5, %v15260_v35  ;;  %v15266_v19 = vld [vmem:[#allocation87_spill] sm:$0xff] }
 0xc5e   :  { %7515 = vmatpush2.msra.mxu0 %v7412_v46  ;;  %7586 = vmatpush2.msra.mxu1 %v7414_v6  ;;  %v7107_v57 = vmul.f32 %v6964_v5, %v15261_v60  ;;  %v7400_v61 = vadd.f32 %v7262_v33, %v7112_v40  ;;  %v7401_v28 = vadd.f32 %v7262_v33, %v7113_v45 }
 0xc5f   :  { %7516 = vmatprep.subr.mxu0 %v7409_v34  ;;  %7587 = vmatprep.subr.mxu1 %v7411_v50  ;;  %v7403_v10 = vadd.f32 %v7262_v33, %v7115_v14  ;;  %v7402_v52 = vadd.f32 %v7262_v33, %v7114_v37 }
 0xc60   :  { %v6959_v21 = vpop.permute.xlu0 %6958  ;;  %v7257_v9 = vpop.permute.xlu1 %7256  ;;  %7517 = vmatpush2.msra.mxu0 %v7408_v15  ;;  %7588 = vmatpush2.msra.mxu1 %v7410_v43 }
 0xc61   :  { %7518 = vmatprep.subr.mxu0 %v7405_v32  ;;  %7589 = vmatprep.subr.mxu1 %v7407_v36  ;;  %v7396_v29 = vadd.f32 %v7257_v9, %v7108_v41  ;;  %v7398_v8 = vadd.f32 %v7257_v9, %v7110_v59  ;;  %v7397_v18 = vadd.f32 %v7257_v9, %v7109_v27 }
 0xc62   :  { %7519 = vmatpush2.msra.mxu0 %v7404_v47  ;;  %7590 = vmatpush2.msra.mxu1 %v7406_v26  ;;  %v7399_v17 = vadd.f32 %v7257_v9, %v7111_v39  ;;  %v7101_v56 = vmul.f32 %v6959_v21, %v15262_v11  ;;  %v7103_v7 = vmul.f32 %v6959_v21, %v15263_v4 }
 0xc63   :  { %7520 = vmatprep.subr.mxu0 %v7401_v28  ;;  %7591 = vmatprep.subr.mxu1 %v7403_v10  ;;  %v7100_v12 = vmul.f32 %v6959_v21, %v15264_v44  ;;  %v7102_v63 = vmul.f32 %v6959_v21, %v15265_v1  ;;  %v7454_v10 = vld [vmem:[%s14174_s23] sm:$0xf] }
 0xc64   :  { %v7252_v55 = vpop.permute.xlu1 %7251  ;;  %v7247_v13 = vpop.permute.xlu0 %7246  ;;  %7521 = vmatpush2.msra.mxu0 %v7400_v61  ;;  %7592 = vmatpush2.msra.mxu1 %v7402_v52 }
 0xc65   :  { %v7392_v2 = vadd.f32 %v7252_v55, %v7104_v49  ;;  %v7394_v38 = vadd.f32 %v7252_v55, %v7106_v3  ;;  %v7393_v25 = vadd.f32 %v7252_v55, %v7105_v42  ;;  %v7395_v51 = vadd.f32 %v7252_v55, %v7107_v57  ;;  %7522 = vmatprep.subr.mxu0 %v7397_v18 }
 0xc66   :  { %7593 = vmatprep.subr.mxu1 %v7399_v17  ;;  %7523 = vmatpush2.msra.mxu0 %v7396_v29  ;;  %v7389_v48 = vadd.f32 %v7247_v13, %v7101_v56  ;;  %v7391_v0 = vadd.f32 %v7247_v13, %v7103_v7  ;;  %v7388_v46 = vadd.f32 %v7247_v13, %v7100_v12 }
 0xc67   :  { %7594 = vmatpush2.msra.mxu1 %v7398_v8  ;;  %7524 = vmatprep.subr.mxu0 %v7393_v25  ;;  %v7390_v6 = vadd.f32 %v7247_v13, %v7102_v63  ;;  %v7455_v8 = vld [vmem:[%s14175_s24] sm:$0xf] }
 0xc68   :  { %7595 = vmatprep.subr.mxu1 %v7395_v51  ;;  %7525 = vmatpush2.msra.mxu0 %v7392_v2  ;;  %v7459_v62 = vpop.permute.xlu1 %7458 }
 0xc69   :  { %7596 = vmatpush2.msra.mxu1 %v7394_v38  ;;  %7526 = vmatprep.subr.mxu0 %v7389_v48 }
 0xc6a   :  { %7597 = vmatprep.subr.mxu1 %v7391_v0  ;;  %7527 = vmatpush2.msra.mxu0 %v7388_v46 }
 0xc6b   :  { %7598 = vmatpush2.msra.mxu1 %v7390_v6  ;;  %7529 = vmatmul.mubr.f32.vlgmr.msra.gmra.mxu0 %v15266_v19 }
 0xc6c   :  { %7600 = vmatmul.mubr.f32.vlgmr.msra.gmra.mxu1 %v15266_v19 }
 0xd2b   :  { %v7530_v40 = vpop.f32.mrf.mxu0 }
 0xd2c   :  { %v7601_v20 = vpop.f32.mrf.mxu1  ;;  %v7531_v45 = vadd.f32 %v7530_v40, %v7459_v62 }
 0xd2d   :  { %v7602_v5 = vadd.f32 %v7601_v20, %v7459_v62  ;;  %v7532_v33 = vpop.f32.mrf.mxu0 }
 0xd2e   :  { %v7603_v23 = vpop.f32.mrf.mxu1  ;;  %v7606_v31 = vmax.f32 %v7531_v45, 0.0  ;;  %v7533_v37 = vadd.f32 %v7532_v33, %v7459_v62 }
 0xd2f   :  { %v7604_v22 = vadd.f32 %v7603_v23, %v7459_v62  ;;  %v7608_v14 = vmax.f32 %v7602_v5, 0.0 }
 0xd30   :  { %v7619_v15 = vmul.f32 %v7606_v31, %v7606_v31  ;;  %v7607_v43 = vmax.f32 %v7533_v37, 0.0  ;;  %v7610_v50 = vsel %vm472_vm0, %v7606_v31, 0.0 }
 0xd31   :  { %v7609_v34 = vmax.f32 %v7604_v22, 0.0  ;;  %v7621_v24 = vmul.f32 %v7608_v14, %v7608_v14  ;;  %v7613_v59 = vsel %vm472_vm0, %v7608_v14, 0.0 }
 0xd32   :  { %v7611_v41 = vsel %vm472_vm0, %v7607_v43, 0.0  ;;  %v7620_v54 = vmul.f32 %v7607_v43, %v7607_v43  ;;  %v7623_v30 = vsel %vm472_vm0, %v7619_v15, 0.0 }
 0xd33   :  { %v7612_v27 = vadd.f32 %v7611_v41, %v7610_v50  ;;  %v7622_v39 = vmul.f32 %v7609_v34, %v7609_v34  ;;  %v7615_v21 = vsel %vm472_vm0, %v7609_v34, 0.0  ;;  %v7626_v9 = vsel %vm472_vm0, %v7621_v24, 0.0 }
 0xd34   :  { %v7624_v16 = vsel %vm472_vm0, %v7620_v54, 0.0 }
 0xd35   :  { %v7614_v47 = vadd.f32 %v7613_v59, %v7612_v27  ;;  %v7625_v26 = vadd.f32 %v7624_v16, %v7623_v30  ;;  %v7628_v32 = vsel %vm472_vm0, %v7622_v39, 0.0 }
 0xd37   :  { %v7616_v58 = vadd.f32 %v7615_v21, %v7614_v47  ;;  %v7627_v49 = vadd.f32 %v7626_v9, %v7625_v26 }
 0xd39   :  { %7617 = vadd.xlane.f32.xlu0 %v7616_v58  ;;  %v7629_v36 = vadd.f32 %v7628_v32, %v7627_v49 }
 0xd3b   :  { %7630 = vadd.xlane.f32.xlu1 %v7629_v36 }
 0xdc2   :  { %v7618_v53 = vpop.xlane.xlu0 %7617 }
 0xdc3   :  { %v7632_v42 = vmul.f32 0.001953125, %v7618_v53 }
 0xdc4   :  { %v7631_v35 = vpop.xlane.xlu1 %7630 }
 0xdc5   :  { %v7634_v3 = vmul.f32 %v7632_v42, %v7632_v42  ;;  %v7633_v60 = vmul.f32 0.001953125, %v7631_v35 }
 0xdc7   :  { %v7635_v57 = vsub.f32 %v7633_v60, %v7634_v3 }
 0xdc9   :  { %v7636_v61 = vmax.f32 %v7635_v57, 0.0 }
 0xdcb   :  { %v7637_v28 = vadd.f32 1e-05, %v7636_v61 }
 0xdcd   :  { %8002 = vrsqrt.f32 %v7637_v28 }
 0xdda   :  { %v8003_v52 = vpop.eup %8002 }
 0xddb   :  { %v7639_v29 = vmul.f32 %v8003_v52, %v7454_v10 }
 0xddd   :  { %7644 = vperm.xlu0 %7787, %v7639_v29   ;;  %v7640_v55 = vmul.f32 %v7639_v29, %v7632_v42 }
 0xddf   :  { %v7641_v2 = vsub.f32 %v7455_v8, %v7640_v55 }
 0xde1   :  { %7653 = vperm.xlu1 %7788, %v7641_v2  }
 0xe58   :  { %v7645_v18 = vpop.permute.xlu0 %7644 }
 0xe59   :  { %v7647_v17 = vmul.f32 %v7645_v18, %v7606_v31  ;;  %v7648_v13 = vmul.f32 %v7645_v18, %v7607_v43  ;;  %v7649_v38 = vmul.f32 %v7645_v18, %v7608_v14  ;;  %v7650_v25 = vmul.f32 %v7645_v18, %v7609_v34 }
 0xe5c   :  { %v7654_v51 = vpop.permute.xlu1 %7653 }
 0xe5d   :  { %v7656_v11 = vadd.f32 %v7654_v51, %v7647_v17  ;;  %v7657_v56 = vadd.f32 %v7654_v51, %v7648_v13  ;;  %v7658_v4 = vadd.f32 %v7654_v51, %v7649_v38  ;;  %v7659_v7 = vadd.f32 %v7654_v51, %v7650_v25 }
 0xe5f   :  { %v7662_v44 = vcombine.low %v7656_v11, %v7657_v56  ;;  %v7667_v12 = vcombine.low %v7658_v4, %v7659_v7 }
 0xe61   :  { %7664 = vst [vmem:[%s14176_s25] sm:$0xff] %v7662_v44  ;;  %7784 = vst [vmem:[%s14176_s25 + $0x8] sm:$0xff] %v7667_v12 }

</bundles_post_ra>
